<compile_context>
chip_gen: v7x
topology: tpu7x:2x2x1
jax: 0.10.0
libtpu: 0.0.40
codegen_flags: <defaults>
</compile_context>

<pallas_src>
import jax
import jax.numpy as jnp
from jax.experimental import pallas as pl
from jax.experimental.pallas import tpu as pltpu

BN_EPS = 1e-3
LANE = 128


def rup(n, m=LANE):
    """Round up to a multiple of m (default: the 128-lane width)."""
    return ((n + m - 1) // m) * m


def _same_pad(size, k, s):
    out = -(-size // s)
    pad_total = max((out - 1) * s + k - size, 0)
    return out, pad_total // 2, pad_total - pad_total // 2


# ----------------------------------------------------------------------------
# Model configuration (small synthetic EfficientNet)
# ----------------------------------------------------------------------------

STEM = dict(in_c=4, out_c=16, k=3, s=2)
BLOCKS = [
    dict(input_filters=16, output_filters=16, expand_ratio=1,
         kernel_size=3, stride=1, se_ratio=0.25, id_skip=True),
    dict(input_filters=16, output_filters=24, expand_ratio=6,
         kernel_size=3, stride=2, se_ratio=0.25, id_skip=True),
    dict(input_filters=24, output_filters=24, expand_ratio=6,
         kernel_size=3, stride=1, se_ratio=0.25, id_skip=True),
]
HEAD_C = 64


def _has_se(cfg):
    return cfg["se_ratio"] is not None and 0 < cfg["se_ratio"] <= 1


# ----------------------------------------------------------------------------
# In-kernel math helpers (EUP-friendly sigmoid / swish)
# ----------------------------------------------------------------------------

def _sigmoid(y):
    # exp on the EUP + approx reciprocal (vrcp) keeps the VPU slot free.
    return pl.reciprocal(1.0 + jnp.exp(-y), approx=True)


def _swish(y):
    return y * _sigmoid(y)


# ----------------------------------------------------------------------------
# Fully fused whole-network kernel
# ----------------------------------------------------------------------------

def make_fused_kernel(B, H0, W0):
    """Build the fused kernel + scratch shapes.  H0,W0 = stem OUTPUT spatial."""
    f32 = jnp.float32

    # Static per-block geometry.
    geoms = []
    H, W = H0, W0
    for cfg in BLOCKS:
        k, s = cfg["kernel_size"], cfg["stride"]
        Ho, ph0, ph1 = _same_pad(H, k, s)
        Wo, pw0, pw1 = _same_pad(W, k, s)
        geoms.append(dict(H=H, W=W, Ho=Ho, Wo=Wo, ph0=ph0, pw0=pw0,
                          Hp=H + ph0 + ph1, Wp=W + pw0 + pw1, k=k, s=s))
        H, W = Ho, Wo
    HW_head = H * W

    def mbconv(x, d, cfg, g, pbuf, dwbuf):
        k, s = g["k"], g["s"]
        H, W, Ho, Wo = g["H"], g["W"], g["Ho"], g["Wo"]
        Hp, Wp, ph0, pw0 = g["Hp"], g["Wp"], g["ph0"], g["pw0"]
        HWo = Ho * Wo
        expand = cfg["expand_ratio"] != 1
        se = _has_se(cfg)
        skip = (cfg["id_skip"] and s == 1
                and cfg["input_filters"] == cfg["output_filters"])

        # ---- expansion 1x1 conv + folded BN + swish (MXU bf16 in, f32 acc)
        if expand:
            y = jnp.dot(x.astype(jnp.bfloat16), d["expand_w"][...],
                        preferred_element_type=f32)
            e = _swish(y * d["bn0_scale"][...] + d["bn0_bias"][...])
        else:
            e = x
        C = e.shape[1]
        img = Hp * Wp

        # ---- stage SAME-padded spatial map in VMEM; zero ONLY the halo.
        gap = Wp - W                                   # right halo + next left halo
        n_top = ph0 * Wp + pw0
        n_bot = img - ((ph0 + H - 1) * Wp + pw0 + W)
        z_top = jnp.zeros((n_top, C), f32) if n_top else None
        z_gap = jnp.zeros((gap, C), f32) if gap else None
        z_bot = jnp.zeros((n_bot, C), f32) if n_bot else None
        for b in range(B):
            base = b * img
            if n_top:
                pbuf[base:base + n_top, :] = z_top
            for h in range(H):
                dst = base + (ph0 + h) * Wp + pw0
                src = (b * H + h) * W
                pbuf[dst:dst + W, :] = e[src:src + W, :]
                if gap and h < H - 1:
                    pbuf[dst + W:dst + W + gap, :] = z_gap
            if n_bot:
                end = base + (ph0 + H - 1) * Wp + pw0 + W
                pbuf[end:end + n_bot, :] = z_bot

        # ---- depthwise kxk conv: hoisted tap broadcasts + (strided) slice loads
        taps = [jnp.broadcast_to(d["dw_w"][t:t + 1, :], (Wo, C))
                for t in range(k * k)]
        for b in range(B):
            base = b * img
            for oh in range(Ho):
                acc = None
                for di in range(k):
                    roff = base + (s * oh + di) * Wp
                    for dj in range(k):
                        if s == 1:
                            win = pbuf[roff + dj:roff + dj + Wo, :]
                        else:
                            win = pbuf[pl.ds(roff + dj, Wo, stride=s), :]
                        term = win * taps[di * k + dj]
                        acc = term if acc is None else acc + term
                o = b * HWo + oh * Wo
                dwbuf[o:o + Wo, :] = acc

        a = dwbuf[...]                                          # (B*HWo, C)
        a = _swish(a * d["bn1_scale"][...] + d["bn1_bias"][...])

        # ---- squeeze & excitation, batched over B (2 MXU matmuls total)
        if se:
            pooled = jnp.concatenate(
                [jnp.mean(a[b * HWo:(b + 1) * HWo, :], axis=0, keepdims=True)
                 for b in range(B)], axis=0)                    # (B, C)
            sq = jnp.dot(pooled.astype(jnp.bfloat16), d["se_r_w"][...],
                         preferred_element_type=f32) + d["se_r_b"][...]
            sq = _swish(sq)
            gt = jnp.dot(sq.astype(jnp.bfloat16), d["se_e_w"][...],
                         preferred_element_type=f32) + d["se_e_b"][...]
            gate = _sigmoid(gt)                                 # (B, C)
            gate_full = jnp.concatenate(
                [jnp.broadcast_to(gate[b:b + 1, :], (HWo, C)) for b in range(B)],
                axis=0)                                         # (B*HWo, C)
            a = a * gate_full

        # ---- projection 1x1 conv + folded BN (no activation) + identity skip
        y = jnp.dot(a.astype(jnp.bfloat16), d["proj_w"][...],
                    preferred_element_type=f32)
        y = y * d["bn2_scale"][...] + d["bn2_bias"][...]
        if skip:
            y = y + x                    # drop_connect = identity in eval mode
        return y

    def kernel(*refs):
        it = iter(refs)
        p_ref = next(it)
        st_w, st_s, st_b = next(it), next(it), next(it)
        blocks = []
        for cfg in BLOCKS:
            d = {}
            if cfg["expand_ratio"] != 1:
                d["expand_w"], d["bn0_scale"], d["bn0_bias"] = (
                    next(it), next(it), next(it))
            d["dw_w"], d["bn1_scale"], d["bn1_bias"] = next(it), next(it), next(it)
            if _has_se(cfg):
                d["se_r_w"], d["se_r_b"], d["se_e_w"], d["se_e_b"] = (
                    next(it), next(it), next(it), next(it))
            d["proj_w"], d["bn2_scale"], d["bn2_bias"] = (
                next(it), next(it), next(it))
            blocks.append(d)
        hd_w, hd_s, hd_b, fc_w, fc_b = (next(it), next(it), next(it),
                                        next(it), next(it))
        o_ref = next(it)
        scr = list(it)                  # [pbuf1, dw1, pbuf2, dw2, pbuf3, dw3]

        # ---- stem conv (im2col'd outside, bf16 patches) + folded BN + swish
        y = jnp.dot(p_ref[...], st_w[...], preferred_element_type=f32)
        x = _swish(y * st_s[...] + st_b[...])           # (B*H0*W0, 128) f32

        # ---- MBConv blocks, chained entirely in VMEM (no HBM round-trips)
        for i, cfg in enumerate(BLOCKS):
            x = mbconv(x, blocks[i], cfg, geoms[i], scr[2 * i], scr[2 * i + 1])

        # ---- head 1x1 conv + BN + swish + GAP + (dropout=id) + FC (batched)
        h = jnp.dot(x.astype(jnp.bfloat16), hd_w[...], preferred_element_type=f32)
        h = _swish(h * hd_s[...] + hd_b[...])
        pooled = jnp.concatenate(
            [jnp.mean(h[b * HW_head:(b + 1) * HW_head, :], axis=0, keepdims=True)
             for b in range(B)], axis=0)                # (B, HEAD_C_p)
        o_ref[...] = jnp.dot(pooled.astype(jnp.bfloat16), fc_w[...],
                             preferred_element_type=f32) + fc_b[...]

    # Per-block VMEM scratch: padded spatial map + depthwise/SE staging.
    scratch = []
    for cfg, g in zip(BLOCKS, geoms):
        Cexp_p = rup(cfg["input_filters"] * cfg["expand_ratio"])
        scratch.append(pltpu.VMEM((B * g["Hp"] * g["Wp"], Cexp_p), jnp.float32))
        scratch.append(pltpu.VMEM((B * g["Ho"] * g["Wo"], Cexp_p), jnp.float32))
    return kernel, scratch


# ----------------------------------------------------------------------------
# Stem im2col (tiny, done in XLA outside the kernel)
# ----------------------------------------------------------------------------

def extract_patches(x, k, s):
    """x: (B, H, W, C) -> (B, Ho, Wo, k, k, C) with SAME padding."""
    B, H, W, C = x.shape
    Ho, ph0, ph1 = _same_pad(H, k, s)
    Wo, pw0, pw1 = _same_pad(W, k, s)
    xp = jnp.pad(x, ((0, 0), (ph0, ph1), (pw0, pw1), (0, 0)))
    rows = []
    for di in range(k):
        cols = []
        for dj in range(k):
            cols.append(xp[:, di:di + Ho * s:s, dj:dj + Wo * s:s, :])
        rows.append(jnp.stack(cols, axis=3))
    return jnp.stack(rows, axis=3), Ho, Wo


# ----------------------------------------------------------------------------
# Deterministic parameter init (folded-BN form) + lane-padded / bf16 prep
# ----------------------------------------------------------------------------

def _nrm(key, shape, std=0.1):
    return std * jax.random.normal(key, shape, dtype=jnp.float32)


def _bn_params(key, c):
    k1, k2, k3, k4 = jax.random.split(key, 4)
    gamma = 1.0 + 0.1 * jax.random.normal(k1, (c,), dtype=jnp.float32)
    beta = 0.1 * jax.random.normal(k2, (c,), dtype=jnp.float32)
    mean = 0.1 * jax.random.normal(k3, (c,), dtype=jnp.float32)
    var = 1.0 + 0.1 * jax.random.uniform(k4, (c,), dtype=jnp.float32)
    scale = gamma / jnp.sqrt(var + BN_EPS)
    bias = beta - mean * scale
    return scale, bias


def init_params(key):
    keys = iter(jax.random.split(key, 256))
    params = {}
    params["stem_w"] = _nrm(next(keys),
                            (STEM["k"] * STEM["k"] * STEM["in_c"], STEM["out_c"]))
    params["bn0_scale"], params["bn0_bias"] = _bn_params(next(keys), STEM["out_c"])

    blocks = []
    for cfg in BLOCKS:
        p = {}
        inp = cfg["input_filters"]
        oup = inp * cfg["expand_ratio"]
        if cfg["expand_ratio"] != 1:
            p["expand_w"] = _nrm(next(keys), (inp, oup))
            p["bn0_scale"], p["bn0_bias"] = _bn_params(next(keys), oup)
        k = cfg["kernel_size"]
        p["dw_w"] = _nrm(next(keys), (k * k, oup))
        p["bn1_scale"], p["bn1_bias"] = _bn_params(next(keys), oup)
        if _has_se(cfg):
            csq = max(1, int(inp * cfg["se_ratio"]))
            p["se_r_w"] = _nrm(next(keys), (oup, csq))
            p["se_r_b"] = _nrm(next(keys), (csq,))
            p["se_e_w"] = _nrm(next(keys), (csq, oup))
            p["se_e_b"] = _nrm(next(keys), (oup,))
        p["proj_w"] = _nrm(next(keys), (oup, cfg["output_filters"]))
        p["bn2_scale"], p["bn2_bias"] = _bn_params(next(keys), cfg["output_filters"])
        blocks.append(p)
    params["blocks"] = blocks

    last_c = BLOCKS[-1]["output_filters"]
    params["head_w"] = _nrm(next(keys), (last_c, HEAD_C))
    params["bn1_scale"], params["bn1_bias"] = _bn_params(next(keys), HEAD_C)
    params["fc_w"] = _nrm(next(keys), (HEAD_C, 1))
    params["fc_b"] = _nrm(next(keys), (1,))
    return params


def prepare_params(params):
    """Zero-pad all channel axes to 128 multiples; cast MXU weights to bf16."""
    def padw(w):
        r, c = w.shape
        return jnp.pad(w, ((0, rup(r) - r), (0, rup(c) - c))).astype(jnp.bfloat16)

    def padv(v, fill):
        n = v.shape[0]
        return jnp.pad(v, (0, rup(n) - n),
                       constant_values=fill).reshape(1, -1).astype(jnp.float32)

    prep = {"stem_w": padw(params["stem_w"]),
            "bn0_scale": padv(params["bn0_scale"], 1.0),
            "bn0_bias": padv(params["bn0_bias"], 0.0)}

    blocks = []
    for cfg, p in zip(BLOCKS, params["blocks"]):
        q = {}
        if cfg["expand_ratio"] != 1:
            q["expand_w"] = padw(p["expand_w"])
            q["bn0_scale"] = padv(p["bn0_scale"], 1.0)
            q["bn0_bias"] = padv(p["bn0_bias"], 0.0)
        kk, c = p["dw_w"].shape
        q["dw_w"] = jnp.pad(p["dw_w"], ((0, 0), (0, rup(c) - c))).astype(jnp.float32)
        q["bn1_scale"] = padv(p["bn1_scale"], 1.0)
        q["bn1_bias"] = padv(p["bn1_bias"], 0.0)
        if "se_r_w" in p:
            q["se_r_w"] = padw(p["se_r_w"])
            q["se_r_b"] = padv(p["se_r_b"], 0.0)
            q["se_e_w"] = padw(p["se_e_w"])
            q["se_e_b"] = padv(p["se_e_b"], 0.0)
        q["proj_w"] = padw(p["proj_w"])
        q["bn2_scale"] = padv(p["bn2_scale"], 1.0)
        q["bn2_bias"] = padv(p["bn2_bias"], 0.0)
        blocks.append(q)
    prep["blocks"] = blocks

    prep["head_w"] = padw(params["head_w"])
    prep["bn1_scale"] = padv(params["bn1_scale"], 1.0)
    prep["bn1_bias"] = padv(params["bn1_bias"], 0.0)
    prep["fc_w"] = padw(params["fc_w"])
    prep["fc_b"] = padv(params["fc_b"], 0.0)
    return prep


# ----------------------------------------------------------------------------
# Forward pass: one pallas_call for the whole network
# ----------------------------------------------------------------------------

def efficientnet_forward(x_nchw, prep):
    x = jnp.transpose(x_nchw, (0, 2, 3, 1)).astype(jnp.float32)   # NCHW -> NHWC
    B, H, W, Cin = x.shape

    # stem 3x3 s2 SAME conv via tiny im2col; patches pre-cast to bf16 (MXU lhs)
    patches, Ho, Wo = extract_patches(x, STEM["k"], STEM["s"])
    K = STEM["k"] * STEM["k"] * Cin
    p2 = patches.reshape(B * Ho * Wo, K)
    p2 = jnp.pad(p2, ((0, 0), (0, rup(K) - K))).astype(jnp.bfloat16)

    kernel, scratch = make_fused_kernel(B, Ho, Wo)

    args = [p2, prep["stem_w"], prep["bn0_scale"], prep["bn0_bias"]]
    for cfg, q in zip(BLOCKS, prep["blocks"]):
        if cfg["expand_ratio"] != 1:
            args += [q["expand_w"], q["bn0_scale"], q["bn0_bias"]]
        args += [q["dw_w"], q["bn1_scale"], q["bn1_bias"]]
        if _has_se(cfg):
            args += [q["se_r_w"], q["se_r_b"], q["se_e_w"], q["se_e_b"]]
        args += [q["proj_w"], q["bn2_scale"], q["bn2_bias"]]
    args += [prep["head_w"], prep["bn1_scale"], prep["bn1_bias"],
             prep["fc_w"], prep["fc_b"]]

    out = pl.pallas_call(
        kernel,
        out_shape=jax.ShapeDtypeStruct((B, LANE), jnp.float32),
        grid=(1,),
        in_specs=[pl.BlockSpec(a.shape, lambda i: (0, 0)) for a in args],
        out_specs=pl.BlockSpec((B, LANE), lambda i: (0, 0)),
        scratch_shapes=scratch,
        compiler_params=pltpu.CompilerParams(
            dimension_semantics=("arbitrary",),
            vmem_limit_bytes=32 * 1024 * 1024),
    )(*args)
    return out[:, :1]                                             # (B, 1)


# ----------------------------------------------------------------------------
# Main
# ----------------------------------------------------------------------------

if __name__ == "__main__":
    key = jax.random.PRNGKey(0)
    kx, kp = jax.random.split(key)
    x = jax.random.normal(kx, (2, 4, 16, 16), dtype=jnp.float32)  # NCHW input
    params = init_params(kp)
    prep = prepare_params(params)

    fwd = jax.jit(efficientnet_forward)
    out = fwd(x, prep)
    jax.block_until_ready(out)
    assert out.shape == (2, 1) and out.dtype == jnp.float32
    assert bool(jnp.all(jnp.isfinite(out)))
    print("KERNEL_OK")
</pallas_src>

<mosaic_0001>
module attributes {stable_mosaic.version = 11 : i64} {
  func.func @kernel(%arg0: i32, %arg1: memref<128x128xbf16, #tpu.memory_space<vmem>>, %arg2: memref<128x128xbf16, #tpu.memory_space<vmem>>, %arg3: memref<1x128xf32, #tpu.memory_space<vmem>>, %arg4: memref<1x128xf32, #tpu.memory_space<vmem>>, %arg5: memref<9x128xf32, #tpu.memory_space<vmem>>, %arg6: memref<1x128xf32, #tpu.memory_space<vmem>>, %arg7: memref<1x128xf32, #tpu.memory_space<vmem>>, %arg8: memref<128x128xbf16, #tpu.memory_space<vmem>>, %arg9: memref<1x128xf32, #tpu.memory_space<vmem>>, %arg10: memref<128x128xbf16, #tpu.memory_space<vmem>>, %arg11: memref<1x128xf32, #tpu.memory_space<vmem>>, %arg12: memref<128x128xbf16, #tpu.memory_space<vmem>>, %arg13: memref<1x128xf32, #tpu.memory_space<vmem>>, %arg14: memref<1x128xf32, #tpu.memory_space<vmem>>, %arg15: memref<128x128xbf16, #tpu.memory_space<vmem>>, %arg16: memref<1x128xf32, #tpu.memory_space<vmem>>, %arg17: memref<1x128xf32, #tpu.memory_space<vmem>>, %arg18: memref<9x128xf32, #tpu.memory_space<vmem>>, %arg19: memref<1x128xf32, #tpu.memory_space<vmem>>, %arg20: memref<1x128xf32, #tpu.memory_space<vmem>>, %arg21: memref<128x128xbf16, #tpu.memory_space<vmem>>, %arg22: memref<1x128xf32, #tpu.memory_space<vmem>>, %arg23: memref<128x128xbf16, #tpu.memory_space<vmem>>, %arg24: memref<1x128xf32, #tpu.memory_space<vmem>>, %arg25: memref<128x128xbf16, #tpu.memory_space<vmem>>, %arg26: memref<1x128xf32, #tpu.memory_space<vmem>>, %arg27: memref<1x128xf32, #tpu.memory_space<vmem>>, %arg28: memref<128x256xbf16, #tpu.memory_space<vmem>>, %arg29: memref<1x256xf32, #tpu.memory_space<vmem>>, %arg30: memref<1x256xf32, #tpu.memory_space<vmem>>, %arg31: memref<9x256xf32, #tpu.memory_space<vmem>>, %arg32: memref<1x256xf32, #tpu.memory_space<vmem>>, %arg33: memref<1x256xf32, #tpu.memory_space<vmem>>, %arg34: memref<256x128xbf16, #tpu.memory_space<vmem>>, %arg35: memref<1x128xf32, #tpu.memory_space<vmem>>, %arg36: memref<128x256xbf16, #tpu.memory_space<vmem>>, %arg37: memref<1x256xf32, #tpu.memory_space<vmem>>, %arg38: memref<256x128xbf16, #tpu.memory_space<vmem>>, %arg39: memref<1x128xf32, #tpu.memory_space<vmem>>, %arg40: memref<1x128xf32, #tpu.memory_space<vmem>>, %arg41: memref<128x128xbf16, #tpu.memory_space<vmem>>, %arg42: memref<1x128xf32, #tpu.memory_space<vmem>>, %arg43: memref<1x128xf32, #tpu.memory_space<vmem>>, %arg44: memref<128x128xbf16, #tpu.memory_space<vmem>>, %arg45: memref<1x128xf32, #tpu.memory_space<vmem>>, %arg46: memref<2x128xf32, #tpu.memory_space<vmem>>, %arg47: memref<200x128xf32, #tpu.memory_space<vmem>>, %arg48: memref<128x128xf32, #tpu.memory_space<vmem>>, %arg49: memref<162x128xf32, #tpu.memory_space<vmem>>, %arg50: memref<32x128xf32, #tpu.memory_space<vmem>>, %arg51: memref<72x256xf32, #tpu.memory_space<vmem>>, %arg52: memref<32x256xf32, #tpu.memory_space<vmem>>) attributes {dimension_semantics = [#tpu.dimension_semantics<arbitrary>], iteration_bounds = array<i64: 1>, scalar_prefetch = 0 : i64, scratch_operands = 6 : i64, tpu.core_type = #tpu.core_type<tc>, window_params = [{pipeline_mode = #tpu.pipeline_mode<synchronous>, transform_indices = @transform_0, window_bounds = array<i64: 128, 128>}, {pipeline_mode = #tpu.pipeline_mode<synchronous>, transform_indices = @transform_1, window_bounds = array<i64: 128, 128>}, {pipeline_mode = #tpu.pipeline_mode<synchronous>, transform_indices = @transform_2, window_bounds = array<i64: 1, 128>}, {pipeline_mode = #tpu.pipeline_mode<synchronous>, transform_indices = @transform_3, window_bounds = array<i64: 1, 128>}, {pipeline_mode = #tpu.pipeline_mode<synchronous>, transform_indices = @transform_4, window_bounds = array<i64: 9, 128>}, {pipeline_mode = #tpu.pipeline_mode<synchronous>, transform_indices = @transform_5, window_bounds = array<i64: 1, 128>}, {pipeline_mode = #tpu.pipeline_mode<synchronous>, transform_indices = @transform_6, window_bounds = array<i64: 1, 128>}, {pipeline_mode = #tpu.pipeline_mode<synchronous>, transform_indices = @transform_7, window_bounds = array<i64: 128, 128>}, {pipeline_mode = #tpu.pipeline_mode<synchronous>, transform_indices = @transform_8, window_bounds = array<i64: 1, 128>}, {pipeline_mode = #tpu.pipeline_mode<synchronous>, transform_indices = @transform_9, window_bounds = array<i64: 128, 128>}, {pipeline_mode = #tpu.pipeline_mode<synchronous>, transform_indices = @transform_10, window_bounds = array<i64: 1, 128>}, {pipeline_mode = #tpu.pipeline_mode<synchronous>, transform_indices = @transform_11, window_bounds = array<i64: 128, 128>}, {pipeline_mode = #tpu.pipeline_mode<synchronous>, transform_indices = @transform_12, window_bounds = array<i64: 1, 128>}, {pipeline_mode = #tpu.pipeline_mode<synchronous>, transform_indices = @transform_13, window_bounds = array<i64: 1, 128>}, {pipeline_mode = #tpu.pipeline_mode<synchronous>, transform_indices = @transform_14, window_bounds = array<i64: 128, 128>}, {pipeline_mode = #tpu.pipeline_mode<synchronous>, transform_indices = @transform_15, window_bounds = array<i64: 1, 128>}, {pipeline_mode = #tpu.pipeline_mode<synchronous>, transform_indices = @transform_16, window_bounds = array<i64: 1, 128>}, {pipeline_mode = #tpu.pipeline_mode<synchronous>, transform_indices = @transform_17, window_bounds = array<i64: 9, 128>}, {pipeline_mode = #tpu.pipeline_mode<synchronous>, transform_indices = @transform_18, window_bounds = array<i64: 1, 128>}, {pipeline_mode = #tpu.pipeline_mode<synchronous>, transform_indices = @transform_19, window_bounds = array<i64: 1, 128>}, {pipeline_mode = #tpu.pipeline_mode<synchronous>, transform_indices = @transform_20, window_bounds = array<i64: 128, 128>}, {pipeline_mode = #tpu.pipeline_mode<synchronous>, transform_indices = @transform_21, window_bounds = array<i64: 1, 128>}, {pipeline_mode = #tpu.pipeline_mode<synchronous>, transform_indices = @transform_22, window_bounds = array<i64: 128, 128>}, {pipeline_mode = #tpu.pipeline_mode<synchronous>, transform_indices = @transform_23, window_bounds = array<i64: 1, 128>}, {pipeline_mode = #tpu.pipeline_mode<synchronous>, transform_indices = @transform_24, window_bounds = array<i64: 128, 128>}, {pipeline_mode = #tpu.pipeline_mode<synchronous>, transform_indices = @transform_25, window_bounds = array<i64: 1, 128>}, {pipeline_mode = #tpu.pipeline_mode<synchronous>, transform_indices = @transform_26, window_bounds = array<i64: 1, 128>}, {pipeline_mode = #tpu.pipeline_mode<synchronous>, transform_indices = @transform_27, window_bounds = array<i64: 128, 256>}, {pipeline_mode = #tpu.pipeline_mode<synchronous>, transform_indices = @transform_28, window_bounds = array<i64: 1, 256>}, {pipeline_mode = #tpu.pipeline_mode<synchronous>, transform_indices = @transform_29, window_bounds = array<i64: 1, 256>}, {pipeline_mode = #tpu.pipeline_mode<synchronous>, transform_indices = @transform_30, window_bounds = array<i64: 9, 256>}, {pipeline_mode = #tpu.pipeline_mode<synchronous>, transform_indices = @transform_31, window_bounds = array<i64: 1, 256>}, {pipeline_mode = #tpu.pipeline_mode<synchronous>, transform_indices = @transform_32, window_bounds = array<i64: 1, 256>}, {pipeline_mode = #tpu.pipeline_mode<synchronous>, transform_indices = @transform_33, window_bounds = array<i64: 256, 128>}, {pipeline_mode = #tpu.pipeline_mode<synchronous>, transform_indices = @transform_34, window_bounds = array<i64: 1, 128>}, {pipeline_mode = #tpu.pipeline_mode<synchronous>, transform_indices = @transform_35, window_bounds = array<i64: 128, 256>}, {pipeline_mode = #tpu.pipeline_mode<synchronous>, transform_indices = @transform_36, window_bounds = array<i64: 1, 256>}, {pipeline_mode = #tpu.pipeline_mode<synchronous>, transform_indices = @transform_37, window_bounds = array<i64: 256, 128>}, {pipeline_mode = #tpu.pipeline_mode<synchronous>, transform_indices = @transform_38, window_bounds = array<i64: 1, 128>}, {pipeline_mode = #tpu.pipeline_mode<synchronous>, transform_indices = @transform_39, window_bounds = array<i64: 1, 128>}, {pipeline_mode = #tpu.pipeline_mode<synchronous>, transform_indices = @transform_40, window_bounds = array<i64: 128, 128>}, {pipeline_mode = #tpu.pipeline_mode<synchronous>, transform_indices = @transform_41, window_bounds = array<i64: 1, 128>}, {pipeline_mode = #tpu.pipeline_mode<synchronous>, transform_indices = @transform_42, window_bounds = array<i64: 1, 128>}, {pipeline_mode = #tpu.pipeline_mode<synchronous>, transform_indices = @transform_43, window_bounds = array<i64: 128, 128>}, {pipeline_mode = #tpu.pipeline_mode<synchronous>, transform_indices = @transform_44, window_bounds = array<i64: 1, 128>}, {pipeline_mode = #tpu.pipeline_mode<synchronous>, transform_indices = @transform_45, window_bounds = array<i64: 2, 128>}]} {
    %c0 = arith.constant 0 : index
    %c0_0 = arith.constant 0 : index
    %0 = vector.load %arg1[%c0, %c0_0] : memref<128x128xbf16, #tpu.memory_space<vmem>>, vector<128x128xbf16>
    %c0_1 = arith.constant 0 : index
    %c0_2 = arith.constant 0 : index
    %1 = vector.load %arg2[%c0_1, %c0_2] : memref<128x128xbf16, #tpu.memory_space<vmem>>, vector<128x128xbf16>
    %cst = arith.constant dense<0.000000e+00> : vector<128x128xf32>
    %2 = tpu.matmul %0, %1, %cst {dimension_numbers = #tpu.dot_dimension_numbers<[1], [0], [0], [1], [0, 0, 1, 1], [], []>} : vector<128x128xbf16>, vector<128x128xbf16>, vector<128x128xf32> -> vector<128x128xf32>
    %c0_3 = arith.constant 0 : index
    %c0_4 = arith.constant 0 : index
    %3 = vector.load %arg3[%c0_3, %c0_4] : memref<1x128xf32, #tpu.memory_space<vmem>>, vector<1x128xf32>
    %4 = vector.broadcast %3 : vector<1x128xf32> to vector<128x128xf32>
    %5 = arith.mulf %2, %4 : vector<128x128xf32>
    %c0_5 = arith.constant 0 : index
    %c0_6 = arith.constant 0 : index
    %6 = vector.load %arg4[%c0_5, %c0_6] : memref<1x128xf32, #tpu.memory_space<vmem>>, vector<1x128xf32>
    %7 = vector.broadcast %6 : vector<1x128xf32> to vector<128x128xf32>
    %8 = arith.addf %5, %7 : vector<128x128xf32>
    %cst_7 = arith.constant 0.000000e+00 : f32
    %9 = vector.broadcast %cst_7 : f32 to vector<128x128xf32>
    %10 = arith.subf %9, %8 : vector<128x128xf32>
    %11 = math.exp %10 : vector<128x128xf32>
    %cst_8 = arith.constant 1.000000e+00 : f32
    %12 = vector.broadcast %cst_8 : f32 to vector<128x128xf32>
    %13 = arith.addf %12, %11 : vector<128x128xf32>
    %14 = tpu.reciprocal %13 {approx = true} : vector<128x128xf32> -> vector<128x128xf32>
    %15 = arith.mulf %8, %14 : vector<128x128xf32>
    %cst_9 = arith.constant 0.000000e+00 : f32
    %16 = vector.broadcast %cst_9 : f32 to vector<11x128xf32>
    %cst_10 = arith.constant 0.000000e+00 : f32
    %17 = vector.broadcast %cst_10 : f32 to vector<2x128xf32>
    %cst_11 = arith.constant 0.000000e+00 : f32
    %18 = vector.broadcast %cst_11 : f32 to vector<11x128xf32>
    %c0_12 = arith.constant 0 : index
    %c0_13 = arith.constant 0 : index
    %19 = vector.load %arg47[%c0_12, %c0_13] : memref<200x128xf32, #tpu.memory_space<vmem>>, vector<11x128xf32>
    tpu.vector_store %arg47[%c0_12, %c0_13], %16 {strides = array<i32>} : memref<200x128xf32, #tpu.memory_space<vmem>>, vector<11x128xf32>,
    %20 = vector.extract_strided_slice %15 {offsets = [0, 0], sizes = [8, 128], strides = [1, 1]} : vector<128x128xf32> to vector<8x128xf32>
    %c11 = arith.constant 11 : index
    %c0_14 = arith.constant 0 : index
    %21 = vector.load %arg47[%c11, %c0_14] : memref<200x128xf32, #tpu.memory_space<vmem>>, vector<8x128xf32>
    tpu.vector_store %arg47[%c11, %c0_14], %20 {strides = array<i32>} : memref<200x128xf32, #tpu.memory_space<vmem>>, vector<8x128xf32>,
    %c19 = arith.constant 19 : index
    %c0_15 = arith.constant 0 : index
    %22 = vector.load %arg47[%c19, %c0_15] : memref<200x128xf32, #tpu.memory_space<vmem>>, vector<2x128xf32>
    tpu.vector_store %arg47[%c19, %c0_15], %17 {strides = array<i32>} : memref<200x128xf32, #tpu.memory_space<vmem>>, vector<2x128xf32>,
    %23 = vector.extract_strided_slice %15 {offsets = [8, 0], sizes = [8, 128], strides = [1, 1]} : vector<128x128xf32> to vector<8x128xf32>
    %c21 = arith.constant 21 : index
    %c0_16 = arith.constant 0 : index
    %24 = vector.load %arg47[%c21, %c0_16] : memref<200x128xf32, #tpu.memory_space<vmem>>, vector<8x128xf32>
    tpu.vector_store %arg47[%c21, %c0_16], %23 {strides = array<i32>} : memref<200x128xf32, #tpu.memory_space<vmem>>, vector<8x128xf32>,
    %c29 = arith.constant 29 : index
    %c0_17 = arith.constant 0 : index
    %25 = vector.load %arg47[%c29, %c0_17] : memref<200x128xf32, #tpu.memory_space<vmem>>, vector<2x128xf32>
    tpu.vector_store %arg47[%c29, %c0_17], %17 {strides = array<i32>} : memref<200x128xf32, #tpu.memory_space<vmem>>, vector<2x128xf32>,
    %26 = vector.extract_strided_slice %15 {offsets = [16, 0], sizes = [8, 128], strides = [1, 1]} : vector<128x128xf32> to vector<8x128xf32>
    %c31 = arith.constant 31 : index
    %c0_18 = arith.constant 0 : index
    %27 = vector.load %arg47[%c31, %c0_18] : memref<200x128xf32, #tpu.memory_space<vmem>>, vector<8x128xf32>
    tpu.vector_store %arg47[%c31, %c0_18], %26 {strides = array<i32>} : memref<200x128xf32, #tpu.memory_space<vmem>>, vector<8x128xf32>,
    %c39 = arith.constant 39 : index
    %c0_19 = arith.constant 0 : index
    %28 = vector.load %arg47[%c39, %c0_19] : memref<200x128xf32, #tpu.memory_space<vmem>>, vector<2x128xf32>
    tpu.vector_store %arg47[%c39, %c0_19], %17 {strides = array<i32>} : memref<200x128xf32, #tpu.memory_space<vmem>>, vector<2x128xf32>,
    %29 = vector.extract_strided_slice %15 {offsets = [24, 0], sizes = [8, 128], strides = [1, 1]} : vector<128x128xf32> to vector<8x128xf32>
    %c41 = arith.constant 41 : index
    %c0_20 = arith.constant 0 : index
    %30 = vector.load %arg47[%c41, %c0_20] : memref<200x128xf32, #tpu.memory_space<vmem>>, vector<8x128xf32>
    tpu.vector_store %arg47[%c41, %c0_20], %29 {strides = array<i32>} : memref<200x128xf32, #tpu.memory_space<vmem>>, vector<8x128xf32>,
    %c49 = arith.constant 49 : index
    %c0_21 = arith.constant 0 : index
    %31 = vector.load %arg47[%c49, %c0_21] : memref<200x128xf32, #tpu.memory_space<vmem>>, vector<2x128xf32>
    tpu.vector_store %arg47[%c49, %c0_21], %17 {strides = array<i32>} : memref<200x128xf32, #tpu.memory_space<vmem>>, vector<2x128xf32>,
    %32 = vector.extract_strided_slice %15 {offsets = [32, 0], sizes = [8, 128], strides = [1, 1]} : vector<128x128xf32> to vector<8x128xf32>
    %c51 = arith.constant 51 : index
    %c0_22 = arith.constant 0 : index
    %33 = vector.load %arg47[%c51, %c0_22] : memref<200x128xf32, #tpu.memory_space<vmem>>, vector<8x128xf32>
    tpu.vector_store %arg47[%c51, %c0_22], %32 {strides = array<i32>} : memref<200x128xf32, #tpu.memory_space<vmem>>, vector<8x128xf32>,
    %c59 = arith.constant 59 : index
    %c0_23 = arith.constant 0 : index
    %34 = vector.load %arg47[%c59, %c0_23] : memref<200x128xf32, #tpu.memory_space<vmem>>, vector<2x128xf32>
    tpu.vector_store %arg47[%c59, %c0_23], %17 {strides = array<i32>} : memref<200x128xf32, #tpu.memory_space<vmem>>, vector<2x128xf32>,
    %35 = vector.extract_strided_slice %15 {offsets = [40, 0], sizes = [8, 128], strides = [1, 1]} : vector<128x128xf32> to vector<8x128xf32>
    %c61 = arith.constant 61 : index
    %c0_24 = arith.constant 0 : index
    %36 = vector.load %arg47[%c61, %c0_24] : memref<200x128xf32, #tpu.memory_space<vmem>>, vector<8x128xf32>
    tpu.vector_store %arg47[%c61, %c0_24], %35 {strides = array<i32>} : memref<200x128xf32, #tpu.memory_space<vmem>>, vector<8x128xf32>,
    %c69 = arith.constant 69 : index
    %c0_25 = arith.constant 0 : index
    %37 = vector.load %arg47[%c69, %c0_25] : memref<200x128xf32, #tpu.memory_space<vmem>>, vector<2x128xf32>
    tpu.vector_store %arg47[%c69, %c0_25], %17 {strides = array<i32>} : memref<200x128xf32, #tpu.memory_space<vmem>>, vector<2x128xf32>,
    %38 = vector.extract_strided_slice %15 {offsets = [48, 0], sizes = [8, 128], strides = [1, 1]} : vector<128x128xf32> to vector<8x128xf32>
    %c71 = arith.constant 71 : index
    %c0_26 = arith.constant 0 : index
    %39 = vector.load %arg47[%c71, %c0_26] : memref<200x128xf32, #tpu.memory_space<vmem>>, vector<8x128xf32>
    tpu.vector_store %arg47[%c71, %c0_26], %38 {strides = array<i32>} : memref<200x128xf32, #tpu.memory_space<vmem>>, vector<8x128xf32>,
    %c79 = arith.constant 79 : index
    %c0_27 = arith.constant 0 : index
    %40 = vector.load %arg47[%c79, %c0_27] : memref<200x128xf32, #tpu.memory_space<vmem>>, vector<2x128xf32>
    tpu.vector_store %arg47[%c79, %c0_27], %17 {strides = array<i32>} : memref<200x128xf32, #tpu.memory_space<vmem>>, vector<2x128xf32>,
    %41 = vector.extract_strided_slice %15 {offsets = [56, 0], sizes = [8, 128], strides = [1, 1]} : vector<128x128xf32> to vector<8x128xf32>
    %c81 = arith.constant 81 : index
    %c0_28 = arith.constant 0 : index
    %42 = vector.load %arg47[%c81, %c0_28] : memref<200x128xf32, #tpu.memory_space<vmem>>, vector<8x128xf32>
    tpu.vector_store %arg47[%c81, %c0_28], %41 {strides = array<i32>} : memref<200x128xf32, #tpu.memory_space<vmem>>, vector<8x128xf32>,
    %c89 = arith.constant 89 : index
    %c0_29 = arith.constant 0 : index
    %43 = vector.load %arg47[%c89, %c0_29] : memref<200x128xf32, #tpu.memory_space<vmem>>, vector<11x128xf32>
    tpu.vector_store %arg47[%c89, %c0_29], %18 {strides = array<i32>} : memref<200x128xf32, #tpu.memory_space<vmem>>, vector<11x128xf32>,
    %c100 = arith.constant 100 : index
    %c0_30 = arith.constant 0 : index
    %44 = vector.load %arg47[%c100, %c0_30] : memref<200x128xf32, #tpu.memory_space<vmem>>, vector<11x128xf32>
    tpu.vector_store %arg47[%c100, %c0_30], %16 {strides = array<i32>} : memref<200x128xf32, #tpu.memory_space<vmem>>, vector<11x128xf32>,
    %45 = vector.extract_strided_slice %15 {offsets = [64, 0], sizes = [8, 128], strides = [1, 1]} : vector<128x128xf32> to vector<8x128xf32>
    %c111 = arith.constant 111 : index
    %c0_31 = arith.constant 0 : index
    %46 = vector.load %arg47[%c111, %c0_31] : memref<200x128xf32, #tpu.memory_space<vmem>>, vector<8x128xf32>
    tpu.vector_store %arg47[%c111, %c0_31], %45 {strides = array<i32>} : memref<200x128xf32, #tpu.memory_space<vmem>>, vector<8x128xf32>,
    %c119 = arith.constant 119 : index
    %c0_32 = arith.constant 0 : index
    %47 = vector.load %arg47[%c119, %c0_32] : memref<200x128xf32, #tpu.memory_space<vmem>>, vector<2x128xf32>
    tpu.vector_store %arg47[%c119, %c0_32], %17 {strides = array<i32>} : memref<200x128xf32, #tpu.memory_space<vmem>>, vector<2x128xf32>,
    %48 = vector.extract_strided_slice %15 {offsets = [72, 0], sizes = [8, 128], strides = [1, 1]} : vector<128x128xf32> to vector<8x128xf32>
    %c121 = arith.constant 121 : index
    %c0_33 = arith.constant 0 : index
    %49 = vector.load %arg47[%c121, %c0_33] : memref<200x128xf32, #tpu.memory_space<vmem>>, vector<8x128xf32>
    tpu.vector_store %arg47[%c121, %c0_33], %48 {strides = array<i32>} : memref<200x128xf32, #tpu.memory_space<vmem>>, vector<8x128xf32>,
    %c129 = arith.constant 129 : index
    %c0_34 = arith.constant 0 : index
    %50 = vector.load %arg47[%c129, %c0_34] : memref<200x128xf32, #tpu.memory_space<vmem>>, vector<2x128xf32>
    tpu.vector_store %arg47[%c129, %c0_34], %17 {strides = array<i32>} : memref<200x128xf32, #tpu.memory_space<vmem>>, vector<2x128xf32>,
    %51 = vector.extract_strided_slice %15 {offsets = [80, 0], sizes = [8, 128], strides = [1, 1]} : vector<128x128xf32> to vector<8x128xf32>
    %c131 = arith.constant 131 : index
    %c0_35 = arith.constant 0 : index
    %52 = vector.load %arg47[%c131, %c0_35] : memref<200x128xf32, #tpu.memory_space<vmem>>, vector<8x128xf32>
    tpu.vector_store %arg47[%c131, %c0_35], %51 {strides = array<i32>} : memref<200x128xf32, #tpu.memory_space<vmem>>, vector<8x128xf32>,
    %c139 = arith.constant 139 : index
    %c0_36 = arith.constant 0 : index
    %53 = vector.load %arg47[%c139, %c0_36] : memref<200x128xf32, #tpu.memory_space<vmem>>, vector<2x128xf32>
    tpu.vector_store %arg47[%c139, %c0_36], %17 {strides = array<i32>} : memref<200x128xf32, #tpu.memory_space<vmem>>, vector<2x128xf32>,
    %54 = vector.extract_strided_slice %15 {offsets = [88, 0], sizes = [8, 128], strides = [1, 1]} : vector<128x128xf32> to vector<8x128xf32>
    %c141 = arith.constant 141 : index
    %c0_37 = arith.constant 0 : index
    %55 = vector.load %arg47[%c141, %c0_37] : memref<200x128xf32, #tpu.memory_space<vmem>>, vector<8x128xf32>
    tpu.vector_store %arg47[%c141, %c0_37], %54 {strides = array<i32>} : memref<200x128xf32, #tpu.memory_space<vmem>>, vector<8x128xf32>,
    %c149 = arith.constant 149 : index
    %c0_38 = arith.constant 0 : index
    %56 = vector.load %arg47[%c149, %c0_38] : memref<200x128xf32, #tpu.memory_space<vmem>>, vector<2x128xf32>
    tpu.vector_store %arg47[%c149, %c0_38], %17 {strides = array<i32>} : memref<200x128xf32, #tpu.memory_space<vmem>>, vector<2x128xf32>,
    %57 = vector.extract_strided_slice %15 {offsets = [96, 0], sizes = [8, 128], strides = [1, 1]} : vector<128x128xf32> to vector<8x128xf32>
    %c151 = arith.constant 151 : index
    %c0_39 = arith.constant 0 : index
    %58 = vector.load %arg47[%c151, %c0_39] : memref<200x128xf32, #tpu.memory_space<vmem>>, vector<8x128xf32>
    tpu.vector_store %arg47[%c151, %c0_39], %57 {strides = array<i32>} : memref<200x128xf32, #tpu.memory_space<vmem>>, vector<8x128xf32>,
    %c159 = arith.constant 159 : index
    %c0_40 = arith.constant 0 : index
    %59 = vector.load %arg47[%c159, %c0_40] : memref<200x128xf32, #tpu.memory_space<vmem>>, vector<2x128xf32>
    tpu.vector_store %arg47[%c159, %c0_40], %17 {strides = array<i32>} : memref<200x128xf32, #tpu.memory_space<vmem>>, vector<2x128xf32>,
    %60 = vector.extract_strided_slice %15 {offsets = [104, 0], sizes = [8, 128], strides = [1, 1]} : vector<128x128xf32> to vector<8x128xf32>
    %c161 = arith.constant 161 : index
    %c0_41 = arith.constant 0 : index
    %61 = vector.load %arg47[%c161, %c0_41] : memref<200x128xf32, #tpu.memory_space<vmem>>, vector<8x128xf32>
    tpu.vector_store %arg47[%c161, %c0_41], %60 {strides = array<i32>} : memref<200x128xf32, #tpu.memory_space<vmem>>, vector<8x128xf32>,
    %c169 = arith.constant 169 : index
    %c0_42 = arith.constant 0 : index
    %62 = vector.load %arg47[%c169, %c0_42] : memref<200x128xf32, #tpu.memory_space<vmem>>, vector<2x128xf32>
    tpu.vector_store %arg47[%c169, %c0_42], %17 {strides = array<i32>} : memref<200x128xf32, #tpu.memory_space<vmem>>, vector<2x128xf32>,
    %63 = vector.extract_strided_slice %15 {offsets = [112, 0], sizes = [8, 128], strides = [1, 1]} : vector<128x128xf32> to vector<8x128xf32>
    %c171 = arith.constant 171 : index
    %c0_43 = arith.constant 0 : index
    %64 = vector.load %arg47[%c171, %c0_43] : memref<200x128xf32, #tpu.memory_space<vmem>>, vector<8x128xf32>
    tpu.vector_store %arg47[%c171, %c0_43], %63 {strides = array<i32>} : memref<200x128xf32, #tpu.memory_space<vmem>>, vector<8x128xf32>,
    %c179 = arith.constant 179 : index
    %c0_44 = arith.constant 0 : index
    %65 = vector.load %arg47[%c179, %c0_44] : memref<200x128xf32, #tpu.memory_space<vmem>>, vector<2x128xf32>
    tpu.vector_store %arg47[%c179, %c0_44], %17 {strides = array<i32>} : memref<200x128xf32, #tpu.memory_space<vmem>>, vector<2x128xf32>,
    %66 = vector.extract_strided_slice %15 {offsets = [120, 0], sizes = [8, 128], strides = [1, 1]} : vector<128x128xf32> to vector<8x128xf32>
    %c181 = arith.constant 181 : index
    %c0_45 = arith.constant 0 : index
    %67 = vector.load %arg47[%c181, %c0_45] : memref<200x128xf32, #tpu.memory_space<vmem>>, vector<8x128xf32>
    tpu.vector_store %arg47[%c181, %c0_45], %66 {strides = array<i32>} : memref<200x128xf32, #tpu.memory_space<vmem>>, vector<8x128xf32>,
    %c189 = arith.constant 189 : index
    %c0_46 = arith.constant 0 : index
    %68 = vector.load %arg47[%c189, %c0_46] : memref<200x128xf32, #tpu.memory_space<vmem>>, vector<11x128xf32>
    tpu.vector_store %arg47[%c189, %c0_46], %18 {strides = array<i32>} : memref<200x128xf32, #tpu.memory_space<vmem>>, vector<11x128xf32>,
    %c0_47 = arith.constant 0 : index
    %c0_48 = arith.constant 0 : index
    %69 = vector.load %arg5[%c0_47, %c0_48] : memref<9x128xf32, #tpu.memory_space<vmem>>, vector<1x128xf32>
    %70 = vector.shape_cast %69 : vector<1x128xf32> to vector<1x128xf32>
    %71 = vector.broadcast %70 : vector<1x128xf32> to vector<8x128xf32>
    %c1 = arith.constant 1 : index
    %c0_49 = arith.constant 0 : index
    %72 = vector.load %arg5[%c1, %c0_49] : memref<9x128xf32, #tpu.memory_space<vmem>>, vector<1x128xf32>
    %73 = vector.shape_cast %72 : vector<1x128xf32> to vector<1x128xf32>
    %74 = vector.broadcast %73 : vector<1x128xf32> to vector<8x128xf32>
    %c2 = arith.constant 2 : index
    %c0_50 = arith.constant 0 : index
    %75 = vector.load %arg5[%c2, %c0_50] : memref<9x128xf32, #tpu.memory_space<vmem>>, vector<1x128xf32>
    %76 = vector.shape_cast %75 : vector<1x128xf32> to vector<1x128xf32>
    %77 = vector.broadcast %76 : vector<1x128xf32> to vector<8x128xf32>
    %c3 = arith.constant 3 : index
    %c0_51 = arith.constant 0 : index
    %78 = vector.load %arg5[%c3, %c0_51] : memref<9x128xf32, #tpu.memory_space<vmem>>, vector<1x128xf32>
    %79 = vector.shape_cast %78 : vector<1x128xf32> to vector<1x128xf32>
    %80 = vector.broadcast %79 : vector<1x128xf32> to vector<8x128xf32>
    %c4 = arith.constant 4 : index
    %c0_52 = arith.constant 0 : index
    %81 = vector.load %arg5[%c4, %c0_52] : memref<9x128xf32, #tpu.memory_space<vmem>>, vector<1x128xf32>
    %82 = vector.shape_cast %81 : vector<1x128xf32> to vector<1x128xf32>
    %83 = vector.broadcast %82 : vector<1x128xf32> to vector<8x128xf32>
    %c5 = arith.constant 5 : index
    %c0_53 = arith.constant 0 : index
    %84 = vector.load %arg5[%c5, %c0_53] : memref<9x128xf32, #tpu.memory_space<vmem>>, vector<1x128xf32>
    %85 = vector.shape_cast %84 : vector<1x128xf32> to vector<1x128xf32>
    %86 = vector.broadcast %85 : vector<1x128xf32> to vector<8x128xf32>
    %c6 = arith.constant 6 : index
    %c0_54 = arith.constant 0 : index
    %87 = vector.load %arg5[%c6, %c0_54] : memref<9x128xf32, #tpu.memory_space<vmem>>, vector<1x128xf32>
    %88 = vector.shape_cast %87 : vector<1x128xf32> to vector<1x128xf32>
    %89 = vector.broadcast %88 : vector<1x128xf32> to vector<8x128xf32>
    %c7 = arith.constant 7 : index
    %c0_55 = arith.constant 0 : index
    %90 = vector.load %arg5[%c7, %c0_55] : memref<9x128xf32, #tpu.memory_space<vmem>>, vector<1x128xf32>
    %91 = vector.shape_cast %90 : vector<1x128xf32> to vector<1x128xf32>
    %92 = vector.broadcast %91 : vector<1x128xf32> to vector<8x128xf32>
    %c8 = arith.constant 8 : index
    %c0_56 = arith.constant 0 : index
    %93 = vector.load %arg5[%c8, %c0_56] : memref<9x128xf32, #tpu.memory_space<vmem>>, vector<1x128xf32>
    %94 = vector.shape_cast %93 : vector<1x128xf32> to vector<1x128xf32>
    %95 = vector.broadcast %94 : vector<1x128xf32> to vector<8x128xf32>
    %c0_57 = arith.constant 0 : index
    %c0_58 = arith.constant 0 : index
    %96 = vector.load %arg47[%c0_57, %c0_58] : memref<200x128xf32, #tpu.memory_space<vmem>>, vector<8x128xf32>
    %97 = arith.mulf %96, %71 : vector<8x128xf32>
    %c1_59 = arith.constant 1 : index
    %c0_60 = arith.constant 0 : index
    %98 = vector.load %arg47[%c1_59, %c0_60] : memref<200x128xf32, #tpu.memory_space<vmem>>, vector<8x128xf32>
    %99 = arith.mulf %98, %74 : vector<8x128xf32>
    %100 = arith.addf %97, %99 : vector<8x128xf32>
    %c2_61 = arith.constant 2 : index
    %c0_62 = arith.constant 0 : index
    %101 = vector.load %arg47[%c2_61, %c0_62] : memref<200x128xf32, #tpu.memory_space<vmem>>, vector<8x128xf32>
    %102 = arith.mulf %101, %77 : vector<8x128xf32>
    %103 = arith.addf %100, %102 : vector<8x128xf32>
    %c10 = arith.constant 10 : index
    %c0_63 = arith.constant 0 : index
    %104 = vector.load %arg47[%c10, %c0_63] : memref<200x128xf32, #tpu.memory_space<vmem>>, vector<8x128xf32>
    %105 = arith.mulf %104, %80 : vector<8x128xf32>
    %106 = arith.addf %103, %105 : vector<8x128xf32>
    %c11_64 = arith.constant 11 : index
    %c0_65 = arith.constant 0 : index
    %107 = vector.load %arg47[%c11_64, %c0_65] : memref<200x128xf32, #tpu.memory_space<vmem>>, vector<8x128xf32>
    %108 = arith.mulf %107, %83 : vector<8x128xf32>
    %109 = arith.addf %106, %108 : vector<8x128xf32>
    %c12 = arith.constant 12 : index
    %c0_66 = arith.constant 0 : index
    %110 = vector.load %arg47[%c12, %c0_66] : memref<200x128xf32, #tpu.memory_space<vmem>>, vector<8x128xf32>
    %111 = arith.mulf %110, %86 : vector<8x128xf32>
    %112 = arith.addf %109, %111 : vector<8x128xf32>
    %c20 = arith.constant 20 : index
    %c0_67 = arith.constant 0 : index
    %113 = vector.load %arg47[%c20, %c0_67] : memref<200x128xf32, #tpu.memory_space<vmem>>, vector<8x128xf32>
    %114 = arith.mulf %113, %89 : vector<8x128xf32>
    %115 = arith.addf %112, %114 : vector<8x128xf32>
    %c21_68 = arith.constant 21 : index
    %c0_69 = arith.constant 0 : index
    %116 = vector.load %arg47[%c21_68, %c0_69] : memref<200x128xf32, #tpu.memory_space<vmem>>, vector<8x128xf32>
    %117 = arith.mulf %116, %92 : vector<8x128xf32>
    %118 = arith.addf %115, %117 : vector<8x128xf32>
    %c22 = arith.constant 22 : index
    %c0_70 = arith.constant 0 : index
    %119 = vector.load %arg47[%c22, %c0_70] : memref<200x128xf32, #tpu.memory_space<vmem>>, vector<8x128xf32>
    %120 = arith.mulf %119, %95 : vector<8x128xf32>
    %121 = arith.addf %118, %120 : vector<8x128xf32>
    %c0_71 = arith.constant 0 : index
    %c0_72 = arith.constant 0 : index
    %122 = vector.load %arg48[%c0_71, %c0_72] : memref<128x128xf32, #tpu.memory_space<vmem>>, vector<8x128xf32>
    tpu.vector_store %arg48[%c0_71, %c0_72], %121 {strides = array<i32>} : memref<128x128xf32, #tpu.memory_space<vmem>>, vector<8x128xf32>,
    %c10_73 = arith.constant 10 : index
    %c0_74 = arith.constant 0 : index
    %123 = vector.load %arg47[%c10_73, %c0_74] : memref<200x128xf32, #tpu.memory_space<vmem>>, vector<8x128xf32>
    %124 = arith.mulf %123, %71 : vector<8x128xf32>
    %c11_75 = arith.constant 11 : index
    %c0_76 = arith.constant 0 : index
    %125 = vector.load %arg47[%c11_75, %c0_76] : memref<200x128xf32, #tpu.memory_space<vmem>>, vector<8x128xf32>
    %126 = arith.mulf %125, %74 : vector<8x128xf32>
    %127 = arith.addf %124, %126 : vector<8x128xf32>
    %c12_77 = arith.constant 12 : index
    %c0_78 = arith.constant 0 : index
    %128 = vector.load %arg47[%c12_77, %c0_78] : memref<200x128xf32, #tpu.memory_space<vmem>>, vector<8x128xf32>
    %129 = arith.mulf %128, %77 : vector<8x128xf32>
    %130 = arith.addf %127, %129 : vector<8x128xf32>
    %c20_79 = arith.constant 20 : index
    %c0_80 = arith.constant 0 : index
    %131 = vector.load %arg47[%c20_79, %c0_80] : memref<200x128xf32, #tpu.memory_space<vmem>>, vector<8x128xf32>
    %132 = arith.mulf %131, %80 : vector<8x128xf32>
    %133 = arith.addf %130, %132 : vector<8x128xf32>
    %c21_81 = arith.constant 21 : index
    %c0_82 = arith.constant 0 : index
    %134 = vector.load %arg47[%c21_81, %c0_82] : memref<200x128xf32, #tpu.memory_space<vmem>>, vector<8x128xf32>
    %135 = arith.mulf %134, %83 : vector<8x128xf32>
    %136 = arith.addf %133, %135 : vector<8x128xf32>
    %c22_83 = arith.constant 22 : index
    %c0_84 = arith.constant 0 : index
    %137 = vector.load %arg47[%c22_83, %c0_84] : memref<200x128xf32, #tpu.memory_space<vmem>>, vector<8x128xf32>
    %138 = arith.mulf %137, %86 : vector<8x128xf32>
    %139 = arith.addf %136, %138 : vector<8x128xf32>
    %c30 = arith.constant 30 : index
    %c0_85 = arith.constant 0 : index
    %140 = vector.load %arg47[%c30, %c0_85] : memref<200x128xf32, #tpu.memory_space<vmem>>, vector<8x128xf32>
    %141 = arith.mulf %140, %89 : vector<8x128xf32>
    %142 = arith.addf %139, %141 : vector<8x128xf32>
    %c31_86 = arith.constant 31 : index
    %c0_87 = arith.constant 0 : index
    %143 = vector.load %arg47[%c31_86, %c0_87] : memref<200x128xf32, #tpu.memory_space<vmem>>, vector<8x128xf32>
    %144 = arith.mulf %143, %92 : vector<8x128xf32>
    %145 = arith.addf %142, %144 : vector<8x128xf32>
    %c32 = arith.constant 32 : index
    %c0_88 = arith.constant 0 : index
    %146 = vector.load %arg47[%c32, %c0_88] : memref<200x128xf32, #tpu.memory_space<vmem>>, vector<8x128xf32>
    %147 = arith.mulf %146, %95 : vector<8x128xf32>
    %148 = arith.addf %145, %147 : vector<8x128xf32>
    %c8_89 = arith.constant 8 : index
    %c0_90 = arith.constant 0 : index
    %149 = vector.load %arg48[%c8_89, %c0_90] : memref<128x128xf32, #tpu.memory_space<vmem>>, vector<8x128xf32>
    tpu.vector_store %arg48[%c8_89, %c0_90], %148 {strides = array<i32>} : memref<128x128xf32, #tpu.memory_space<vmem>>, vector<8x128xf32>,
    %c20_91 = arith.constant 20 : index
    %c0_92 = arith.constant 0 : index
    %150 = vector.load %arg47[%c20_91, %c0_92] : memref<200x128xf32, #tpu.memory_space<vmem>>, vector<8x128xf32>
    %151 = arith.mulf %150, %71 : vector<8x128xf32>
    %c21_93 = arith.constant 21 : index
    %c0_94 = arith.constant 0 : index
    %152 = vector.load %arg47[%c21_93, %c0_94] : memref<200x128xf32, #tpu.memory_space<vmem>>, vector<8x128xf32>
    %153 = arith.mulf %152, %74 : vector<8x128xf32>
    %154 = arith.addf %151, %153 : vector<8x128xf32>
    %c22_95 = arith.constant 22 : index
    %c0_96 = arith.constant 0 : index
    %155 = vector.load %arg47[%c22_95, %c0_96] : memref<200x128xf32, #tpu.memory_space<vmem>>, vector<8x128xf32>
    %156 = arith.mulf %155, %77 : vector<8x128xf32>
    %157 = arith.addf %154, %156 : vector<8x128xf32>
    %c30_97 = arith.constant 30 : index
    %c0_98 = arith.constant 0 : index
    %158 = vector.load %arg47[%c30_97, %c0_98] : memref<200x128xf32, #tpu.memory_space<vmem>>, vector<8x128xf32>
    %159 = arith.mulf %158, %80 : vector<8x128xf32>
    %160 = arith.addf %157, %159 : vector<8x128xf32>
    %c31_99 = arith.constant 31 : index
    %c0_100 = arith.constant 0 : index
    %161 = vector.load %arg47[%c31_99, %c0_100] : memref<200x128xf32, #tpu.memory_space<vmem>>, vector<8x128xf32>
    %162 = arith.mulf %161, %83 : vector<8x128xf32>
    %163 = arith.addf %160, %162 : vector<8x128xf32>
    %c32_101 = arith.constant 32 : index
    %c0_102 = arith.constant 0 : index
    %164 = vector.load %arg47[%c32_101, %c0_102] : memref<200x128xf32, #tpu.memory_space<vmem>>, vector<8x128xf32>
    %165 = arith.mulf %164, %86 : vector<8x128xf32>
    %166 = arith.addf %163, %165 : vector<8x128xf32>
    %c40 = arith.constant 40 : index
    %c0_103 = arith.constant 0 : index
    %167 = vector.load %arg47[%c40, %c0_103] : memref<200x128xf32, #tpu.memory_space<vmem>>, vector<8x128xf32>
    %168 = arith.mulf %167, %89 : vector<8x128xf32>
    %169 = arith.addf %166, %168 : vector<8x128xf32>
    %c41_104 = arith.constant 41 : index
    %c0_105 = arith.constant 0 : index
    %170 = vector.load %arg47[%c41_104, %c0_105] : memref<200x128xf32, #tpu.memory_space<vmem>>, vector<8x128xf32>
    %171 = arith.mulf %170, %92 : vector<8x128xf32>
    %172 = arith.addf %169, %171 : vector<8x128xf32>
    %c42 = arith.constant 42 : index
    %c0_106 = arith.constant 0 : index
    %173 = vector.load %arg47[%c42, %c0_106] : memref<200x128xf32, #tpu.memory_space<vmem>>, vector<8x128xf32>
    %174 = arith.mulf %173, %95 : vector<8x128xf32>
    %175 = arith.addf %172, %174 : vector<8x128xf32>
    %c16 = arith.constant 16 : index
    %c0_107 = arith.constant 0 : index
    %176 = vector.load %arg48[%c16, %c0_107] : memref<128x128xf32, #tpu.memory_space<vmem>>, vector<8x128xf32>
    tpu.vector_store %arg48[%c16, %c0_107], %175 {strides = array<i32>} : memref<128x128xf32, #tpu.memory_space<vmem>>, vector<8x128xf32>,
    %c30_108 = arith.constant 30 : index
    %c0_109 = arith.constant 0 : index
    %177 = vector.load %arg47[%c30_108, %c0_109] : memref<200x128xf32, #tpu.memory_space<vmem>>, vector<8x128xf32>
    %178 = arith.mulf %177, %71 : vector<8x128xf32>
    %c31_110 = arith.constant 31 : index
    %c0_111 = arith.constant 0 : index
    %179 = vector.load %arg47[%c31_110, %c0_111] : memref<200x128xf32, #tpu.memory_space<vmem>>, vector<8x128xf32>
    %180 = arith.mulf %179, %74 : vector<8x128xf32>
    %181 = arith.addf %178, %180 : vector<8x128xf32>
    %c32_112 = arith.constant 32 : index
    %c0_113 = arith.constant 0 : index
    %182 = vector.load %arg47[%c32_112, %c0_113] : memref<200x128xf32, #tpu.memory_space<vmem>>, vector<8x128xf32>
    %183 = arith.mulf %182, %77 : vector<8x128xf32>
    %184 = arith.addf %181, %183 : vector<8x128xf32>
    %c40_114 = arith.constant 40 : index
    %c0_115 = arith.constant 0 : index
    %185 = vector.load %arg47[%c40_114, %c0_115] : memref<200x128xf32, #tpu.memory_space<vmem>>, vector<8x128xf32>
    %186 = arith.mulf %185, %80 : vector<8x128xf32>
    %187 = arith.addf %184, %186 : vector<8x128xf32>
    %c41_116 = arith.constant 41 : index
    %c0_117 = arith.constant 0 : index
    %188 = vector.load %arg47[%c41_116, %c0_117] : memref<200x128xf32, #tpu.memory_space<vmem>>, vector<8x128xf32>
    %189 = arith.mulf %188, %83 : vector<8x128xf32>
    %190 = arith.addf %187, %189 : vector<8x128xf32>
    %c42_118 = arith.constant 42 : index
    %c0_119 = arith.constant 0 : index
    %191 = vector.load %arg47[%c42_118, %c0_119] : memref<200x128xf32, #tpu.memory_space<vmem>>, vector<8x128xf32>
    %192 = arith.mulf %191, %86 : vector<8x128xf32>
    %193 = arith.addf %190, %192 : vector<8x128xf32>
    %c50 = arith.constant 50 : index
    %c0_120 = arith.constant 0 : index
    %194 = vector.load %arg47[%c50, %c0_120] : memref<200x128xf32, #tpu.memory_space<vmem>>, vector<8x128xf32>
    %195 = arith.mulf %194, %89 : vector<8x128xf32>
    %196 = arith.addf %193, %195 : vector<8x128xf32>
    %c51_121 = arith.constant 51 : index
    %c0_122 = arith.constant 0 : index
    %197 = vector.load %arg47[%c51_121, %c0_122] : memref<200x128xf32, #tpu.memory_space<vmem>>, vector<8x128xf32>
    %198 = arith.mulf %197, %92 : vector<8x128xf32>
    %199 = arith.addf %196, %198 : vector<8x128xf32>
    %c52 = arith.constant 52 : index
    %c0_123 = arith.constant 0 : index
    %200 = vector.load %arg47[%c52, %c0_123] : memref<200x128xf32, #tpu.memory_space<vmem>>, vector<8x128xf32>
    %201 = arith.mulf %200, %95 : vector<8x128xf32>
    %202 = arith.addf %199, %201 : vector<8x128xf32>
    %c24 = arith.constant 24 : index
    %c0_124 = arith.constant 0 : index
    %203 = vector.load %arg48[%c24, %c0_124] : memref<128x128xf32, #tpu.memory_space<vmem>>, vector<8x128xf32>
    tpu.vector_store %arg48[%c24, %c0_124], %202 {strides = array<i32>} : memref<128x128xf32, #tpu.memory_space<vmem>>, vector<8x128xf32>,
    %c40_125 = arith.constant 40 : index
    %c0_126 = arith.constant 0 : index
    %204 = vector.load %arg47[%c40_125, %c0_126] : memref<200x128xf32, #tpu.memory_space<vmem>>, vector<8x128xf32>
    %205 = arith.mulf %204, %71 : vector<8x128xf32>
    %c41_127 = arith.constant 41 : index
    %c0_128 = arith.constant 0 : index
    %206 = vector.load %arg47[%c41_127, %c0_128] : memref<200x128xf32, #tpu.memory_space<vmem>>, vector<8x128xf32>
    %207 = arith.mulf %206, %74 : vector<8x128xf32>
    %208 = arith.addf %205, %207 : vector<8x128xf32>
    %c42_129 = arith.constant 42 : index
    %c0_130 = arith.constant 0 : index
    %209 = vector.load %arg47[%c42_129, %c0_130] : memref<200x128xf32, #tpu.memory_space<vmem>>, vector<8x128xf32>
    %210 = arith.mulf %209, %77 : vector<8x128xf32>
    %211 = arith.addf %208, %210 : vector<8x128xf32>
    %c50_131 = arith.constant 50 : index
    %c0_132 = arith.constant 0 : index
    %212 = vector.load %arg47[%c50_131, %c0_132] : memref<200x128xf32, #tpu.memory_space<vmem>>, vector<8x128xf32>
    %213 = arith.mulf %212, %80 : vector<8x128xf32>
    %214 = arith.addf %211, %213 : vector<8x128xf32>
    %c51_133 = arith.constant 51 : index
    %c0_134 = arith.constant 0 : index
    %215 = vector.load %arg47[%c51_133, %c0_134] : memref<200x128xf32, #tpu.memory_space<vmem>>, vector<8x128xf32>
    %216 = arith.mulf %215, %83 : vector<8x128xf32>
    %217 = arith.addf %214, %216 : vector<8x128xf32>
    %c52_135 = arith.constant 52 : index
    %c0_136 = arith.constant 0 : index
    %218 = vector.load %arg47[%c52_135, %c0_136] : memref<200x128xf32, #tpu.memory_space<vmem>>, vector<8x128xf32>
    %219 = arith.mulf %218, %86 : vector<8x128xf32>
    %220 = arith.addf %217, %219 : vector<8x128xf32>
    %c60 = arith.constant 60 : index
    %c0_137 = arith.constant 0 : index
    %221 = vector.load %arg47[%c60, %c0_137] : memref<200x128xf32, #tpu.memory_space<vmem>>, vector<8x128xf32>
    %222 = arith.mulf %221, %89 : vector<8x128xf32>
    %223 = arith.addf %220, %222 : vector<8x128xf32>
    %c61_138 = arith.constant 61 : index
    %c0_139 = arith.constant 0 : index
    %224 = vector.load %arg47[%c61_138, %c0_139] : memref<200x128xf32, #tpu.memory_space<vmem>>, vector<8x128xf32>
    %225 = arith.mulf %224, %92 : vector<8x128xf32>
    %226 = arith.addf %223, %225 : vector<8x128xf32>
    %c62 = arith.constant 62 : index
    %c0_140 = arith.constant 0 : index
    %227 = vector.load %arg47[%c62, %c0_140] : memref<200x128xf32, #tpu.memory_space<vmem>>, vector<8x128xf32>
    %228 = arith.mulf %227, %95 : vector<8x128xf32>
    %229 = arith.addf %226, %228 : vector<8x128xf32>
    %c32_141 = arith.constant 32 : index
    %c0_142 = arith.constant 0 : index
    %230 = vector.load %arg48[%c32_141, %c0_142] : memref<128x128xf32, #tpu.memory_space<vmem>>, vector<8x128xf32>
    tpu.vector_store %arg48[%c32_141, %c0_142], %229 {strides = array<i32>} : memref<128x128xf32, #tpu.memory_space<vmem>>, vector<8x128xf32>,
    %c50_143 = arith.constant 50 : index
    %c0_144 = arith.constant 0 : index
    %231 = vector.load %arg47[%c50_143, %c0_144] : memref<200x128xf32, #tpu.memory_space<vmem>>, vector<8x128xf32>
    %232 = arith.mulf %231, %71 : vector<8x128xf32>
    %c51_145 = arith.constant 51 : index
    %c0_146 = arith.constant 0 : index
    %233 = vector.load %arg47[%c51_145, %c0_146] : memref<200x128xf32, #tpu.memory_space<vmem>>, vector<8x128xf32>
    %234 = arith.mulf %233, %74 : vector<8x128xf32>
    %235 = arith.addf %232, %234 : vector<8x128xf32>
    %c52_147 = arith.constant 52 : index
    %c0_148 = arith.constant 0 : index
    %236 = vector.load %arg47[%c52_147, %c0_148] : memref<200x128xf32, #tpu.memory_space<vmem>>, vector<8x128xf32>
    %237 = arith.mulf %236, %77 : vector<8x128xf32>
    %238 = arith.addf %235, %237 : vector<8x128xf32>
    %c60_149 = arith.constant 60 : index
    %c0_150 = arith.constant 0 : index
    %239 = vector.load %arg47[%c60_149, %c0_150] : memref<200x128xf32, #tpu.memory_space<vmem>>, vector<8x128xf32>
    %240 = arith.mulf %239, %80 : vector<8x128xf32>
    %241 = arith.addf %238, %240 : vector<8x128xf32>
    %c61_151 = arith.constant 61 : index
    %c0_152 = arith.constant 0 : index
    %242 = vector.load %arg47[%c61_151, %c0_152] : memref<200x128xf32, #tpu.memory_space<vmem>>, vector<8x128xf32>
    %243 = arith.mulf %242, %83 : vector<8x128xf32>
    %244 = arith.addf %241, %243 : vector<8x128xf32>
    %c62_153 = arith.constant 62 : index
    %c0_154 = arith.constant 0 : index
    %245 = vector.load %arg47[%c62_153, %c0_154] : memref<200x128xf32, #tpu.memory_space<vmem>>, vector<8x128xf32>
    %246 = arith.mulf %245, %86 : vector<8x128xf32>
    %247 = arith.addf %244, %246 : vector<8x128xf32>
    %c70 = arith.constant 70 : index
    %c0_155 = arith.constant 0 : index
    %248 = vector.load %arg47[%c70, %c0_155] : memref<200x128xf32, #tpu.memory_space<vmem>>, vector<8x128xf32>
    %249 = arith.mulf %248, %89 : vector<8x128xf32>
    %250 = arith.addf %247, %249 : vector<8x128xf32>
    %c71_156 = arith.constant 71 : index
    %c0_157 = arith.constant 0 : index
    %251 = vector.load %arg47[%c71_156, %c0_157] : memref<200x128xf32, #tpu.memory_space<vmem>>, vector<8x128xf32>
    %252 = arith.mulf %251, %92 : vector<8x128xf32>
    %253 = arith.addf %250, %252 : vector<8x128xf32>
    %c72 = arith.constant 72 : index
    %c0_158 = arith.constant 0 : index
    %254 = vector.load %arg47[%c72, %c0_158] : memref<200x128xf32, #tpu.memory_space<vmem>>, vector<8x128xf32>
    %255 = arith.mulf %254, %95 : vector<8x128xf32>
    %256 = arith.addf %253, %255 : vector<8x128xf32>
    %c40_159 = arith.constant 40 : index
    %c0_160 = arith.constant 0 : index
    %257 = vector.load %arg48[%c40_159, %c0_160] : memref<128x128xf32, #tpu.memory_space<vmem>>, vector<8x128xf32>
    tpu.vector_store %arg48[%c40_159, %c0_160], %256 {strides = array<i32>} : memref<128x128xf32, #tpu.memory_space<vmem>>, vector<8x128xf32>,
    %c60_161 = arith.constant 60 : index
    %c0_162 = arith.constant 0 : index
    %258 = vector.load %arg47[%c60_161, %c0_162] : memref<200x128xf32, #tpu.memory_space<vmem>>, vector<8x128xf32>
    %259 = arith.mulf %258, %71 : vector<8x128xf32>
    %c61_163 = arith.constant 61 : index
    %c0_164 = arith.constant 0 : index
    %260 = vector.load %arg47[%c61_163, %c0_164] : memref<200x128xf32, #tpu.memory_space<vmem>>, vector<8x128xf32>
    %261 = arith.mulf %260, %74 : vector<8x128xf32>
    %262 = arith.addf %259, %261 : vector<8x128xf32>
    %c62_165 = arith.constant 62 : index
    %c0_166 = arith.constant 0 : index
    %263 = vector.load %arg47[%c62_165, %c0_166] : memref<200x128xf32, #tpu.memory_space<vmem>>, vector<8x128xf32>
    %264 = arith.mulf %263, %77 : vector<8x128xf32>
    %265 = arith.addf %262, %264 : vector<8x128xf32>
    %c70_167 = arith.constant 70 : index
    %c0_168 = arith.constant 0 : index
    %266 = vector.load %arg47[%c70_167, %c0_168] : memref<200x128xf32, #tpu.memory_space<vmem>>, vector<8x128xf32>
    %267 = arith.mulf %266, %80 : vector<8x128xf32>
    %268 = arith.addf %265, %267 : vector<8x128xf32>
    %c71_169 = arith.constant 71 : index
    %c0_170 = arith.constant 0 : index
    %269 = vector.load %arg47[%c71_169, %c0_170] : memref<200x128xf32, #tpu.memory_space<vmem>>, vector<8x128xf32>
    %270 = arith.mulf %269, %83 : vector<8x128xf32>
    %271 = arith.addf %268, %270 : vector<8x128xf32>
    %c72_171 = arith.constant 72 : index
    %c0_172 = arith.constant 0 : index
    %272 = vector.load %arg47[%c72_171, %c0_172] : memref<200x128xf32, #tpu.memory_space<vmem>>, vector<8x128xf32>
    %273 = arith.mulf %272, %86 : vector<8x128xf32>
    %274 = arith.addf %271, %273 : vector<8x128xf32>
    %c80 = arith.constant 80 : index
    %c0_173 = arith.constant 0 : index
    %275 = vector.load %arg47[%c80, %c0_173] : memref<200x128xf32, #tpu.memory_space<vmem>>, vector<8x128xf32>
    %276 = arith.mulf %275, %89 : vector<8x128xf32>
    %277 = arith.addf %274, %276 : vector<8x128xf32>
    %c81_174 = arith.constant 81 : index
    %c0_175 = arith.constant 0 : index
    %278 = vector.load %arg47[%c81_174, %c0_175] : memref<200x128xf32, #tpu.memory_space<vmem>>, vector<8x128xf32>
    %279 = arith.mulf %278, %92 : vector<8x128xf32>
    %280 = arith.addf %277, %279 : vector<8x128xf32>
    %c82 = arith.constant 82 : index
    %c0_176 = arith.constant 0 : index
    %281 = vector.load %arg47[%c82, %c0_176] : memref<200x128xf32, #tpu.memory_space<vmem>>, vector<8x128xf32>
    %282 = arith.mulf %281, %95 : vector<8x128xf32>
    %283 = arith.addf %280, %282 : vector<8x128xf32>
    %c48 = arith.constant 48 : index
    %c0_177 = arith.constant 0 : index
    %284 = vector.load %arg48[%c48, %c0_177] : memref<128x128xf32, #tpu.memory_space<vmem>>, vector<8x128xf32>
    tpu.vector_store %arg48[%c48, %c0_177], %283 {strides = array<i32>} : memref<128x128xf32, #tpu.memory_space<vmem>>, vector<8x128xf32>,
    %c70_178 = arith.constant 70 : index
    %c0_179 = arith.constant 0 : index
    %285 = vector.load %arg47[%c70_178, %c0_179] : memref<200x128xf32, #tpu.memory_space<vmem>>, vector<8x128xf32>
    %286 = arith.mulf %285, %71 : vector<8x128xf32>
    %c71_180 = arith.constant 71 : index
    %c0_181 = arith.constant 0 : index
    %287 = vector.load %arg47[%c71_180, %c0_181] : memref<200x128xf32, #tpu.memory_space<vmem>>, vector<8x128xf32>
    %288 = arith.mulf %287, %74 : vector<8x128xf32>
    %289 = arith.addf %286, %288 : vector<8x128xf32>
    %c72_182 = arith.constant 72 : index
    %c0_183 = arith.constant 0 : index
    %290 = vector.load %arg47[%c72_182, %c0_183] : memref<200x128xf32, #tpu.memory_space<vmem>>, vector<8x128xf32>
    %291 = arith.mulf %290, %77 : vector<8x128xf32>
    %292 = arith.addf %289, %291 : vector<8x128xf32>
    %c80_184 = arith.constant 80 : index
    %c0_185 = arith.constant 0 : index
    %293 = vector.load %arg47[%c80_184, %c0_185] : memref<200x128xf32, #tpu.memory_space<vmem>>, vector<8x128xf32>
    %294 = arith.mulf %293, %80 : vector<8x128xf32>
    %295 = arith.addf %292, %294 : vector<8x128xf32>
    %c81_186 = arith.constant 81 : index
    %c0_187 = arith.constant 0 : index
    %296 = vector.load %arg47[%c81_186, %c0_187] : memref<200x128xf32, #tpu.memory_space<vmem>>, vector<8x128xf32>
    %297 = arith.mulf %296, %83 : vector<8x128xf32>
    %298 = arith.addf %295, %297 : vector<8x128xf32>
    %c82_188 = arith.constant 82 : index
    %c0_189 = arith.constant 0 : index
    %299 = vector.load %arg47[%c82_188, %c0_189] : memref<200x128xf32, #tpu.memory_space<vmem>>, vector<8x128xf32>
    %300 = arith.mulf %299, %86 : vector<8x128xf32>
    %301 = arith.addf %298, %300 : vector<8x128xf32>
    %c90 = arith.constant 90 : index
    %c0_190 = arith.constant 0 : index
    %302 = vector.load %arg47[%c90, %c0_190] : memref<200x128xf32, #tpu.memory_space<vmem>>, vector<8x128xf32>
    %303 = arith.mulf %302, %89 : vector<8x128xf32>
    %304 = arith.addf %301, %303 : vector<8x128xf32>
    %c91 = arith.constant 91 : index
    %c0_191 = arith.constant 0 : index
    %305 = vector.load %arg47[%c91, %c0_191] : memref<200x128xf32, #tpu.memory_space<vmem>>, vector<8x128xf32>
    %306 = arith.mulf %305, %92 : vector<8x128xf32>
    %307 = arith.addf %304, %306 : vector<8x128xf32>
    %c92 = arith.constant 92 : index
    %c0_192 = arith.constant 0 : index
    %308 = vector.load %arg47[%c92, %c0_192] : memref<200x128xf32, #tpu.memory_space<vmem>>, vector<8x128xf32>
    %309 = arith.mulf %308, %95 : vector<8x128xf32>
    %310 = arith.addf %307, %309 : vector<8x128xf32>
    %c56 = arith.constant 56 : index
    %c0_193 = arith.constant 0 : index
    %311 = vector.load %arg48[%c56, %c0_193] : memref<128x128xf32, #tpu.memory_space<vmem>>, vector<8x128xf32>
    tpu.vector_store %arg48[%c56, %c0_193], %310 {strides = array<i32>} : memref<128x128xf32, #tpu.memory_space<vmem>>, vector<8x128xf32>,
    %c100_194 = arith.constant 100 : index
    %c0_195 = arith.constant 0 : index
    %312 = vector.load %arg47[%c100_194, %c0_195] : memref<200x128xf32, #tpu.memory_space<vmem>>, vector<8x128xf32>
    %313 = arith.mulf %312, %71 : vector<8x128xf32>
    %c101 = arith.constant 101 : index
    %c0_196 = arith.constant 0 : index
    %314 = vector.load %arg47[%c101, %c0_196] : memref<200x128xf32, #tpu.memory_space<vmem>>, vector<8x128xf32>
    %315 = arith.mulf %314, %74 : vector<8x128xf32>
    %316 = arith.addf %313, %315 : vector<8x128xf32>
    %c102 = arith.constant 102 : index
    %c0_197 = arith.constant 0 : index
    %317 = vector.load %arg47[%c102, %c0_197] : memref<200x128xf32, #tpu.memory_space<vmem>>, vector<8x128xf32>
    %318 = arith.mulf %317, %77 : vector<8x128xf32>
    %319 = arith.addf %316, %318 : vector<8x128xf32>
    %c110 = arith.constant 110 : index
    %c0_198 = arith.constant 0 : index
    %320 = vector.load %arg47[%c110, %c0_198] : memref<200x128xf32, #tpu.memory_space<vmem>>, vector<8x128xf32>
    %321 = arith.mulf %320, %80 : vector<8x128xf32>
    %322 = arith.addf %319, %321 : vector<8x128xf32>
    %c111_199 = arith.constant 111 : index
    %c0_200 = arith.constant 0 : index
    %323 = vector.load %arg47[%c111_199, %c0_200] : memref<200x128xf32, #tpu.memory_space<vmem>>, vector<8x128xf32>
    %324 = arith.mulf %323, %83 : vector<8x128xf32>
    %325 = arith.addf %322, %324 : vector<8x128xf32>
    %c112 = arith.constant 112 : index
    %c0_201 = arith.constant 0 : index
    %326 = vector.load %arg47[%c112, %c0_201] : memref<200x128xf32, #tpu.memory_space<vmem>>, vector<8x128xf32>
    %327 = arith.mulf %326, %86 : vector<8x128xf32>
    %328 = arith.addf %325, %327 : vector<8x128xf32>
    %c120 = arith.constant 120 : index
    %c0_202 = arith.constant 0 : index
    %329 = vector.load %arg47[%c120, %c0_202] : memref<200x128xf32, #tpu.memory_space<vmem>>, vector<8x128xf32>
    %330 = arith.mulf %329, %89 : vector<8x128xf32>
    %331 = arith.addf %328, %330 : vector<8x128xf32>
    %c121_203 = arith.constant 121 : index
    %c0_204 = arith.constant 0 : index
    %332 = vector.load %arg47[%c121_203, %c0_204] : memref<200x128xf32, #tpu.memory_space<vmem>>, vector<8x128xf32>
    %333 = arith.mulf %332, %92 : vector<8x128xf32>
    %334 = arith.addf %331, %333 : vector<8x128xf32>
    %c122 = arith.constant 122 : index
    %c0_205 = arith.constant 0 : index
    %335 = vector.load %arg47[%c122, %c0_205] : memref<200x128xf32, #tpu.memory_space<vmem>>, vector<8x128xf32>
    %336 = arith.mulf %335, %95 : vector<8x128xf32>
    %337 = arith.addf %334, %336 : vector<8x128xf32>
    %c64 = arith.constant 64 : index
    %c0_206 = arith.constant 0 : index
    %338 = vector.load %arg48[%c64, %c0_206] : memref<128x128xf32, #tpu.memory_space<vmem>>, vector<8x128xf32>
    tpu.vector_store %arg48[%c64, %c0_206], %337 {strides = array<i32>} : memref<128x128xf32, #tpu.memory_space<vmem>>, vector<8x128xf32>,
    %c110_207 = arith.constant 110 : index
    %c0_208 = arith.constant 0 : index
    %339 = vector.load %arg47[%c110_207, %c0_208] : memref<200x128xf32, #tpu.memory_space<vmem>>, vector<8x128xf32>
    %340 = arith.mulf %339, %71 : vector<8x128xf32>
    %c111_209 = arith.constant 111 : index
    %c0_210 = arith.constant 0 : index
    %341 = vector.load %arg47[%c111_209, %c0_210] : memref<200x128xf32, #tpu.memory_space<vmem>>, vector<8x128xf32>
    %342 = arith.mulf %341, %74 : vector<8x128xf32>
    %343 = arith.addf %340, %342 : vector<8x128xf32>
    %c112_211 = arith.constant 112 : index
    %c0_212 = arith.constant 0 : index
    %344 = vector.load %arg47[%c112_211, %c0_212] : memref<200x128xf32, #tpu.memory_space<vmem>>, vector<8x128xf32>
    %345 = arith.mulf %344, %77 : vector<8x128xf32>
    %346 = arith.addf %343, %345 : vector<8x128xf32>
    %c120_213 = arith.constant 120 : index
    %c0_214 = arith.constant 0 : index
    %347 = vector.load %arg47[%c120_213, %c0_214] : memref<200x128xf32, #tpu.memory_space<vmem>>, vector<8x128xf32>
    %348 = arith.mulf %347, %80 : vector<8x128xf32>
    %349 = arith.addf %346, %348 : vector<8x128xf32>
    %c121_215 = arith.constant 121 : index
    %c0_216 = arith.constant 0 : index
    %350 = vector.load %arg47[%c121_215, %c0_216] : memref<200x128xf32, #tpu.memory_space<vmem>>, vector<8x128xf32>
    %351 = arith.mulf %350, %83 : vector<8x128xf32>
    %352 = arith.addf %349, %351 : vector<8x128xf32>
    %c122_217 = arith.constant 122 : index
    %c0_218 = arith.constant 0 : index
    %353 = vector.load %arg47[%c122_217, %c0_218] : memref<200x128xf32, #tpu.memory_space<vmem>>, vector<8x128xf32>
    %354 = arith.mulf %353, %86 : vector<8x128xf32>
    %355 = arith.addf %352, %354 : vector<8x128xf32>
    %c130 = arith.constant 130 : index
    %c0_219 = arith.constant 0 : index
    %356 = vector.load %arg47[%c130, %c0_219] : memref<200x128xf32, #tpu.memory_space<vmem>>, vector<8x128xf32>
    %357 = arith.mulf %356, %89 : vector<8x128xf32>
    %358 = arith.addf %355, %357 : vector<8x128xf32>
    %c131_220 = arith.constant 131 : index
    %c0_221 = arith.constant 0 : index
    %359 = vector.load %arg47[%c131_220, %c0_221] : memref<200x128xf32, #tpu.memory_space<vmem>>, vector<8x128xf32>
    %360 = arith.mulf %359, %92 : vector<8x128xf32>
    %361 = arith.addf %358, %360 : vector<8x128xf32>
    %c132 = arith.constant 132 : index
    %c0_222 = arith.constant 0 : index
    %362 = vector.load %arg47[%c132, %c0_222] : memref<200x128xf32, #tpu.memory_space<vmem>>, vector<8x128xf32>
    %363 = arith.mulf %362, %95 : vector<8x128xf32>
    %364 = arith.addf %361, %363 : vector<8x128xf32>
    %c72_223 = arith.constant 72 : index
    %c0_224 = arith.constant 0 : index
    %365 = vector.load %arg48[%c72_223, %c0_224] : memref<128x128xf32, #tpu.memory_space<vmem>>, vector<8x128xf32>
    tpu.vector_store %arg48[%c72_223, %c0_224], %364 {strides = array<i32>} : memref<128x128xf32, #tpu.memory_space<vmem>>, vector<8x128xf32>,
    %c120_225 = arith.constant 120 : index
    %c0_226 = arith.constant 0 : index
    %366 = vector.load %arg47[%c120_225, %c0_226] : memref<200x128xf32, #tpu.memory_space<vmem>>, vector<8x128xf32>
    %367 = arith.mulf %366, %71 : vector<8x128xf32>
    %c121_227 = arith.constant 121 : index
    %c0_228 = arith.constant 0 : index
    %368 = vector.load %arg47[%c121_227, %c0_228] : memref<200x128xf32, #tpu.memory_space<vmem>>, vector<8x128xf32>
    %369 = arith.mulf %368, %74 : vector<8x128xf32>
    %370 = arith.addf %367, %369 : vector<8x128xf32>
    %c122_229 = arith.constant 122 : index
    %c0_230 = arith.constant 0 : index
    %371 = vector.load %arg47[%c122_229, %c0_230] : memref<200x128xf32, #tpu.memory_space<vmem>>, vector<8x128xf32>
    %372 = arith.mulf %371, %77 : vector<8x128xf32>
    %373 = arith.addf %370, %372 : vector<8x128xf32>
    %c130_231 = arith.constant 130 : index
    %c0_232 = arith.constant 0 : index
    %374 = vector.load %arg47[%c130_231, %c0_232] : memref<200x128xf32, #tpu.memory_space<vmem>>, vector<8x128xf32>
    %375 = arith.mulf %374, %80 : vector<8x128xf32>
    %376 = arith.addf %373, %375 : vector<8x128xf32>
    %c131_233 = arith.constant 131 : index
    %c0_234 = arith.constant 0 : index
    %377 = vector.load %arg47[%c131_233, %c0_234] : memref<200x128xf32, #tpu.memory_space<vmem>>, vector<8x128xf32>
    %378 = arith.mulf %377, %83 : vector<8x128xf32>
    %379 = arith.addf %376, %378 : vector<8x128xf32>
    %c132_235 = arith.constant 132 : index
    %c0_236 = arith.constant 0 : index
    %380 = vector.load %arg47[%c132_235, %c0_236] : memref<200x128xf32, #tpu.memory_space<vmem>>, vector<8x128xf32>
    %381 = arith.mulf %380, %86 : vector<8x128xf32>
    %382 = arith.addf %379, %381 : vector<8x128xf32>
    %c140 = arith.constant 140 : index
    %c0_237 = arith.constant 0 : index
    %383 = vector.load %arg47[%c140, %c0_237] : memref<200x128xf32, #tpu.memory_space<vmem>>, vector<8x128xf32>
    %384 = arith.mulf %383, %89 : vector<8x128xf32>
    %385 = arith.addf %382, %384 : vector<8x128xf32>
    %c141_238 = arith.constant 141 : index
    %c0_239 = arith.constant 0 : index
    %386 = vector.load %arg47[%c141_238, %c0_239] : memref<200x128xf32, #tpu.memory_space<vmem>>, vector<8x128xf32>
    %387 = arith.mulf %386, %92 : vector<8x128xf32>
    %388 = arith.addf %385, %387 : vector<8x128xf32>
    %c142 = arith.constant 142 : index
    %c0_240 = arith.constant 0 : index
    %389 = vector.load %arg47[%c142, %c0_240] : memref<200x128xf32, #tpu.memory_space<vmem>>, vector<8x128xf32>
    %390 = arith.mulf %389, %95 : vector<8x128xf32>
    %391 = arith.addf %388, %390 : vector<8x128xf32>
    %c80_241 = arith.constant 80 : index
    %c0_242 = arith.constant 0 : index
    %392 = vector.load %arg48[%c80_241, %c0_242] : memref<128x128xf32, #tpu.memory_space<vmem>>, vector<8x128xf32>
    tpu.vector_store %arg48[%c80_241, %c0_242], %391 {strides = array<i32>} : memref<128x128xf32, #tpu.memory_space<vmem>>, vector<8x128xf32>,
    %c130_243 = arith.constant 130 : index
    %c0_244 = arith.constant 0 : index
    %393 = vector.load %arg47[%c130_243, %c0_244] : memref<200x128xf32, #tpu.memory_space<vmem>>, vector<8x128xf32>
    %394 = arith.mulf %393, %71 : vector<8x128xf32>
    %c131_245 = arith.constant 131 : index
    %c0_246 = arith.constant 0 : index
    %395 = vector.load %arg47[%c131_245, %c0_246] : memref<200x128xf32, #tpu.memory_space<vmem>>, vector<8x128xf32>
    %396 = arith.mulf %395, %74 : vector<8x128xf32>
    %397 = arith.addf %394, %396 : vector<8x128xf32>
    %c132_247 = arith.constant 132 : index
    %c0_248 = arith.constant 0 : index
    %398 = vector.load %arg47[%c132_247, %c0_248] : memref<200x128xf32, #tpu.memory_space<vmem>>, vector<8x128xf32>
    %399 = arith.mulf %398, %77 : vector<8x128xf32>
    %400 = arith.addf %397, %399 : vector<8x128xf32>
    %c140_249 = arith.constant 140 : index
    %c0_250 = arith.constant 0 : index
    %401 = vector.load %arg47[%c140_249, %c0_250] : memref<200x128xf32, #tpu.memory_space<vmem>>, vector<8x128xf32>
    %402 = arith.mulf %401, %80 : vector<8x128xf32>
    %403 = arith.addf %400, %402 : vector<8x128xf32>
    %c141_251 = arith.constant 141 : index
    %c0_252 = arith.constant 0 : index
    %404 = vector.load %arg47[%c141_251, %c0_252] : memref<200x128xf32, #tpu.memory_space<vmem>>, vector<8x128xf32>
    %405 = arith.mulf %404, %83 : vector<8x128xf32>
    %406 = arith.addf %403, %405 : vector<8x128xf32>
    %c142_253 = arith.constant 142 : index
    %c0_254 = arith.constant 0 : index
    %407 = vector.load %arg47[%c142_253, %c0_254] : memref<200x128xf32, #tpu.memory_space<vmem>>, vector<8x128xf32>
    %408 = arith.mulf %407, %86 : vector<8x128xf32>
    %409 = arith.addf %406, %408 : vector<8x128xf32>
    %c150 = arith.constant 150 : index
    %c0_255 = arith.constant 0 : index
    %410 = vector.load %arg47[%c150, %c0_255] : memref<200x128xf32, #tpu.memory_space<vmem>>, vector<8x128xf32>
    %411 = arith.mulf %410, %89 : vector<8x128xf32>
    %412 = arith.addf %409, %411 : vector<8x128xf32>
    %c151_256 = arith.constant 151 : index
    %c0_257 = arith.constant 0 : index
    %413 = vector.load %arg47[%c151_256, %c0_257] : memref<200x128xf32, #tpu.memory_space<vmem>>, vector<8x128xf32>
    %414 = arith.mulf %413, %92 : vector<8x128xf32>
    %415 = arith.addf %412, %414 : vector<8x128xf32>
    %c152 = arith.constant 152 : index
    %c0_258 = arith.constant 0 : index
    %416 = vector.load %arg47[%c152, %c0_258] : memref<200x128xf32, #tpu.memory_space<vmem>>, vector<8x128xf32>
    %417 = arith.mulf %416, %95 : vector<8x128xf32>
    %418 = arith.addf %415, %417 : vector<8x128xf32>
    %c88 = arith.constant 88 : index
    %c0_259 = arith.constant 0 : index
    %419 = vector.load %arg48[%c88, %c0_259] : memref<128x128xf32, #tpu.memory_space<vmem>>, vector<8x128xf32>
    tpu.vector_store %arg48[%c88, %c0_259], %418 {strides = array<i32>} : memref<128x128xf32, #tpu.memory_space<vmem>>, vector<8x128xf32>,
    %c140_260 = arith.constant 140 : index
    %c0_261 = arith.constant 0 : index
    %420 = vector.load %arg47[%c140_260, %c0_261] : memref<200x128xf32, #tpu.memory_space<vmem>>, vector<8x128xf32>
    %421 = arith.mulf %420, %71 : vector<8x128xf32>
    %c141_262 = arith.constant 141 : index
    %c0_263 = arith.constant 0 : index
    %422 = vector.load %arg47[%c141_262, %c0_263] : memref<200x128xf32, #tpu.memory_space<vmem>>, vector<8x128xf32>
    %423 = arith.mulf %422, %74 : vector<8x128xf32>
    %424 = arith.addf %421, %423 : vector<8x128xf32>
    %c142_264 = arith.constant 142 : index
    %c0_265 = arith.constant 0 : index
    %425 = vector.load %arg47[%c142_264, %c0_265] : memref<200x128xf32, #tpu.memory_space<vmem>>, vector<8x128xf32>
    %426 = arith.mulf %425, %77 : vector<8x128xf32>
    %427 = arith.addf %424, %426 : vector<8x128xf32>
    %c150_266 = arith.constant 150 : index
    %c0_267 = arith.constant 0 : index
    %428 = vector.load %arg47[%c150_266, %c0_267] : memref<200x128xf32, #tpu.memory_space<vmem>>, vector<8x128xf32>
    %429 = arith.mulf %428, %80 : vector<8x128xf32>
    %430 = arith.addf %427, %429 : vector<8x128xf32>
    %c151_268 = arith.constant 151 : index
    %c0_269 = arith.constant 0 : index
    %431 = vector.load %arg47[%c151_268, %c0_269] : memref<200x128xf32, #tpu.memory_space<vmem>>, vector<8x128xf32>
    %432 = arith.mulf %431, %83 : vector<8x128xf32>
    %433 = arith.addf %430, %432 : vector<8x128xf32>
    %c152_270 = arith.constant 152 : index
    %c0_271 = arith.constant 0 : index
    %434 = vector.load %arg47[%c152_270, %c0_271] : memref<200x128xf32, #tpu.memory_space<vmem>>, vector<8x128xf32>
    %435 = arith.mulf %434, %86 : vector<8x128xf32>
    %436 = arith.addf %433, %435 : vector<8x128xf32>
    %c160 = arith.constant 160 : index
    %c0_272 = arith.constant 0 : index
    %437 = vector.load %arg47[%c160, %c0_272] : memref<200x128xf32, #tpu.memory_space<vmem>>, vector<8x128xf32>
    %438 = arith.mulf %437, %89 : vector<8x128xf32>
    %439 = arith.addf %436, %438 : vector<8x128xf32>
    %c161_273 = arith.constant 161 : index
    %c0_274 = arith.constant 0 : index
    %440 = vector.load %arg47[%c161_273, %c0_274] : memref<200x128xf32, #tpu.memory_space<vmem>>, vector<8x128xf32>
    %441 = arith.mulf %440, %92 : vector<8x128xf32>
    %442 = arith.addf %439, %441 : vector<8x128xf32>
    %c162 = arith.constant 162 : index
    %c0_275 = arith.constant 0 : index
    %443 = vector.load %arg47[%c162, %c0_275] : memref<200x128xf32, #tpu.memory_space<vmem>>, vector<8x128xf32>
    %444 = arith.mulf %443, %95 : vector<8x128xf32>
    %445 = arith.addf %442, %444 : vector<8x128xf32>
    %c96 = arith.constant 96 : index
    %c0_276 = arith.constant 0 : index
    %446 = vector.load %arg48[%c96, %c0_276] : memref<128x128xf32, #tpu.memory_space<vmem>>, vector<8x128xf32>
    tpu.vector_store %arg48[%c96, %c0_276], %445 {strides = array<i32>} : memref<128x128xf32, #tpu.memory_space<vmem>>, vector<8x128xf32>,
    %c150_277 = arith.constant 150 : index
    %c0_278 = arith.constant 0 : index
    %447 = vector.load %arg47[%c150_277, %c0_278] : memref<200x128xf32, #tpu.memory_space<vmem>>, vector<8x128xf32>
    %448 = arith.mulf %447, %71 : vector<8x128xf32>
    %c151_279 = arith.constant 151 : index
    %c0_280 = arith.constant 0 : index
    %449 = vector.load %arg47[%c151_279, %c0_280] : memref<200x128xf32, #tpu.memory_space<vmem>>, vector<8x128xf32>
    %450 = arith.mulf %449, %74 : vector<8x128xf32>
    %451 = arith.addf %448, %450 : vector<8x128xf32>
    %c152_281 = arith.constant 152 : index
    %c0_282 = arith.constant 0 : index
    %452 = vector.load %arg47[%c152_281, %c0_282] : memref<200x128xf32, #tpu.memory_space<vmem>>, vector<8x128xf32>
    %453 = arith.mulf %452, %77 : vector<8x128xf32>
    %454 = arith.addf %451, %453 : vector<8x128xf32>
    %c160_283 = arith.constant 160 : index
    %c0_284 = arith.constant 0 : index
    %455 = vector.load %arg47[%c160_283, %c0_284] : memref<200x128xf32, #tpu.memory_space<vmem>>, vector<8x128xf32>
    %456 = arith.mulf %455, %80 : vector<8x128xf32>
    %457 = arith.addf %454, %456 : vector<8x128xf32>
    %c161_285 = arith.constant 161 : index
    %c0_286 = arith.constant 0 : index
    %458 = vector.load %arg47[%c161_285, %c0_286] : memref<200x128xf32, #tpu.memory_space<vmem>>, vector<8x128xf32>
    %459 = arith.mulf %458, %83 : vector<8x128xf32>
    %460 = arith.addf %457, %459 : vector<8x128xf32>
    %c162_287 = arith.constant 162 : index
    %c0_288 = arith.constant 0 : index
    %461 = vector.load %arg47[%c162_287, %c0_288] : memref<200x128xf32, #tpu.memory_space<vmem>>, vector<8x128xf32>
    %462 = arith.mulf %461, %86 : vector<8x128xf32>
    %463 = arith.addf %460, %462 : vector<8x128xf32>
    %c170 = arith.constant 170 : index
    %c0_289 = arith.constant 0 : index
    %464 = vector.load %arg47[%c170, %c0_289] : memref<200x128xf32, #tpu.memory_space<vmem>>, vector<8x128xf32>
    %465 = arith.mulf %464, %89 : vector<8x128xf32>
    %466 = arith.addf %463, %465 : vector<8x128xf32>
    %c171_290 = arith.constant 171 : index
    %c0_291 = arith.constant 0 : index
    %467 = vector.load %arg47[%c171_290, %c0_291] : memref<200x128xf32, #tpu.memory_space<vmem>>, vector<8x128xf32>
    %468 = arith.mulf %467, %92 : vector<8x128xf32>
    %469 = arith.addf %466, %468 : vector<8x128xf32>
    %c172 = arith.constant 172 : index
    %c0_292 = arith.constant 0 : index
    %470 = vector.load %arg47[%c172, %c0_292] : memref<200x128xf32, #tpu.memory_space<vmem>>, vector<8x128xf32>
    %471 = arith.mulf %470, %95 : vector<8x128xf32>
    %472 = arith.addf %469, %471 : vector<8x128xf32>
    %c104 = arith.constant 104 : index
    %c0_293 = arith.constant 0 : index
    %473 = vector.load %arg48[%c104, %c0_293] : memref<128x128xf32, #tpu.memory_space<vmem>>, vector<8x128xf32>
    tpu.vector_store %arg48[%c104, %c0_293], %472 {strides = array<i32>} : memref<128x128xf32, #tpu.memory_space<vmem>>, vector<8x128xf32>,
    %c160_294 = arith.constant 160 : index
    %c0_295 = arith.constant 0 : index
    %474 = vector.load %arg47[%c160_294, %c0_295] : memref<200x128xf32, #tpu.memory_space<vmem>>, vector<8x128xf32>
    %475 = arith.mulf %474, %71 : vector<8x128xf32>
    %c161_296 = arith.constant 161 : index
    %c0_297 = arith.constant 0 : index
    %476 = vector.load %arg47[%c161_296, %c0_297] : memref<200x128xf32, #tpu.memory_space<vmem>>, vector<8x128xf32>
    %477 = arith.mulf %476, %74 : vector<8x128xf32>
    %478 = arith.addf %475, %477 : vector<8x128xf32>
    %c162_298 = arith.constant 162 : index
    %c0_299 = arith.constant 0 : index
    %479 = vector.load %arg47[%c162_298, %c0_299] : memref<200x128xf32, #tpu.memory_space<vmem>>, vector<8x128xf32>
    %480 = arith.mulf %479, %77 : vector<8x128xf32>
    %481 = arith.addf %478, %480 : vector<8x128xf32>
    %c170_300 = arith.constant 170 : index
    %c0_301 = arith.constant 0 : index
    %482 = vector.load %arg47[%c170_300, %c0_301] : memref<200x128xf32, #tpu.memory_space<vmem>>, vector<8x128xf32>
    %483 = arith.mulf %482, %80 : vector<8x128xf32>
    %484 = arith.addf %481, %483 : vector<8x128xf32>
    %c171_302 = arith.constant 171 : index
    %c0_303 = arith.constant 0 : index
    %485 = vector.load %arg47[%c171_302, %c0_303] : memref<200x128xf32, #tpu.memory_space<vmem>>, vector<8x128xf32>
    %486 = arith.mulf %485, %83 : vector<8x128xf32>
    %487 = arith.addf %484, %486 : vector<8x128xf32>
    %c172_304 = arith.constant 172 : index
    %c0_305 = arith.constant 0 : index
    %488 = vector.load %arg47[%c172_304, %c0_305] : memref<200x128xf32, #tpu.memory_space<vmem>>, vector<8x128xf32>
    %489 = arith.mulf %488, %86 : vector<8x128xf32>
    %490 = arith.addf %487, %489 : vector<8x128xf32>
    %c180 = arith.constant 180 : index
    %c0_306 = arith.constant 0 : index
    %491 = vector.load %arg47[%c180, %c0_306] : memref<200x128xf32, #tpu.memory_space<vmem>>, vector<8x128xf32>
    %492 = arith.mulf %491, %89 : vector<8x128xf32>
    %493 = arith.addf %490, %492 : vector<8x128xf32>
    %c181_307 = arith.constant 181 : index
    %c0_308 = arith.constant 0 : index
    %494 = vector.load %arg47[%c181_307, %c0_308] : memref<200x128xf32, #tpu.memory_space<vmem>>, vector<8x128xf32>
    %495 = arith.mulf %494, %92 : vector<8x128xf32>
    %496 = arith.addf %493, %495 : vector<8x128xf32>
    %c182 = arith.constant 182 : index
    %c0_309 = arith.constant 0 : index
    %497 = vector.load %arg47[%c182, %c0_309] : memref<200x128xf32, #tpu.memory_space<vmem>>, vector<8x128xf32>
    %498 = arith.mulf %497, %95 : vector<8x128xf32>
    %499 = arith.addf %496, %498 : vector<8x128xf32>
    %c112_310 = arith.constant 112 : index
    %c0_311 = arith.constant 0 : index
    %500 = vector.load %arg48[%c112_310, %c0_311] : memref<128x128xf32, #tpu.memory_space<vmem>>, vector<8x128xf32>
    tpu.vector_store %arg48[%c112_310, %c0_311], %499 {strides = array<i32>} : memref<128x128xf32, #tpu.memory_space<vmem>>, vector<8x128xf32>,
    %c170_312 = arith.constant 170 : index
    %c0_313 = arith.constant 0 : index
    %501 = vector.load %arg47[%c170_312, %c0_313] : memref<200x128xf32, #tpu.memory_space<vmem>>, vector<8x128xf32>
    %502 = arith.mulf %501, %71 : vector<8x128xf32>
    %c171_314 = arith.constant 171 : index
    %c0_315 = arith.constant 0 : index
    %503 = vector.load %arg47[%c171_314, %c0_315] : memref<200x128xf32, #tpu.memory_space<vmem>>, vector<8x128xf32>
    %504 = arith.mulf %503, %74 : vector<8x128xf32>
    %505 = arith.addf %502, %504 : vector<8x128xf32>
    %c172_316 = arith.constant 172 : index
    %c0_317 = arith.constant 0 : index
    %506 = vector.load %arg47[%c172_316, %c0_317] : memref<200x128xf32, #tpu.memory_space<vmem>>, vector<8x128xf32>
    %507 = arith.mulf %506, %77 : vector<8x128xf32>
    %508 = arith.addf %505, %507 : vector<8x128xf32>
    %c180_318 = arith.constant 180 : index
    %c0_319 = arith.constant 0 : index
    %509 = vector.load %arg47[%c180_318, %c0_319] : memref<200x128xf32, #tpu.memory_space<vmem>>, vector<8x128xf32>
    %510 = arith.mulf %509, %80 : vector<8x128xf32>
    %511 = arith.addf %508, %510 : vector<8x128xf32>
    %c181_320 = arith.constant 181 : index
    %c0_321 = arith.constant 0 : index
    %512 = vector.load %arg47[%c181_320, %c0_321] : memref<200x128xf32, #tpu.memory_space<vmem>>, vector<8x128xf32>
    %513 = arith.mulf %512, %83 : vector<8x128xf32>
    %514 = arith.addf %511, %513 : vector<8x128xf32>
    %c182_322 = arith.constant 182 : index
    %c0_323 = arith.constant 0 : index
    %515 = vector.load %arg47[%c182_322, %c0_323] : memref<200x128xf32, #tpu.memory_space<vmem>>, vector<8x128xf32>
    %516 = arith.mulf %515, %86 : vector<8x128xf32>
    %517 = arith.addf %514, %516 : vector<8x128xf32>
    %c190 = arith.constant 190 : index
    %c0_324 = arith.constant 0 : index
    %518 = vector.load %arg47[%c190, %c0_324] : memref<200x128xf32, #tpu.memory_space<vmem>>, vector<8x128xf32>
    %519 = arith.mulf %518, %89 : vector<8x128xf32>
    %520 = arith.addf %517, %519 : vector<8x128xf32>
    %c191 = arith.constant 191 : index
    %c0_325 = arith.constant 0 : index
    %521 = vector.load %arg47[%c191, %c0_325] : memref<200x128xf32, #tpu.memory_space<vmem>>, vector<8x128xf32>
    %522 = arith.mulf %521, %92 : vector<8x128xf32>
    %523 = arith.addf %520, %522 : vector<8x128xf32>
    %c192 = arith.constant 192 : index
    %c0_326 = arith.constant 0 : index
    %524 = vector.load %arg47[%c192, %c0_326] : memref<200x128xf32, #tpu.memory_space<vmem>>, vector<8x128xf32>
    %525 = arith.mulf %524, %95 : vector<8x128xf32>
    %526 = arith.addf %523, %525 : vector<8x128xf32>
    %c120_327 = arith.constant 120 : index
    %c0_328 = arith.constant 0 : index
    %527 = vector.load %arg48[%c120_327, %c0_328] : memref<128x128xf32, #tpu.memory_space<vmem>>, vector<8x128xf32>
    tpu.vector_store %arg48[%c120_327, %c0_328], %526 {strides = array<i32>} : memref<128x128xf32, #tpu.memory_space<vmem>>, vector<8x128xf32>,
    %c0_329 = arith.constant 0 : index
    %c0_330 = arith.constant 0 : index
    %528 = vector.load %arg48[%c0_329, %c0_330] : memref<128x128xf32, #tpu.memory_space<vmem>>, vector<128x128xf32>
    %c0_331 = arith.constant 0 : index
    %c0_332 = arith.constant 0 : index
    %529 = vector.load %arg6[%c0_331, %c0_332] : memref<1x128xf32, #tpu.memory_space<vmem>>, vector<1x128xf32>
    %530 = vector.broadcast %529 : vector<1x128xf32> to vector<128x128xf32>
    %531 = arith.mulf %528, %530 : vector<128x128xf32>
    %c0_333 = arith.constant 0 : index
    %c0_334 = arith.constant 0 : index
    %532 = vector.load %arg7[%c0_333, %c0_334] : memref<1x128xf32, #tpu.memory_space<vmem>>, vector<1x128xf32>
    %533 = vector.broadcast %532 : vector<1x128xf32> to vector<128x128xf32>
    %534 = arith.addf %531, %533 : vector<128x128xf32>
    %cst_335 = arith.constant 0.000000e+00 : f32
    %535 = vector.broadcast %cst_335 : f32 to vector<128x128xf32>
    %536 = arith.subf %535, %534 : vector<128x128xf32>
    %537 = math.exp %536 : vector<128x128xf32>
    %cst_336 = arith.constant 1.000000e+00 : f32
    %538 = vector.broadcast %cst_336 : f32 to vector<128x128xf32>
    %539 = arith.addf %538, %537 : vector<128x128xf32>
    %540 = tpu.reciprocal %539 {approx = true} : vector<128x128xf32> -> vector<128x128xf32>
    %541 = arith.mulf %534, %540 : vector<128x128xf32>
    %542 = vector.extract_strided_slice %541 {offsets = [0, 0], sizes = [64, 128], strides = [1, 1]} : vector<128x128xf32> to vector<64x128xf32>
    %cst_337 = arith.constant dense<0.000000e+00> : vector<128xf32>
    %543 = vector.multi_reduction <add>, %542, %cst_337 [0] : vector<64x128xf32> to vector<128xf32>
    %544 = vector.shape_cast %543 : vector<128xf32> to vector<1x128xf32>
    %cst_338 = arith.constant 6.400000e+01 : f32
    %545 = vector.broadcast %cst_338 : f32 to vector<1x128xf32>
    %546 = arith.divf %544, %545 : vector<1x128xf32>
    %547 = vector.extract_strided_slice %541 {offsets = [64, 0], sizes = [64, 128], strides = [1, 1]} : vector<128x128xf32> to vector<64x128xf32>
    %cst_339 = arith.constant dense<0.000000e+00> : vector<128xf32>
    %548 = vector.multi_reduction <add>, %547, %cst_339 [0] : vector<64x128xf32> to vector<128xf32>
    %549 = vector.shape_cast %548 : vector<128xf32> to vector<1x128xf32>
    %cst_340 = arith.constant 6.400000e+01 : f32
    %550 = vector.broadcast %cst_340 : f32 to vector<1x128xf32>
    %551 = arith.divf %549, %550 : vector<1x128xf32>
    %552 = tpu.concatenate %546, %551 in 0 : vector<1x128xf32>, vector<1x128xf32> -> vector<2x128xf32>
    %553 = arith.truncf %552 : vector<2x128xf32> to vector<2x128xbf16>
    %c0_341 = arith.constant 0 : index
    %c0_342 = arith.constant 0 : index
    %554 = vector.load %arg8[%c0_341, %c0_342] : memref<128x128xbf16, #tpu.memory_space<vmem>>, vector<128x128xbf16>
    %cst_343 = arith.constant dense<0.000000e+00> : vector<2x128xf32>
    %555 = tpu.matmul %553, %554, %cst_343 {dimension_numbers = #tpu.dot_dimension_numbers<[1], [0], [0], [1], [0, 0, 1, 1], [], []>} : vector<2x128xbf16>, vector<128x128xbf16>, vector<2x128xf32> -> vector<2x128xf32>
    %c0_344 = arith.constant 0 : index
    %c0_345 = arith.constant 0 : index
    %556 = vector.load %arg9[%c0_344, %c0_345] : memref<1x128xf32, #tpu.memory_space<vmem>>, vector<1x128xf32>
    %557 = vector.broadcast %556 : vector<1x128xf32> to vector<2x128xf32>
    %558 = arith.addf %555, %557 : vector<2x128xf32>
    %cst_346 = arith.constant 0.000000e+00 : f32
    %559 = vector.broadcast %cst_346 : f32 to vector<2x128xf32>
    %560 = arith.subf %559, %558 : vector<2x128xf32>
    %561 = math.exp %560 : vector<2x128xf32>
    %cst_347 = arith.constant 1.000000e+00 : f32
    %562 = vector.broadcast %cst_347 : f32 to vector<2x128xf32>
    %563 = arith.addf %562, %561 : vector<2x128xf32>
    %564 = tpu.reciprocal %563 {approx = true} : vector<2x128xf32> -> vector<2x128xf32>
    %565 = arith.mulf %558, %564 : vector<2x128xf32>
    %566 = arith.truncf %565 : vector<2x128xf32> to vector<2x128xbf16>
    %c0_348 = arith.constant 0 : index
    %c0_349 = arith.constant 0 : index
    %567 = vector.load %arg10[%c0_348, %c0_349] : memref<128x128xbf16, #tpu.memory_space<vmem>>, vector<128x128xbf16>
    %cst_350 = arith.constant dense<0.000000e+00> : vector<2x128xf32>
    %568 = tpu.matmul %566, %567, %cst_350 {dimension_numbers = #tpu.dot_dimension_numbers<[1], [0], [0], [1], [0, 0, 1, 1], [], []>} : vector<2x128xbf16>, vector<128x128xbf16>, vector<2x128xf32> -> vector<2x128xf32>
    %c0_351 = arith.constant 0 : index
    %c0_352 = arith.constant 0 : index
    %569 = vector.load %arg11[%c0_351, %c0_352] : memref<1x128xf32, #tpu.memory_space<vmem>>, vector<1x128xf32>
    %570 = vector.broadcast %569 : vector<1x128xf32> to vector<2x128xf32>
    %571 = arith.addf %568, %570 : vector<2x128xf32>
    %cst_353 = arith.constant 0.000000e+00 : f32
    %572 = vector.broadcast %cst_353 : f32 to vector<2x128xf32>
    %573 = arith.subf %572, %571 : vector<2x128xf32>
    %574 = math.exp %573 : vector<2x128xf32>
    %cst_354 = arith.constant 1.000000e+00 : f32
    %575 = vector.broadcast %cst_354 : f32 to vector<2x128xf32>
    %576 = arith.addf %575, %574 : vector<2x128xf32>
    %577 = tpu.reciprocal %576 {approx = true} : vector<2x128xf32> -> vector<2x128xf32>
    %578 = vector.extract_strided_slice %577 {offsets = [0, 0], sizes = [1, 128], strides = [1, 1]} : vector<2x128xf32> to vector<1x128xf32>
    %579 = vector.shape_cast %578 : vector<1x128xf32> to vector<1x128xf32>
    %580 = vector.broadcast %579 : vector<1x128xf32> to vector<64x128xf32>
    %581 = vector.extract_strided_slice %577 {offsets = [1, 0], sizes = [1, 128], strides = [1, 1]} : vector<2x128xf32> to vector<1x128xf32>
    %582 = vector.shape_cast %581 : vector<1x128xf32> to vector<1x128xf32>
    %583 = vector.broadcast %582 : vector<1x128xf32> to vector<64x128xf32>
    %584 = tpu.concatenate %580, %583 in 0 : vector<64x128xf32>, vector<64x128xf32> -> vector<128x128xf32>
    %585 = arith.mulf %541, %584 : vector<128x128xf32>
    %586 = arith.truncf %585 : vector<128x128xf32> to vector<128x128xbf16>
    %c0_355 = arith.constant 0 : index
    %c0_356 = arith.constant 0 : index
    %587 = vector.load %arg12[%c0_355, %c0_356] : memref<128x128xbf16, #tpu.memory_space<vmem>>, vector<128x128xbf16>
    %cst_357 = arith.constant dense<0.000000e+00> : vector<128x128xf32>
    %588 = tpu.matmul %586, %587, %cst_357 {dimension_numbers = #tpu.dot_dimension_numbers<[1], [0], [0], [1], [0, 0, 1, 1], [], []>} : vector<128x128xbf16>, vector<128x128xbf16>, vector<128x128xf32> -> vector<128x128xf32>
    %c0_358 = arith.constant 0 : index
    %c0_359 = arith.constant 0 : index
    %589 = vector.load %arg13[%c0_358, %c0_359] : memref<1x128xf32, #tpu.memory_space<vmem>>, vector<1x128xf32>
    %590 = vector.broadcast %589 : vector<1x128xf32> to vector<128x128xf32>
    %591 = arith.mulf %588, %590 : vector<128x128xf32>
    %c0_360 = arith.constant 0 : index
    %c0_361 = arith.constant 0 : index
    %592 = vector.load %arg14[%c0_360, %c0_361] : memref<1x128xf32, #tpu.memory_space<vmem>>, vector<1x128xf32>
    %593 = vector.broadcast %592 : vector<1x128xf32> to vector<128x128xf32>
    %594 = arith.addf %591, %593 : vector<128x128xf32>
    %595 = arith.addf %594, %15 : vector<128x128xf32>
    %596 = arith.truncf %595 : vector<128x128xf32> to vector<128x128xbf16>
    %c0_362 = arith.constant 0 : index
    %c0_363 = arith.constant 0 : index
    %597 = vector.load %arg15[%c0_362, %c0_363] : memref<128x128xbf16, #tpu.memory_space<vmem>>, vector<128x128xbf16>
    %cst_364 = arith.constant dense<0.000000e+00> : vector<128x128xf32>
    %598 = tpu.matmul %596, %597, %cst_364 {dimension_numbers = #tpu.dot_dimension_numbers<[1], [0], [0], [1], [0, 0, 1, 1], [], []>} : vector<128x128xbf16>, vector<128x128xbf16>, vector<128x128xf32> -> vector<128x128xf32>
    %c0_365 = arith.constant 0 : index
    %c0_366 = arith.constant 0 : index
    %599 = vector.load %arg16[%c0_365, %c0_366] : memref<1x128xf32, #tpu.memory_space<vmem>>, vector<1x128xf32>
    %600 = vector.broadcast %599 : vector<1x128xf32> to vector<128x128xf32>
    %601 = arith.mulf %598, %600 : vector<128x128xf32>
    %c0_367 = arith.constant 0 : index
    %c0_368 = arith.constant 0 : index
    %602 = vector.load %arg17[%c0_367, %c0_368] : memref<1x128xf32, #tpu.memory_space<vmem>>, vector<1x128xf32>
    %603 = vector.broadcast %602 : vector<1x128xf32> to vector<128x128xf32>
    %604 = arith.addf %601, %603 : vector<128x128xf32>
    %cst_369 = arith.constant 0.000000e+00 : f32
    %605 = vector.broadcast %cst_369 : f32 to vector<128x128xf32>
    %606 = arith.subf %605, %604 : vector<128x128xf32>
    %607 = math.exp %606 : vector<128x128xf32>
    %cst_370 = arith.constant 1.000000e+00 : f32
    %608 = vector.broadcast %cst_370 : f32 to vector<128x128xf32>
    %609 = arith.addf %608, %607 : vector<128x128xf32>
    %610 = tpu.reciprocal %609 {approx = true} : vector<128x128xf32> -> vector<128x128xf32>
    %611 = arith.mulf %604, %610 : vector<128x128xf32>
    %cst_371 = arith.constant 0.000000e+00 : f32
    %612 = vector.broadcast %cst_371 : f32 to vector<1x128xf32>
    %cst_372 = arith.constant 0.000000e+00 : f32
    %613 = vector.broadcast %cst_372 : f32 to vector<10x128xf32>
    %614 = vector.extract_strided_slice %611 {offsets = [0, 0], sizes = [8, 128], strides = [1, 1]} : vector<128x128xf32> to vector<8x128xf32>
    %c0_373 = arith.constant 0 : index
    %c0_374 = arith.constant 0 : index
    %615 = vector.load %arg49[%c0_373, %c0_374] : memref<162x128xf32, #tpu.memory_space<vmem>>, vector<8x128xf32>
    tpu.vector_store %arg49[%c0_373, %c0_374], %614 {strides = array<i32>} : memref<162x128xf32, #tpu.memory_space<vmem>>, vector<8x128xf32>,
    %c8_375 = arith.constant 8 : index
    %c0_376 = arith.constant 0 : index
    %616 = vector.load %arg49[%c8_375, %c0_376] : memref<162x128xf32, #tpu.memory_space<vmem>>, vector<1x128xf32>
    tpu.vector_store %arg49[%c8_375, %c0_376], %612 {strides = array<i32>} : memref<162x128xf32, #tpu.memory_space<vmem>>, vector<1x128xf32>,
    %617 = vector.extract_strided_slice %611 {offsets = [8, 0], sizes = [8, 128], strides = [1, 1]} : vector<128x128xf32> to vector<8x128xf32>
    %c9 = arith.constant 9 : index
    %c0_377 = arith.constant 0 : index
    %618 = vector.load %arg49[%c9, %c0_377] : memref<162x128xf32, #tpu.memory_space<vmem>>, vector<8x128xf32>
    tpu.vector_store %arg49[%c9, %c0_377], %617 {strides = array<i32>} : memref<162x128xf32, #tpu.memory_space<vmem>>, vector<8x128xf32>,
    %c17 = arith.constant 17 : index
    %c0_378 = arith.constant 0 : index
    %619 = vector.load %arg49[%c17, %c0_378] : memref<162x128xf32, #tpu.memory_space<vmem>>, vector<1x128xf32>
    tpu.vector_store %arg49[%c17, %c0_378], %612 {strides = array<i32>} : memref<162x128xf32, #tpu.memory_space<vmem>>, vector<1x128xf32>,
    %620 = vector.extract_strided_slice %611 {offsets = [16, 0], sizes = [8, 128], strides = [1, 1]} : vector<128x128xf32> to vector<8x128xf32>
    %c18 = arith.constant 18 : index
    %c0_379 = arith.constant 0 : index
    %621 = vector.load %arg49[%c18, %c0_379] : memref<162x128xf32, #tpu.memory_space<vmem>>, vector<8x128xf32>
    tpu.vector_store %arg49[%c18, %c0_379], %620 {strides = array<i32>} : memref<162x128xf32, #tpu.memory_space<vmem>>, vector<8x128xf32>,
    %c26 = arith.constant 26 : index
    %c0_380 = arith.constant 0 : index
    %622 = vector.load %arg49[%c26, %c0_380] : memref<162x128xf32, #tpu.memory_space<vmem>>, vector<1x128xf32>
    tpu.vector_store %arg49[%c26, %c0_380], %612 {strides = array<i32>} : memref<162x128xf32, #tpu.memory_space<vmem>>, vector<1x128xf32>,
    %623 = vector.extract_strided_slice %611 {offsets = [24, 0], sizes = [8, 128], strides = [1, 1]} : vector<128x128xf32> to vector<8x128xf32>
    %c27 = arith.constant 27 : index
    %c0_381 = arith.constant 0 : index
    %624 = vector.load %arg49[%c27, %c0_381] : memref<162x128xf32, #tpu.memory_space<vmem>>, vector<8x128xf32>
    tpu.vector_store %arg49[%c27, %c0_381], %623 {strides = array<i32>} : memref<162x128xf32, #tpu.memory_space<vmem>>, vector<8x128xf32>,
    %c35 = arith.constant 35 : index
    %c0_382 = arith.constant 0 : index
    %625 = vector.load %arg49[%c35, %c0_382] : memref<162x128xf32, #tpu.memory_space<vmem>>, vector<1x128xf32>
    tpu.vector_store %arg49[%c35, %c0_382], %612 {strides = array<i32>} : memref<162x128xf32, #tpu.memory_space<vmem>>, vector<1x128xf32>,
    %626 = vector.extract_strided_slice %611 {offsets = [32, 0], sizes = [8, 128], strides = [1, 1]} : vector<128x128xf32> to vector<8x128xf32>
    %c36 = arith.constant 36 : index
    %c0_383 = arith.constant 0 : index
    %627 = vector.load %arg49[%c36, %c0_383] : memref<162x128xf32, #tpu.memory_space<vmem>>, vector<8x128xf32>
    tpu.vector_store %arg49[%c36, %c0_383], %626 {strides = array<i32>} : memref<162x128xf32, #tpu.memory_space<vmem>>, vector<8x128xf32>,
    %c44 = arith.constant 44 : index
    %c0_384 = arith.constant 0 : index
    %628 = vector.load %arg49[%c44, %c0_384] : memref<162x128xf32, #tpu.memory_space<vmem>>, vector<1x128xf32>
    tpu.vector_store %arg49[%c44, %c0_384], %612 {strides = array<i32>} : memref<162x128xf32, #tpu.memory_space<vmem>>, vector<1x128xf32>,
    %629 = vector.extract_strided_slice %611 {offsets = [40, 0], sizes = [8, 128], strides = [1, 1]} : vector<128x128xf32> to vector<8x128xf32>
    %c45 = arith.constant 45 : index
    %c0_385 = arith.constant 0 : index
    %630 = vector.load %arg49[%c45, %c0_385] : memref<162x128xf32, #tpu.memory_space<vmem>>, vector<8x128xf32>
    tpu.vector_store %arg49[%c45, %c0_385], %629 {strides = array<i32>} : memref<162x128xf32, #tpu.memory_space<vmem>>, vector<8x128xf32>,
    %c53 = arith.constant 53 : index
    %c0_386 = arith.constant 0 : index
    %631 = vector.load %arg49[%c53, %c0_386] : memref<162x128xf32, #tpu.memory_space<vmem>>, vector<1x128xf32>
    tpu.vector_store %arg49[%c53, %c0_386], %612 {strides = array<i32>} : memref<162x128xf32, #tpu.memory_space<vmem>>, vector<1x128xf32>,
    %632 = vector.extract_strided_slice %611 {offsets = [48, 0], sizes = [8, 128], strides = [1, 1]} : vector<128x128xf32> to vector<8x128xf32>
    %c54 = arith.constant 54 : index
    %c0_387 = arith.constant 0 : index
    %633 = vector.load %arg49[%c54, %c0_387] : memref<162x128xf32, #tpu.memory_space<vmem>>, vector<8x128xf32>
    tpu.vector_store %arg49[%c54, %c0_387], %632 {strides = array<i32>} : memref<162x128xf32, #tpu.memory_space<vmem>>, vector<8x128xf32>,
    %c62_388 = arith.constant 62 : index
    %c0_389 = arith.constant 0 : index
    %634 = vector.load %arg49[%c62_388, %c0_389] : memref<162x128xf32, #tpu.memory_space<vmem>>, vector<1x128xf32>
    tpu.vector_store %arg49[%c62_388, %c0_389], %612 {strides = array<i32>} : memref<162x128xf32, #tpu.memory_space<vmem>>, vector<1x128xf32>,
    %635 = vector.extract_strided_slice %611 {offsets = [56, 0], sizes = [8, 128], strides = [1, 1]} : vector<128x128xf32> to vector<8x128xf32>
    %c63 = arith.constant 63 : index
    %c0_390 = arith.constant 0 : index
    %636 = vector.load %arg49[%c63, %c0_390] : memref<162x128xf32, #tpu.memory_space<vmem>>, vector<8x128xf32>
    tpu.vector_store %arg49[%c63, %c0_390], %635 {strides = array<i32>} : memref<162x128xf32, #tpu.memory_space<vmem>>, vector<8x128xf32>,
    %c71_391 = arith.constant 71 : index
    %c0_392 = arith.constant 0 : index
    %637 = vector.load %arg49[%c71_391, %c0_392] : memref<162x128xf32, #tpu.memory_space<vmem>>, vector<10x128xf32>
    tpu.vector_store %arg49[%c71_391, %c0_392], %613 {strides = array<i32>} : memref<162x128xf32, #tpu.memory_space<vmem>>, vector<10x128xf32>,
    %638 = vector.extract_strided_slice %611 {offsets = [64, 0], sizes = [8, 128], strides = [1, 1]} : vector<128x128xf32> to vector<8x128xf32>
    %c81_393 = arith.constant 81 : index
    %c0_394 = arith.constant 0 : index
    %639 = vector.load %arg49[%c81_393, %c0_394] : memref<162x128xf32, #tpu.memory_space<vmem>>, vector<8x128xf32>
    tpu.vector_store %arg49[%c81_393, %c0_394], %638 {strides = array<i32>} : memref<162x128xf32, #tpu.memory_space<vmem>>, vector<8x128xf32>,
    %c89_395 = arith.constant 89 : index
    %c0_396 = arith.constant 0 : index
    %640 = vector.load %arg49[%c89_395, %c0_396] : memref<162x128xf32, #tpu.memory_space<vmem>>, vector<1x128xf32>
    tpu.vector_store %arg49[%c89_395, %c0_396], %612 {strides = array<i32>} : memref<162x128xf32, #tpu.memory_space<vmem>>, vector<1x128xf32>,
    %641 = vector.extract_strided_slice %611 {offsets = [72, 0], sizes = [8, 128], strides = [1, 1]} : vector<128x128xf32> to vector<8x128xf32>
    %c90_397 = arith.constant 90 : index
    %c0_398 = arith.constant 0 : index
    %642 = vector.load %arg49[%c90_397, %c0_398] : memref<162x128xf32, #tpu.memory_space<vmem>>, vector<8x128xf32>
    tpu.vector_store %arg49[%c90_397, %c0_398], %641 {strides = array<i32>} : memref<162x128xf32, #tpu.memory_space<vmem>>, vector<8x128xf32>,
    %c98 = arith.constant 98 : index
    %c0_399 = arith.constant 0 : index
    %643 = vector.load %arg49[%c98, %c0_399] : memref<162x128xf32, #tpu.memory_space<vmem>>, vector<1x128xf32>
    tpu.vector_store %arg49[%c98, %c0_399], %612 {strides = array<i32>} : memref<162x128xf32, #tpu.memory_space<vmem>>, vector<1x128xf32>,
    %644 = vector.extract_strided_slice %611 {offsets = [80, 0], sizes = [8, 128], strides = [1, 1]} : vector<128x128xf32> to vector<8x128xf32>
    %c99 = arith.constant 99 : index
    %c0_400 = arith.constant 0 : index
    %645 = vector.load %arg49[%c99, %c0_400] : memref<162x128xf32, #tpu.memory_space<vmem>>, vector<8x128xf32>
    tpu.vector_store %arg49[%c99, %c0_400], %644 {strides = array<i32>} : memref<162x128xf32, #tpu.memory_space<vmem>>, vector<8x128xf32>,
    %c107 = arith.constant 107 : index
    %c0_401 = arith.constant 0 : index
    %646 = vector.load %arg49[%c107, %c0_401] : memref<162x128xf32, #tpu.memory_space<vmem>>, vector<1x128xf32>
    tpu.vector_store %arg49[%c107, %c0_401], %612 {strides = array<i32>} : memref<162x128xf32, #tpu.memory_space<vmem>>, vector<1x128xf32>,
    %647 = vector.extract_strided_slice %611 {offsets = [88, 0], sizes = [8, 128], strides = [1, 1]} : vector<128x128xf32> to vector<8x128xf32>
    %c108 = arith.constant 108 : index
    %c0_402 = arith.constant 0 : index
    %648 = vector.load %arg49[%c108, %c0_402] : memref<162x128xf32, #tpu.memory_space<vmem>>, vector<8x128xf32>
    tpu.vector_store %arg49[%c108, %c0_402], %647 {strides = array<i32>} : memref<162x128xf32, #tpu.memory_space<vmem>>, vector<8x128xf32>,
    %c116 = arith.constant 116 : index
    %c0_403 = arith.constant 0 : index
    %649 = vector.load %arg49[%c116, %c0_403] : memref<162x128xf32, #tpu.memory_space<vmem>>, vector<1x128xf32>
    tpu.vector_store %arg49[%c116, %c0_403], %612 {strides = array<i32>} : memref<162x128xf32, #tpu.memory_space<vmem>>, vector<1x128xf32>,
    %650 = vector.extract_strided_slice %611 {offsets = [96, 0], sizes = [8, 128], strides = [1, 1]} : vector<128x128xf32> to vector<8x128xf32>
    %c117 = arith.constant 117 : index
    %c0_404 = arith.constant 0 : index
    %651 = vector.load %arg49[%c117, %c0_404] : memref<162x128xf32, #tpu.memory_space<vmem>>, vector<8x128xf32>
    tpu.vector_store %arg49[%c117, %c0_404], %650 {strides = array<i32>} : memref<162x128xf32, #tpu.memory_space<vmem>>, vector<8x128xf32>,
    %c125 = arith.constant 125 : index
    %c0_405 = arith.constant 0 : index
    %652 = vector.load %arg49[%c125, %c0_405] : memref<162x128xf32, #tpu.memory_space<vmem>>, vector<1x128xf32>
    tpu.vector_store %arg49[%c125, %c0_405], %612 {strides = array<i32>} : memref<162x128xf32, #tpu.memory_space<vmem>>, vector<1x128xf32>,
    %653 = vector.extract_strided_slice %611 {offsets = [104, 0], sizes = [8, 128], strides = [1, 1]} : vector<128x128xf32> to vector<8x128xf32>
    %c126 = arith.constant 126 : index
    %c0_406 = arith.constant 0 : index
    %654 = vector.load %arg49[%c126, %c0_406] : memref<162x128xf32, #tpu.memory_space<vmem>>, vector<8x128xf32>
    tpu.vector_store %arg49[%c126, %c0_406], %653 {strides = array<i32>} : memref<162x128xf32, #tpu.memory_space<vmem>>, vector<8x128xf32>,
    %c134 = arith.constant 134 : index
    %c0_407 = arith.constant 0 : index
    %655 = vector.load %arg49[%c134, %c0_407] : memref<162x128xf32, #tpu.memory_space<vmem>>, vector<1x128xf32>
    tpu.vector_store %arg49[%c134, %c0_407], %612 {strides = array<i32>} : memref<162x128xf32, #tpu.memory_space<vmem>>, vector<1x128xf32>,
    %656 = vector.extract_strided_slice %611 {offsets = [112, 0], sizes = [8, 128], strides = [1, 1]} : vector<128x128xf32> to vector<8x128xf32>
    %c135 = arith.constant 135 : index
    %c0_408 = arith.constant 0 : index
    %657 = vector.load %arg49[%c135, %c0_408] : memref<162x128xf32, #tpu.memory_space<vmem>>, vector<8x128xf32>
    tpu.vector_store %arg49[%c135, %c0_408], %656 {strides = array<i32>} : memref<162x128xf32, #tpu.memory_space<vmem>>, vector<8x128xf32>,
    %c143 = arith.constant 143 : index
    %c0_409 = arith.constant 0 : index
    %658 = vector.load %arg49[%c143, %c0_409] : memref<162x128xf32, #tpu.memory_space<vmem>>, vector<1x128xf32>
    tpu.vector_store %arg49[%c143, %c0_409], %612 {strides = array<i32>} : memref<162x128xf32, #tpu.memory_space<vmem>>, vector<1x128xf32>,
    %659 = vector.extract_strided_slice %611 {offsets = [120, 0], sizes = [8, 128], strides = [1, 1]} : vector<128x128xf32> to vector<8x128xf32>
    %c144 = arith.constant 144 : index
    %c0_410 = arith.constant 0 : index
    %660 = vector.load %arg49[%c144, %c0_410] : memref<162x128xf32, #tpu.memory_space<vmem>>, vector<8x128xf32>
    tpu.vector_store %arg49[%c144, %c0_410], %659 {strides = array<i32>} : memref<162x128xf32, #tpu.memory_space<vmem>>, vector<8x128xf32>,
    %c152_411 = arith.constant 152 : index
    %c0_412 = arith.constant 0 : index
    %661 = vector.load %arg49[%c152_411, %c0_412] : memref<162x128xf32, #tpu.memory_space<vmem>>, vector<10x128xf32>
    tpu.vector_store %arg49[%c152_411, %c0_412], %613 {strides = array<i32>} : memref<162x128xf32, #tpu.memory_space<vmem>>, vector<10x128xf32>,
    %c0_413 = arith.constant 0 : index
    %c0_414 = arith.constant 0 : index
    %662 = vector.load %arg18[%c0_413, %c0_414] : memref<9x128xf32, #tpu.memory_space<vmem>>, vector<1x128xf32>
    %663 = vector.shape_cast %662 : vector<1x128xf32> to vector<1x128xf32>
    %664 = vector.broadcast %663 : vector<1x128xf32> to vector<4x128xf32>
    %c1_415 = arith.constant 1 : index
    %c0_416 = arith.constant 0 : index
    %665 = vector.load %arg18[%c1_415, %c0_416] : memref<9x128xf32, #tpu.memory_space<vmem>>, vector<1x128xf32>
    %666 = vector.shape_cast %665 : vector<1x128xf32> to vector<1x128xf32>
    %667 = vector.broadcast %666 : vector<1x128xf32> to vector<4x128xf32>
    %c2_417 = arith.constant 2 : index
    %c0_418 = arith.constant 0 : index
    %668 = vector.load %arg18[%c2_417, %c0_418] : memref<9x128xf32, #tpu.memory_space<vmem>>, vector<1x128xf32>
    %669 = vector.shape_cast %668 : vector<1x128xf32> to vector<1x128xf32>
    %670 = vector.broadcast %669 : vector<1x128xf32> to vector<4x128xf32>
    %c3_419 = arith.constant 3 : index
    %c0_420 = arith.constant 0 : index
    %671 = vector.load %arg18[%c3_419, %c0_420] : memref<9x128xf32, #tpu.memory_space<vmem>>, vector<1x128xf32>
    %672 = vector.shape_cast %671 : vector<1x128xf32> to vector<1x128xf32>
    %673 = vector.broadcast %672 : vector<1x128xf32> to vector<4x128xf32>
    %c4_421 = arith.constant 4 : index
    %c0_422 = arith.constant 0 : index
    %674 = vector.load %arg18[%c4_421, %c0_422] : memref<9x128xf32, #tpu.memory_space<vmem>>, vector<1x128xf32>
    %675 = vector.shape_cast %674 : vector<1x128xf32> to vector<1x128xf32>
    %676 = vector.broadcast %675 : vector<1x128xf32> to vector<4x128xf32>
    %c5_423 = arith.constant 5 : index
    %c0_424 = arith.constant 0 : index
    %677 = vector.load %arg18[%c5_423, %c0_424] : memref<9x128xf32, #tpu.memory_space<vmem>>, vector<1x128xf32>
    %678 = vector.shape_cast %677 : vector<1x128xf32> to vector<1x128xf32>
    %679 = vector.broadcast %678 : vector<1x128xf32> to vector<4x128xf32>
    %c6_425 = arith.constant 6 : index
    %c0_426 = arith.constant 0 : index
    %680 = vector.load %arg18[%c6_425, %c0_426] : memref<9x128xf32, #tpu.memory_space<vmem>>, vector<1x128xf32>
    %681 = vector.shape_cast %680 : vector<1x128xf32> to vector<1x128xf32>
    %682 = vector.broadcast %681 : vector<1x128xf32> to vector<4x128xf32>
    %c7_427 = arith.constant 7 : index
    %c0_428 = arith.constant 0 : index
    %683 = vector.load %arg18[%c7_427, %c0_428] : memref<9x128xf32, #tpu.memory_space<vmem>>, vector<1x128xf32>
    %684 = vector.shape_cast %683 : vector<1x128xf32> to vector<1x128xf32>
    %685 = vector.broadcast %684 : vector<1x128xf32> to vector<4x128xf32>
    %c8_429 = arith.constant 8 : index
    %c0_430 = arith.constant 0 : index
    %686 = vector.load %arg18[%c8_429, %c0_430] : memref<9x128xf32, #tpu.memory_space<vmem>>, vector<1x128xf32>
    %687 = vector.shape_cast %686 : vector<1x128xf32> to vector<1x128xf32>
    %688 = vector.broadcast %687 : vector<1x128xf32> to vector<4x128xf32>
    %c0_431 = arith.constant 0 : index
    %c0_432 = arith.constant 0 : index
    %689 = tpu.strided_load %arg49[%c0_431, %c0_432] {strides = array<i32: 2, 1>} : memref<162x128xf32, #tpu.memory_space<vmem>>, vector<4x128xf32>
    %690 = arith.mulf %689, %664 : vector<4x128xf32>
    %c1_433 = arith.constant 1 : index
    %c0_434 = arith.constant 0 : index
    %691 = tpu.strided_load %arg49[%c1_433, %c0_434] {strides = array<i32: 2, 1>} : memref<162x128xf32, #tpu.memory_space<vmem>>, vector<4x128xf32>
    %692 = arith.mulf %691, %667 : vector<4x128xf32>
    %693 = arith.addf %690, %692 : vector<4x128xf32>
    %c2_435 = arith.constant 2 : index
    %c0_436 = arith.constant 0 : index
    %694 = tpu.strided_load %arg49[%c2_435, %c0_436] {strides = array<i32: 2, 1>} : memref<162x128xf32, #tpu.memory_space<vmem>>, vector<4x128xf32>
    %695 = arith.mulf %694, %670 : vector<4x128xf32>
    %696 = arith.addf %693, %695 : vector<4x128xf32>
    %c9_437 = arith.constant 9 : index
    %c0_438 = arith.constant 0 : index
    %697 = tpu.strided_load %arg49[%c9_437, %c0_438] {strides = array<i32: 2, 1>} : memref<162x128xf32, #tpu.memory_space<vmem>>, vector<4x128xf32>
    %698 = arith.mulf %697, %673 : vector<4x128xf32>
    %699 = arith.addf %696, %698 : vector<4x128xf32>
    %c10_439 = arith.constant 10 : index
    %c0_440 = arith.constant 0 : index
    %700 = tpu.strided_load %arg49[%c10_439, %c0_440] {strides = array<i32: 2, 1>} : memref<162x128xf32, #tpu.memory_space<vmem>>, vector<4x128xf32>
    %701 = arith.mulf %700, %676 : vector<4x128xf32>
    %702 = arith.addf %699, %701 : vector<4x128xf32>
    %c11_441 = arith.constant 11 : index
    %c0_442 = arith.constant 0 : index
    %703 = tpu.strided_load %arg49[%c11_441, %c0_442] {strides = array<i32: 2, 1>} : memref<162x128xf32, #tpu.memory_space<vmem>>, vector<4x128xf32>
    %704 = arith.mulf %703, %679 : vector<4x128xf32>
    %705 = arith.addf %702, %704 : vector<4x128xf32>
    %c18_443 = arith.constant 18 : index
    %c0_444 = arith.constant 0 : index
    %706 = tpu.strided_load %arg49[%c18_443, %c0_444] {strides = array<i32: 2, 1>} : memref<162x128xf32, #tpu.memory_space<vmem>>, vector<4x128xf32>
    %707 = arith.mulf %706, %682 : vector<4x128xf32>
    %708 = arith.addf %705, %707 : vector<4x128xf32>
    %c19_445 = arith.constant 19 : index
    %c0_446 = arith.constant 0 : index
    %709 = tpu.strided_load %arg49[%c19_445, %c0_446] {strides = array<i32: 2, 1>} : memref<162x128xf32, #tpu.memory_space<vmem>>, vector<4x128xf32>
    %710 = arith.mulf %709, %685 : vector<4x128xf32>
    %711 = arith.addf %708, %710 : vector<4x128xf32>
    %c20_447 = arith.constant 20 : index
    %c0_448 = arith.constant 0 : index
    %712 = tpu.strided_load %arg49[%c20_447, %c0_448] {strides = array<i32: 2, 1>} : memref<162x128xf32, #tpu.memory_space<vmem>>, vector<4x128xf32>
    %713 = arith.mulf %712, %688 : vector<4x128xf32>
    %714 = arith.addf %711, %713 : vector<4x128xf32>
    %c0_449 = arith.constant 0 : index
    %c0_450 = arith.constant 0 : index
    %715 = vector.load %arg50[%c0_449, %c0_450] : memref<32x128xf32, #tpu.memory_space<vmem>>, vector<4x128xf32>
    tpu.vector_store %arg50[%c0_449, %c0_450], %714 {strides = array<i32>} : memref<32x128xf32, #tpu.memory_space<vmem>>, vector<4x128xf32>,
    %c18_451 = arith.constant 18 : index
    %c0_452 = arith.constant 0 : index
    %716 = tpu.strided_load %arg49[%c18_451, %c0_452] {strides = array<i32: 2, 1>} : memref<162x128xf32, #tpu.memory_space<vmem>>, vector<4x128xf32>
    %717 = arith.mulf %716, %664 : vector<4x128xf32>
    %c19_453 = arith.constant 19 : index
    %c0_454 = arith.constant 0 : index
    %718 = tpu.strided_load %arg49[%c19_453, %c0_454] {strides = array<i32: 2, 1>} : memref<162x128xf32, #tpu.memory_space<vmem>>, vector<4x128xf32>
    %719 = arith.mulf %718, %667 : vector<4x128xf32>
    %720 = arith.addf %717, %719 : vector<4x128xf32>
    %c20_455 = arith.constant 20 : index
    %c0_456 = arith.constant 0 : index
    %721 = tpu.strided_load %arg49[%c20_455, %c0_456] {strides = array<i32: 2, 1>} : memref<162x128xf32, #tpu.memory_space<vmem>>, vector<4x128xf32>
    %722 = arith.mulf %721, %670 : vector<4x128xf32>
    %723 = arith.addf %720, %722 : vector<4x128xf32>
    %c27_457 = arith.constant 27 : index
    %c0_458 = arith.constant 0 : index
    %724 = tpu.strided_load %arg49[%c27_457, %c0_458] {strides = array<i32: 2, 1>} : memref<162x128xf32, #tpu.memory_space<vmem>>, vector<4x128xf32>
    %725 = arith.mulf %724, %673 : vector<4x128xf32>
    %726 = arith.addf %723, %725 : vector<4x128xf32>
    %c28 = arith.constant 28 : index
    %c0_459 = arith.constant 0 : index
    %727 = tpu.strided_load %arg49[%c28, %c0_459] {strides = array<i32: 2, 1>} : memref<162x128xf32, #tpu.memory_space<vmem>>, vector<4x128xf32>
    %728 = arith.mulf %727, %676 : vector<4x128xf32>
    %729 = arith.addf %726, %728 : vector<4x128xf32>
    %c29_460 = arith.constant 29 : index
    %c0_461 = arith.constant 0 : index
    %730 = tpu.strided_load %arg49[%c29_460, %c0_461] {strides = array<i32: 2, 1>} : memref<162x128xf32, #tpu.memory_space<vmem>>, vector<4x128xf32>
    %731 = arith.mulf %730, %679 : vector<4x128xf32>
    %732 = arith.addf %729, %731 : vector<4x128xf32>
    %c36_462 = arith.constant 36 : index
    %c0_463 = arith.constant 0 : index
    %733 = tpu.strided_load %arg49[%c36_462, %c0_463] {strides = array<i32: 2, 1>} : memref<162x128xf32, #tpu.memory_space<vmem>>, vector<4x128xf32>
    %734 = arith.mulf %733, %682 : vector<4x128xf32>
    %735 = arith.addf %732, %734 : vector<4x128xf32>
    %c37 = arith.constant 37 : index
    %c0_464 = arith.constant 0 : index
    %736 = tpu.strided_load %arg49[%c37, %c0_464] {strides = array<i32: 2, 1>} : memref<162x128xf32, #tpu.memory_space<vmem>>, vector<4x128xf32>
    %737 = arith.mulf %736, %685 : vector<4x128xf32>
    %738 = arith.addf %735, %737 : vector<4x128xf32>
    %c38 = arith.constant 38 : index
    %c0_465 = arith.constant 0 : index
    %739 = tpu.strided_load %arg49[%c38, %c0_465] {strides = array<i32: 2, 1>} : memref<162x128xf32, #tpu.memory_space<vmem>>, vector<4x128xf32>
    %740 = arith.mulf %739, %688 : vector<4x128xf32>
    %741 = arith.addf %738, %740 : vector<4x128xf32>
    %c4_466 = arith.constant 4 : index
    %c0_467 = arith.constant 0 : index
    %742 = vector.load %arg50[%c4_466, %c0_467] : memref<32x128xf32, #tpu.memory_space<vmem>>, vector<4x128xf32>
    tpu.vector_store %arg50[%c4_466, %c0_467], %741 {strides = array<i32>} : memref<32x128xf32, #tpu.memory_space<vmem>>, vector<4x128xf32>,
    %c36_468 = arith.constant 36 : index
    %c0_469 = arith.constant 0 : index
    %743 = tpu.strided_load %arg49[%c36_468, %c0_469] {strides = array<i32: 2, 1>} : memref<162x128xf32, #tpu.memory_space<vmem>>, vector<4x128xf32>
    %744 = arith.mulf %743, %664 : vector<4x128xf32>
    %c37_470 = arith.constant 37 : index
    %c0_471 = arith.constant 0 : index
    %745 = tpu.strided_load %arg49[%c37_470, %c0_471] {strides = array<i32: 2, 1>} : memref<162x128xf32, #tpu.memory_space<vmem>>, vector<4x128xf32>
    %746 = arith.mulf %745, %667 : vector<4x128xf32>
    %747 = arith.addf %744, %746 : vector<4x128xf32>
    %c38_472 = arith.constant 38 : index
    %c0_473 = arith.constant 0 : index
    %748 = tpu.strided_load %arg49[%c38_472, %c0_473] {strides = array<i32: 2, 1>} : memref<162x128xf32, #tpu.memory_space<vmem>>, vector<4x128xf32>
    %749 = arith.mulf %748, %670 : vector<4x128xf32>
    %750 = arith.addf %747, %749 : vector<4x128xf32>
    %c45_474 = arith.constant 45 : index
    %c0_475 = arith.constant 0 : index
    %751 = tpu.strided_load %arg49[%c45_474, %c0_475] {strides = array<i32: 2, 1>} : memref<162x128xf32, #tpu.memory_space<vmem>>, vector<4x128xf32>
    %752 = arith.mulf %751, %673 : vector<4x128xf32>
    %753 = arith.addf %750, %752 : vector<4x128xf32>
    %c46 = arith.constant 46 : index
    %c0_476 = arith.constant 0 : index
    %754 = tpu.strided_load %arg49[%c46, %c0_476] {strides = array<i32: 2, 1>} : memref<162x128xf32, #tpu.memory_space<vmem>>, vector<4x128xf32>
    %755 = arith.mulf %754, %676 : vector<4x128xf32>
    %756 = arith.addf %753, %755 : vector<4x128xf32>
    %c47 = arith.constant 47 : index
    %c0_477 = arith.constant 0 : index
    %757 = tpu.strided_load %arg49[%c47, %c0_477] {strides = array<i32: 2, 1>} : memref<162x128xf32, #tpu.memory_space<vmem>>, vector<4x128xf32>
    %758 = arith.mulf %757, %679 : vector<4x128xf32>
    %759 = arith.addf %756, %758 : vector<4x128xf32>
    %c54_478 = arith.constant 54 : index
    %c0_479 = arith.constant 0 : index
    %760 = tpu.strided_load %arg49[%c54_478, %c0_479] {strides = array<i32: 2, 1>} : memref<162x128xf32, #tpu.memory_space<vmem>>, vector<4x128xf32>
    %761 = arith.mulf %760, %682 : vector<4x128xf32>
    %762 = arith.addf %759, %761 : vector<4x128xf32>
    %c55 = arith.constant 55 : index
    %c0_480 = arith.constant 0 : index
    %763 = tpu.strided_load %arg49[%c55, %c0_480] {strides = array<i32: 2, 1>} : memref<162x128xf32, #tpu.memory_space<vmem>>, vector<4x128xf32>
    %764 = arith.mulf %763, %685 : vector<4x128xf32>
    %765 = arith.addf %762, %764 : vector<4x128xf32>
    %c56_481 = arith.constant 56 : index
    %c0_482 = arith.constant 0 : index
    %766 = tpu.strided_load %arg49[%c56_481, %c0_482] {strides = array<i32: 2, 1>} : memref<162x128xf32, #tpu.memory_space<vmem>>, vector<4x128xf32>
    %767 = arith.mulf %766, %688 : vector<4x128xf32>
    %768 = arith.addf %765, %767 : vector<4x128xf32>
    %c8_483 = arith.constant 8 : index
    %c0_484 = arith.constant 0 : index
    %769 = vector.load %arg50[%c8_483, %c0_484] : memref<32x128xf32, #tpu.memory_space<vmem>>, vector<4x128xf32>
    tpu.vector_store %arg50[%c8_483, %c0_484], %768 {strides = array<i32>} : memref<32x128xf32, #tpu.memory_space<vmem>>, vector<4x128xf32>,
    %c54_485 = arith.constant 54 : index
    %c0_486 = arith.constant 0 : index
    %770 = tpu.strided_load %arg49[%c54_485, %c0_486] {strides = array<i32: 2, 1>} : memref<162x128xf32, #tpu.memory_space<vmem>>, vector<4x128xf32>
    %771 = arith.mulf %770, %664 : vector<4x128xf32>
    %c55_487 = arith.constant 55 : index
    %c0_488 = arith.constant 0 : index
    %772 = tpu.strided_load %arg49[%c55_487, %c0_488] {strides = array<i32: 2, 1>} : memref<162x128xf32, #tpu.memory_space<vmem>>, vector<4x128xf32>
    %773 = arith.mulf %772, %667 : vector<4x128xf32>
    %774 = arith.addf %771, %773 : vector<4x128xf32>
    %c56_489 = arith.constant 56 : index
    %c0_490 = arith.constant 0 : index
    %775 = tpu.strided_load %arg49[%c56_489, %c0_490] {strides = array<i32: 2, 1>} : memref<162x128xf32, #tpu.memory_space<vmem>>, vector<4x128xf32>
    %776 = arith.mulf %775, %670 : vector<4x128xf32>
    %777 = arith.addf %774, %776 : vector<4x128xf32>
    %c63_491 = arith.constant 63 : index
    %c0_492 = arith.constant 0 : index
    %778 = tpu.strided_load %arg49[%c63_491, %c0_492] {strides = array<i32: 2, 1>} : memref<162x128xf32, #tpu.memory_space<vmem>>, vector<4x128xf32>
    %779 = arith.mulf %778, %673 : vector<4x128xf32>
    %780 = arith.addf %777, %779 : vector<4x128xf32>
    %c64_493 = arith.constant 64 : index
    %c0_494 = arith.constant 0 : index
    %781 = tpu.strided_load %arg49[%c64_493, %c0_494] {strides = array<i32: 2, 1>} : memref<162x128xf32, #tpu.memory_space<vmem>>, vector<4x128xf32>
    %782 = arith.mulf %781, %676 : vector<4x128xf32>
    %783 = arith.addf %780, %782 : vector<4x128xf32>
    %c65 = arith.constant 65 : index
    %c0_495 = arith.constant 0 : index
    %784 = tpu.strided_load %arg49[%c65, %c0_495] {strides = array<i32: 2, 1>} : memref<162x128xf32, #tpu.memory_space<vmem>>, vector<4x128xf32>
    %785 = arith.mulf %784, %679 : vector<4x128xf32>
    %786 = arith.addf %783, %785 : vector<4x128xf32>
    %c72_496 = arith.constant 72 : index
    %c0_497 = arith.constant 0 : index
    %787 = tpu.strided_load %arg49[%c72_496, %c0_497] {strides = array<i32: 2, 1>} : memref<162x128xf32, #tpu.memory_space<vmem>>, vector<4x128xf32>
    %788 = arith.mulf %787, %682 : vector<4x128xf32>
    %789 = arith.addf %786, %788 : vector<4x128xf32>
    %c73 = arith.constant 73 : index
    %c0_498 = arith.constant 0 : index
    %790 = tpu.strided_load %arg49[%c73, %c0_498] {strides = array<i32: 2, 1>} : memref<162x128xf32, #tpu.memory_space<vmem>>, vector<4x128xf32>
    %791 = arith.mulf %790, %685 : vector<4x128xf32>
    %792 = arith.addf %789, %791 : vector<4x128xf32>
    %c74 = arith.constant 74 : index
    %c0_499 = arith.constant 0 : index
    %793 = tpu.strided_load %arg49[%c74, %c0_499] {strides = array<i32: 2, 1>} : memref<162x128xf32, #tpu.memory_space<vmem>>, vector<4x128xf32>
    %794 = arith.mulf %793, %688 : vector<4x128xf32>
    %795 = arith.addf %792, %794 : vector<4x128xf32>
    %c12_500 = arith.constant 12 : index
    %c0_501 = arith.constant 0 : index
    %796 = vector.load %arg50[%c12_500, %c0_501] : memref<32x128xf32, #tpu.memory_space<vmem>>, vector<4x128xf32>
    tpu.vector_store %arg50[%c12_500, %c0_501], %795 {strides = array<i32>} : memref<32x128xf32, #tpu.memory_space<vmem>>, vector<4x128xf32>,
    %c81_502 = arith.constant 81 : index
    %c0_503 = arith.constant 0 : index
    %797 = tpu.strided_load %arg49[%c81_502, %c0_503] {strides = array<i32: 2, 1>} : memref<162x128xf32, #tpu.memory_space<vmem>>, vector<4x128xf32>
    %798 = arith.mulf %797, %664 : vector<4x128xf32>
    %c82_504 = arith.constant 82 : index
    %c0_505 = arith.constant 0 : index
    %799 = tpu.strided_load %arg49[%c82_504, %c0_505] {strides = array<i32: 2, 1>} : memref<162x128xf32, #tpu.memory_space<vmem>>, vector<4x128xf32>
    %800 = arith.mulf %799, %667 : vector<4x128xf32>
    %801 = arith.addf %798, %800 : vector<4x128xf32>
    %c83 = arith.constant 83 : index
    %c0_506 = arith.constant 0 : index
    %802 = tpu.strided_load %arg49[%c83, %c0_506] {strides = array<i32: 2, 1>} : memref<162x128xf32, #tpu.memory_space<vmem>>, vector<4x128xf32>
    %803 = arith.mulf %802, %670 : vector<4x128xf32>
    %804 = arith.addf %801, %803 : vector<4x128xf32>
    %c90_507 = arith.constant 90 : index
    %c0_508 = arith.constant 0 : index
    %805 = tpu.strided_load %arg49[%c90_507, %c0_508] {strides = array<i32: 2, 1>} : memref<162x128xf32, #tpu.memory_space<vmem>>, vector<4x128xf32>
    %806 = arith.mulf %805, %673 : vector<4x128xf32>
    %807 = arith.addf %804, %806 : vector<4x128xf32>
    %c91_509 = arith.constant 91 : index
    %c0_510 = arith.constant 0 : index
    %808 = tpu.strided_load %arg49[%c91_509, %c0_510] {strides = array<i32: 2, 1>} : memref<162x128xf32, #tpu.memory_space<vmem>>, vector<4x128xf32>
    %809 = arith.mulf %808, %676 : vector<4x128xf32>
    %810 = arith.addf %807, %809 : vector<4x128xf32>
    %c92_511 = arith.constant 92 : index
    %c0_512 = arith.constant 0 : index
    %811 = tpu.strided_load %arg49[%c92_511, %c0_512] {strides = array<i32: 2, 1>} : memref<162x128xf32, #tpu.memory_space<vmem>>, vector<4x128xf32>
    %812 = arith.mulf %811, %679 : vector<4x128xf32>
    %813 = arith.addf %810, %812 : vector<4x128xf32>
    %c99_513 = arith.constant 99 : index
    %c0_514 = arith.constant 0 : index
    %814 = tpu.strided_load %arg49[%c99_513, %c0_514] {strides = array<i32: 2, 1>} : memref<162x128xf32, #tpu.memory_space<vmem>>, vector<4x128xf32>
    %815 = arith.mulf %814, %682 : vector<4x128xf32>
    %816 = arith.addf %813, %815 : vector<4x128xf32>
    %c100_515 = arith.constant 100 : index
    %c0_516 = arith.constant 0 : index
    %817 = tpu.strided_load %arg49[%c100_515, %c0_516] {strides = array<i32: 2, 1>} : memref<162x128xf32, #tpu.memory_space<vmem>>, vector<4x128xf32>
    %818 = arith.mulf %817, %685 : vector<4x128xf32>
    %819 = arith.addf %816, %818 : vector<4x128xf32>
    %c101_517 = arith.constant 101 : index
    %c0_518 = arith.constant 0 : index
    %820 = tpu.strided_load %arg49[%c101_517, %c0_518] {strides = array<i32: 2, 1>} : memref<162x128xf32, #tpu.memory_space<vmem>>, vector<4x128xf32>
    %821 = arith.mulf %820, %688 : vector<4x128xf32>
    %822 = arith.addf %819, %821 : vector<4x128xf32>
    %c16_519 = arith.constant 16 : index
    %c0_520 = arith.constant 0 : index
    %823 = vector.load %arg50[%c16_519, %c0_520] : memref<32x128xf32, #tpu.memory_space<vmem>>, vector<4x128xf32>
    tpu.vector_store %arg50[%c16_519, %c0_520], %822 {strides = array<i32>} : memref<32x128xf32, #tpu.memory_space<vmem>>, vector<4x128xf32>,
    %c99_521 = arith.constant 99 : index
    %c0_522 = arith.constant 0 : index
    %824 = tpu.strided_load %arg49[%c99_521, %c0_522] {strides = array<i32: 2, 1>} : memref<162x128xf32, #tpu.memory_space<vmem>>, vector<4x128xf32>
    %825 = arith.mulf %824, %664 : vector<4x128xf32>
    %c100_523 = arith.constant 100 : index
    %c0_524 = arith.constant 0 : index
    %826 = tpu.strided_load %arg49[%c100_523, %c0_524] {strides = array<i32: 2, 1>} : memref<162x128xf32, #tpu.memory_space<vmem>>, vector<4x128xf32>
    %827 = arith.mulf %826, %667 : vector<4x128xf32>
    %828 = arith.addf %825, %827 : vector<4x128xf32>
    %c101_525 = arith.constant 101 : index
    %c0_526 = arith.constant 0 : index
    %829 = tpu.strided_load %arg49[%c101_525, %c0_526] {strides = array<i32: 2, 1>} : memref<162x128xf32, #tpu.memory_space<vmem>>, vector<4x128xf32>
    %830 = arith.mulf %829, %670 : vector<4x128xf32>
    %831 = arith.addf %828, %830 : vector<4x128xf32>
    %c108_527 = arith.constant 108 : index
    %c0_528 = arith.constant 0 : index
    %832 = tpu.strided_load %arg49[%c108_527, %c0_528] {strides = array<i32: 2, 1>} : memref<162x128xf32, #tpu.memory_space<vmem>>, vector<4x128xf32>
    %833 = arith.mulf %832, %673 : vector<4x128xf32>
    %834 = arith.addf %831, %833 : vector<4x128xf32>
    %c109 = arith.constant 109 : index
    %c0_529 = arith.constant 0 : index
    %835 = tpu.strided_load %arg49[%c109, %c0_529] {strides = array<i32: 2, 1>} : memref<162x128xf32, #tpu.memory_space<vmem>>, vector<4x128xf32>
    %836 = arith.mulf %835, %676 : vector<4x128xf32>
    %837 = arith.addf %834, %836 : vector<4x128xf32>
    %c110_530 = arith.constant 110 : index
    %c0_531 = arith.constant 0 : index
    %838 = tpu.strided_load %arg49[%c110_530, %c0_531] {strides = array<i32: 2, 1>} : memref<162x128xf32, #tpu.memory_space<vmem>>, vector<4x128xf32>
    %839 = arith.mulf %838, %679 : vector<4x128xf32>
    %840 = arith.addf %837, %839 : vector<4x128xf32>
    %c117_532 = arith.constant 117 : index
    %c0_533 = arith.constant 0 : index
    %841 = tpu.strided_load %arg49[%c117_532, %c0_533] {strides = array<i32: 2, 1>} : memref<162x128xf32, #tpu.memory_space<vmem>>, vector<4x128xf32>
    %842 = arith.mulf %841, %682 : vector<4x128xf32>
    %843 = arith.addf %840, %842 : vector<4x128xf32>
    %c118 = arith.constant 118 : index
    %c0_534 = arith.constant 0 : index
    %844 = tpu.strided_load %arg49[%c118, %c0_534] {strides = array<i32: 2, 1>} : memref<162x128xf32, #tpu.memory_space<vmem>>, vector<4x128xf32>
    %845 = arith.mulf %844, %685 : vector<4x128xf32>
    %846 = arith.addf %843, %845 : vector<4x128xf32>
    %c119_535 = arith.constant 119 : index
    %c0_536 = arith.constant 0 : index
    %847 = tpu.strided_load %arg49[%c119_535, %c0_536] {strides = array<i32: 2, 1>} : memref<162x128xf32, #tpu.memory_space<vmem>>, vector<4x128xf32>
    %848 = arith.mulf %847, %688 : vector<4x128xf32>
    %849 = arith.addf %846, %848 : vector<4x128xf32>
    %c20_537 = arith.constant 20 : index
    %c0_538 = arith.constant 0 : index
    %850 = vector.load %arg50[%c20_537, %c0_538] : memref<32x128xf32, #tpu.memory_space<vmem>>, vector<4x128xf32>
    tpu.vector_store %arg50[%c20_537, %c0_538], %849 {strides = array<i32>} : memref<32x128xf32, #tpu.memory_space<vmem>>, vector<4x128xf32>,
    %c117_539 = arith.constant 117 : index
    %c0_540 = arith.constant 0 : index
    %851 = tpu.strided_load %arg49[%c117_539, %c0_540] {strides = array<i32: 2, 1>} : memref<162x128xf32, #tpu.memory_space<vmem>>, vector<4x128xf32>
    %852 = arith.mulf %851, %664 : vector<4x128xf32>
    %c118_541 = arith.constant 118 : index
    %c0_542 = arith.constant 0 : index
    %853 = tpu.strided_load %arg49[%c118_541, %c0_542] {strides = array<i32: 2, 1>} : memref<162x128xf32, #tpu.memory_space<vmem>>, vector<4x128xf32>
    %854 = arith.mulf %853, %667 : vector<4x128xf32>
    %855 = arith.addf %852, %854 : vector<4x128xf32>
    %c119_543 = arith.constant 119 : index
    %c0_544 = arith.constant 0 : index
    %856 = tpu.strided_load %arg49[%c119_543, %c0_544] {strides = array<i32: 2, 1>} : memref<162x128xf32, #tpu.memory_space<vmem>>, vector<4x128xf32>
    %857 = arith.mulf %856, %670 : vector<4x128xf32>
    %858 = arith.addf %855, %857 : vector<4x128xf32>
    %c126_545 = arith.constant 126 : index
    %c0_546 = arith.constant 0 : index
    %859 = tpu.strided_load %arg49[%c126_545, %c0_546] {strides = array<i32: 2, 1>} : memref<162x128xf32, #tpu.memory_space<vmem>>, vector<4x128xf32>
    %860 = arith.mulf %859, %673 : vector<4x128xf32>
    %861 = arith.addf %858, %860 : vector<4x128xf32>
    %c127 = arith.constant 127 : index
    %c0_547 = arith.constant 0 : index
    %862 = tpu.strided_load %arg49[%c127, %c0_547] {strides = array<i32: 2, 1>} : memref<162x128xf32, #tpu.memory_space<vmem>>, vector<4x128xf32>
    %863 = arith.mulf %862, %676 : vector<4x128xf32>
    %864 = arith.addf %861, %863 : vector<4x128xf32>
    %c128 = arith.constant 128 : index
    %c0_548 = arith.constant 0 : index
    %865 = tpu.strided_load %arg49[%c128, %c0_548] {strides = array<i32: 2, 1>} : memref<162x128xf32, #tpu.memory_space<vmem>>, vector<4x128xf32>
    %866 = arith.mulf %865, %679 : vector<4x128xf32>
    %867 = arith.addf %864, %866 : vector<4x128xf32>
    %c135_549 = arith.constant 135 : index
    %c0_550 = arith.constant 0 : index
    %868 = tpu.strided_load %arg49[%c135_549, %c0_550] {strides = array<i32: 2, 1>} : memref<162x128xf32, #tpu.memory_space<vmem>>, vector<4x128xf32>
    %869 = arith.mulf %868, %682 : vector<4x128xf32>
    %870 = arith.addf %867, %869 : vector<4x128xf32>
    %c136 = arith.constant 136 : index
    %c0_551 = arith.constant 0 : index
    %871 = tpu.strided_load %arg49[%c136, %c0_551] {strides = array<i32: 2, 1>} : memref<162x128xf32, #tpu.memory_space<vmem>>, vector<4x128xf32>
    %872 = arith.mulf %871, %685 : vector<4x128xf32>
    %873 = arith.addf %870, %872 : vector<4x128xf32>
    %c137 = arith.constant 137 : index
    %c0_552 = arith.constant 0 : index
    %874 = tpu.strided_load %arg49[%c137, %c0_552] {strides = array<i32: 2, 1>} : memref<162x128xf32, #tpu.memory_space<vmem>>, vector<4x128xf32>
    %875 = arith.mulf %874, %688 : vector<4x128xf32>
    %876 = arith.addf %873, %875 : vector<4x128xf32>
    %c24_553 = arith.constant 24 : index
    %c0_554 = arith.constant 0 : index
    %877 = vector.load %arg50[%c24_553, %c0_554] : memref<32x128xf32, #tpu.memory_space<vmem>>, vector<4x128xf32>
    tpu.vector_store %arg50[%c24_553, %c0_554], %876 {strides = array<i32>} : memref<32x128xf32, #tpu.memory_space<vmem>>, vector<4x128xf32>,
    %c135_555 = arith.constant 135 : index
    %c0_556 = arith.constant 0 : index
    %878 = tpu.strided_load %arg49[%c135_555, %c0_556] {strides = array<i32: 2, 1>} : memref<162x128xf32, #tpu.memory_space<vmem>>, vector<4x128xf32>
    %879 = arith.mulf %878, %664 : vector<4x128xf32>
    %c136_557 = arith.constant 136 : index
    %c0_558 = arith.constant 0 : index
    %880 = tpu.strided_load %arg49[%c136_557, %c0_558] {strides = array<i32: 2, 1>} : memref<162x128xf32, #tpu.memory_space<vmem>>, vector<4x128xf32>
    %881 = arith.mulf %880, %667 : vector<4x128xf32>
    %882 = arith.addf %879, %881 : vector<4x128xf32>
    %c137_559 = arith.constant 137 : index
    %c0_560 = arith.constant 0 : index
    %883 = tpu.strided_load %arg49[%c137_559, %c0_560] {strides = array<i32: 2, 1>} : memref<162x128xf32, #tpu.memory_space<vmem>>, vector<4x128xf32>
    %884 = arith.mulf %883, %670 : vector<4x128xf32>
    %885 = arith.addf %882, %884 : vector<4x128xf32>
    %c144_561 = arith.constant 144 : index
    %c0_562 = arith.constant 0 : index
    %886 = tpu.strided_load %arg49[%c144_561, %c0_562] {strides = array<i32: 2, 1>} : memref<162x128xf32, #tpu.memory_space<vmem>>, vector<4x128xf32>
    %887 = arith.mulf %886, %673 : vector<4x128xf32>
    %888 = arith.addf %885, %887 : vector<4x128xf32>
    %c145 = arith.constant 145 : index
    %c0_563 = arith.constant 0 : index
    %889 = tpu.strided_load %arg49[%c145, %c0_563] {strides = array<i32: 2, 1>} : memref<162x128xf32, #tpu.memory_space<vmem>>, vector<4x128xf32>
    %890 = arith.mulf %889, %676 : vector<4x128xf32>
    %891 = arith.addf %888, %890 : vector<4x128xf32>
    %c146 = arith.constant 146 : index
    %c0_564 = arith.constant 0 : index
    %892 = tpu.strided_load %arg49[%c146, %c0_564] {strides = array<i32: 2, 1>} : memref<162x128xf32, #tpu.memory_space<vmem>>, vector<4x128xf32>
    %893 = arith.mulf %892, %679 : vector<4x128xf32>
    %894 = arith.addf %891, %893 : vector<4x128xf32>
    %c153 = arith.constant 153 : index
    %c0_565 = arith.constant 0 : index
    %895 = tpu.strided_load %arg49[%c153, %c0_565] {strides = array<i32: 2, 1>} : memref<162x128xf32, #tpu.memory_space<vmem>>, vector<4x128xf32>
    %896 = arith.mulf %895, %682 : vector<4x128xf32>
    %897 = arith.addf %894, %896 : vector<4x128xf32>
    %c154 = arith.constant 154 : index
    %c0_566 = arith.constant 0 : index
    %898 = tpu.strided_load %arg49[%c154, %c0_566] {strides = array<i32: 2, 1>} : memref<162x128xf32, #tpu.memory_space<vmem>>, vector<4x128xf32>
    %899 = arith.mulf %898, %685 : vector<4x128xf32>
    %900 = arith.addf %897, %899 : vector<4x128xf32>
    %c155 = arith.constant 155 : index
    %c0_567 = arith.constant 0 : index
    %901 = tpu.strided_load %arg49[%c155, %c0_567] {strides = array<i32: 2, 1>} : memref<162x128xf32, #tpu.memory_space<vmem>>, vector<4x128xf32>
    %902 = arith.mulf %901, %688 : vector<4x128xf32>
    %903 = arith.addf %900, %902 : vector<4x128xf32>
    %c28_568 = arith.constant 28 : index
    %c0_569 = arith.constant 0 : index
    %904 = vector.load %arg50[%c28_568, %c0_569] : memref<32x128xf32, #tpu.memory_space<vmem>>, vector<4x128xf32>
    tpu.vector_store %arg50[%c28_568, %c0_569], %903 {strides = array<i32>} : memref<32x128xf32, #tpu.memory_space<vmem>>, vector<4x128xf32>,
    %c0_570 = arith.constant 0 : index
    %c0_571 = arith.constant 0 : index
    %905 = vector.load %arg50[%c0_570, %c0_571] : memref<32x128xf32, #tpu.memory_space<vmem>>, vector<32x128xf32>
    %c0_572 = arith.constant 0 : index
    %c0_573 = arith.constant 0 : index
    %906 = vector.load %arg19[%c0_572, %c0_573] : memref<1x128xf32, #tpu.memory_space<vmem>>, vector<1x128xf32>
    %907 = vector.broadcast %906 : vector<1x128xf32> to vector<32x128xf32>
    %908 = arith.mulf %905, %907 : vector<32x128xf32>
    %c0_574 = arith.constant 0 : index
    %c0_575 = arith.constant 0 : index
    %909 = vector.load %arg20[%c0_574, %c0_575] : memref<1x128xf32, #tpu.memory_space<vmem>>, vector<1x128xf32>
    %910 = vector.broadcast %909 : vector<1x128xf32> to vector<32x128xf32>
    %911 = arith.addf %908, %910 : vector<32x128xf32>
    %cst_576 = arith.constant 0.000000e+00 : f32
    %912 = vector.broadcast %cst_576 : f32 to vector<32x128xf32>
    %913 = arith.subf %912, %911 : vector<32x128xf32>
    %914 = math.exp %913 : vector<32x128xf32>
    %cst_577 = arith.constant 1.000000e+00 : f32
    %915 = vector.broadcast %cst_577 : f32 to vector<32x128xf32>
    %916 = arith.addf %915, %914 : vector<32x128xf32>
    %917 = tpu.reciprocal %916 {approx = true} : vector<32x128xf32> -> vector<32x128xf32>
    %918 = arith.mulf %911, %917 : vector<32x128xf32>
    %919 = vector.extract_strided_slice %918 {offsets = [0, 0], sizes = [16, 128], strides = [1, 1]} : vector<32x128xf32> to vector<16x128xf32>
    %cst_578 = arith.constant dense<0.000000e+00> : vector<128xf32>
    %920 = vector.multi_reduction <add>, %919, %cst_578 [0] : vector<16x128xf32> to vector<128xf32>
    %921 = vector.shape_cast %920 : vector<128xf32> to vector<1x128xf32>
    %cst_579 = arith.constant 1.600000e+01 : f32
    %922 = vector.broadcast %cst_579 : f32 to vector<1x128xf32>
    %923 = arith.divf %921, %922 : vector<1x128xf32>
    %924 = vector.extract_strided_slice %918 {offsets = [16, 0], sizes = [16, 128], strides = [1, 1]} : vector<32x128xf32> to vector<16x128xf32>
    %cst_580 = arith.constant dense<0.000000e+00> : vector<128xf32>
    %925 = vector.multi_reduction <add>, %924, %cst_580 [0] : vector<16x128xf32> to vector<128xf32>
    %926 = vector.shape_cast %925 : vector<128xf32> to vector<1x128xf32>
    %cst_581 = arith.constant 1.600000e+01 : f32
    %927 = vector.broadcast %cst_581 : f32 to vector<1x128xf32>
    %928 = arith.divf %926, %927 : vector<1x128xf32>
    %929 = tpu.concatenate %923, %928 in 0 : vector<1x128xf32>, vector<1x128xf32> -> vector<2x128xf32>
    %930 = arith.truncf %929 : vector<2x128xf32> to vector<2x128xbf16>
    %c0_582 = arith.constant 0 : index
    %c0_583 = arith.constant 0 : index
    %931 = vector.load %arg21[%c0_582, %c0_583] : memref<128x128xbf16, #tpu.memory_space<vmem>>, vector<128x128xbf16>
    %cst_584 = arith.constant dense<0.000000e+00> : vector<2x128xf32>
    %932 = tpu.matmul %930, %931, %cst_584 {dimension_numbers = #tpu.dot_dimension_numbers<[1], [0], [0], [1], [0, 0, 1, 1], [], []>} : vector<2x128xbf16>, vector<128x128xbf16>, vector<2x128xf32> -> vector<2x128xf32>
    %c0_585 = arith.constant 0 : index
    %c0_586 = arith.constant 0 : index
    %933 = vector.load %arg22[%c0_585, %c0_586] : memref<1x128xf32, #tpu.memory_space<vmem>>, vector<1x128xf32>
    %934 = vector.broadcast %933 : vector<1x128xf32> to vector<2x128xf32>
    %935 = arith.addf %932, %934 : vector<2x128xf32>
    %cst_587 = arith.constant 0.000000e+00 : f32
    %936 = vector.broadcast %cst_587 : f32 to vector<2x128xf32>
    %937 = arith.subf %936, %935 : vector<2x128xf32>
    %938 = math.exp %937 : vector<2x128xf32>
    %cst_588 = arith.constant 1.000000e+00 : f32
    %939 = vector.broadcast %cst_588 : f32 to vector<2x128xf32>
    %940 = arith.addf %939, %938 : vector<2x128xf32>
    %941 = tpu.reciprocal %940 {approx = true} : vector<2x128xf32> -> vector<2x128xf32>
    %942 = arith.mulf %935, %941 : vector<2x128xf32>
    %943 = arith.truncf %942 : vector<2x128xf32> to vector<2x128xbf16>
    %c0_589 = arith.constant 0 : index
    %c0_590 = arith.constant 0 : index
    %944 = vector.load %arg23[%c0_589, %c0_590] : memref<128x128xbf16, #tpu.memory_space<vmem>>, vector<128x128xbf16>
    %cst_591 = arith.constant dense<0.000000e+00> : vector<2x128xf32>
    %945 = tpu.matmul %943, %944, %cst_591 {dimension_numbers = #tpu.dot_dimension_numbers<[1], [0], [0], [1], [0, 0, 1, 1], [], []>} : vector<2x128xbf16>, vector<128x128xbf16>, vector<2x128xf32> -> vector<2x128xf32>
    %c0_592 = arith.constant 0 : index
    %c0_593 = arith.constant 0 : index
    %946 = vector.load %arg24[%c0_592, %c0_593] : memref<1x128xf32, #tpu.memory_space<vmem>>, vector<1x128xf32>
    %947 = vector.broadcast %946 : vector<1x128xf32> to vector<2x128xf32>
    %948 = arith.addf %945, %947 : vector<2x128xf32>
    %cst_594 = arith.constant 0.000000e+00 : f32
    %949 = vector.broadcast %cst_594 : f32 to vector<2x128xf32>
    %950 = arith.subf %949, %948 : vector<2x128xf32>
    %951 = math.exp %950 : vector<2x128xf32>
    %cst_595 = arith.constant 1.000000e+00 : f32
    %952 = vector.broadcast %cst_595 : f32 to vector<2x128xf32>
    %953 = arith.addf %952, %951 : vector<2x128xf32>
    %954 = tpu.reciprocal %953 {approx = true} : vector<2x128xf32> -> vector<2x128xf32>
    %955 = vector.extract_strided_slice %954 {offsets = [0, 0], sizes = [1, 128], strides = [1, 1]} : vector<2x128xf32> to vector<1x128xf32>
    %956 = vector.shape_cast %955 : vector<1x128xf32> to vector<1x128xf32>
    %957 = vector.broadcast %956 : vector<1x128xf32> to vector<16x128xf32>
    %958 = vector.extract_strided_slice %954 {offsets = [1, 0], sizes = [1, 128], strides = [1, 1]} : vector<2x128xf32> to vector<1x128xf32>
    %959 = vector.shape_cast %958 : vector<1x128xf32> to vector<1x128xf32>
    %960 = vector.broadcast %959 : vector<1x128xf32> to vector<16x128xf32>
    %961 = tpu.concatenate %957, %960 in 0 : vector<16x128xf32>, vector<16x128xf32> -> vector<32x128xf32>
    %962 = arith.mulf %918, %961 : vector<32x128xf32>
    %963 = arith.truncf %962 : vector<32x128xf32> to vector<32x128xbf16>
    %c0_596 = arith.constant 0 : index
    %c0_597 = arith.constant 0 : index
    %964 = vector.load %arg25[%c0_596, %c0_597] : memref<128x128xbf16, #tpu.memory_space<vmem>>, vector<128x128xbf16>
    %cst_598 = arith.constant dense<0.000000e+00> : vector<32x128xf32>
    %965 = tpu.matmul %963, %964, %cst_598 {dimension_numbers = #tpu.dot_dimension_numbers<[1], [0], [0], [1], [0, 0, 1, 1], [], []>} : vector<32x128xbf16>, vector<128x128xbf16>, vector<32x128xf32> -> vector<32x128xf32>
    %c0_599 = arith.constant 0 : index
    %c0_600 = arith.constant 0 : index
    %966 = vector.load %arg26[%c0_599, %c0_600] : memref<1x128xf32, #tpu.memory_space<vmem>>, vector<1x128xf32>
    %967 = vector.broadcast %966 : vector<1x128xf32> to vector<32x128xf32>
    %968 = arith.mulf %965, %967 : vector<32x128xf32>
    %c0_601 = arith.constant 0 : index
    %c0_602 = arith.constant 0 : index
    %969 = vector.load %arg27[%c0_601, %c0_602] : memref<1x128xf32, #tpu.memory_space<vmem>>, vector<1x128xf32>
    %970 = vector.broadcast %969 : vector<1x128xf32> to vector<32x128xf32>
    %971 = arith.addf %968, %970 : vector<32x128xf32>
    %972 = arith.truncf %971 : vector<32x128xf32> to vector<32x128xbf16>
    %c0_603 = arith.constant 0 : index
    %c0_604 = arith.constant 0 : index
    %973 = vector.load %arg28[%c0_603, %c0_604] : memref<128x256xbf16, #tpu.memory_space<vmem>>, vector<128x256xbf16>
    %cst_605 = arith.constant dense<0.000000e+00> : vector<32x256xf32>
    %974 = tpu.matmul %972, %973, %cst_605 {dimension_numbers = #tpu.dot_dimension_numbers<[1], [0], [0], [1], [0, 0, 1, 1], [], []>} : vector<32x128xbf16>, vector<128x256xbf16>, vector<32x256xf32> -> vector<32x256xf32>
    %c0_606 = arith.constant 0 : index
    %c0_607 = arith.constant 0 : index
    %975 = vector.load %arg29[%c0_606, %c0_607] : memref<1x256xf32, #tpu.memory_space<vmem>>, vector<1x256xf32>
    %976 = vector.broadcast %975 : vector<1x256xf32> to vector<32x256xf32>
    %977 = arith.mulf %974, %976 : vector<32x256xf32>
    %c0_608 = arith.constant 0 : index
    %c0_609 = arith.constant 0 : index
    %978 = vector.load %arg30[%c0_608, %c0_609] : memref<1x256xf32, #tpu.memory_space<vmem>>, vector<1x256xf32>
    %979 = vector.broadcast %978 : vector<1x256xf32> to vector<32x256xf32>
    %980 = arith.addf %977, %979 : vector<32x256xf32>
    %cst_610 = arith.constant 0.000000e+00 : f32
    %981 = vector.broadcast %cst_610 : f32 to vector<32x256xf32>
    %982 = arith.subf %981, %980 : vector<32x256xf32>
    %983 = math.exp %982 : vector<32x256xf32>
    %cst_611 = arith.constant 1.000000e+00 : f32
    %984 = vector.broadcast %cst_611 : f32 to vector<32x256xf32>
    %985 = arith.addf %984, %983 : vector<32x256xf32>
    %986 = tpu.reciprocal %985 {approx = true} : vector<32x256xf32> -> vector<32x256xf32>
    %987 = arith.mulf %980, %986 : vector<32x256xf32>
    %cst_612 = arith.constant 0.000000e+00 : f32
    %988 = vector.broadcast %cst_612 : f32 to vector<7x256xf32>
    %cst_613 = arith.constant 0.000000e+00 : f32
    %989 = vector.broadcast %cst_613 : f32 to vector<2x256xf32>
    %cst_614 = arith.constant 0.000000e+00 : f32
    %990 = vector.broadcast %cst_614 : f32 to vector<7x256xf32>
    %c0_615 = arith.constant 0 : index
    %c0_616 = arith.constant 0 : index
    %991 = vector.load %arg51[%c0_615, %c0_616] : memref<72x256xf32, #tpu.memory_space<vmem>>, vector<7x256xf32>
    tpu.vector_store %arg51[%c0_615, %c0_616], %988 {strides = array<i32>} : memref<72x256xf32, #tpu.memory_space<vmem>>, vector<7x256xf32>,
    %992 = vector.extract_strided_slice %987 {offsets = [0, 0], sizes = [4, 256], strides = [1, 1]} : vector<32x256xf32> to vector<4x256xf32>
    %c7_617 = arith.constant 7 : index
    %c0_618 = arith.constant 0 : index
    %993 = vector.load %arg51[%c7_617, %c0_618] : memref<72x256xf32, #tpu.memory_space<vmem>>, vector<4x256xf32>
    tpu.vector_store %arg51[%c7_617, %c0_618], %992 {strides = array<i32>} : memref<72x256xf32, #tpu.memory_space<vmem>>, vector<4x256xf32>,
    %c11_619 = arith.constant 11 : index
    %c0_620 = arith.constant 0 : index
    %994 = vector.load %arg51[%c11_619, %c0_620] : memref<72x256xf32, #tpu.memory_space<vmem>>, vector<2x256xf32>
    tpu.vector_store %arg51[%c11_619, %c0_620], %989 {strides = array<i32>} : memref<72x256xf32, #tpu.memory_space<vmem>>, vector<2x256xf32>,
    %995 = vector.extract_strided_slice %987 {offsets = [4, 0], sizes = [4, 256], strides = [1, 1]} : vector<32x256xf32> to vector<4x256xf32>
    %c13 = arith.constant 13 : index
    %c0_621 = arith.constant 0 : index
    %996 = vector.load %arg51[%c13, %c0_621] : memref<72x256xf32, #tpu.memory_space<vmem>>, vector<4x256xf32>
    tpu.vector_store %arg51[%c13, %c0_621], %995 {strides = array<i32>} : memref<72x256xf32, #tpu.memory_space<vmem>>, vector<4x256xf32>,
    %c17_622 = arith.constant 17 : index
    %c0_623 = arith.constant 0 : index
    %997 = vector.load %arg51[%c17_622, %c0_623] : memref<72x256xf32, #tpu.memory_space<vmem>>, vector<2x256xf32>
    tpu.vector_store %arg51[%c17_622, %c0_623], %989 {strides = array<i32>} : memref<72x256xf32, #tpu.memory_space<vmem>>, vector<2x256xf32>,
    %998 = vector.extract_strided_slice %987 {offsets = [8, 0], sizes = [4, 256], strides = [1, 1]} : vector<32x256xf32> to vector<4x256xf32>
    %c19_624 = arith.constant 19 : index
    %c0_625 = arith.constant 0 : index
    %999 = vector.load %arg51[%c19_624, %c0_625] : memref<72x256xf32, #tpu.memory_space<vmem>>, vector<4x256xf32>
    tpu.vector_store %arg51[%c19_624, %c0_625], %998 {strides = array<i32>} : memref<72x256xf32, #tpu.memory_space<vmem>>, vector<4x256xf32>,
    %c23 = arith.constant 23 : index
    %c0_626 = arith.constant 0 : index
    %1000 = vector.load %arg51[%c23, %c0_626] : memref<72x256xf32, #tpu.memory_space<vmem>>, vector<2x256xf32>
    tpu.vector_store %arg51[%c23, %c0_626], %989 {strides = array<i32>} : memref<72x256xf32, #tpu.memory_space<vmem>>, vector<2x256xf32>,
    %1001 = vector.extract_strided_slice %987 {offsets = [12, 0], sizes = [4, 256], strides = [1, 1]} : vector<32x256xf32> to vector<4x256xf32>
    %c25 = arith.constant 25 : index
    %c0_627 = arith.constant 0 : index
    %1002 = vector.load %arg51[%c25, %c0_627] : memref<72x256xf32, #tpu.memory_space<vmem>>, vector<4x256xf32>
    tpu.vector_store %arg51[%c25, %c0_627], %1001 {strides = array<i32>} : memref<72x256xf32, #tpu.memory_space<vmem>>, vector<4x256xf32>,
    %c29_628 = arith.constant 29 : index
    %c0_629 = arith.constant 0 : index
    %1003 = vector.load %arg51[%c29_628, %c0_629] : memref<72x256xf32, #tpu.memory_space<vmem>>, vector<7x256xf32>
    tpu.vector_store %arg51[%c29_628, %c0_629], %990 {strides = array<i32>} : memref<72x256xf32, #tpu.memory_space<vmem>>, vector<7x256xf32>,
    %c36_630 = arith.constant 36 : index
    %c0_631 = arith.constant 0 : index
    %1004 = vector.load %arg51[%c36_630, %c0_631] : memref<72x256xf32, #tpu.memory_space<vmem>>, vector<7x256xf32>
    tpu.vector_store %arg51[%c36_630, %c0_631], %988 {strides = array<i32>} : memref<72x256xf32, #tpu.memory_space<vmem>>, vector<7x256xf32>,
    %1005 = vector.extract_strided_slice %987 {offsets = [16, 0], sizes = [4, 256], strides = [1, 1]} : vector<32x256xf32> to vector<4x256xf32>
    %c43 = arith.constant 43 : index
    %c0_632 = arith.constant 0 : index
    %1006 = vector.load %arg51[%c43, %c0_632] : memref<72x256xf32, #tpu.memory_space<vmem>>, vector<4x256xf32>
    tpu.vector_store %arg51[%c43, %c0_632], %1005 {strides = array<i32>} : memref<72x256xf32, #tpu.memory_space<vmem>>, vector<4x256xf32>,
    %c47_633 = arith.constant 47 : index
    %c0_634 = arith.constant 0 : index
    %1007 = vector.load %arg51[%c47_633, %c0_634] : memref<72x256xf32, #tpu.memory_space<vmem>>, vector<2x256xf32>
    tpu.vector_store %arg51[%c47_633, %c0_634], %989 {strides = array<i32>} : memref<72x256xf32, #tpu.memory_space<vmem>>, vector<2x256xf32>,
    %1008 = vector.extract_strided_slice %987 {offsets = [20, 0], sizes = [4, 256], strides = [1, 1]} : vector<32x256xf32> to vector<4x256xf32>
    %c49_635 = arith.constant 49 : index
    %c0_636 = arith.constant 0 : index
    %1009 = vector.load %arg51[%c49_635, %c0_636] : memref<72x256xf32, #tpu.memory_space<vmem>>, vector<4x256xf32>
    tpu.vector_store %arg51[%c49_635, %c0_636], %1008 {strides = array<i32>} : memref<72x256xf32, #tpu.memory_space<vmem>>, vector<4x256xf32>,
    %c53_637 = arith.constant 53 : index
    %c0_638 = arith.constant 0 : index
    %1010 = vector.load %arg51[%c53_637, %c0_638] : memref<72x256xf32, #tpu.memory_space<vmem>>, vector<2x256xf32>
    tpu.vector_store %arg51[%c53_637, %c0_638], %989 {strides = array<i32>} : memref<72x256xf32, #tpu.memory_space<vmem>>, vector<2x256xf32>,
    %1011 = vector.extract_strided_slice %987 {offsets = [24, 0], sizes = [4, 256], strides = [1, 1]} : vector<32x256xf32> to vector<4x256xf32>
    %c55_639 = arith.constant 55 : index
    %c0_640 = arith.constant 0 : index
    %1012 = vector.load %arg51[%c55_639, %c0_640] : memref<72x256xf32, #tpu.memory_space<vmem>>, vector<4x256xf32>
    tpu.vector_store %arg51[%c55_639, %c0_640], %1011 {strides = array<i32>} : memref<72x256xf32, #tpu.memory_space<vmem>>, vector<4x256xf32>,
    %c59_641 = arith.constant 59 : index
    %c0_642 = arith.constant 0 : index
    %1013 = vector.load %arg51[%c59_641, %c0_642] : memref<72x256xf32, #tpu.memory_space<vmem>>, vector<2x256xf32>
    tpu.vector_store %arg51[%c59_641, %c0_642], %989 {strides = array<i32>} : memref<72x256xf32, #tpu.memory_space<vmem>>, vector<2x256xf32>,
    %1014 = vector.extract_strided_slice %987 {offsets = [28, 0], sizes = [4, 256], strides = [1, 1]} : vector<32x256xf32> to vector<4x256xf32>
    %c61_643 = arith.constant 61 : index
    %c0_644 = arith.constant 0 : index
    %1015 = vector.load %arg51[%c61_643, %c0_644] : memref<72x256xf32, #tpu.memory_space<vmem>>, vector<4x256xf32>
    tpu.vector_store %arg51[%c61_643, %c0_644], %1014 {strides = array<i32>} : memref<72x256xf32, #tpu.memory_space<vmem>>, vector<4x256xf32>,
    %c65_645 = arith.constant 65 : index
    %c0_646 = arith.constant 0 : index
    %1016 = vector.load %arg51[%c65_645, %c0_646] : memref<72x256xf32, #tpu.memory_space<vmem>>, vector<7x256xf32>
    tpu.vector_store %arg51[%c65_645, %c0_646], %990 {strides = array<i32>} : memref<72x256xf32, #tpu.memory_space<vmem>>, vector<7x256xf32>,
    %c0_647 = arith.constant 0 : index
    %c0_648 = arith.constant 0 : index
    %1017 = vector.load %arg31[%c0_647, %c0_648] : memref<9x256xf32, #tpu.memory_space<vmem>>, vector<1x256xf32>
    %1018 = vector.shape_cast %1017 : vector<1x256xf32> to vector<1x256xf32>
    %1019 = vector.broadcast %1018 : vector<1x256xf32> to vector<4x256xf32>
    %c1_649 = arith.constant 1 : index
    %c0_650 = arith.constant 0 : index
    %1020 = vector.load %arg31[%c1_649, %c0_650] : memref<9x256xf32, #tpu.memory_space<vmem>>, vector<1x256xf32>
    %1021 = vector.shape_cast %1020 : vector<1x256xf32> to vector<1x256xf32>
    %1022 = vector.broadcast %1021 : vector<1x256xf32> to vector<4x256xf32>
    %c2_651 = arith.constant 2 : index
    %c0_652 = arith.constant 0 : index
    %1023 = vector.load %arg31[%c2_651, %c0_652] : memref<9x256xf32, #tpu.memory_space<vmem>>, vector<1x256xf32>
    %1024 = vector.shape_cast %1023 : vector<1x256xf32> to vector<1x256xf32>
    %1025 = vector.broadcast %1024 : vector<1x256xf32> to vector<4x256xf32>
    %c3_653 = arith.constant 3 : index
    %c0_654 = arith.constant 0 : index
    %1026 = vector.load %arg31[%c3_653, %c0_654] : memref<9x256xf32, #tpu.memory_space<vmem>>, vector<1x256xf32>
    %1027 = vector.shape_cast %1026 : vector<1x256xf32> to vector<1x256xf32>
    %1028 = vector.broadcast %1027 : vector<1x256xf32> to vector<4x256xf32>
    %c4_655 = arith.constant 4 : index
    %c0_656 = arith.constant 0 : index
    %1029 = vector.load %arg31[%c4_655, %c0_656] : memref<9x256xf32, #tpu.memory_space<vmem>>, vector<1x256xf32>
    %1030 = vector.shape_cast %1029 : vector<1x256xf32> to vector<1x256xf32>
    %1031 = vector.broadcast %1030 : vector<1x256xf32> to vector<4x256xf32>
    %c5_657 = arith.constant 5 : index
    %c0_658 = arith.constant 0 : index
    %1032 = vector.load %arg31[%c5_657, %c0_658] : memref<9x256xf32, #tpu.memory_space<vmem>>, vector<1x256xf32>
    %1033 = vector.shape_cast %1032 : vector<1x256xf32> to vector<1x256xf32>
    %1034 = vector.broadcast %1033 : vector<1x256xf32> to vector<4x256xf32>
    %c6_659 = arith.constant 6 : index
    %c0_660 = arith.constant 0 : index
    %1035 = vector.load %arg31[%c6_659, %c0_660] : memref<9x256xf32, #tpu.memory_space<vmem>>, vector<1x256xf32>
    %1036 = vector.shape_cast %1035 : vector<1x256xf32> to vector<1x256xf32>
    %1037 = vector.broadcast %1036 : vector<1x256xf32> to vector<4x256xf32>
    %c7_661 = arith.constant 7 : index
    %c0_662 = arith.constant 0 : index
    %1038 = vector.load %arg31[%c7_661, %c0_662] : memref<9x256xf32, #tpu.memory_space<vmem>>, vector<1x256xf32>
    %1039 = vector.shape_cast %1038 : vector<1x256xf32> to vector<1x256xf32>
    %1040 = vector.broadcast %1039 : vector<1x256xf32> to vector<4x256xf32>
    %c8_663 = arith.constant 8 : index
    %c0_664 = arith.constant 0 : index
    %1041 = vector.load %arg31[%c8_663, %c0_664] : memref<9x256xf32, #tpu.memory_space<vmem>>, vector<1x256xf32>
    %1042 = vector.shape_cast %1041 : vector<1x256xf32> to vector<1x256xf32>
    %1043 = vector.broadcast %1042 : vector<1x256xf32> to vector<4x256xf32>
    %c0_665 = arith.constant 0 : index
    %c0_666 = arith.constant 0 : index
    %1044 = vector.load %arg51[%c0_665, %c0_666] : memref<72x256xf32, #tpu.memory_space<vmem>>, vector<4x256xf32>
    %1045 = arith.mulf %1044, %1019 : vector<4x256xf32>
    %c1_667 = arith.constant 1 : index
    %c0_668 = arith.constant 0 : index
    %1046 = vector.load %arg51[%c1_667, %c0_668] : memref<72x256xf32, #tpu.memory_space<vmem>>, vector<4x256xf32>
    %1047 = arith.mulf %1046, %1022 : vector<4x256xf32>
    %1048 = arith.addf %1045, %1047 : vector<4x256xf32>
    %c2_669 = arith.constant 2 : index
    %c0_670 = arith.constant 0 : index
    %1049 = vector.load %arg51[%c2_669, %c0_670] : memref<72x256xf32, #tpu.memory_space<vmem>>, vector<4x256xf32>
    %1050 = arith.mulf %1049, %1025 : vector<4x256xf32>
    %1051 = arith.addf %1048, %1050 : vector<4x256xf32>
    %c6_671 = arith.constant 6 : index
    %c0_672 = arith.constant 0 : index
    %1052 = vector.load %arg51[%c6_671, %c0_672] : memref<72x256xf32, #tpu.memory_space<vmem>>, vector<4x256xf32>
    %1053 = arith.mulf %1052, %1028 : vector<4x256xf32>
    %1054 = arith.addf %1051, %1053 : vector<4x256xf32>
    %c7_673 = arith.constant 7 : index
    %c0_674 = arith.constant 0 : index
    %1055 = vector.load %arg51[%c7_673, %c0_674] : memref<72x256xf32, #tpu.memory_space<vmem>>, vector<4x256xf32>
    %1056 = arith.mulf %1055, %1031 : vector<4x256xf32>
    %1057 = arith.addf %1054, %1056 : vector<4x256xf32>
    %c8_675 = arith.constant 8 : index
    %c0_676 = arith.constant 0 : index
    %1058 = vector.load %arg51[%c8_675, %c0_676] : memref<72x256xf32, #tpu.memory_space<vmem>>, vector<4x256xf32>
    %1059 = arith.mulf %1058, %1034 : vector<4x256xf32>
    %1060 = arith.addf %1057, %1059 : vector<4x256xf32>
    %c12_677 = arith.constant 12 : index
    %c0_678 = arith.constant 0 : index
    %1061 = vector.load %arg51[%c12_677, %c0_678] : memref<72x256xf32, #tpu.memory_space<vmem>>, vector<4x256xf32>
    %1062 = arith.mulf %1061, %1037 : vector<4x256xf32>
    %1063 = arith.addf %1060, %1062 : vector<4x256xf32>
    %c13_679 = arith.constant 13 : index
    %c0_680 = arith.constant 0 : index
    %1064 = vector.load %arg51[%c13_679, %c0_680] : memref<72x256xf32, #tpu.memory_space<vmem>>, vector<4x256xf32>
    %1065 = arith.mulf %1064, %1040 : vector<4x256xf32>
    %1066 = arith.addf %1063, %1065 : vector<4x256xf32>
    %c14 = arith.constant 14 : index
    %c0_681 = arith.constant 0 : index
    %1067 = vector.load %arg51[%c14, %c0_681] : memref<72x256xf32, #tpu.memory_space<vmem>>, vector<4x256xf32>
    %1068 = arith.mulf %1067, %1043 : vector<4x256xf32>
    %1069 = arith.addf %1066, %1068 : vector<4x256xf32>
    %c0_682 = arith.constant 0 : index
    %c0_683 = arith.constant 0 : index
    %1070 = vector.load %arg52[%c0_682, %c0_683] : memref<32x256xf32, #tpu.memory_space<vmem>>, vector<4x256xf32>
    tpu.vector_store %arg52[%c0_682, %c0_683], %1069 {strides = array<i32>} : memref<32x256xf32, #tpu.memory_space<vmem>>, vector<4x256xf32>,
    %c6_684 = arith.constant 6 : index
    %c0_685 = arith.constant 0 : index
    %1071 = vector.load %arg51[%c6_684, %c0_685] : memref<72x256xf32, #tpu.memory_space<vmem>>, vector<4x256xf32>
    %1072 = arith.mulf %1071, %1019 : vector<4x256xf32>
    %c7_686 = arith.constant 7 : index
    %c0_687 = arith.constant 0 : index
    %1073 = vector.load %arg51[%c7_686, %c0_687] : memref<72x256xf32, #tpu.memory_space<vmem>>, vector<4x256xf32>
    %1074 = arith.mulf %1073, %1022 : vector<4x256xf32>
    %1075 = arith.addf %1072, %1074 : vector<4x256xf32>
    %c8_688 = arith.constant 8 : index
    %c0_689 = arith.constant 0 : index
    %1076 = vector.load %arg51[%c8_688, %c0_689] : memref<72x256xf32, #tpu.memory_space<vmem>>, vector<4x256xf32>
    %1077 = arith.mulf %1076, %1025 : vector<4x256xf32>
    %1078 = arith.addf %1075, %1077 : vector<4x256xf32>
    %c12_690 = arith.constant 12 : index
    %c0_691 = arith.constant 0 : index
    %1079 = vector.load %arg51[%c12_690, %c0_691] : memref<72x256xf32, #tpu.memory_space<vmem>>, vector<4x256xf32>
    %1080 = arith.mulf %1079, %1028 : vector<4x256xf32>
    %1081 = arith.addf %1078, %1080 : vector<4x256xf32>
    %c13_692 = arith.constant 13 : index
    %c0_693 = arith.constant 0 : index
    %1082 = vector.load %arg51[%c13_692, %c0_693] : memref<72x256xf32, #tpu.memory_space<vmem>>, vector<4x256xf32>
    %1083 = arith.mulf %1082, %1031 : vector<4x256xf32>
    %1084 = arith.addf %1081, %1083 : vector<4x256xf32>
    %c14_694 = arith.constant 14 : index
    %c0_695 = arith.constant 0 : index
    %1085 = vector.load %arg51[%c14_694, %c0_695] : memref<72x256xf32, #tpu.memory_space<vmem>>, vector<4x256xf32>
    %1086 = arith.mulf %1085, %1034 : vector<4x256xf32>
    %1087 = arith.addf %1084, %1086 : vector<4x256xf32>
    %c18_696 = arith.constant 18 : index
    %c0_697 = arith.constant 0 : index
    %1088 = vector.load %arg51[%c18_696, %c0_697] : memref<72x256xf32, #tpu.memory_space<vmem>>, vector<4x256xf32>
    %1089 = arith.mulf %1088, %1037 : vector<4x256xf32>
    %1090 = arith.addf %1087, %1089 : vector<4x256xf32>
    %c19_698 = arith.constant 19 : index
    %c0_699 = arith.constant 0 : index
    %1091 = vector.load %arg51[%c19_698, %c0_699] : memref<72x256xf32, #tpu.memory_space<vmem>>, vector<4x256xf32>
    %1092 = arith.mulf %1091, %1040 : vector<4x256xf32>
    %1093 = arith.addf %1090, %1092 : vector<4x256xf32>
    %c20_700 = arith.constant 20 : index
    %c0_701 = arith.constant 0 : index
    %1094 = vector.load %arg51[%c20_700, %c0_701] : memref<72x256xf32, #tpu.memory_space<vmem>>, vector<4x256xf32>
    %1095 = arith.mulf %1094, %1043 : vector<4x256xf32>
    %1096 = arith.addf %1093, %1095 : vector<4x256xf32>
    %c4_702 = arith.constant 4 : index
    %c0_703 = arith.constant 0 : index
    %1097 = vector.load %arg52[%c4_702, %c0_703] : memref<32x256xf32, #tpu.memory_space<vmem>>, vector<4x256xf32>
    tpu.vector_store %arg52[%c4_702, %c0_703], %1096 {strides = array<i32>} : memref<32x256xf32, #tpu.memory_space<vmem>>, vector<4x256xf32>,
    %c12_704 = arith.constant 12 : index
    %c0_705 = arith.constant 0 : index
    %1098 = vector.load %arg51[%c12_704, %c0_705] : memref<72x256xf32, #tpu.memory_space<vmem>>, vector<4x256xf32>
    %1099 = arith.mulf %1098, %1019 : vector<4x256xf32>
    %c13_706 = arith.constant 13 : index
    %c0_707 = arith.constant 0 : index
    %1100 = vector.load %arg51[%c13_706, %c0_707] : memref<72x256xf32, #tpu.memory_space<vmem>>, vector<4x256xf32>
    %1101 = arith.mulf %1100, %1022 : vector<4x256xf32>
    %1102 = arith.addf %1099, %1101 : vector<4x256xf32>
    %c14_708 = arith.constant 14 : index
    %c0_709 = arith.constant 0 : index
    %1103 = vector.load %arg51[%c14_708, %c0_709] : memref<72x256xf32, #tpu.memory_space<vmem>>, vector<4x256xf32>
    %1104 = arith.mulf %1103, %1025 : vector<4x256xf32>
    %1105 = arith.addf %1102, %1104 : vector<4x256xf32>
    %c18_710 = arith.constant 18 : index
    %c0_711 = arith.constant 0 : index
    %1106 = vector.load %arg51[%c18_710, %c0_711] : memref<72x256xf32, #tpu.memory_space<vmem>>, vector<4x256xf32>
    %1107 = arith.mulf %1106, %1028 : vector<4x256xf32>
    %1108 = arith.addf %1105, %1107 : vector<4x256xf32>
    %c19_712 = arith.constant 19 : index
    %c0_713 = arith.constant 0 : index
    %1109 = vector.load %arg51[%c19_712, %c0_713] : memref<72x256xf32, #tpu.memory_space<vmem>>, vector<4x256xf32>
    %1110 = arith.mulf %1109, %1031 : vector<4x256xf32>
    %1111 = arith.addf %1108, %1110 : vector<4x256xf32>
    %c20_714 = arith.constant 20 : index
    %c0_715 = arith.constant 0 : index
    %1112 = vector.load %arg51[%c20_714, %c0_715] : memref<72x256xf32, #tpu.memory_space<vmem>>, vector<4x256xf32>
    %1113 = arith.mulf %1112, %1034 : vector<4x256xf32>
    %1114 = arith.addf %1111, %1113 : vector<4x256xf32>
    %c24_716 = arith.constant 24 : index
    %c0_717 = arith.constant 0 : index
    %1115 = vector.load %arg51[%c24_716, %c0_717] : memref<72x256xf32, #tpu.memory_space<vmem>>, vector<4x256xf32>
    %1116 = arith.mulf %1115, %1037 : vector<4x256xf32>
    %1117 = arith.addf %1114, %1116 : vector<4x256xf32>
    %c25_718 = arith.constant 25 : index
    %c0_719 = arith.constant 0 : index
    %1118 = vector.load %arg51[%c25_718, %c0_719] : memref<72x256xf32, #tpu.memory_space<vmem>>, vector<4x256xf32>
    %1119 = arith.mulf %1118, %1040 : vector<4x256xf32>
    %1120 = arith.addf %1117, %1119 : vector<4x256xf32>
    %c26_720 = arith.constant 26 : index
    %c0_721 = arith.constant 0 : index
    %1121 = vector.load %arg51[%c26_720, %c0_721] : memref<72x256xf32, #tpu.memory_space<vmem>>, vector<4x256xf32>
    %1122 = arith.mulf %1121, %1043 : vector<4x256xf32>
    %1123 = arith.addf %1120, %1122 : vector<4x256xf32>
    %c8_722 = arith.constant 8 : index
    %c0_723 = arith.constant 0 : index
    %1124 = vector.load %arg52[%c8_722, %c0_723] : memref<32x256xf32, #tpu.memory_space<vmem>>, vector<4x256xf32>
    tpu.vector_store %arg52[%c8_722, %c0_723], %1123 {strides = array<i32>} : memref<32x256xf32, #tpu.memory_space<vmem>>, vector<4x256xf32>,
    %c18_724 = arith.constant 18 : index
    %c0_725 = arith.constant 0 : index
    %1125 = vector.load %arg51[%c18_724, %c0_725] : memref<72x256xf32, #tpu.memory_space<vmem>>, vector<4x256xf32>
    %1126 = arith.mulf %1125, %1019 : vector<4x256xf32>
    %c19_726 = arith.constant 19 : index
    %c0_727 = arith.constant 0 : index
    %1127 = vector.load %arg51[%c19_726, %c0_727] : memref<72x256xf32, #tpu.memory_space<vmem>>, vector<4x256xf32>
    %1128 = arith.mulf %1127, %1022 : vector<4x256xf32>
    %1129 = arith.addf %1126, %1128 : vector<4x256xf32>
    %c20_728 = arith.constant 20 : index
    %c0_729 = arith.constant 0 : index
    %1130 = vector.load %arg51[%c20_728, %c0_729] : memref<72x256xf32, #tpu.memory_space<vmem>>, vector<4x256xf32>
    %1131 = arith.mulf %1130, %1025 : vector<4x256xf32>
    %1132 = arith.addf %1129, %1131 : vector<4x256xf32>
    %c24_730 = arith.constant 24 : index
    %c0_731 = arith.constant 0 : index
    %1133 = vector.load %arg51[%c24_730, %c0_731] : memref<72x256xf32, #tpu.memory_space<vmem>>, vector<4x256xf32>
    %1134 = arith.mulf %1133, %1028 : vector<4x256xf32>
    %1135 = arith.addf %1132, %1134 : vector<4x256xf32>
    %c25_732 = arith.constant 25 : index
    %c0_733 = arith.constant 0 : index
    %1136 = vector.load %arg51[%c25_732, %c0_733] : memref<72x256xf32, #tpu.memory_space<vmem>>, vector<4x256xf32>
    %1137 = arith.mulf %1136, %1031 : vector<4x256xf32>
    %1138 = arith.addf %1135, %1137 : vector<4x256xf32>
    %c26_734 = arith.constant 26 : index
    %c0_735 = arith.constant 0 : index
    %1139 = vector.load %arg51[%c26_734, %c0_735] : memref<72x256xf32, #tpu.memory_space<vmem>>, vector<4x256xf32>
    %1140 = arith.mulf %1139, %1034 : vector<4x256xf32>
    %1141 = arith.addf %1138, %1140 : vector<4x256xf32>
    %c30_736 = arith.constant 30 : index
    %c0_737 = arith.constant 0 : index
    %1142 = vector.load %arg51[%c30_736, %c0_737] : memref<72x256xf32, #tpu.memory_space<vmem>>, vector<4x256xf32>
    %1143 = arith.mulf %1142, %1037 : vector<4x256xf32>
    %1144 = arith.addf %1141, %1143 : vector<4x256xf32>
    %c31_738 = arith.constant 31 : index
    %c0_739 = arith.constant 0 : index
    %1145 = vector.load %arg51[%c31_738, %c0_739] : memref<72x256xf32, #tpu.memory_space<vmem>>, vector<4x256xf32>
    %1146 = arith.mulf %1145, %1040 : vector<4x256xf32>
    %1147 = arith.addf %1144, %1146 : vector<4x256xf32>
    %c32_740 = arith.constant 32 : index
    %c0_741 = arith.constant 0 : index
    %1148 = vector.load %arg51[%c32_740, %c0_741] : memref<72x256xf32, #tpu.memory_space<vmem>>, vector<4x256xf32>
    %1149 = arith.mulf %1148, %1043 : vector<4x256xf32>
    %1150 = arith.addf %1147, %1149 : vector<4x256xf32>
    %c12_742 = arith.constant 12 : index
    %c0_743 = arith.constant 0 : index
    %1151 = vector.load %arg52[%c12_742, %c0_743] : memref<32x256xf32, #tpu.memory_space<vmem>>, vector<4x256xf32>
    tpu.vector_store %arg52[%c12_742, %c0_743], %1150 {strides = array<i32>} : memref<32x256xf32, #tpu.memory_space<vmem>>, vector<4x256xf32>,
    %c36_744 = arith.constant 36 : index
    %c0_745 = arith.constant 0 : index
    %1152 = vector.load %arg51[%c36_744, %c0_745] : memref<72x256xf32, #tpu.memory_space<vmem>>, vector<4x256xf32>
    %1153 = arith.mulf %1152, %1019 : vector<4x256xf32>
    %c37_746 = arith.constant 37 : index
    %c0_747 = arith.constant 0 : index
    %1154 = vector.load %arg51[%c37_746, %c0_747] : memref<72x256xf32, #tpu.memory_space<vmem>>, vector<4x256xf32>
    %1155 = arith.mulf %1154, %1022 : vector<4x256xf32>
    %1156 = arith.addf %1153, %1155 : vector<4x256xf32>
    %c38_748 = arith.constant 38 : index
    %c0_749 = arith.constant 0 : index
    %1157 = vector.load %arg51[%c38_748, %c0_749] : memref<72x256xf32, #tpu.memory_space<vmem>>, vector<4x256xf32>
    %1158 = arith.mulf %1157, %1025 : vector<4x256xf32>
    %1159 = arith.addf %1156, %1158 : vector<4x256xf32>
    %c42_750 = arith.constant 42 : index
    %c0_751 = arith.constant 0 : index
    %1160 = vector.load %arg51[%c42_750, %c0_751] : memref<72x256xf32, #tpu.memory_space<vmem>>, vector<4x256xf32>
    %1161 = arith.mulf %1160, %1028 : vector<4x256xf32>
    %1162 = arith.addf %1159, %1161 : vector<4x256xf32>
    %c43_752 = arith.constant 43 : index
    %c0_753 = arith.constant 0 : index
    %1163 = vector.load %arg51[%c43_752, %c0_753] : memref<72x256xf32, #tpu.memory_space<vmem>>, vector<4x256xf32>
    %1164 = arith.mulf %1163, %1031 : vector<4x256xf32>
    %1165 = arith.addf %1162, %1164 : vector<4x256xf32>
    %c44_754 = arith.constant 44 : index
    %c0_755 = arith.constant 0 : index
    %1166 = vector.load %arg51[%c44_754, %c0_755] : memref<72x256xf32, #tpu.memory_space<vmem>>, vector<4x256xf32>
    %1167 = arith.mulf %1166, %1034 : vector<4x256xf32>
    %1168 = arith.addf %1165, %1167 : vector<4x256xf32>
    %c48_756 = arith.constant 48 : index
    %c0_757 = arith.constant 0 : index
    %1169 = vector.load %arg51[%c48_756, %c0_757] : memref<72x256xf32, #tpu.memory_space<vmem>>, vector<4x256xf32>
    %1170 = arith.mulf %1169, %1037 : vector<4x256xf32>
    %1171 = arith.addf %1168, %1170 : vector<4x256xf32>
    %c49_758 = arith.constant 49 : index
    %c0_759 = arith.constant 0 : index
    %1172 = vector.load %arg51[%c49_758, %c0_759] : memref<72x256xf32, #tpu.memory_space<vmem>>, vector<4x256xf32>
    %1173 = arith.mulf %1172, %1040 : vector<4x256xf32>
    %1174 = arith.addf %1171, %1173 : vector<4x256xf32>
    %c50_760 = arith.constant 50 : index
    %c0_761 = arith.constant 0 : index
    %1175 = vector.load %arg51[%c50_760, %c0_761] : memref<72x256xf32, #tpu.memory_space<vmem>>, vector<4x256xf32>
    %1176 = arith.mulf %1175, %1043 : vector<4x256xf32>
    %1177 = arith.addf %1174, %1176 : vector<4x256xf32>
    %c16_762 = arith.constant 16 : index
    %c0_763 = arith.constant 0 : index
    %1178 = vector.load %arg52[%c16_762, %c0_763] : memref<32x256xf32, #tpu.memory_space<vmem>>, vector<4x256xf32>
    tpu.vector_store %arg52[%c16_762, %c0_763], %1177 {strides = array<i32>} : memref<32x256xf32, #tpu.memory_space<vmem>>, vector<4x256xf32>,
    %c42_764 = arith.constant 42 : index
    %c0_765 = arith.constant 0 : index
    %1179 = vector.load %arg51[%c42_764, %c0_765] : memref<72x256xf32, #tpu.memory_space<vmem>>, vector<4x256xf32>
    %1180 = arith.mulf %1179, %1019 : vector<4x256xf32>
    %c43_766 = arith.constant 43 : index
    %c0_767 = arith.constant 0 : index
    %1181 = vector.load %arg51[%c43_766, %c0_767] : memref<72x256xf32, #tpu.memory_space<vmem>>, vector<4x256xf32>
    %1182 = arith.mulf %1181, %1022 : vector<4x256xf32>
    %1183 = arith.addf %1180, %1182 : vector<4x256xf32>
    %c44_768 = arith.constant 44 : index
    %c0_769 = arith.constant 0 : index
    %1184 = vector.load %arg51[%c44_768, %c0_769] : memref<72x256xf32, #tpu.memory_space<vmem>>, vector<4x256xf32>
    %1185 = arith.mulf %1184, %1025 : vector<4x256xf32>
    %1186 = arith.addf %1183, %1185 : vector<4x256xf32>
    %c48_770 = arith.constant 48 : index
    %c0_771 = arith.constant 0 : index
    %1187 = vector.load %arg51[%c48_770, %c0_771] : memref<72x256xf32, #tpu.memory_space<vmem>>, vector<4x256xf32>
    %1188 = arith.mulf %1187, %1028 : vector<4x256xf32>
    %1189 = arith.addf %1186, %1188 : vector<4x256xf32>
    %c49_772 = arith.constant 49 : index
    %c0_773 = arith.constant 0 : index
    %1190 = vector.load %arg51[%c49_772, %c0_773] : memref<72x256xf32, #tpu.memory_space<vmem>>, vector<4x256xf32>
    %1191 = arith.mulf %1190, %1031 : vector<4x256xf32>
    %1192 = arith.addf %1189, %1191 : vector<4x256xf32>
    %c50_774 = arith.constant 50 : index
    %c0_775 = arith.constant 0 : index
    %1193 = vector.load %arg51[%c50_774, %c0_775] : memref<72x256xf32, #tpu.memory_space<vmem>>, vector<4x256xf32>
    %1194 = arith.mulf %1193, %1034 : vector<4x256xf32>
    %1195 = arith.addf %1192, %1194 : vector<4x256xf32>
    %c54_776 = arith.constant 54 : index
    %c0_777 = arith.constant 0 : index
    %1196 = vector.load %arg51[%c54_776, %c0_777] : memref<72x256xf32, #tpu.memory_space<vmem>>, vector<4x256xf32>
    %1197 = arith.mulf %1196, %1037 : vector<4x256xf32>
    %1198 = arith.addf %1195, %1197 : vector<4x256xf32>
    %c55_778 = arith.constant 55 : index
    %c0_779 = arith.constant 0 : index
    %1199 = vector.load %arg51[%c55_778, %c0_779] : memref<72x256xf32, #tpu.memory_space<vmem>>, vector<4x256xf32>
    %1200 = arith.mulf %1199, %1040 : vector<4x256xf32>
    %1201 = arith.addf %1198, %1200 : vector<4x256xf32>
    %c56_780 = arith.constant 56 : index
    %c0_781 = arith.constant 0 : index
    %1202 = vector.load %arg51[%c56_780, %c0_781] : memref<72x256xf32, #tpu.memory_space<vmem>>, vector<4x256xf32>
    %1203 = arith.mulf %1202, %1043 : vector<4x256xf32>
    %1204 = arith.addf %1201, %1203 : vector<4x256xf32>
    %c20_782 = arith.constant 20 : index
    %c0_783 = arith.constant 0 : index
    %1205 = vector.load %arg52[%c20_782, %c0_783] : memref<32x256xf32, #tpu.memory_space<vmem>>, vector<4x256xf32>
    tpu.vector_store %arg52[%c20_782, %c0_783], %1204 {strides = array<i32>} : memref<32x256xf32, #tpu.memory_space<vmem>>, vector<4x256xf32>,
    %c48_784 = arith.constant 48 : index
    %c0_785 = arith.constant 0 : index
    %1206 = vector.load %arg51[%c48_784, %c0_785] : memref<72x256xf32, #tpu.memory_space<vmem>>, vector<4x256xf32>
    %1207 = arith.mulf %1206, %1019 : vector<4x256xf32>
    %c49_786 = arith.constant 49 : index
    %c0_787 = arith.constant 0 : index
    %1208 = vector.load %arg51[%c49_786, %c0_787] : memref<72x256xf32, #tpu.memory_space<vmem>>, vector<4x256xf32>
    %1209 = arith.mulf %1208, %1022 : vector<4x256xf32>
    %1210 = arith.addf %1207, %1209 : vector<4x256xf32>
    %c50_788 = arith.constant 50 : index
    %c0_789 = arith.constant 0 : index
    %1211 = vector.load %arg51[%c50_788, %c0_789] : memref<72x256xf32, #tpu.memory_space<vmem>>, vector<4x256xf32>
    %1212 = arith.mulf %1211, %1025 : vector<4x256xf32>
    %1213 = arith.addf %1210, %1212 : vector<4x256xf32>
    %c54_790 = arith.constant 54 : index
    %c0_791 = arith.constant 0 : index
    %1214 = vector.load %arg51[%c54_790, %c0_791] : memref<72x256xf32, #tpu.memory_space<vmem>>, vector<4x256xf32>
    %1215 = arith.mulf %1214, %1028 : vector<4x256xf32>
    %1216 = arith.addf %1213, %1215 : vector<4x256xf32>
    %c55_792 = arith.constant 55 : index
    %c0_793 = arith.constant 0 : index
    %1217 = vector.load %arg51[%c55_792, %c0_793] : memref<72x256xf32, #tpu.memory_space<vmem>>, vector<4x256xf32>
    %1218 = arith.mulf %1217, %1031 : vector<4x256xf32>
    %1219 = arith.addf %1216, %1218 : vector<4x256xf32>
    %c56_794 = arith.constant 56 : index
    %c0_795 = arith.constant 0 : index
    %1220 = vector.load %arg51[%c56_794, %c0_795] : memref<72x256xf32, #tpu.memory_space<vmem>>, vector<4x256xf32>
    %1221 = arith.mulf %1220, %1034 : vector<4x256xf32>
    %1222 = arith.addf %1219, %1221 : vector<4x256xf32>
    %c60_796 = arith.constant 60 : index
    %c0_797 = arith.constant 0 : index
    %1223 = vector.load %arg51[%c60_796, %c0_797] : memref<72x256xf32, #tpu.memory_space<vmem>>, vector<4x256xf32>
    %1224 = arith.mulf %1223, %1037 : vector<4x256xf32>
    %1225 = arith.addf %1222, %1224 : vector<4x256xf32>
    %c61_798 = arith.constant 61 : index
    %c0_799 = arith.constant 0 : index
    %1226 = vector.load %arg51[%c61_798, %c0_799] : memref<72x256xf32, #tpu.memory_space<vmem>>, vector<4x256xf32>
    %1227 = arith.mulf %1226, %1040 : vector<4x256xf32>
    %1228 = arith.addf %1225, %1227 : vector<4x256xf32>
    %c62_800 = arith.constant 62 : index
    %c0_801 = arith.constant 0 : index
    %1229 = vector.load %arg51[%c62_800, %c0_801] : memref<72x256xf32, #tpu.memory_space<vmem>>, vector<4x256xf32>
    %1230 = arith.mulf %1229, %1043 : vector<4x256xf32>
    %1231 = arith.addf %1228, %1230 : vector<4x256xf32>
    %c24_802 = arith.constant 24 : index
    %c0_803 = arith.constant 0 : index
    %1232 = vector.load %arg52[%c24_802, %c0_803] : memref<32x256xf32, #tpu.memory_space<vmem>>, vector<4x256xf32>
    tpu.vector_store %arg52[%c24_802, %c0_803], %1231 {strides = array<i32>} : memref<32x256xf32, #tpu.memory_space<vmem>>, vector<4x256xf32>,
    %c54_804 = arith.constant 54 : index
    %c0_805 = arith.constant 0 : index
    %1233 = vector.load %arg51[%c54_804, %c0_805] : memref<72x256xf32, #tpu.memory_space<vmem>>, vector<4x256xf32>
    %1234 = arith.mulf %1233, %1019 : vector<4x256xf32>
    %c55_806 = arith.constant 55 : index
    %c0_807 = arith.constant 0 : index
    %1235 = vector.load %arg51[%c55_806, %c0_807] : memref<72x256xf32, #tpu.memory_space<vmem>>, vector<4x256xf32>
    %1236 = arith.mulf %1235, %1022 : vector<4x256xf32>
    %1237 = arith.addf %1234, %1236 : vector<4x256xf32>
    %c56_808 = arith.constant 56 : index
    %c0_809 = arith.constant 0 : index
    %1238 = vector.load %arg51[%c56_808, %c0_809] : memref<72x256xf32, #tpu.memory_space<vmem>>, vector<4x256xf32>
    %1239 = arith.mulf %1238, %1025 : vector<4x256xf32>
    %1240 = arith.addf %1237, %1239 : vector<4x256xf32>
    %c60_810 = arith.constant 60 : index
    %c0_811 = arith.constant 0 : index
    %1241 = vector.load %arg51[%c60_810, %c0_811] : memref<72x256xf32, #tpu.memory_space<vmem>>, vector<4x256xf32>
    %1242 = arith.mulf %1241, %1028 : vector<4x256xf32>
    %1243 = arith.addf %1240, %1242 : vector<4x256xf32>
    %c61_812 = arith.constant 61 : index
    %c0_813 = arith.constant 0 : index
    %1244 = vector.load %arg51[%c61_812, %c0_813] : memref<72x256xf32, #tpu.memory_space<vmem>>, vector<4x256xf32>
    %1245 = arith.mulf %1244, %1031 : vector<4x256xf32>
    %1246 = arith.addf %1243, %1245 : vector<4x256xf32>
    %c62_814 = arith.constant 62 : index
    %c0_815 = arith.constant 0 : index
    %1247 = vector.load %arg51[%c62_814, %c0_815] : memref<72x256xf32, #tpu.memory_space<vmem>>, vector<4x256xf32>
    %1248 = arith.mulf %1247, %1034 : vector<4x256xf32>
    %1249 = arith.addf %1246, %1248 : vector<4x256xf32>
    %c66 = arith.constant 66 : index
    %c0_816 = arith.constant 0 : index
    %1250 = vector.load %arg51[%c66, %c0_816] : memref<72x256xf32, #tpu.memory_space<vmem>>, vector<4x256xf32>
    %1251 = arith.mulf %1250, %1037 : vector<4x256xf32>
    %1252 = arith.addf %1249, %1251 : vector<4x256xf32>
    %c67 = arith.constant 67 : index
    %c0_817 = arith.constant 0 : index
    %1253 = vector.load %arg51[%c67, %c0_817] : memref<72x256xf32, #tpu.memory_space<vmem>>, vector<4x256xf32>
    %1254 = arith.mulf %1253, %1040 : vector<4x256xf32>
    %1255 = arith.addf %1252, %1254 : vector<4x256xf32>
    %c68 = arith.constant 68 : index
    %c0_818 = arith.constant 0 : index
    %1256 = vector.load %arg51[%c68, %c0_818] : memref<72x256xf32, #tpu.memory_space<vmem>>, vector<4x256xf32>
    %1257 = arith.mulf %1256, %1043 : vector<4x256xf32>
    %1258 = arith.addf %1255, %1257 : vector<4x256xf32>
    %c28_819 = arith.constant 28 : index
    %c0_820 = arith.constant 0 : index
    %1259 = vector.load %arg52[%c28_819, %c0_820] : memref<32x256xf32, #tpu.memory_space<vmem>>, vector<4x256xf32>
    tpu.vector_store %arg52[%c28_819, %c0_820], %1258 {strides = array<i32>} : memref<32x256xf32, #tpu.memory_space<vmem>>, vector<4x256xf32>,
    %c0_821 = arith.constant 0 : index
    %c0_822 = arith.constant 0 : index
    %1260 = vector.load %arg52[%c0_821, %c0_822] : memref<32x256xf32, #tpu.memory_space<vmem>>, vector<32x256xf32>
    %c0_823 = arith.constant 0 : index
    %c0_824 = arith.constant 0 : index
    %1261 = vector.load %arg32[%c0_823, %c0_824] : memref<1x256xf32, #tpu.memory_space<vmem>>, vector<1x256xf32>
    %1262 = vector.broadcast %1261 : vector<1x256xf32> to vector<32x256xf32>
    %1263 = arith.mulf %1260, %1262 : vector<32x256xf32>
    %c0_825 = arith.constant 0 : index
    %c0_826 = arith.constant 0 : index
    %1264 = vector.load %arg33[%c0_825, %c0_826] : memref<1x256xf32, #tpu.memory_space<vmem>>, vector<1x256xf32>
    %1265 = vector.broadcast %1264 : vector<1x256xf32> to vector<32x256xf32>
    %1266 = arith.addf %1263, %1265 : vector<32x256xf32>
    %cst_827 = arith.constant 0.000000e+00 : f32
    %1267 = vector.broadcast %cst_827 : f32 to vector<32x256xf32>
    %1268 = arith.subf %1267, %1266 : vector<32x256xf32>
    %1269 = math.exp %1268 : vector<32x256xf32>
    %cst_828 = arith.constant 1.000000e+00 : f32
    %1270 = vector.broadcast %cst_828 : f32 to vector<32x256xf32>
    %1271 = arith.addf %1270, %1269 : vector<32x256xf32>
    %1272 = tpu.reciprocal %1271 {approx = true} : vector<32x256xf32> -> vector<32x256xf32>
    %1273 = arith.mulf %1266, %1272 : vector<32x256xf32>
    %1274 = vector.extract_strided_slice %1273 {offsets = [0, 0], sizes = [16, 256], strides = [1, 1]} : vector<32x256xf32> to vector<16x256xf32>
    %cst_829 = arith.constant dense<0.000000e+00> : vector<256xf32>
    %1275 = vector.multi_reduction <add>, %1274, %cst_829 [0] : vector<16x256xf32> to vector<256xf32>
    %1276 = vector.shape_cast %1275 : vector<256xf32> to vector<1x256xf32>
    %cst_830 = arith.constant 1.600000e+01 : f32
    %1277 = vector.broadcast %cst_830 : f32 to vector<1x256xf32>
    %1278 = arith.divf %1276, %1277 : vector<1x256xf32>
    %1279 = vector.extract_strided_slice %1273 {offsets = [16, 0], sizes = [16, 256], strides = [1, 1]} : vector<32x256xf32> to vector<16x256xf32>
    %cst_831 = arith.constant dense<0.000000e+00> : vector<256xf32>
    %1280 = vector.multi_reduction <add>, %1279, %cst_831 [0] : vector<16x256xf32> to vector<256xf32>
    %1281 = vector.shape_cast %1280 : vector<256xf32> to vector<1x256xf32>
    %cst_832 = arith.constant 1.600000e+01 : f32
    %1282 = vector.broadcast %cst_832 : f32 to vector<1x256xf32>
    %1283 = arith.divf %1281, %1282 : vector<1x256xf32>
    %1284 = tpu.concatenate %1278, %1283 in 0 : vector<1x256xf32>, vector<1x256xf32> -> vector<2x256xf32>
    %1285 = arith.truncf %1284 : vector<2x256xf32> to vector<2x256xbf16>
    %c0_833 = arith.constant 0 : index
    %c0_834 = arith.constant 0 : index
    %1286 = vector.load %arg34[%c0_833, %c0_834] : memref<256x128xbf16, #tpu.memory_space<vmem>>, vector<256x128xbf16>
    %cst_835 = arith.constant dense<0.000000e+00> : vector<2x128xf32>
    %1287 = tpu.matmul %1285, %1286, %cst_835 {dimension_numbers = #tpu.dot_dimension_numbers<[1], [0], [0], [1], [0, 0, 1, 1], [], []>} : vector<2x256xbf16>, vector<256x128xbf16>, vector<2x128xf32> -> vector<2x128xf32>
    %c0_836 = arith.constant 0 : index
    %c0_837 = arith.constant 0 : index
    %1288 = vector.load %arg35[%c0_836, %c0_837] : memref<1x128xf32, #tpu.memory_space<vmem>>, vector<1x128xf32>
    %1289 = vector.broadcast %1288 : vector<1x128xf32> to vector<2x128xf32>
    %1290 = arith.addf %1287, %1289 : vector<2x128xf32>
    %cst_838 = arith.constant 0.000000e+00 : f32
    %1291 = vector.broadcast %cst_838 : f32 to vector<2x128xf32>
    %1292 = arith.subf %1291, %1290 : vector<2x128xf32>
    %1293 = math.exp %1292 : vector<2x128xf32>
    %cst_839 = arith.constant 1.000000e+00 : f32
    %1294 = vector.broadcast %cst_839 : f32 to vector<2x128xf32>
    %1295 = arith.addf %1294, %1293 : vector<2x128xf32>
    %1296 = tpu.reciprocal %1295 {approx = true} : vector<2x128xf32> -> vector<2x128xf32>
    %1297 = arith.mulf %1290, %1296 : vector<2x128xf32>
    %1298 = arith.truncf %1297 : vector<2x128xf32> to vector<2x128xbf16>
    %c0_840 = arith.constant 0 : index
    %c0_841 = arith.constant 0 : index
    %1299 = vector.load %arg36[%c0_840, %c0_841] : memref<128x256xbf16, #tpu.memory_space<vmem>>, vector<128x256xbf16>
    %cst_842 = arith.constant dense<0.000000e+00> : vector<2x256xf32>
    %1300 = tpu.matmul %1298, %1299, %cst_842 {dimension_numbers = #tpu.dot_dimension_numbers<[1], [0], [0], [1], [0, 0, 1, 1], [], []>} : vector<2x128xbf16>, vector<128x256xbf16>, vector<2x256xf32> -> vector<2x256xf32>
    %c0_843 = arith.constant 0 : index
    %c0_844 = arith.constant 0 : index
    %1301 = vector.load %arg37[%c0_843, %c0_844] : memref<1x256xf32, #tpu.memory_space<vmem>>, vector<1x256xf32>
    %1302 = vector.broadcast %1301 : vector<1x256xf32> to vector<2x256xf32>
    %1303 = arith.addf %1300, %1302 : vector<2x256xf32>
    %cst_845 = arith.constant 0.000000e+00 : f32
    %1304 = vector.broadcast %cst_845 : f32 to vector<2x256xf32>
    %1305 = arith.subf %1304, %1303 : vector<2x256xf32>
    %1306 = math.exp %1305 : vector<2x256xf32>
    %cst_846 = arith.constant 1.000000e+00 : f32
    %1307 = vector.broadcast %cst_846 : f32 to vector<2x256xf32>
    %1308 = arith.addf %1307, %1306 : vector<2x256xf32>
    %1309 = tpu.reciprocal %1308 {approx = true} : vector<2x256xf32> -> vector<2x256xf32>
    %1310 = vector.extract_strided_slice %1309 {offsets = [0, 0], sizes = [1, 256], strides = [1, 1]} : vector<2x256xf32> to vector<1x256xf32>
    %1311 = vector.shape_cast %1310 : vector<1x256xf32> to vector<1x256xf32>
    %1312 = vector.broadcast %1311 : vector<1x256xf32> to vector<16x256xf32>
    %1313 = vector.extract_strided_slice %1309 {offsets = [1, 0], sizes = [1, 256], strides = [1, 1]} : vector<2x256xf32> to vector<1x256xf32>
    %1314 = vector.shape_cast %1313 : vector<1x256xf32> to vector<1x256xf32>
    %1315 = vector.broadcast %1314 : vector<1x256xf32> to vector<16x256xf32>
    %1316 = tpu.concatenate %1312, %1315 in 0 : vector<16x256xf32>, vector<16x256xf32> -> vector<32x256xf32>
    %1317 = arith.mulf %1273, %1316 : vector<32x256xf32>
    %1318 = arith.truncf %1317 : vector<32x256xf32> to vector<32x256xbf16>
    %c0_847 = arith.constant 0 : index
    %c0_848 = arith.constant 0 : index
    %1319 = vector.load %arg38[%c0_847, %c0_848] : memref<256x128xbf16, #tpu.memory_space<vmem>>, vector<256x128xbf16>
    %cst_849 = arith.constant dense<0.000000e+00> : vector<32x128xf32>
    %1320 = tpu.matmul %1318, %1319, %cst_849 {dimension_numbers = #tpu.dot_dimension_numbers<[1], [0], [0], [1], [0, 0, 1, 1], [], []>} : vector<32x256xbf16>, vector<256x128xbf16>, vector<32x128xf32> -> vector<32x128xf32>
    %c0_850 = arith.constant 0 : index
    %c0_851 = arith.constant 0 : index
    %1321 = vector.load %arg39[%c0_850, %c0_851] : memref<1x128xf32, #tpu.memory_space<vmem>>, vector<1x128xf32>
    %1322 = vector.broadcast %1321 : vector<1x128xf32> to vector<32x128xf32>
    %1323 = arith.mulf %1320, %1322 : vector<32x128xf32>
    %c0_852 = arith.constant 0 : index
    %c0_853 = arith.constant 0 : index
    %1324 = vector.load %arg40[%c0_852, %c0_853] : memref<1x128xf32, #tpu.memory_space<vmem>>, vector<1x128xf32>
    %1325 = vector.broadcast %1324 : vector<1x128xf32> to vector<32x128xf32>
    %1326 = arith.addf %1323, %1325 : vector<32x128xf32>
    %1327 = arith.addf %1326, %971 : vector<32x128xf32>
    %1328 = arith.truncf %1327 : vector<32x128xf32> to vector<32x128xbf16>
    %c0_854 = arith.constant 0 : index
    %c0_855 = arith.constant 0 : index
    %1329 = vector.load %arg41[%c0_854, %c0_855] : memref<128x128xbf16, #tpu.memory_space<vmem>>, vector<128x128xbf16>
    %cst_856 = arith.constant dense<0.000000e+00> : vector<32x128xf32>
    %1330 = tpu.matmul %1328, %1329, %cst_856 {dimension_numbers = #tpu.dot_dimension_numbers<[1], [0], [0], [1], [0, 0, 1, 1], [], []>} : vector<32x128xbf16>, vector<128x128xbf16>, vector<32x128xf32> -> vector<32x128xf32>
    %c0_857 = arith.constant 0 : index
    %c0_858 = arith.constant 0 : index
    %1331 = vector.load %arg42[%c0_857, %c0_858] : memref<1x128xf32, #tpu.memory_space<vmem>>, vector<1x128xf32>
    %1332 = vector.broadcast %1331 : vector<1x128xf32> to vector<32x128xf32>
    %1333 = arith.mulf %1330, %1332 : vector<32x128xf32>
    %c0_859 = arith.constant 0 : index
    %c0_860 = arith.constant 0 : index
    %1334 = vector.load %arg43[%c0_859, %c0_860] : memref<1x128xf32, #tpu.memory_space<vmem>>, vector<1x128xf32>
    %1335 = vector.broadcast %1334 : vector<1x128xf32> to vector<32x128xf32>
    %1336 = arith.addf %1333, %1335 : vector<32x128xf32>
    %cst_861 = arith.constant 0.000000e+00 : f32
    %1337 = vector.broadcast %cst_861 : f32 to vector<32x128xf32>
    %1338 = arith.subf %1337, %1336 : vector<32x128xf32>
    %1339 = math.exp %1338 : vector<32x128xf32>
    %cst_862 = arith.constant 1.000000e+00 : f32
    %1340 = vector.broadcast %cst_862 : f32 to vector<32x128xf32>
    %1341 = arith.addf %1340, %1339 : vector<32x128xf32>
    %1342 = tpu.reciprocal %1341 {approx = true} : vector<32x128xf32> -> vector<32x128xf32>
    %1343 = arith.mulf %1336, %1342 : vector<32x128xf32>
    %1344 = vector.extract_strided_slice %1343 {offsets = [0, 0], sizes = [16, 128], strides = [1, 1]} : vector<32x128xf32> to vector<16x128xf32>
    %cst_863 = arith.constant dense<0.000000e+00> : vector<128xf32>
    %1345 = vector.multi_reduction <add>, %1344, %cst_863 [0] : vector<16x128xf32> to vector<128xf32>
    %1346 = vector.shape_cast %1345 : vector<128xf32> to vector<1x128xf32>
    %cst_864 = arith.constant 1.600000e+01 : f32
    %1347 = vector.broadcast %cst_864 : f32 to vector<1x128xf32>
    %1348 = arith.divf %1346, %1347 : vector<1x128xf32>
    %1349 = vector.extract_strided_slice %1343 {offsets = [16, 0], sizes = [16, 128], strides = [1, 1]} : vector<32x128xf32> to vector<16x128xf32>
    %cst_865 = arith.constant dense<0.000000e+00> : vector<128xf32>
    %1350 = vector.multi_reduction <add>, %1349, %cst_865 [0] : vector<16x128xf32> to vector<128xf32>
    %1351 = vector.shape_cast %1350 : vector<128xf32> to vector<1x128xf32>
    %cst_866 = arith.constant 1.600000e+01 : f32
    %1352 = vector.broadcast %cst_866 : f32 to vector<1x128xf32>
    %1353 = arith.divf %1351, %1352 : vector<1x128xf32>
    %1354 = tpu.concatenate %1348, %1353 in 0 : vector<1x128xf32>, vector<1x128xf32> -> vector<2x128xf32>
    %1355 = arith.truncf %1354 : vector<2x128xf32> to vector<2x128xbf16>
    %c0_867 = arith.constant 0 : index
    %c0_868 = arith.constant 0 : index
    %1356 = vector.load %arg44[%c0_867, %c0_868] : memref<128x128xbf16, #tpu.memory_space<vmem>>, vector<128x128xbf16>
    %cst_869 = arith.constant dense<0.000000e+00> : vector<2x128xf32>
    %1357 = tpu.matmul %1355, %1356, %cst_869 {dimension_numbers = #tpu.dot_dimension_numbers<[1], [0], [0], [1], [0, 0, 1, 1], [], []>} : vector<2x128xbf16>, vector<128x128xbf16>, vector<2x128xf32> -> vector<2x128xf32>
    %c0_870 = arith.constant 0 : index
    %c0_871 = arith.constant 0 : index
    %1358 = vector.load %arg45[%c0_870, %c0_871] : memref<1x128xf32, #tpu.memory_space<vmem>>, vector<1x128xf32>
    %1359 = vector.broadcast %1358 : vector<1x128xf32> to vector<2x128xf32>
    %1360 = arith.addf %1357, %1359 : vector<2x128xf32>
    %c0_872 = arith.constant 0 : index
    %c0_873 = arith.constant 0 : index
    %1361 = vector.load %arg46[%c0_872, %c0_873] : memref<2x128xf32, #tpu.memory_space<vmem>>, vector<2x128xf32>
    tpu.vector_store %arg46[%c0_872, %c0_873], %1360 {strides = array<i32>} : memref<2x128xf32, #tpu.memory_space<vmem>>, vector<2x128xf32>,
    return
  }
  func.func @transform_0(%arg0: i32) -> (i32, i32) {
    %c0_i32 = arith.constant 0 : i32
    %c0_i32_0 = arith.constant 0 : i32
    %c0_i32_1 = arith.constant 0 : i32
    return %c0_i32, %c0_i32_0 : i32, i32
  }
  func.func @transform_1(%arg0: i32) -> (i32, i32) {
    %c0_i32 = arith.constant 0 : i32
    %c0_i32_0 = arith.constant 0 : i32
    %c0_i32_1 = arith.constant 0 : i32
    return %c0_i32, %c0_i32_0 : i32, i32
  }
  func.func @transform_2(%arg0: i32) -> (i32, i32) {
    %c0_i32 = arith.constant 0 : i32
    %c0_i32_0 = arith.constant 0 : i32
    %c0_i32_1 = arith.constant 0 : i32
    return %c0_i32, %c0_i32_0 : i32, i32
  }
  func.func @transform_3(%arg0: i32) -> (i32, i32) {
    %c0_i32 = arith.constant 0 : i32
    %c0_i32_0 = arith.constant 0 : i32
    %c0_i32_1 = arith.constant 0 : i32
    return %c0_i32, %c0_i32_0 : i32, i32
  }
  func.func @transform_4(%arg0: i32) -> (i32, i32) {
    %c0_i32 = arith.constant 0 : i32
    %c0_i32_0 = arith.constant 0 : i32
    %c0_i32_1 = arith.constant 0 : i32
    return %c0_i32, %c0_i32_0 : i32, i32
  }
  func.func @transform_5(%arg0: i32) -> (i32, i32) {
    %c0_i32 = arith.constant 0 : i32
    %c0_i32_0 = arith.constant 0 : i32
    %c0_i32_1 = arith.constant 0 : i32
    return %c0_i32, %c0_i32_0 : i32, i32
  }
  func.func @transform_6(%arg0: i32) -> (i32, i32) {
    %c0_i32 = arith.constant 0 : i32
    %c0_i32_0 = arith.constant 0 : i32
    %c0_i32_1 = arith.constant 0 : i32
    return %c0_i32, %c0_i32_0 : i32, i32
  }
  func.func @transform_7(%arg0: i32) -> (i32, i32) {
    %c0_i32 = arith.constant 0 : i32
    %c0_i32_0 = arith.constant 0 : i32
    %c0_i32_1 = arith.constant 0 : i32
    return %c0_i32, %c0_i32_0 : i32, i32
  }
  func.func @transform_8(%arg0: i32) -> (i32, i32) {
    %c0_i32 = arith.constant 0 : i32
    %c0_i32_0 = arith.constant 0 : i32
    %c0_i32_1 = arith.constant 0 : i32
    return %c0_i32, %c0_i32_0 : i32, i32
  }
  func.func @transform_9(%arg0: i32) -> (i32, i32) {
    %c0_i32 = arith.constant 0 : i32
    %c0_i32_0 = arith.constant 0 : i32
    %c0_i32_1 = arith.constant 0 : i32
    return %c0_i32, %c0_i32_0 : i32, i32
  }
  func.func @transform_10(%arg0: i32) -> (i32, i32) {
    %c0_i32 = arith.constant 0 : i32
    %c0_i32_0 = arith.constant 0 : i32
    %c0_i32_1 = arith.constant 0 : i32
    return %c0_i32, %c0_i32_0 : i32, i32
  }
  func.func @transform_11(%arg0: i32) -> (i32, i32) {
    %c0_i32 = arith.constant 0 : i32
    %c0_i32_0 = arith.constant 0 : i32
    %c0_i32_1 = arith.constant 0 : i32
    return %c0_i32, %c0_i32_0 : i32, i32
  }
  func.func @transform_12(%arg0: i32) -> (i32, i32) {
    %c0_i32 = arith.constant 0 : i32
    %c0_i32_0 = arith.constant 0 : i32
    %c0_i32_1 = arith.constant 0 : i32
    return %c0_i32, %c0_i32_0 : i32, i32
  }
  func.func @transform_13(%arg0: i32) -> (i32, i32) {
    %c0_i32 = arith.constant 0 : i32
    %c0_i32_0 = arith.constant 0 : i32
    %c0_i32_1 = arith.constant 0 : i32
    return %c0_i32, %c0_i32_0 : i32, i32
  }
  func.func @transform_14(%arg0: i32) -> (i32, i32) {
    %c0_i32 = arith.constant 0 : i32
    %c0_i32_0 = arith.constant 0 : i32
    %c0_i32_1 = arith.constant 0 : i32
    return %c0_i32, %c0_i32_0 : i32, i32
  }
  func.func @transform_15(%arg0: i32) -> (i32, i32) {
    %c0_i32 = arith.constant 0 : i32
    %c0_i32_0 = arith.constant 0 : i32
    %c0_i32_1 = arith.constant 0 : i32
    return %c0_i32, %c0_i32_0 : i32, i32
  }
  func.func @transform_16(%arg0: i32) -> (i32, i32) {
    %c0_i32 = arith.constant 0 : i32
    %c0_i32_0 = arith.constant 0 : i32
    %c0_i32_1 = arith.constant 0 : i32
    return %c0_i32, %c0_i32_0 : i32, i32
  }
  func.func @transform_17(%arg0: i32) -> (i32, i32) {
    %c0_i32 = arith.constant 0 : i32
    %c0_i32_0 = arith.constant 0 : i32
    %c0_i32_1 = arith.constant 0 : i32
    return %c0_i32, %c0_i32_0 : i32, i32
  }
  func.func @transform_18(%arg0: i32) -> (i32, i32) {
    %c0_i32 = arith.constant 0 : i32
    %c0_i32_0 = arith.constant 0 : i32
    %c0_i32_1 = arith.constant 0 : i32
    return %c0_i32, %c0_i32_0 : i32, i32
  }
  func.func @transform_19(%arg0: i32) -> (i32, i32) {
    %c0_i32 = arith.constant 0 : i32
    %c0_i32_0 = arith.constant 0 : i32
    %c0_i32_1 = arith.constant 0 : i32
    return %c0_i32, %c0_i32_0 : i32, i32
  }
  func.func @transform_20(%arg0: i32) -> (i32, i32) {
    %c0_i32 = arith.constant 0 : i32
    %c0_i32_0 = arith.constant 0 : i32
    %c0_i32_1 = arith.constant 0 : i32
    return %c0_i32, %c0_i32_0 : i32, i32
  }
  func.func @transform_21(%arg0: i32) -> (i32, i32) {
    %c0_i32 = arith.constant 0 : i32
    %c0_i32_0 = arith.constant 0 : i32
    %c0_i32_1 = arith.constant 0 : i32
    return %c0_i32, %c0_i32_0 : i32, i32
  }
  func.func @transform_22(%arg0: i32) -> (i32, i32) {
    %c0_i32 = arith.constant 0 : i32
    %c0_i32_0 = arith.constant 0 : i32
    %c0_i32_1 = arith.constant 0 : i32
    return %c0_i32, %c0_i32_0 : i32, i32
  }
  func.func @transform_23(%arg0: i32) -> (i32, i32) {
    %c0_i32 = arith.constant 0 : i32
    %c0_i32_0 = arith.constant 0 : i32
    %c0_i32_1 = arith.constant 0 : i32
    return %c0_i32, %c0_i32_0 : i32, i32
  }
  func.func @transform_24(%arg0: i32) -> (i32, i32) {
    %c0_i32 = arith.constant 0 : i32
    %c0_i32_0 = arith.constant 0 : i32
    %c0_i32_1 = arith.constant 0 : i32
    return %c0_i32, %c0_i32_0 : i32, i32
  }
  func.func @transform_25(%arg0: i32) -> (i32, i32) {
    %c0_i32 = arith.constant 0 : i32
    %c0_i32_0 = arith.constant 0 : i32
    %c0_i32_1 = arith.constant 0 : i32
    return %c0_i32, %c0_i32_0 : i32, i32
  }
  func.func @transform_26(%arg0: i32) -> (i32, i32) {
    %c0_i32 = arith.constant 0 : i32
    %c0_i32_0 = arith.constant 0 : i32
    %c0_i32_1 = arith.constant 0 : i32
    return %c0_i32, %c0_i32_0 : i32, i32
  }
  func.func @transform_27(%arg0: i32) -> (i32, i32) {
    %c0_i32 = arith.constant 0 : i32
    %c0_i32_0 = arith.constant 0 : i32
    %c0_i32_1 = arith.constant 0 : i32
    return %c0_i32, %c0_i32_0 : i32, i32
  }
  func.func @transform_28(%arg0: i32) -> (i32, i32) {
    %c0_i32 = arith.constant 0 : i32
    %c0_i32_0 = arith.constant 0 : i32
    %c0_i32_1 = arith.constant 0 : i32
    return %c0_i32, %c0_i32_0 : i32, i32
  }
  func.func @transform_29(%arg0: i32) -> (i32, i32) {
    %c0_i32 = arith.constant 0 : i32
    %c0_i32_0 = arith.constant 0 : i32
    %c0_i32_1 = arith.constant 0 : i32
    return %c0_i32, %c0_i32_0 : i32, i32
  }
  func.func @transform_30(%arg0: i32) -> (i32, i32) {
    %c0_i32 = arith.constant 0 : i32
    %c0_i32_0 = arith.constant 0 : i32
    %c0_i32_1 = arith.constant 0 : i32
    return %c0_i32, %c0_i32_0 : i32, i32
  }
  func.func @transform_31(%arg0: i32) -> (i32, i32) {
    %c0_i32 = arith.constant 0 : i32
    %c0_i32_0 = arith.constant 0 : i32
    %c0_i32_1 = arith.constant 0 : i32
    return %c0_i32, %c0_i32_0 : i32, i32
  }
  func.func @transform_32(%arg0: i32) -> (i32, i32) {
    %c0_i32 = arith.constant 0 : i32
    %c0_i32_0 = arith.constant 0 : i32
    %c0_i32_1 = arith.constant 0 : i32
    return %c0_i32, %c0_i32_0 : i32, i32
  }
  func.func @transform_33(%arg0: i32) -> (i32, i32) {
    %c0_i32 = arith.constant 0 : i32
    %c0_i32_0 = arith.constant 0 : i32
    %c0_i32_1 = arith.constant 0 : i32
    return %c0_i32, %c0_i32_0 : i32, i32
  }
  func.func @transform_34(%arg0: i32) -> (i32, i32) {
    %c0_i32 = arith.constant 0 : i32
    %c0_i32_0 = arith.constant 0 : i32
    %c0_i32_1 = arith.constant 0 : i32
    return %c0_i32, %c0_i32_0 : i32, i32
  }
  func.func @transform_35(%arg0: i32) -> (i32, i32) {
    %c0_i32 = arith.constant 0 : i32
    %c0_i32_0 = arith.constant 0 : i32
    %c0_i32_1 = arith.constant 0 : i32
    return %c0_i32, %c0_i32_0 : i32, i32
  }
  func.func @transform_36(%arg0: i32) -> (i32, i32) {
    %c0_i32 = arith.constant 0 : i32
    %c0_i32_0 = arith.constant 0 : i32
    %c0_i32_1 = arith.constant 0 : i32
    return %c0_i32, %c0_i32_0 : i32, i32
  }
  func.func @transform_37(%arg0: i32) -> (i32, i32) {
    %c0_i32 = arith.constant 0 : i32
    %c0_i32_0 = arith.constant 0 : i32
    %c0_i32_1 = arith.constant 0 : i32
    return %c0_i32, %c0_i32_0 : i32, i32
  }
  func.func @transform_38(%arg0: i32) -> (i32, i32) {
    %c0_i32 = arith.constant 0 : i32
    %c0_i32_0 = arith.constant 0 : i32
    %c0_i32_1 = arith.constant 0 : i32
    return %c0_i32, %c0_i32_0 : i32, i32
  }
  func.func @transform_39(%arg0: i32) -> (i32, i32) {
    %c0_i32 = arith.constant 0 : i32
    %c0_i32_0 = arith.constant 0 : i32
    %c0_i32_1 = arith.constant 0 : i32
    return %c0_i32, %c0_i32_0 : i32, i32
  }
  func.func @transform_40(%arg0: i32) -> (i32, i32) {
    %c0_i32 = arith.constant 0 : i32
    %c0_i32_0 = arith.constant 0 : i32
    %c0_i32_1 = arith.constant 0 : i32
    return %c0_i32, %c0_i32_0 : i32, i32
  }
  func.func @transform_41(%arg0: i32) -> (i32, i32) {
    %c0_i32 = arith.constant 0 : i32
    %c0_i32_0 = arith.constant 0 : i32
    %c0_i32_1 = arith.constant 0 : i32
    return %c0_i32, %c0_i32_0 : i32, i32
  }
  func.func @transform_42(%arg0: i32) -> (i32, i32) {
    %c0_i32 = arith.constant 0 : i32
    %c0_i32_0 = arith.constant 0 : i32
    %c0_i32_1 = arith.constant 0 : i32
    return %c0_i32, %c0_i32_0 : i32, i32
  }
  func.func @transform_43(%arg0: i32) -> (i32, i32) {
    %c0_i32 = arith.constant 0 : i32
    %c0_i32_0 = arith.constant 0 : i32
    %c0_i32_1 = arith.constant 0 : i32
    return %c0_i32, %c0_i32_0 : i32, i32
  }
  func.func @transform_44(%arg0: i32) -> (i32, i32) {
    %c0_i32 = arith.constant 0 : i32
    %c0_i32_0 = arith.constant 0 : i32
    %c0_i32_1 = arith.constant 0 : i32
    return %c0_i32, %c0_i32_0 : i32, i32
  }
  func.func @transform_45(%arg0: i32) -> (i32, i32) {
    %c0_i32 = arith.constant 0 : i32
    %c0_i32_0 = arith.constant 0 : i32
    %c0_i32_1 = arith.constant 0 : i32
    return %c0_i32, %c0_i32_0 : i32, i32
  }
}

</mosaic_0001>

<bundles_post_ra>
// kernel: efficientnet_forward.1
= control target key start
LH: loop header
LB: loop body
LE: loop exit
PB: predicated region body
PF: predicated region fallthrough
CT: control target
= control target key end

     0   :  { %s6725_s6 = smov 1   ;;  %s6726_s10 = smov 2   ;;  %s8914_s0 = inlined_call_operand.smem [shape: u32[46], index: -1, kind: input, shape index: {}] }
   0x1   :  { %s6785_s5 = sld [smem:[%s8914_s0]]   ;;  %s6727_s14 = smov 3  }
   0x2   :  { %s6790_s9 = sld [smem:[%s8914_s0 + %s6725_s6]]   ;;  %s6728_s18 = smov 4  }
   0x3   :  { %s6795_s13 = sld [smem:[%s8914_s0 + %s6726_s10]]   ;;  %s6729_s22 = smov 5  }
   0x4   :  { %s6800_s17 = sld [smem:[%s8914_s0 + %s6727_s14]]   ;;  %s6730_s26 = smov 6  }
   0x5   :  { %s6805_s21 = sld [smem:[%s8914_s0 + %s6728_s18]]   ;;  %s6731_s30 = smov 7  }
   0x6   :  { %s6810_s25 = sld [smem:[%s8914_s0 + %s6729_s22]]   ;;  %s6732_s4 = smov 8  }
   0x7   :  { %s6815_s29 = sld [smem:[%s8914_s0 + %s6730_s26]]   ;;  %s6733_s10 = smov 9  }
   0x8   :  { %s6820_s3 = sld [smem:[%s8914_s0 + %s6731_s30]]   ;;  %s6734_s15 = smov 10  }
   0x9   :  { %s6825_s8 = sld [smem:[%s8914_s0 + %s6732_s4]]   ;;  %s6735_s20 = smov 11  }
   0xa   :  { %s6830_s14 = sld [smem:[%s8914_s0 + %s6733_s10]]   ;;  %s6736_s26 = smov 12  }
   0xb   :  { %s6835_s19 = sld [smem:[%s8914_s0 + %s6734_s15]]   ;;  %s6737_s1 = smov 13  }
   0xc   :  { %s6840_s24 = sld [smem:[%s8914_s0 + %s6735_s20]]   ;;  %s6738_s7 = smov 14  }
   0xd   :  { %s6845_s30 = sld [smem:[%s8914_s0 + %s6736_s26]]   ;;  %s6739_s15 = smov 15  }
   0xe   :  { %s6850_s6 = sld [smem:[%s8914_s0 + %s6737_s1]]   ;;  %s6740_s22 = smov 16  }
   0xf   :  { %s6855_s12 = sld [smem:[%s8914_s0 + %s6738_s7]]   ;;  %s6741_s28 = smov 17  }
  0x10   :  { %s6860_s20 = sld [smem:[%s8914_s0 + %s6739_s15]]   ;;  %s6742_s7 = smov 18  }
  0x11   :  { %8951 = sst [smem:[#allocation18_spill]] %s6835_s19  ;;  %s6743_s15 = smov 19  }
  0x12   :  { %s6865_s27 = sld [smem:[%s8914_s0 + %s6740_s22]]   ;;  %s6744_s22 = smov 20  }
  0x13   :  { %8952 = sst [smem:[#allocation19_spill]] %s6845_s30 }
  0x14   :  { %8953 = sst [smem:[#allocation20_spill]] %s6850_s6 }
  0x15   :  { %s6870_s4 = sld [smem:[%s8914_s0 + %s6741_s28]]   ;;  %s6745_s28 = smov 21  }
  0x16   :  { %8954 = sst [smem:[#allocation21_spill]] %s6860_s20 }
  0x17   :  { %s6875_s6 = sld [smem:[%s8914_s0 + %s6742_s7]]   ;;  %s6746_s7 = smov 22  }
  0x18   :  { %8955 = sst [smem:[#allocation22_spill]] %s6865_s27 }
  0x19   :  { %s6880_s20 = sld [smem:[%s8914_s0 + %s6743_s15]]   ;;  %s6747_s15 = smov 23  }
  0x1a   :  { %s6885_s27 = sld [smem:[%s8914_s0 + %s6744_s22]]   ;;  %s6748_s22 = smov 24  }
  0x1b   :  { %8956 = sst [smem:[#allocation23_spill]] %s6870_s4 }
  0x1c   :  { %s6890_s4 = sld [smem:[%s8914_s0 + %s6745_s28]]   ;;  %s6749_s28 = smov 25  }
  0x1d   :  { %8957 = sst [smem:[#allocation24_spill]] %s6875_s6 }
  0x1e   :  { %s6895_s6 = sld [smem:[%s8914_s0 + %s6746_s7]]   ;;  %s6750_s7 = smov 26  }
  0x1f   :  { %8958 = sst [smem:[#allocation25_spill]] %s6880_s20 }
  0x20   :  { %8959 = sst [smem:[#allocation26_spill]] %s6885_s27 }
  0x21   :  { %s6900_s20 = sld [smem:[%s8914_s0 + %s6747_s15]]   ;;  %s6751_s15 = smov 27  }
  0x22   :  { %8960 = sst [smem:[#allocation27_spill]] %s6890_s4 }
  0x23   :  { %s6905_s27 = sld [smem:[%s8914_s0 + %s6748_s22]]   ;;  %s6752_s22 = smov 28  }
  0x24   :  { %8961 = sst [smem:[#allocation28_spill]] %s6895_s6 }
  0x25   :  { %s6910_s4 = sld [smem:[%s8914_s0 + %s6749_s28]]   ;;  %s6753_s28 = smov 29  }
  0x26   :  { %s6915_s6 = sld [smem:[%s8914_s0 + %s6750_s7]]   ;;  %s6754_s7 = smov 30  }
  0x27   :  { %8962 = sst [smem:[#allocation29_spill]] %s6900_s20 }
  0x28   :  { %s6920_s20 = sld [smem:[%s8914_s0 + %s6751_s15]]   ;;  %s6755_s15 = smov 31  }
  0x29   :  { %8963 = sst [smem:[#allocation30_spill]] %s6905_s27 }
  0x2a   :  { %s6925_s27 = sld [smem:[%s8914_s0 + %s6752_s22]]   ;;  %s6756_s22 = smov 32  }
  0x2b   :  { %8964 = sst [smem:[#allocation31_spill]] %s6910_s4 }
  0x2c   :  { %8965 = sst [smem:[#allocation32_spill]] %s6915_s6 }
  0x2d   :  { %s6930_s4 = sld [smem:[%s8914_s0 + %s6753_s28]]   ;;  %s6757_s28 = smov 33  }
  0x2e   :  { %8966 = sst [smem:[#allocation33_spill]] %s6920_s20 }
  0x2f   :  { %s6935_s6 = sld [smem:[%s8914_s0 + %s6754_s7]]   ;;  %s6758_s7 = smov 34  }
  0x30   :  { %8967 = sst [smem:[#allocation34_spill]] %s6925_s27 }
  0x31   :  { %s6940_s20 = sld [smem:[%s8914_s0 + %s6755_s15]]   ;;  %s6759_s15 = smov 35  }
  0x32   :  { %s6945_s27 = sld [smem:[%s8914_s0 + %s6756_s22]]   ;;  %s6760_s22 = smov 36  }
  0x33   :  { %8968 = sst [smem:[#allocation35_spill]] %s6930_s4 }
  0x34   :  { %s6950_s4 = sld [smem:[%s8914_s0 + %s6757_s28]]   ;;  %s6761_s28 = smov 37  }
  0x35   :  { %8969 = sst [smem:[#allocation36_spill]] %s6935_s6 }
  0x36   :  { %s6955_s6 = sld [smem:[%s8914_s0 + %s6758_s7]]   ;;  %s6762_s7 = smov 38  }
  0x37   :  { %8970 = sst [smem:[#allocation37_spill]] %s6940_s20 }
  0x38   :  { %8971 = sst [smem:[#allocation38_spill]] %s6945_s27 }
  0x39   :  { %s6960_s20 = sld [smem:[%s8914_s0 + %s6759_s15]]   ;;  %s6763_s15 = smov 39  }
  0x3a   :  { %8972 = sst [smem:[#allocation39_spill]] %s6950_s4 }
  0x3b   :  { %s6965_s27 = sld [smem:[%s8914_s0 + %s6760_s22]]   ;;  %s6764_s22 = smov 40  }
  0x3c   :  { %8973 = sst [smem:[#allocation40_spill]] %s6955_s6 }
  0x3d   :  { %s6970_s4 = sld [smem:[%s8914_s0 + %s6761_s28]]   ;;  %s6765_s28 = smov 41  }
  0x3e   :  { %s6975_s6 = sld [smem:[%s8914_s0 + %s6762_s7]]   ;;  %s6766_s7 = smov 42  }
  0x3f   :  { %8974 = sst [smem:[#allocation41_spill]] %s6960_s20 }
  0x40   :  { %s6980_s20 = sld [smem:[%s8914_s0 + %s6763_s15]]   ;;  %s6767_s15 = smov 43  }
  0x41   :  { %8975 = sst [smem:[#allocation42_spill]] %s6965_s27 }
  0x42   :  { %s6985_s27 = sld [smem:[%s8914_s0 + %s6764_s22]]   ;;  %s6768_s22 = smov 44  }
  0x43   :  { %8976 = sst [smem:[#allocation43_spill]] %s6970_s4 }
  0x44   :  { %8977 = sst [smem:[#allocation44_spill]] %s6975_s6 }
  0x45   :  { %s6990_s4 = sld [smem:[%s8914_s0 + %s6765_s28]]   ;;  %s6769_s28 = smov 45  }
  0x46   :  { %s6995_s6 = sld [smem:[%s8914_s0 + %s6766_s7]]  }
  0x47   :  { %s7000_s30 = sld [smem:[%s8914_s0 + %s6767_s15]]  }
  0x48   :  { %8978 = sst [smem:[#allocation45_spill]] %s6985_s27 }
  0x49   :  { %s7005_s27 = sld [smem:[%s8914_s0 + %s6768_s22]]  }
  0x4a   :  { %s7010_s19 = sld [smem:[%s8914_s0 + %s6769_s28]]  }
  0x4b   :  { %96 = vsyncpa [#allocation9], 0 }
  0x4c   :  { %97 = vsyncpa [#allocation11], 0 }
  0x4d   :  { %98 = vsyncpa [#allocation14], 0  ;;  %s6770_s7 = smov [#allocation10]   ;;  %s6771_s11 = smov [#allocation8]  }
  0x4e   :  { %s195_s10 = sshll.u32 %s6770_s7, 4  ;;  %s183_s15 = sshll.u32 %s6771_s11, 4  ;;  %s196_s10 = int_to_ptr.vmem [resolvable:$true] %s195_s10  ;;  %s184_s15 = int_to_ptr.vmem [resolvable:$true] %s183_s15 }
  0x4f   :  { %s6631_s16 = scalar_lea.hbm %s6990_s4, 16 }
  0x50   :  { %p6632_p0 = scmp.ne.s32.totalorder %s6990_s4, %s6631_s16  ;;  %p6635_p1 = scmp.lt.u32.totalorder %s6631_s16, %s6990_s4 }
  0x52   :  { %p6637_p2 = pnand %p6635_p1, %p6632_p0 }
  0x54   :  { %6640 = shalt.err (!%p6637_p2)
}
  0x55   :  { %s6641_s18 = scalar_lea.vmem %s196_s10, 16  ;;  %s6645_s0 = scalar_lea.vmem %s196_s10, 32 }
  0x56   :  { %p6642_p3 = scmp.ne.s32.totalorder %s196_s10, %s6641_s18  ;;  %p6646_p4 = scmp.lt.s32.totalorder %s196_s10, %s196_s10 }
  0x57   :  { %p6647_p5 = scmp.lt.s32.totalorder %s6645_s0, %s6641_s18 }
  0x59   :  { %p6648_p6 = por %p6647_p5, %p6646_p4 }
  0x5b   :  { %p6649_p7 = pnand %p6648_p6, %p6642_p3 }
  0x5d   :  { %6652 = shalt.err (!%p6649_p7)
}
  0x5e   :  { %198 = dma.hbm_to_vmem [thread:$0]  %s6990_s4, 16, %s196_s10, [#allocation11]  }
  0x5f   :  { %s6653_s22 = scalar_lea.hbm %s6980_s20, 16 }
  0x60   :  { %p6654_p8 = scmp.ne.s32.totalorder %s6980_s20, %s6653_s22  ;;  %p6657_p9 = scmp.lt.u32.totalorder %s6653_s22, %s6980_s20 }
  0x62   :  { %p6659_p10 = pnand %p6657_p9, %p6654_p8 }
  0x64   :  { %6662 = shalt.err (!%p6659_p10)
}
  0x65   :  { %s6663_s23 = scalar_lea.vmem %s184_s15, 16  ;;  %s6667_s26 = scalar_lea.vmem %s184_s15, 32 }
  0x66   :  { %p6664_p11 = scmp.ne.s32.totalorder %s184_s15, %s6663_s23  ;;  %p6668_p12 = scmp.lt.s32.totalorder %s184_s15, %s184_s15 }
  0x67   :  { %p6669_p13 = scmp.lt.s32.totalorder %s6667_s26, %s6663_s23 }
  0x69   :  { %p6670_p0 = por %p6669_p13, %p6668_p12 }
  0x6b   :  { %p6671_p1 = pnand %p6670_p0, %p6664_p11 }
  0x6d   :  { %6674 = shalt.err (!%p6671_p1)
}
  0x6e   :  { %186 = dma.hbm_to_vmem [thread:$0]  %s6980_s20, 16, %s184_s15, [#allocation9]  }
  0x6f   :  { %s6772_s28 = smov [#allocation12]   ;;  %s6773_s1 = smov [#allocation13]  }
  0x70   :  { %s205_s4 = sshll.u32 %s6772_s28, 4  ;;  %s217_s2 = sshll.u32 %s6773_s1, 4  ;;  %s206_s4 = int_to_ptr.vmem [resolvable:$true] %s205_s4  ;;  %s218_s2 = int_to_ptr.vmem [resolvable:$true] %s217_s2 }
  0x71   :  { %s6675_s7 = scalar_lea.hbm %s6995_s6, 16 }
  0x72   :  { %p6676_p2 = scmp.ne.s32.totalorder %s6995_s6, %s6675_s7  ;;  %p6679_p3 = scmp.lt.u32.totalorder %s6675_s7, %s6995_s6 }
  0x74   :  { %p6681_p4 = pnand %p6679_p3, %p6676_p2 }
  0x76   :  { %6684 = shalt.err (!%p6681_p4)
}
  0x77   :  { %s6685_s10 = scalar_lea.vmem %s206_s4, 16  ;;  %s6689_s11 = scalar_lea.vmem %s206_s4, 32 }
  0x78   :  { %p6686_p5 = scmp.ne.s32.totalorder %s206_s4, %s6685_s10  ;;  %p6690_p6 = scmp.lt.s32.totalorder %s206_s4, %s206_s4 }
  0x79   :  { %p6691_p7 = scmp.lt.s32.totalorder %s6689_s11, %s6685_s10 }
  0x7b   :  { %p6692_p8 = por %p6691_p7, %p6690_p6 }
  0x7d   :  { %p6693_p9 = pnand %p6692_p8, %p6686_p5 }
  0x7f   :  { %6696 = shalt.err (!%p6693_p9)
}
  0x80   :  { %208 = dma.hbm_to_vmem [thread:$0]  %s6995_s6, 16, %s206_s4, [#allocation11]  }
  0x81   :  { %s6697_s20 = scalar_lea.hbm %s7005_s27, 16 }
  0x82   :  { %p6698_p10 = scmp.ne.s32.totalorder %s7005_s27, %s6697_s20  ;;  %p6701_p11 = scmp.lt.u32.totalorder %s6697_s20, %s7005_s27 }
  0x84   :  { %p6703_p12 = pnand %p6701_p11, %p6698_p10 }
  0x86   :  { %6706 = shalt.err (!%p6703_p12)
}
  0x87   :  { %s6707_s15 = scalar_lea.vmem %s218_s2, 16  ;;  %s6711_s16 = scalar_lea.vmem %s218_s2, 32 }
  0x88   :  { %p6708_p13 = scmp.ne.s32.totalorder %s218_s2, %s6707_s15  ;;  %p6712_p0 = scmp.lt.s32.totalorder %s218_s2, %s218_s2 }
  0x89   :  { %p6713_p1 = scmp.lt.s32.totalorder %s6711_s16, %s6707_s15 }
  0x8b   :  { %p6714_p2 = por %p6713_p1, %p6712_p0 }
  0x8d   :  { %p6715_p3 = pnand %p6714_p2, %p6708_p13 }
  0x8f   :  { %6718 = shalt.err (!%p6715_p3)
}
  0x90   :  { %220 = dma.hbm_to_vmem [thread:$0]  %s7005_s27, 16, %s218_s2, [#allocation14]  }
  0x91   :  { %6719 = dma.done.wait [#allocation9], 16  }
  0x92   :  { %6720 = vsyncadd [#allocation9], 4294967280 }
  0x93   :  { %6721 = dma.done.wait [#allocation11], 32  }
  0x94   :  { %6722 = vsyncadd [#allocation11], 4294967264 }
  0x95   :  { %6723 = dma.done.wait [#allocation14], 16  }
  0x96   :  { %6724 = vsyncadd [#allocation14], 4294967280  ;;  %v6128_v0 = vld [vmem:[%s6790_s9] sm:$0xff]   ;;  %v6129_v1 = vld [vmem:[%s6790_s9 + $0x8] sm:$0xff]   ;;  %v6774_v16 = vmov 0.0   ;;  %vm6775_vm0 = vmmov 0  }
  0x97   :  { %5840 = vmatprep.subr.bf16.mxu0 %v6128_v0  ;;  %v6130_v2 = vld [vmem:[%s6790_s9 + $0x10] sm:$0xff]   ;;  %v6131_v3 = vld [vmem:[%s6790_s9 + $0x18] sm:$0xff]   ;;  %v6136_v4 = vld [vmem:[%s6785_s5] sm:$0xff]   ;;  %606 = vst [vmem:[#allocation2 + $0x1d] sm:$0x3] %v6774_v16  ;;  %5872 = vmatprep.subr.bf16.mxu1 %v6774_v16  ;;  %vm1303_vm1 = vcmask 1040384  }
  0x98   :  { %5841 = vmatpush3.bf16.msra.mxu0 %v6128_v0  ;;  %5856 = vmatprep.mubr.bf16.mxu0 %v6136_v4  ;;  %v6132_v5 = vld [vmem:[%s6790_s9 + $0x20] sm:$0xff]   ;;  %v6133_v6 = vld [vmem:[%s6790_s9 + $0x28] sm:$0xff]   ;;  %v6134_v7 = vld [vmem:[%s6790_s9 + $0x30] sm:$0xff]   ;;  %608 = vst [vmem:[#allocation2 + $0x27] sm:$0x3] %v6774_v16  ;;  %s9028_s6 = sld [smem:[#allocation30_spill]] }
  0x99   :  { %5842 = vmatprep.subr.bf16.mxu0 %v6129_v1  ;;  %v6135_v8 = vld [vmem:[%s6790_s9 + $0x38] sm:$0xff]   ;;  %v6137_v9 = vld [vmem:[%s6785_s5 + $0x8] sm:$0xff]   ;;  %v6138_v10 = vld [vmem:[%s6785_s5 + $0x10] sm:$0xff]   ;;  %601 = vst [vmem:[#allocation2] sm:$0xff] %v6774_v16  ;;  %5888 = vmatprep.mubr.msk.bf16.mxu1 %vm6775_vm0, %v6774_v16  ;;  %s9018_s9 = sld [smem:[#allocation19_spill]]  ;;  %s9030_s27 = sld [smem:[#allocation29_spill]] }
  0x9a   :  { %v6139_v11 = vld [vmem:[%s6785_s5 + $0x18] sm:$0xff]   ;;  %v6140_v12 = vld [vmem:[%s6785_s5 + $0x20] sm:$0xff]   ;;  %v6141_v13 = vld [vmem:[%s6785_s5 + $0x28] sm:$0xff]   ;;  %602 = vst [vmem:[#allocation2 + $0x8] sm:$0x7] %v6774_v16  ;;  %s9031_s18 = sld [smem:[#allocation31_spill]] }
  0x9b   :  { %v6142_v14 = vld [vmem:[%s6785_s5 + $0x30] sm:$0xff]   ;;  %v6143_v15 = vld [vmem:[%s6785_s5 + $0x38] sm:$0xff]   ;;  %604 = vst [vmem:[#allocation2 + $0x13] sm:$0x3] %v6774_v16  ;;  %610 = vst [vmem:[#allocation2 + $0x31] sm:$0x3] %v6774_v16 }
  0x9c   :  { %5843 = vmatpush3.bf16.msra.mxu0 %v6129_v1  ;;  %612 = vst [vmem:[#allocation2 + $0x3b] sm:$0x3] %v6774_v16  ;;  %614 = vst [vmem:[#allocation2 + $0x45] sm:$0x3] %v6774_v16  ;;  %v6144_v17 = vld [vmem:[%s6820_s3] sm:$0xff]   ;;  %v6145_v18 = vld [vmem:[%s6820_s3 + $0x8] sm:$0xff]  }
  0x9d   :  { %5844 = vmatprep.subr.bf16.mxu0 %v6130_v2  ;;  %616 = vst [vmem:[#allocation2 + $0x4f] sm:$0x3] %v6774_v16  ;;  %618 = vst [vmem:[#allocation2 + $0x59] sm:$0xff] %v6774_v16  ;;  %5873 = vmatpush3.bf16.msra.mxu1 %v6144_v17  ;;  %v6146_v19 = vld [vmem:[%s6820_s3 + $0x10] sm:$0xff]   ;;  %v6147_v20 = vld [vmem:[%s6820_s3 + $0x18] sm:$0xff]   ;;  %s9015_s5 = sld [smem:[#allocation18_spill]] }
  0x9e   :  { %619 = vst [vmem:[#allocation2 + $0x61] sm:$0x7] %v6774_v16  ;;  %620 = vst [vmem:[#allocation2 + $0x64] sm:$0xff] %v6774_v16  ;;  %5874 = vmatprep.subr.bf16.mxu1 %v6774_v16  ;;  %v6148_v21 = vld [vmem:[%s6820_s3 + $0x20] sm:$0xff]   ;;  %v6149_v22 = vld [vmem:[%s6820_s3 + $0x28] sm:$0xff]   ;;  %s9032_s0 = sld [smem:[#allocation32_spill]] }
  0x9f   :  { %621 = vst [vmem:[#allocation2 + $0x6c] sm:$0x7] %v6774_v16  ;;  %623 = vst [vmem:[#allocation2 + $0x77] sm:$0x3] %v6774_v16  ;;  %v6150_v23 = vld [vmem:[%s6820_s3 + $0x30] sm:$0xff]   ;;  %v6151_v24 = vld [vmem:[%s6820_s3 + $0x38] sm:$0xff]  }
  0xa0   :  { %5845 = vmatpush3.bf16.msra.mxu0 %v6130_v2  ;;  %625 = vst [vmem:[#allocation2 + $0x81] sm:$0x3] %v6774_v16  ;;  %627 = vst [vmem:[#allocation2 + $0x8b] sm:$0x3] %v6774_v16  ;;  %v7134_v25 = vld [vmem:[%s6795_s13] ss:$0 sm:$0xff] }
  0xa1   :  { %5846 = vmatprep.subr.bf16.mxu0 %v6131_v3  ;;  %629 = vst [vmem:[#allocation2 + $0x95] sm:$0x3] %v6774_v16  ;;  %631 = vst [vmem:[#allocation2 + $0x9f] sm:$0x3] %v6774_v16  ;;  %5875 = vmatpush3.bf16.msra.mxu1 %v6145_v18  ;;  %v7137_v27 = vld [vmem:[%s6800_s17] ss:$0 sm:$0xff] }
  0xa2   :  { %633 = vst [vmem:[#allocation2 + $0xa9] sm:$0x3] %v6774_v16  ;;  %635 = vst [vmem:[#allocation2 + $0xb3] sm:$0x3] %v6774_v16  ;;  %5876 = vmatprep.subr.bf16.mxu1 %v6774_v16  ;;  %s9019_s13 = sld [smem:[#allocation20_spill]]  ;;  %s9020_s17 = sld [smem:[#allocation26_spill]] }
  0xa3   :  { %637 = vst [vmem:[#allocation2 + $0xbd] sm:$0xff] %v6774_v16  ;;  %638 = vst [vmem:[#allocation2 + $0xc5] sm:$0x7] %v6774_v16  ;;  %s9024_s3 = sld [smem:[#allocation24_spill]]  ;;  %s9033_s22 = sld [smem:[#allocation34_spill]]  ;;  %vm3511_vm2 = vcmask 1046528  }
  0xa4   :  { %5847 = vmatpush3.bf16.msra.mxu0 %v6131_v3  ;;  %2107 = vst [vmem:[#allocation4 + $0x8] sm:$0x1] %v6774_v16  ;;  %2109 = vst [vmem:[#allocation4 + $0x11] sm:$0x1] %v6774_v16  ;;  %s9034_s23 = sld [smem:[#allocation35_spill]]  ;;  %s9037_s26 = sld [smem:[#allocation36_spill]] }
  0xa5   :  { %5848 = vmatprep.subr.bf16.mxu0 %v6132_v5  ;;  %2111 = vst [vmem:[#allocation4 + $0x1a] sm:$0x1] %v6774_v16  ;;  %2113 = vst [vmem:[#allocation4 + $0x23] sm:$0x1] %v6774_v16  ;;  %5877 = vmatpush3.bf16.msra.mxu1 %v6146_v19  ;;  %vm3841_vm3 = vcmask 1043456   ;;  %vm3638_vm4 = vcmask 1045504  }
  0xa6   :  { %2115 = vst [vmem:[#allocation4 + $0x2c] sm:$0x1] %v6774_v16  ;;  %2117 = vst [vmem:[#allocation4 + $0x35] sm:$0x1] %v6774_v16  ;;  %5878 = vmatprep.subr.bf16.mxu1 %v6774_v16  ;;  %vm3456_vm5 = vcmask 1042432   ;;  %vm3393_vm6 = vcmask 1041408  }
  0xa7   :  { %2119 = vst [vmem:[#allocation4 + $0x3e] sm:$0x1] %v6774_v16  ;;  %2121 = vst [vmem:[#allocation4 + $0x47] sm:$0xff] %v6774_v16  ;;  %s9047_s28 = sld [smem:[#allocation39_spill]]  ;;  %s9049_s4 = sld [smem:[#allocation37_spill]] }
  0xa8   :  { %5849 = vmatpush3.bf16.msra.mxu0 %v6132_v5  ;;  %2122 = vst [vmem:[#allocation4 + $0x4f] sm:$0x3] %v6774_v16  ;;  %2124 = vst [vmem:[#allocation4 + $0x59] sm:$0x1] %v6774_v16  ;;  %s9051_s1 = sld [smem:[#allocation38_spill]]  ;;  %s9069_s2 = sld [smem:[#allocation41_spill]] }
  0xa9   :  { %5850 = vmatprep.subr.bf16.mxu0 %v6133_v6  ;;  %2126 = vst [vmem:[#allocation4 + $0x62] sm:$0x1] %v6774_v16  ;;  %2128 = vst [vmem:[#allocation4 + $0x6b] sm:$0x1] %v6774_v16  ;;  %5879 = vmatpush3.bf16.msra.mxu1 %v6147_v20  ;;  %s9070_s7 = sld [smem:[#allocation40_spill]]  ;;  %s9071_s10 = sld [smem:[#allocation43_spill]] }
  0xaa   :  { %2130 = vst [vmem:[#allocation4 + $0x74] sm:$0x1] %v6774_v16  ;;  %2132 = vst [vmem:[#allocation4 + $0x7d] sm:$0x1] %v6774_v16  ;;  %5880 = vmatprep.subr.bf16.mxu1 %v6774_v16  ;;  %s9072_s11 = sld [smem:[#allocation45_spill]]  ;;  %s9073_s20 = sld [smem:[#allocation42_spill]] }
  0xab   :  { %2134 = vst [vmem:[#allocation4 + $0x86] sm:$0x1] %v6774_v16  ;;  %2136 = vst [vmem:[#allocation4 + $0x8f] sm:$0x1] %v6774_v16  ;;  %s9076_s15 = sld [smem:[#allocation44_spill]] }
  0xac   :  { %5851 = vmatpush3.bf16.msra.mxu0 %v6133_v6  ;;  %2138 = vst [vmem:[#allocation4 + $0x98] sm:$0xff] %v6774_v16  ;;  %2139 = vst [vmem:[#allocation4 + $0xa0] sm:$0x3] %v6774_v16 }
  0xad   :  { %5852 = vmatprep.subr.bf16.mxu0 %v6134_v7  ;;  %3145 = vst [vmem:[#allocation6] sm:$0x7f] %v6774_v16  ;;  %3146 = vst [vmem:[#allocation6 + $0x8] sm:$0x7f] %v6774_v16  ;;  %5881 = vmatpush3.bf16.msra.mxu1 %v6148_v21 }
  0xae   :  { %3157 = vst [vmem:[#allocation6 + $0x10] sm:$0x18] %v6774_v16  ;;  %3158 = vst [vmem:[#allocation6 + $0x18] sm:$0x18] %v6774_v16  ;;  %5882 = vmatprep.subr.bf16.mxu1 %v6774_v16 }
  0xaf   :  { %3167 = vst [vmem:[#allocation6 + $0x20] sm:$0x6] %v6774_v16  ;;  %3168 = vst [vmem:[#allocation6 + $0x28] sm:$0x6] %v6774_v16 }
  0xb0   :  { %5853 = vmatpush3.bf16.msra.mxu0 %v6134_v7  ;;  %3177 = vst [vmem:[#allocation6 + $0x20] sm:$0x80] %v6774_v16  ;;  %3178 = vst [vmem:[#allocation6 + $0x28] sm:$0x80] %v6774_v16 }
  0xb1   :  { %5854 = vmatprep.subr.bf16.mxu0 %v6135_v8  ;;  %3179 = vst [vmem:[#allocation6 + $0x30] sm:$0x1] %v6774_v16  ;;  %3180 = vst [vmem:[#allocation6 + $0x38] sm:$0x1] %v6774_v16  ;;  %5883 = vmatpush3.bf16.msra.mxu1 %v6149_v22 }
  0xb2   :  { %3187 = vst [vmem:[#allocation6 + $0x30] sm:$0xe0] %v6774_v16  ;;  %3188 = vst [vmem:[#allocation6 + $0x38] sm:$0xe0] %v6774_v16  ;;  %5884 = vmatprep.subr.bf16.mxu1 %v6774_v16 }
  0xb3   :  { %3189 = vst [vmem:[#allocation6 + $0x40] sm:$0xf] %v6774_v16  ;;  %3190 = vst [vmem:[#allocation6 + $0x48] sm:$0xf] %v6774_v16 }
  0xb4   :  { %5855 = vmatpush3.bf16.msra.mxu0 %v6135_v8  ;;  %3191 = vst [vmem:[#allocation6 + $0x40] sm:$0xf0] %v6774_v16  ;;  %3192 = vst [vmem:[#allocation6 + $0x48] sm:$0xf0] %v6774_v16 }
  0xb5   :  { %3193 = vst [vmem:[#allocation6 + $0x50] sm:$0x7] %v6774_v16  ;;  %3194 = vst [vmem:[#allocation6 + $0x58] sm:$0x7] %v6774_v16  ;;  %5892 = vmatprep.subr.bf16.mxu0 %v6774_v16  ;;  %5885 = vmatpush3.bf16.msra.mxu1 %v6150_v23 }
  0xb6   :  { %3203 = vst [vmem:[#allocation6 + $0x50] sm:$0x80] %v6774_v16  ;;  %3204 = vst [vmem:[#allocation6 + $0x58] sm:$0x80] %v6774_v16  ;;  %5886 = vmatprep.subr.bf16.mxu1 %v6774_v16 }
  0xb7   :  { %5857 = vmatmul.mubr.bf16.vlgmr.msra.gmra.mrb[0].mxu0 %v6137_v9  ;;  %3205 = vst [vmem:[#allocation6 + $0x60] sm:$0x1] %v6774_v16  ;;  %3206 = vst [vmem:[#allocation6 + $0x68] sm:$0x1] %v6774_v16 }
  0xb8   :  { %5860 = vmatprep.mubr.bf16.mxu0 %v6138_v10  ;;  %3213 = vst [vmem:[#allocation6 + $0x60] sm:$0x60] %v6774_v16  ;;  %3214 = vst [vmem:[#allocation6 + $0x68] sm:$0x60] %v6774_v16 }
  0xb9   :  { %3225 = vst [vmem:[#allocation6 + $0x70] sm:$0x18] %v6774_v16  ;;  %3226 = vst [vmem:[#allocation6 + $0x78] sm:$0x18] %v6774_v16  ;;  %5887 = vmatpush3.bf16.msra.mxu1 %v6151_v24  ;;  %v7198_v24 = vld [vmem:[%s6805_s21] ss:$0 sm:$0xff] }
  0xba   :  { %3235 = vst [vmem:[#allocation6 + $0x80] sm:$0xfe] %v6774_v16  ;;  %3236 = vst [vmem:[#allocation6 + $0x88] sm:$0xfe] %v6774_v16 }
  0xbf   :  { %5861 = vmatmul.mubr.bf16.gmra.mrb[4].mxu0 %v6139_v11 }
  0xc0   :  { %5864 = vmatprep.mubr.bf16.mxu0 %v6140_v12 }
  0xc7   :  { %5865 = vmatmul.mubr.bf16.gmra.mrb[8].mxu0 %v6141_v13 }
  0xc8   :  { %5868 = vmatprep.mubr.bf16.mxu0 %v6142_v14 }
  0xcf   :  { %5869 = vmatmul.mubr.bf16.gmra.mrb[12].mxu0 %v6143_v15 }
  0xd0   :  { %5908 = vmatprep.mubr.msk.bf16.mxu0 %vm6775_vm0, %v6774_v16 }
 0x18a   :  { %v5858_v26 = vpop.f32.mrb[0].mxu0 }
 0x18b   :  { %v468_v28 = vmul.f32 %v5858_v26, %v7134_v25  ;;  %v396_v29 = vpop.f32.mrb[1].mxu0 }
 0x18c   :  { %v466_v30 = vmul.f32 %v7134_v25, %v396_v29  ;;  %v5859_v31 = vpop.f32.mrb[2].mxu0 }
 0x18d   :  { %v7142_v32 = vadd.f32 %v7137_v27, %v468_v28  ;;  %v469_v33 = vmul.f32 %v5859_v31, %v7134_v25  ;;  %v399_v34 = vpop.f32.mrb[3].mxu0 }
 0x18e   :  { %v7146_v35 = vadd.f32 %v7137_v27, %v466_v30  ;;  %v467_v36 = vmul.f32 %v7134_v25, %v399_v34  ;;  %v686_v30 = vld [vmem:[#allocation2 + $0x1] sm:$0xff] }
 0x18f   :  { %v507_v37 = vsub.f32 0.0, %v7142_v32  ;;  %v7151_v38 = vadd.f32 %v7137_v27, %v469_v33 }
 0x190   :  { %v505_v39 = vsub.f32 0.0, %v7146_v35  ;;  %v7155_v40 = vadd.f32 %v7137_v27, %v467_v36 }
 0x191   :  { %v525_v41 = vmul.f32 1.442695, %v507_v37  ;;  %v508_v42 = vsub.f32 0.0, %v7151_v38 }
 0x192   :  { %v521_v43 = vmul.f32 1.442695, %v505_v39  ;;  %v506_v44 = vsub.f32 0.0, %v7155_v40  ;;  %v5862_v45 = vpop.f32.mrb[4].mxu0 }
 0x193   :  { %6296 = vpow2.f32 %v525_v41  ;;  %v527_v46 = vmul.f32 1.442695, %v508_v42  ;;  %v472_v47 = vmul.f32 %v5862_v45, %v7134_v25  ;;  %v412_v48 = vpop.f32.mrb[5].mxu0  ;;  %v7204_v41 = vld [vmem:[%s6805_s21 + $0x1] ss:$0 sm:$0xff]  ;;  %v685_v42 = vmul.f32 0.0, %v7198_v24 }
 0x194   :  { %6298 = vpow2.f32 %v521_v43  ;;  %v523_v49 = vmul.f32 1.442695, %v506_v44  ;;  %v470_v50 = vmul.f32 %v7134_v25, %v412_v48  ;;  %v5863_v51 = vpop.f32.mrb[6].mxu0 }
 0x195   :  { %6300 = vpow2.f32 %v527_v46  ;;  %v7162_v52 = vadd.f32 %v7137_v27, %v472_v47  ;;  %v473_v53 = vmul.f32 %v5863_v51, %v7134_v25  ;;  %v415_v54 = vpop.f32.mrb[7].mxu0  ;;  %v687_v47 = vmul.f32 %v7204_v41, %v686_v30 }
 0x196   :  { %6302 = vpow2.f32 %v523_v49  ;;  %v7166_v55 = vadd.f32 %v7137_v27, %v470_v50  ;;  %v471_v56 = vmul.f32 %v7134_v25, %v415_v54 }
 0x197   :  { %v511_v57 = vsub.f32 0.0, %v7162_v52  ;;  %v7171_v58 = vadd.f32 %v7137_v27, %v473_v53 }
 0x198   :  { %v509_v59 = vsub.f32 0.0, %v7166_v55  ;;  %v7175_v60 = vadd.f32 %v7137_v27, %v471_v56 }
 0x199   :  { %v533_v61 = vmul.f32 1.442695, %v511_v57  ;;  %v512_v62 = vsub.f32 0.0, %v7171_v58 }
 0x19a   :  { %v529_v63 = vmul.f32 1.442695, %v509_v59  ;;  %v510_v0 = vsub.f32 0.0, %v7175_v60  ;;  %v5866_v1 = vpop.f32.mrb[8].mxu0 }
 0x19b   :  { %6304 = vpow2.f32 %v533_v61  ;;  %v535_v2 = vmul.f32 1.442695, %v512_v62  ;;  %v476_v3 = vmul.f32 %v5866_v1, %v7134_v25  ;;  %v428_v4 = vpop.f32.mrb[9].mxu0  ;;  %v902_v61 = vld [vmem:[#allocation2 + $0x65] sm:$0xff] }
 0x19c   :  { %6306 = vpow2.f32 %v529_v63  ;;  %v531_v5 = vmul.f32 1.442695, %v510_v0  ;;  %v474_v6 = vmul.f32 %v7134_v25, %v428_v4  ;;  %v5867_v7 = vpop.f32.mrb[10].mxu0 }
 0x19d   :  { %v6297_v8 = vpop.eup %6296  ;;  %6308 = vpow2.f32 %v535_v2  ;;  %v7182_v9 = vadd.f32 %v7137_v27, %v476_v3  ;;  %v477_v10 = vmul.f32 %v5867_v7, %v7134_v25  ;;  %v431_v11 = vpop.f32.mrb[11].mxu0  ;;  %v7227_v7 = vld [vmem:[%s6805_s21 + $0x2] ss:$0 sm:$0xff] }
 0x19e   :  { %v6299_v12 = vpop.eup %6298  ;;  %v555_v13 = vadd.f32 1.0, %v6297_v8  ;;  %6310 = vpow2.f32 %v531_v5  ;;  %v7186_v14 = vadd.f32 %v7137_v27, %v474_v6  ;;  %v475_v15 = vmul.f32 %v7134_v25, %v431_v11  ;;  %v689_v8 = vld [vmem:[#allocation2 + $0x2] sm:$0xff] }
 0x19f   :  { %v6301_v16 = vpop.eup %6300  ;;  %v553_v17 = vadd.f32 1.0, %v6299_v12  ;;  %v515_v18 = vsub.f32 0.0, %v7182_v9  ;;  %v7191_v19 = vadd.f32 %v7137_v27, %v477_v10  ;;  %v903_v10 = vmul.f32 %v7204_v41, %v902_v61 }
 0x1a0   :  { %v6303_v20 = vpop.eup %6302  ;;  %6312 = vrcp.f32 %v555_v13  ;;  %v556_v21 = vadd.f32 1.0, %v6301_v16  ;;  %v513_v22 = vsub.f32 0.0, %v7186_v14  ;;  %v7195_v23 = vadd.f32 %v7137_v27, %v475_v15 }
 0x1a1   :  { %6314 = vrcp.f32 %v553_v17  ;;  %v554_v26 = vadd.f32 1.0, %v6303_v20  ;;  %v541_v28 = vmul.f32 1.442695, %v515_v18  ;;  %v516_v29 = vsub.f32 0.0, %v7191_v19 }
 0x1a2   :  { %6316 = vrcp.f32 %v556_v21  ;;  %v537_v31 = vmul.f32 1.442695, %v513_v22  ;;  %v514_v33 = vsub.f32 0.0, %v7195_v23  ;;  %v5870_v34 = vpop.f32.mrb[12].mxu0  ;;  %v688_v22 = vadd.f32 %v687_v47, %v685_v42 }
 0x1a3   :  { %6318 = vrcp.f32 %v554_v26  ;;  %v543_v36 = vmul.f32 1.442695, %v516_v29  ;;  %v480_v37 = vmul.f32 %v5870_v34, %v7134_v25  ;;  %v444_v39 = vpop.f32.mrb[13].mxu0  ;;  %v690_v26 = vmul.f32 %v7227_v7, %v689_v8 }
 0x1a4   :  { %6320 = vpow2.f32 %v541_v28  ;;  %v539_v43 = vmul.f32 1.442695, %v514_v33  ;;  %v478_v44 = vmul.f32 %v7134_v25, %v444_v39  ;;  %v5871_v45 = vpop.f32.mrb[14].mxu0 }
 0x1a5   :  { %v6305_v46 = vpop.eup %6304  ;;  %6322 = vpow2.f32 %v537_v31  ;;  %v7210_v48 = vadd.f32 %v7137_v27, %v480_v37  ;;  %v481_v49 = vmul.f32 %v5871_v45, %v7134_v25  ;;  %v447_v50 = vpop.f32.mrb[15].mxu0  ;;  %v893_v37 = vld [vmem:[#allocation2 + $0x5b] sm:$0xff]  ;;  %v691_v47 = vadd.f32 %v690_v26, %v688_v22 }
 0x1a6   :  { %v6307_v51 = vpop.eup %6306  ;;  %v559_v53 = vadd.f32 1.0, %v6305_v46  ;;  %6324 = vpow2.f32 %v543_v36  ;;  %v7214_v54 = vadd.f32 %v7137_v27, %v478_v44  ;;  %v479_v56 = vmul.f32 %v7134_v25, %v447_v50  ;;  %v896_v44 = vld [vmem:[#allocation2 + $0x5c] sm:$0xff] }
 0x1a7   :  { %v6309_v57 = vpop.eup %6308  ;;  %v557_v59 = vadd.f32 1.0, %v6307_v51  ;;  %6326 = vpow2.f32 %v539_v43  ;;  %v519_v62 = vsub.f32 0.0, %v7210_v48  ;;  %v7219_v63 = vadd.f32 %v7137_v27, %v481_v49  ;;  %v1106_v45 = vld [vmem:[#allocation2 + $0xbe] sm:$0xff]  ;;  %v7258_v51 = vld [vmem:[%s6805_s21 + $0x7] ss:$0 sm:$0xff] }
 0x1a8   :  { %v6311_v0 = vpop.eup %6310  ;;  %6328 = vrcp.f32 %v559_v53  ;;  %v560_v1 = vadd.f32 1.0, %v6309_v57  ;;  %v517_v2 = vsub.f32 0.0, %v7214_v54  ;;  %v7223_v3 = vadd.f32 %v7137_v27, %v479_v56  ;;  %v905_v27 = vld [vmem:[#allocation2 + $0x66] sm:$0xff] }
 0x1a9   :  { %6330 = vrcp.f32 %v557_v59  ;;  %v558_v25 = vadd.f32 1.0, %v6311_v0  ;;  %v549_v4 = vmul.f32 1.442695, %v519_v62  ;;  %v520_v5 = vsub.f32 0.0, %v7219_v63  ;;  %v1109_v53 = vld [vmem:[#allocation2 + $0xbf] sm:$0xff] }
 0x1aa   :  { %v6313_v6 = vpop.eup %6312  ;;  %v545_v11 = vmul.f32 1.442695, %v517_v2  ;;  %v518_v12 = vsub.f32 0.0, %v7223_v3  ;;  %6332 = vrcp.f32 %v560_v1  ;;  %v906_v30 = vmul.f32 %v7227_v7, %v905_v27  ;;  %v1112_v56 = vld [vmem:[#allocation2 + $0xc0] sm:$0xff]  ;;  %v7267_v62 = vld [vmem:[%s6805_s21 + $0x8] ss:$0 sm:$0xff] }
 0x1ab   :  { %v6315_v13 = vpop.eup %6314  ;;  %v7232_v15 = vmul.f32 %v6313_v6, %v7142_v32  ;;  %v551_v16 = vmul.f32 1.442695, %v520_v5  ;;  %6334 = vrcp.f32 %v558_v25  ;;  %v7261_v59 = vld [vmem:[%s6805_s21 + $0x3] ss:$0 sm:$0xff]  ;;  %8980 = vst [vmem:[#allocation47_spill] sm:$0xff] %v7267_v62  ;;  %v7273_v1 = vmul.f32 %v7258_v51, %v893_v37 }
 0x1ac   :  { %v6317_v17 = vpop.eup %6316  ;;  %v7235_v18 = vmul.f32 %v6315_v13, %v7146_v35  ;;  %v547_v20 = vmul.f32 1.442695, %v518_v12  ;;  %6336 = vpow2.f32 %v549_v4  ;;  %v904_v35 = vadd.f32 %v903_v10, %v685_v42  ;;  %v7253_v42 = vld [vmem:[%s6805_s21 + $0x6] ss:$0 sm:$0xff] }
 0x1ad   :  { %v6319_v21 = vpop.eup %6318  ;;  %607 = vst [vmem:[#allocation2 + $0x1f] sm:$0xff] %v7232_v15  ;;  %v7240_v28 = vmul.f32 %v6317_v17, %v7151_v38  ;;  %6338 = vpow2.f32 %v545_v11  ;;  %v7249_v38 = vld [vmem:[%s6805_s21 + $0x4] ss:$0 sm:$0xff]  ;;  %8982 = vst [vmem:[#allocation49_spill] sm:$0xff] %v7273_v1  ;;  %v7279_v4 = vmul.f32 %v7267_v62, %v896_v44  ;;  %v768_v8 = vmul.f32 %v7204_v41, %v7232_v15 }
 0x1ae   :  { %v6321_v32 = vpop.eup %6320  ;;  %603 = vst [vmem:[#allocation2 + $0xb] sm:$0xff] %v7235_v18  ;;  %v7244_v29 = vmul.f32 %v6319_v21, %v7155_v40  ;;  %6340 = vpow2.f32 %v551_v16  ;;  %v890_v40 = vld [vmem:[#allocation2 + $0x5a] sm:$0xff]  ;;  %v7255_v49 = vadd.f32 %v906_v30, %v904_v35  ;;  %v7286_v6 = vmul.f32 %v7249_v38, %v7232_v15 }
 0x1af   :  { %v6323_v31 = vpop.eup %6322  ;;  %609 = vst [vmem:[#allocation2 + $0x29] sm:$0xff] %v7240_v28  ;;  %v563_v33 = vadd.f32 1.0, %v6321_v32  ;;  %6342 = vpow2.f32 %v547_v20  ;;  %v7270_v0 = vmul.f32 %v7253_v42, %v890_v40  ;;  %8983 = vst [vmem:[#allocation50_spill] sm:$0xff] %v7279_v4  ;;  %v7295_v12 = vmul.f32 %v7267_v62, %v1112_v56 }
 0x1b0   :  { %v6325_v34 = vpop.eup %6324  ;;  %605 = vst [vmem:[#allocation2 + $0x15] sm:$0xff] %v7244_v29  ;;  %v561_v36 = vadd.f32 1.0, %v6323_v31  ;;  %v696_v16 = vmul.f32 %v7249_v38, %v7235_v18  ;;  %v714_v20 = vmul.f32 %v7204_v41, %v7235_v18  ;;  %v7309_v32 = vmul.f32 %v7249_v38, %v7240_v28 }
 0x1b1   :  { %v6327_v39 = vpop.eup %6326  ;;  %6344 = vrcp.f32 %v563_v33  ;;  %v564_v43 = vadd.f32 1.0, %v6325_v34  ;;  %8981 = vst [vmem:[#allocation48_spill] sm:$0xff] %v7270_v0  ;;  %8986 = vst [vmem:[#allocation53_spill] sm:$0xff] %v7295_v12  ;;  %v795_v35 = vmul.f32 %v7204_v41, %v7240_v28  ;;  %v723_v31 = vmul.f32 %v7249_v38, %v7244_v29 }
 0x1b2   :  { %v6329_v46 = vpop.eup %6328  ;;  %6346 = vrcp.f32 %v561_v36  ;;  %v562_v50 = vadd.f32 1.0, %v6327_v39  ;;  %v741_v36 = vmul.f32 %v7204_v41, %v7244_v29  ;;  %v7320_v40 = vmul.f32 %v7258_v51, %v7244_v29 }
 0x1b3   :  { %v6331_v57 = vpop.eup %6330  ;;  %v7264_v61 = vmul.f32 %v6329_v46, %v7162_v52  ;;  %6348 = vrcp.f32 %v564_v43  ;;  %v7282_v52 = vmul.f32 %v7253_v42, %v1106_v45  ;;  %v7329_v45 = vmul.f32 %v7258_v51, %v7232_v15 }
 0x1b4   :  { %v728_v2 = vld [vmem:[#allocation2 + $0x1e] sm:$0xff]  ;;  %v7276_v25 = vmul.f32 %v6331_v57, %v7166_v55  ;;  %6350 = vrcp.f32 %v562_v50  ;;  %v6333_v5 = vpop.eup %6332  ;;  %v7292_v55 = vmul.f32 %v7258_v51, %v1109_v53  ;;  %v7333_v46 = vmul.f32 %v7258_v51, %v7240_v28 }
 0x1b5   :  { %8979 = vst [vmem:[#allocation46_spill] sm:$0xff] %v7264_v61  ;;  %8984 = vst [vmem:[#allocation51_spill] sm:$0xff] %v7282_v52  ;;  %v692_v10 = vld [vmem:[#allocation2 + $0xa] sm:$0xff]  ;;  %v6335_v13 = vpop.eup %6334  ;;  %v7304_v22 = vld [vmem:[#allocation2 + $0x20] sm:$0xff]  ;;  %v766_v26 = vmul.f32 %v7198_v24, %v728_v2  ;;  %v7323_v39 = vmul.f32 %v7253_v42, %v728_v2  ;;  %v7336_v53 = vmul.f32 %v7261_v59, %v728_v2 }
 0x1b6   :  { %v698_v11 = vld [vmem:[#allocation2 + $0xc] sm:$0xff]  ;;  %615 = vst [vmem:[#allocation2 + $0x47] sm:$0xff] %v7264_v61  ;;  %8985 = vst [vmem:[#allocation52_spill] sm:$0xff] %v7292_v55  ;;  %v693_v27 = vmul.f32 %v7261_v59, %v692_v10  ;;  %v712_v17 = vmul.f32 %v7198_v24, %v692_v10  ;;  %v6337_v21 = vpop.eup %6336  ;;  %v771_v29 = vmul.f32 %v7227_v7, %v7304_v22  ;;  %v7342_v10 = vld [vmem:[%s6805_s21 + $0x5] ss:$0 sm:$0xff]  ;;  %s9021_s21 = sld [smem:[#allocation21_spill]] }
 0x1b7   :  { %611 = vst [vmem:[#allocation2 + $0x33] sm:$0xff] %v7276_v25  ;;  %v701_v30 = vld [vmem:[#allocation2 + $0x14] sm:$0xff]  ;;  %v6339_v33 = vpop.eup %6338  ;;  %v717_v34 = vmul.f32 %v7227_v7, %v698_v11  ;;  %v7325_v44 = vld [vmem:[#allocation2 + $0x28] sm:$0xff]  ;;  %v7345_v15 = vmul.f32 %v6333_v5, %v7171_v58  ;;  %v7348_v28 = vmul.f32 %v6335_v13, %v7175_v60  ;;  %v7390_v4 = vmul.f32 %v7204_v41, %v7276_v25 }
 0x1b8   :  { %v715_v18 = vadd.f32 %v714_v20, %v712_v17  ;;  %v6341_v37 = vpop.eup %6340  ;;  %v694_v43 = vadd.f32 %v693_v27, %v691_v47  ;;  %v739_v47 = vmul.f32 %v7198_v24, %v701_v30  ;;  %v769_v27 = vadd.f32 %v768_v8, %v766_v26  ;;  %v7350_v2 = vld [vmem:[#allocation2 + $0x2a] sm:$0xff]  ;;  %v725_v58 = vld [vmem:[#allocation2 + $0x16] sm:$0xff] }
 0x1b9   :  { %v6343_v50 = vpop.eup %6342  ;;  %8987 = vst [vmem:[#allocation54_spill] sm:$0xff] %v7345_v15  ;;  %8988 = vst [vmem:[#allocation55_spill] sm:$0xff] %v7348_v28  ;;  %v567_v17 = vadd.f32 1.0, %v6337_v21  ;;  %v793_v12 = vmul.f32 %v7198_v24, %v7325_v44  ;;  %v565_v55 = vadd.f32 1.0, %v6339_v33  ;;  %v568_v5 = vadd.f32 1.0, %v6341_v37 }
 0x1ba   :  { %v718_v56 = vadd.f32 %v717_v34, %v715_v18  ;;  %v720_v18 = vmul.f32 %v7261_v59, %v701_v30  ;;  %v697_v26 = vadd.f32 %v696_v16, %v694_v43  ;;  %617 = vst [vmem:[#allocation2 + $0x51] sm:$0xff] %v7345_v15  ;;  %613 = vst [vmem:[#allocation2 + $0x3d] sm:$0xff] %v7348_v28 }
 0x1bb   :  { %v6345_v57 = vpop.eup %6344  ;;  %6352 = vrcp.f32 %v567_v17  ;;  %v7363_v21 = vmul.f32 %v7342_v10, %v7304_v22  ;;  %v742_v33 = vadd.f32 %v741_v36, %v739_v47  ;;  %v772_v16 = vadd.f32 %v771_v29, %v769_v27 }
 0x1bc   :  { %v6347_v20 = vpop.eup %6346  ;;  %v7356_v34 = vmul.f32 %v6345_v57, %v7182_v9  ;;  %v699_v9 = vmul.f32 %v7342_v10, %v698_v11  ;;  %v721_v57 = vadd.f32 %v720_v18, %v718_v56  ;;  %v774_v43 = vmul.f32 %v7261_v59, %v7325_v44 }
 0x1bd   :  { %v6349_v8 = vpop.eup %6348  ;;  %v593_v60 = vmul.f32 %v6347_v20, %v7186_v14  ;;  %v7371_v14 = vmul.f32 %v7227_v7, %v7350_v2  ;;  %v702_v37 = vmul.f32 %v7253_v42, %v701_v30  ;;  %v744_v17 = vmul.f32 %v7227_v7, %v725_v58 }
 0x1be   :  { %8989 = vst [vmem:[#allocation56_spill] sm:$0xff] %v7356_v34  ;;  %v6351_v13 = vpop.eup %6350  ;;  %626 = vst [vmem:[#allocation2 + $0x83] sm:$0xff] %v7356_v34  ;;  %v7375_v20 = vld [vmem:[#allocation2 + $0x32] sm:$0xff]  ;;  %v7378_v11 = vmul.f32 %v6349_v8, %v7191_v19  ;;  %6354 = vrcp.f32 %v565_v55  ;;  %v7383_v29 = vadd.f32 %v795_v35, %v793_v12  ;;  %v566_v47 = vadd.f32 1.0, %v6343_v50 }
 0x1bf   :  { %622 = vst [vmem:[#allocation2 + $0x6f] sm:$0xff] %v593_v60  ;;  %v7381_v36 = vmul.f32 %v6351_v13, %v7195_v23  ;;  %v7385_v56 = vld [vmem:[#allocation2 + $0x34] sm:$0xff]  ;;  %6356 = vrcp.f32 %v568_v5  ;;  %v700_v27 = vadd.f32 %v699_v9, %v697_v26  ;;  %v724_v30 = vadd.f32 %v723_v31, %v721_v57 }
 0x1c0   :  { %8990 = vst [vmem:[#allocation57_spill] sm:$0xff] %v7378_v11  ;;  %v726_v18 = vmul.f32 %v7342_v10, %v725_v58  ;;  %v745_v52 = vadd.f32 %v744_v17, %v742_v33  ;;  %628 = vst [vmem:[#allocation2 + $0x8d] sm:$0xff] %v7378_v11  ;;  %v7396_v19 = vmul.f32 %v7261_v59, %v7375_v20  ;;  %6358 = vrcp.f32 %v566_v47 }
 0x1c1   :  { %8991 = vst [vmem:[#allocation58_spill] sm:$0xff] %v7381_v36  ;;  %624 = vst [vmem:[#allocation2 + $0x79] sm:$0xff] %v7381_v36  ;;  %v7400_v23 = vmul.f32 %v7198_v24, %v7375_v20  ;;  %v7404_v55 = vmul.f32 %v7204_v41, %v7348_v28  ;;  %v7408_v12 = vmul.f32 %v7227_v7, %v7385_v56  ;;  %v7425_v57 = vld [vmem:[#allocation2 + $0x3c] sm:$0xff] }
 0x1c2   :  { %v7412_v35 = vmul.f32 %v7249_v38, %v7356_v34  ;;  %v984_v31 = vmul.f32 %v7204_v41, %v7356_v34  ;;  %v7417_v50 = vmul.f32 %v7249_v38, %v593_v60  ;;  %v930_v26 = vmul.f32 %v7204_v41, %v593_v60 }
 0x1c3   :  { %v7422_v5 = vmul.f32 %v7249_v38, %v7378_v11  ;;  %v703_v13 = vadd.f32 %v702_v37, %v700_v27  ;;  %v708_v9 = vmul.f32 %v7267_v62, %v725_v58  ;;  %v1011_v17 = vmul.f32 %v7204_v41, %v7378_v11 }
 0x1c4   :  { %8992 = vst [vmem:[#allocation59_spill] sm:$0xff] %v7412_v35  ;;  %v7431_v47 = vmul.f32 %v7249_v38, %v7381_v36  ;;  %v727_v1 = vadd.f32 %v726_v18, %v724_v30  ;;  %v748_v60 = vadd.f32 %v7336_v53, %v745_v52  ;;  %v957_v58 = vmul.f32 %v7204_v41, %v7381_v36 }
 0x1c5   :  { %v944_v8 = vld [vmem:[#allocation2 + $0x82] sm:$0xff]  ;;  %8993 = vst [vmem:[#allocation60_spill] sm:$0xff] %v7422_v5  ;;  %v6353_v0 = vpop.eup %6352  ;;  %v735_v27 = vmul.f32 %v7267_v62, %v7304_v22  ;;  %v756_v52 = vmul.f32 %v7253_v42, %v7325_v44  ;;  %v7450_v53 = vmul.f32 %v7267_v62, %v7350_v2  ;;  %v7454_v18 = vmul.f32 %v7198_v24, %v7425_v57 }
 0x1c6   :  { %v908_v33 = vld [vmem:[#allocation2 + $0x6e] sm:$0xff]  ;;  %v982_v34 = vmul.f32 %v7198_v24, %v944_v8  ;;  %v7440_v11 = vld [vmem:[#allocation2 + $0x84] sm:$0xff]  ;;  %v7444_v30 = vmul.f32 %v6353_v0, %v7210_v48  ;;  %v706_v22 = vadd.f32 %v7320_v40, %v703_v13  ;;  %v775_v15 = vadd.f32 %v774_v43, %v772_v16 }
 0x1c7   :  { %v914_v5 = vld [vmem:[#allocation2 + $0x70] sm:$0xff]  ;;  %v928_v37 = vmul.f32 %v7198_v24, %v908_v33  ;;  %v909_v35 = vmul.f32 %v7261_v59, %v908_v33  ;;  %8995 = vst [vmem:[#allocation62_spill] sm:$0xff] %v7450_v53  ;;  %v730_v44 = vadd.f32 %v7323_v39, %v727_v1  ;;  %v751_v53 = vadd.f32 %v7286_v6, %v748_v60 }
 0x1c8   :  { %8994 = vst [vmem:[#allocation61_spill] sm:$0xff] %v7444_v30  ;;  %v6355_v61 = vpop.eup %6354  ;;  %v933_v33 = vmul.f32 %v7227_v7, %v914_v5  ;;  %v7458_v48 = vld [vmem:[#allocation2 + $0x8c] sm:$0xff]  ;;  %v917_v0 = vld [vmem:[#allocation2 + $0x78] sm:$0xff]  ;;  %634 = vst [vmem:[#allocation2 + $0xab] sm:$0xff] %v7444_v30  ;;  %v780_v28 = vmul.f32 %v7342_v10, %v7350_v2  ;;  %v7469_v40 = vmul.f32 %v7261_v59, %v944_v8 }
 0x1c9   :  { %v931_v36 = vadd.f32 %v930_v26, %v928_v37  ;;  %v6357_v62 = vpop.eup %6356  ;;  %v7466_v26 = vmul.f32 %v7253_v42, %v944_v8  ;;  %v7473_v16 = vmul.f32 %v7342_v10, %v7440_v11  ;;  %v985_v43 = vadd.f32 %v984_v31, %v982_v34  ;;  %v7481_v60 = vld [vmem:[#allocation2 + $0x8e] sm:$0xff] }
 0x1ca   :  { %v987_v1 = vmul.f32 %v7227_v7, %v7440_v11  ;;  %v910_v6 = vadd.f32 %v909_v35, %v7255_v49  ;;  %v7479_v39 = vmul.f32 %v7342_v10, %v914_v5  ;;  %v6359_v13 = vpop.eup %6358  ;;  %v1009_v8 = vmul.f32 %v7198_v24, %v7458_v48 }
 0x1cb   :  { %v934_v2 = vadd.f32 %v933_v33, %v931_v36  ;;  %v955_v37 = vmul.f32 %v7198_v24, %v917_v0  ;;  %v7487_v30 = vmul.f32 %v6355_v61, %v7214_v54  ;;  %v7490_v34 = vmul.f32 %v6357_v62, %v7219_v63  ;;  %v7500_v33 = vld [vmem:[#allocation2 + $0x7a] sm:$0xff] }
 0x1cc   :  { %v936_v49 = vmul.f32 %v7261_v59, %v917_v0  ;;  %v7494_v35 = vmul.f32 %v6359_v13, %v7223_v3  ;;  %v754_v36 = vadd.f32 %v7363_v21, %v751_v53  ;;  %v778_v31 = vadd.f32 %v7309_v32, %v775_v15 }
 0x1cd   :  { %v7498_v5 = vadd.f32 %v987_v1, %v985_v43  ;;  %630 = vst [vmem:[#allocation2 + $0x97] sm:$0xff] %v7487_v30  ;;  %636 = vst [vmem:[#allocation2 + $0xb5] sm:$0xff] %v7490_v34  ;;  %v7504_v54 = vadd.f32 %v708_v9, %v706_v22  ;;  %v733_v63 = vadd.f32 %v7329_v45, %v730_v44  ;;  %v851_v1 = vld [vmem:[#allocation2 + $0x3e] sm:$0xff] }
 0x1ce   :  { %v783_v3 = vmul.f32 %v7253_v42, %v7375_v20  ;;  %v7511_v61 = vmul.f32 %v7261_v59, %v7458_v48  ;;  %v7515_v62 = vmul.f32 %v7227_v7, %v7481_v60  ;;  %v937_v32 = vadd.f32 %v936_v49, %v934_v2  ;;  %632 = vst [vmem:[#allocation2 + $0xa1] sm:$0xff] %v7494_v35 }
 0x1cf   :  { %v781_v15 = vadd.f32 %v780_v28, %v778_v31  ;;  %v913_v21 = vadd.f32 %v7417_v50, %v910_v6  ;;  %v958_v9 = vadd.f32 %v957_v58, %v955_v37  ;;  %v757_v53 = vadd.f32 %v756_v52, %v754_v36  ;;  %v8996_v37 = vld [vmem:[#allocation47_spill] sm:$0xff] }
 0x1d0   :  { %v799_v45 = vadd.f32 %v7371_v14, %v7383_v29  ;;  %v7521_v20 = vadd.f32 %v1011_v17, %v1009_v8  ;;  %v7524_v22 = vmul.f32 %v7253_v42, %v917_v0  ;;  %v942_v44 = vmul.f32 %v7342_v10, %v7500_v33  ;;  %v8997_v31 = vld [vmem:[#allocation55_spill] sm:$0xff] }
 0x1d1   :  { %v960_v43 = vmul.f32 %v7227_v7, %v7500_v33  ;;  %v7530_v28 = vadd.f32 %v735_v27, %v733_v63  ;;  %v784_v50 = vadd.f32 %v783_v3, %v781_v15  ;;  %v823_v14 = vadd.f32 %v7390_v4, %v7400_v23  ;;  %v873_v27 = vld [vmem:[#allocation2 + $0x46] sm:$0xff] }
 0x1d2   :  { %v802_v58 = vadd.f32 %v7396_v19, %v799_v45  ;;  %v940_v29 = vadd.f32 %v7431_v47, %v937_v32  ;;  %v7538_v17 = vmul.f32 %v7204_v41, %v7487_v30  ;;  %v786_v52 = vmul.f32 %v7258_v51, %v7276_v25 }
 0x1d3   :  { %v804_v0 = vmul.f32 %v7249_v38, %v7276_v25  ;;  %v961_v6 = vadd.f32 %v960_v43, %v958_v9  ;;  %v7546_v19 = vmul.f32 %v7204_v41, %v7494_v35  ;;  %v760_v4 = vadd.f32 %v7333_v46, %v757_v53  ;;  %v842_v53 = vld [vmem:[#allocation2 + $0x48] sm:$0xff] }
 0x1d4   :  { %v826_v23 = vadd.f32 %v7408_v12, %v823_v14  ;;  %v828_v2 = vmul.f32 %v7261_v59, %v7425_v57  ;;  %v850_v13 = vadd.f32 %v7404_v55, %v7454_v18  ;;  %v852_v8 = vmul.f32 %v7227_v7, %v851_v1  ;;  %v8998_v55 = vld [vmem:[#allocation62_spill] sm:$0xff]  ;;  %v1016_v14 = vld [vmem:[#allocation2 + $0x96] sm:$0xff] }
 0x1d5   :  { %v805_v47 = vadd.f32 %v804_v0, %v802_v58  ;;  %v787_v25 = vadd.f32 %v786_v52, %v784_v50  ;;  %v789_v49 = vmul.f32 %v8996_v37, %v7385_v56  ;;  %v807_v36 = vmul.f32 %v7342_v10, %v7385_v56  ;;  %v8999_v50 = vld [vmem:[#allocation46_spill] sm:$0xff] }
 0x1d6   :  { %v810_v46 = vmul.f32 %v7253_v42, %v7425_v57  ;;  %v829_v12 = vadd.f32 %v828_v2, %v826_v23  ;;  %v831_v63 = vmul.f32 %v7249_v38, %v8997_v31  ;;  %v853_v3 = vadd.f32 %v852_v8, %v850_v13 }
 0x1d7   :  { %v855_v32 = vmul.f32 %v7261_v59, %v873_v27  ;;  %v7565_v18 = vadd.f32 %v8998_v55, %v760_v4  ;;  %v813_v15 = vmul.f32 %v7258_v51, %v8997_v31  ;;  %v816_v9 = vmul.f32 %v8996_v37, %v851_v1  ;;  %v863_v4 = vld [vmem:[#allocation2 + $0x50] sm:$0xff] }
 0x1d8   :  { %v834_v56 = vmul.f32 %v7342_v10, %v851_v1  ;;  %v808_v45 = vadd.f32 %v807_v36, %v805_v47  ;;  %v832_v57 = vadd.f32 %v831_v63, %v829_v12  ;;  %v858_v58 = vmul.f32 %v7249_v38, %v8999_v50  ;;  %v7582_v36 = vld [vmem:[#allocation2 + $0x98] sm:$0xff] }
 0x1d9   :  { %v856_v43 = vadd.f32 %v855_v32, %v853_v3  ;;  %v837_v52 = vmul.f32 %v7253_v42, %v873_v27  ;;  %v840_v0 = vmul.f32 %v7258_v51, %v8999_v50  ;;  %v874_v23 = vmul.f32 %v7198_v24, %v873_v27 }
 0x1da   :  { %v876_v2 = vmul.f32 %v7204_v41, %v8999_v50  ;;  %v7579_v1 = vadd.f32 %v789_v49, %v787_v25  ;;  %v835_v47 = vadd.f32 %v834_v56, %v832_v57  ;;  %v861_v8 = vmul.f32 %v7342_v10, %v842_v53  ;;  %v7589_v49 = vld [vmem:[#allocation2 + $0xa0] sm:$0xff] }
 0x1db   :  { %v859_v13 = vadd.f32 %v858_v58, %v856_v43  ;;  %v843_v12 = vmul.f32 %v8996_v37, %v842_v53  ;;  %v879_v63 = vmul.f32 %v7227_v7, %v842_v53  ;;  %v916_v3 = vadd.f32 %v7479_v39, %v913_v21 }
 0x1dc   :  { %9000 = vst [vmem:[#allocation47_spill] sm:$0xff] %v7579_v1  ;;  %v877_v31 = vadd.f32 %v876_v2, %v874_v23  ;;  %v1017_v27 = vmul.f32 %v7261_v59, %v1016_v14  ;;  %v811_v32 = vadd.f32 %v810_v46, %v808_v45  ;;  %v864_v25 = vmul.f32 %v7253_v42, %v863_v4  ;;  %v9001_v23 = vld [vmem:[#allocation54_spill] sm:$0xff]  ;;  %v869_v45 = vld [vmem:[#allocation2 + $0x52] sm:$0xff] }
 0x1dd   :  { %v862_v55 = vadd.f32 %v861_v8, %v859_v13  ;;  %v838_v56 = vadd.f32 %v837_v52, %v835_v47  ;;  %v882_v43 = vmul.f32 %v7261_v59, %v863_v4  ;;  %v943_v50 = vadd.f32 %v942_v44, %v940_v29  ;;  %v9002_v47 = vld [vmem:[#allocation59_spill] sm:$0xff]  ;;  %v9003_v1 = vld [vmem:[#allocation58_spill] sm:$0xff] }
 0x1de   :  { %v880_v57 = vadd.f32 %v879_v63, %v877_v31  ;;  %v1036_v58 = vmul.f32 %v7198_v24, %v1016_v14  ;;  %v1041_v53 = vmul.f32 %v7227_v7, %v7582_v36  ;;  %v885_v39 = vmul.f32 %v7249_v38, %v9001_v23 }
 0x1df   :  { %v964_v21 = vadd.f32 %v7469_v40, %v961_v6  ;;  %v865_v46 = vadd.f32 %v864_v25, %v862_v55  ;;  %v919_v13 = vadd.f32 %v7524_v22, %v916_v3  ;;  %v946_v52 = vadd.f32 %v7466_v26, %v943_v50  ;;  %v9004_v6 = vld [vmem:[#allocation56_spill] sm:$0xff] }
 0x1e0   :  { %v883_v2 = vadd.f32 %v882_v43, %v880_v57  ;;  %v1063_v44 = vmul.f32 %v7198_v24, %v7589_v49  ;;  %v814_v29 = vadd.f32 %v813_v15, %v811_v32  ;;  %v867_v4 = vmul.f32 %v7258_v51, %v9001_v23 }
 0x1e1   :  { %v967_v8 = vadd.f32 %v9002_v47, %v964_v21  ;;  %v841_v31 = vadd.f32 %v840_v0, %v838_v56  ;;  %v921_v40 = vmul.f32 %v7258_v51, %v9003_v1  ;;  %v948_v55 = vmul.f32 %v7258_v51, %v9004_v6  ;;  %v9005_v1 = vld [vmem:[#allocation60_spill] sm:$0xff] }
 0x1e2   :  { %v886_v63 = vadd.f32 %v885_v39, %v883_v2  ;;  %v870_v22 = vmul.f32 %v8996_v37, %v869_v45  ;;  %v888_v26 = vmul.f32 %v7342_v10, %v869_v45  ;;  %v991_v15 = vadd.f32 %v7511_v61, %v7498_v5 }
 0x1e3   :  { %v970_v3 = vadd.f32 %v7473_v16, %v967_v8  ;;  %v868_v32 = vadd.f32 %v867_v4, %v865_v46  ;;  %v922_v25 = vadd.f32 %v921_v40, %v919_v13  ;;  %v949_v57 = vadd.f32 %v948_v55, %v946_v52  ;;  %v9006_v13 = vld [vmem:[#allocation57_spill] sm:$0xff]  ;;  %v9007_v52 = vld [vmem:[#allocation48_spill] sm:$0xff] }
 0x1e4   :  { %v972_v0 = vmul.f32 %v7253_v42, %v7458_v48  ;;  %v889_v56 = vadd.f32 %v888_v26, %v886_v63  ;;  %v994_v43 = vadd.f32 %v9005_v1, %v991_v15  ;;  %v996_v50 = vmul.f32 %v7342_v10, %v7481_v60  ;;  %v9008_v55 = vld [vmem:[#allocation49_spill] sm:$0xff] }
 0x1e5   :  { %v1015_v23 = vadd.f32 %v7515_v62, %v7521_v20  ;;  %v7621_v39 = vadd.f32 %v816_v9, %v814_v29  ;;  %v7623_v16 = vadd.f32 %v843_v12, %v841_v31  ;;  %v924_v5 = vmul.f32 %v8996_v37, %v7500_v33  ;;  %v1067_v12 = vld [vmem:[#allocation2 + $0xa2] sm:$0xff]  ;;  %v1089_v31 = vld [vmem:[#allocation2 + $0xaa] sm:$0xff] }
 0x1e6   :  { %v951_v61 = vmul.f32 %v8996_v37, %v7440_v11  ;;  %v973_v48 = vadd.f32 %v972_v0, %v970_v3  ;;  %v997_v21 = vadd.f32 %v996_v50, %v994_v43  ;;  %v999_v46 = vmul.f32 %v7253_v42, %v1016_v14  ;;  %v9009_v1 = vld [vmem:[#allocation61_spill] sm:$0xff] }
 0x1e7   :  { %v1018_v45 = vadd.f32 %v1017_v27, %v1015_v23  ;;  %v7630_v2 = vadd.f32 %v924_v5, %v922_v25  ;;  %v975_v62 = vmul.f32 %v7258_v51, %v9006_v13  ;;  %v1020_v20 = vmul.f32 %v7249_v38, %v7487_v30  ;;  %v1058_v25 = vld [vmem:[#allocation2 + $0xac] sm:$0xff]  ;;  %v1079_v5 = vld [vmem:[#allocation2 + $0xb4] sm:$0xff] }
 0x1e8   :  { %v1039_v9 = vadd.f32 %v7538_v17, %v1036_v58  ;;  %v7637_v33 = vadd.f32 %v870_v22, %v868_v32  ;;  %v892_v11 = vadd.f32 %v9007_v52, %v889_v56  ;;  %v7640_v29 = vadd.f32 %v951_v61, %v949_v57  ;;  %v9010_v61 = vld [vmem:[#allocation50_spill] sm:$0xff] }
 0x1e9   :  { %v978_v14 = vmul.f32 %v8996_v37, %v7481_v60  ;;  %v1002_v27 = vmul.f32 %v7258_v51, %v7487_v30  ;;  %v1021_v4 = vadd.f32 %v1020_v20, %v1018_v45  ;;  %v1044_v8 = vmul.f32 %v7261_v59, %v7589_v49  ;;  %v7676_v20 = vld [vmem:[%s6810_s25] ss:$0 sm:$0xff]  ;;  %s9022_s25 = sld [smem:[#allocation22_spill]] }
 0x1ea   :  { %v1042_v47 = vadd.f32 %v1041_v53, %v1039_v9  ;;  %v976_v17 = vadd.f32 %v975_v62, %v973_v48  ;;  %v1000_v58 = vadd.f32 %v999_v46, %v997_v21  ;;  %v1005_v63 = vmul.f32 %v8996_v37, %v7582_v36 }
 0x1eb   :  { %v1023_v40 = vmul.f32 %v7342_v10, %v7582_v36  ;;  %v1047_v60 = vmul.f32 %v7249_v38, %v7494_v35  ;;  %v1066_v30 = vadd.f32 %v7546_v19, %v1063_v44  ;;  %v1068_v53 = vmul.f32 %v7227_v7, %v1067_v12 }
 0x1ec   :  { %v1045_v6 = vadd.f32 %v1044_v8, %v1042_v47  ;;  %v895_v22 = vadd.f32 %v9008_v55, %v892_v11  ;;  %v1026_v26 = vmul.f32 %v7253_v42, %v7589_v49  ;;  %v1029_v3 = vmul.f32 %v7258_v51, %v7494_v35 }
 0x1ed   :  { %v1050_v15 = vmul.f32 %v7342_v10, %v1067_v12  ;;  %v1024_v32 = vadd.f32 %v1023_v40, %v1021_v4  ;;  %v1069_v57 = vadd.f32 %v1068_v53, %v1066_v30  ;;  %v1071_v0 = vmul.f32 %v7261_v59, %v1089_v31  ;;  %v1085_v4 = vld [vmem:[#allocation2 + $0xb6] sm:$0xff] }
 0x1ee   :  { %v1048_v36 = vadd.f32 %v1047_v60, %v1045_v6  ;;  %v979_v56 = vadd.f32 %v978_v14, %v976_v17  ;;  %v1032_v19 = vmul.f32 %v8996_v37, %v1067_v12  ;;  %v1090_v44 = vmul.f32 %v7198_v24, %v1089_v31  ;;  %v5505_v60 = vld [vmem:[%s6815_s29] ss:$0 sm:$0xff]  ;;  %s9023_s29 = sld [smem:[#allocation23_spill]] }
 0x1ef   :  { %v1092_v49 = vmul.f32 %v7204_v41, %v9009_v1  ;;  %v1003_v43 = vadd.f32 %v1002_v27, %v1000_v58  ;;  %v1072_v35 = vadd.f32 %v1071_v0, %v1069_v57  ;;  %v1074_v23 = vmul.f32 %v7249_v38, %v9009_v1 }
 0x1f0   :  { %v1051_v50 = vadd.f32 %v1050_v15, %v1048_v36  ;;  %v898_v48 = vadd.f32 %v9010_v61, %v895_v22  ;;  %v1053_v21 = vmul.f32 %v7253_v42, %v1089_v31  ;;  %v1095_v45 = vmul.f32 %v7227_v7, %v1058_v25 }
 0x1f1   :  { %v1093_v46 = vadd.f32 %v1092_v49, %v1090_v44  ;;  %v1027_v13 = vadd.f32 %v1026_v26, %v1024_v32  ;;  %v1056_v24 = vmul.f32 %v7258_v51, %v9009_v1  ;;  %v1075_v62 = vadd.f32 %v1074_v23, %v1072_v35  ;;  %v9013_v1 = vld [vmem:[#allocation52_spill] sm:$0xff] }
 0x1f2   :  { %v1077_v41 = vmul.f32 %v7342_v10, %v1058_v25  ;;  %v1054_v9 = vadd.f32 %v1053_v21, %v1051_v50  ;;  %v1059_v12 = vmul.f32 %v8996_v37, %v1058_v25  ;;  %v1098_v11 = vmul.f32 %v7261_v59, %v1079_v5 }
 0x1f3   :  { %v1096_v52 = vadd.f32 %v1095_v45, %v1093_v46  ;;  %v1006_v14 = vadd.f32 %v1005_v63, %v1003_v43  ;;  %v1080_v7 = vmul.f32 %v7253_v42, %v1079_v5  ;;  %v1101_v47 = vmul.f32 %v7249_v38, %v7490_v34  ;;  %v9011_v42 = vld [vmem:[#allocation47_spill] sm:$0xff]  ;;  %v9014_v5 = vld [vmem:[#allocation53_spill] sm:$0xff] }
 0x1f4   :  { %v1078_v27 = vadd.f32 %v1077_v41, %v1075_v62  ;;  %v1139_v31 = vmul.f32 %v7676_v20, %v7504_v54  ;;  %v1140_v17 = vmul.f32 %v7676_v20, %v7530_v28  ;;  %v1141_v58 = vmul.f32 %v7676_v20, %v7565_v18 }
 0x1f5   :  { %v1099_v8 = vadd.f32 %v1098_v11, %v1096_v52  ;;  %v1030_v40 = vadd.f32 %v1029_v3, %v1027_v13  ;;  %v1083_v63 = vmul.f32 %v7258_v51, %v7490_v34  ;;  %v1142_v6 = vmul.f32 %v7676_v20, %v9011_v42 }
 0x1f6   :  { %v1081_v59 = vadd.f32 %v1080_v7, %v1078_v27  ;;  %v1057_v38 = vadd.f32 %v1056_v24, %v1054_v9  ;;  %v1104_v53 = vmul.f32 %v7342_v10, %v1085_v4  ;;  %v1143_v54 = vmul.f32 %v7676_v20, %v7621_v39 }
 0x1f7   :  { %v1102_v30 = vadd.f32 %v1101_v47, %v1099_v8  ;;  %v1086_v55 = vmul.f32 %v8996_v37, %v1085_v4  ;;  %v1144_v18 = vmul.f32 %v7676_v20, %v7623_v16  ;;  %v1145_v51 = vmul.f32 %v7676_v20, %v7637_v33  ;;  %v9012_v16 = vld [vmem:[#allocation51_spill] sm:$0xff] }
 0x1f8   :  { %v1084_v28 = vadd.f32 %v1083_v63, %v1081_v59  ;;  %v7702_v22 = vadd.f32 %v5505_v60, %v1139_v31  ;;  %v7704_v26 = vadd.f32 %v5505_v60, %v1140_v17  ;;  %v7706_v3 = vadd.f32 %v5505_v60, %v1141_v58 }
 0x1f9   :  { %v1105_v34 = vadd.f32 %v1104_v53, %v1102_v30  ;;  %v1033_v10 = vadd.f32 %v1032_v19, %v1030_v40  ;;  %v1146_v15 = vmul.f32 %v7676_v20, %v898_v48  ;;  %v1147_v39 = vmul.f32 %v7676_v20, %v7630_v2 }
 0x1fa   :  { %v7711_v37 = vadd.f32 %v5505_v60, %v1142_v6  ;;  %v1060_v32 = vadd.f32 %v1059_v12, %v1057_v38  ;;  %v1148_v33 = vmul.f32 %v7676_v20, %v7640_v29  ;;  %v7716_v25 = vadd.f32 %v5505_v60, %v1143_v54 }
 0x1fb   :  { %v1108_v36 = vadd.f32 %v9012_v16, %v1105_v34  ;;  %v1087_v57 = vadd.f32 %v1086_v55, %v1084_v28  ;;  %v1149_v0 = vmul.f32 %v7676_v20, %v979_v56  ;;  %v7719_v44 = vadd.f32 %v5505_v60, %v1144_v18 }
 0x1fc   :  { %v7721_v19 = vadd.f32 %v5505_v60, %v1145_v51  ;;  %v1178_v2 = vsub.f32 0.0, %v7702_v22  ;;  %v1179_v43 = vsub.f32 0.0, %v7704_v26  ;;  %v1180_v50 = vsub.f32 0.0, %v7706_v3 }
 0x1fd   :  { %v1111_v49 = vadd.f32 %v9013_v1, %v1108_v36  ;;  %v1150_v35 = vmul.f32 %v7676_v20, %v1006_v14  ;;  %v1151_v29 = vmul.f32 %v7676_v20, %v1033_v10  ;;  %v7729_v23 = vadd.f32 %v5505_v60, %v1146_v15 }
 0x1fe   :  { %v1181_v56 = vsub.f32 0.0, %v7711_v37  ;;  %v1152_v48 = vmul.f32 %v7676_v20, %v1060_v32  ;;  %v7734_v21 = vadd.f32 %v5505_v60, %v1147_v39  ;;  %v1182_v46 = vsub.f32 0.0, %v7716_v25 }
 0x1ff   :  { %v1114_v61 = vadd.f32 %v9014_v5, %v1111_v49  ;;  %v7737_v45 = vadd.f32 %v5505_v60, %v1148_v33  ;;  %v7739_v13 = vadd.f32 %v5505_v60, %v1149_v0  ;;  %v1183_v24 = vsub.f32 0.0, %v7719_v44 }
 0x200   :  { %v1184_v62 = vsub.f32 0.0, %v7721_v19  ;;  %v1153_v41 = vmul.f32 %v7676_v20, %v1087_v57  ;;  %v1194_v9 = vmul.f32 1.442695, %v1178_v2  ;;  %v1196_v12 = vmul.f32 1.442695, %v1179_v43 }
 0x201   :  { %v1198_v52 = vmul.f32 1.442695, %v1180_v50  ;;  %v1154_v11 = vmul.f32 %v7676_v20, %v1114_v61  ;;  %v7745_v14 = vadd.f32 %v5505_v60, %v1150_v35  ;;  %v1185_v27 = vsub.f32 0.0, %v7729_v23 }
 0x202   :  { %v1200_v7 = vmul.f32 1.442695, %v1181_v56  ;;  %v7748_v4 = vadd.f32 %v5505_v60, %v1151_v29  ;;  %v1186_v47 = vsub.f32 0.0, %v7734_v21  ;;  %6360 = vpow2.f32 %v1194_v9 }
 0x203   :  { %v1202_v8 = vmul.f32 1.442695, %v1182_v46  ;;  %v7751_v31 = vadd.f32 %v5505_v60, %v1152_v48  ;;  %v1187_v17 = vsub.f32 0.0, %v7737_v45  ;;  %6362 = vpow2.f32 %v1196_v12 }
 0x204   :  { %v1204_v58 = vmul.f32 1.442695, %v1183_v24  ;;  %v7754_v40 = vadd.f32 %v5505_v60, %v1153_v41  ;;  %v1188_v20 = vsub.f32 0.0, %v7739_v13  ;;  %6364 = vpow2.f32 %v1198_v52 }
 0x205   :  { %v1206_v59 = vmul.f32 1.442695, %v1184_v62  ;;  %v7757_v63 = vadd.f32 %v5505_v60, %v1154_v11  ;;  %v1189_v42 = vsub.f32 0.0, %v7745_v14  ;;  %6366 = vpow2.f32 %v1200_v7 }
 0x206   :  { %v1208_v6 = vmul.f32 1.442695, %v1185_v27  ;;  %v1190_v38 = vsub.f32 0.0, %v7748_v4  ;;  %6368 = vpow2.f32 %v1202_v8  ;;  %v1210_v30 = vmul.f32 1.442695, %v1186_v47 }
 0x207   :  { %v1191_v53 = vsub.f32 0.0, %v7751_v31  ;;  %6370 = vpow2.f32 %v1204_v58  ;;  %v1212_v54 = vmul.f32 1.442695, %v1187_v17  ;;  %v1192_v28 = vsub.f32 0.0, %v7754_v40 }
 0x208   :  { %6372 = vpow2.f32 %v1206_v59  ;;  %v1214_v55 = vmul.f32 1.442695, %v1188_v20  ;;  %v1193_v18 = vsub.f32 0.0, %v7757_v63  ;;  %v1216_v60 = vmul.f32 1.442695, %v1189_v42 }
 0x209   :  { %6374 = vpow2.f32 %v1208_v6  ;;  %v1218_v51 = vmul.f32 1.442695, %v1190_v38  ;;  %v1220_v34 = vmul.f32 1.442695, %v1191_v53  ;;  %v1222_v15 = vmul.f32 1.442695, %v1192_v28 }
 0x20a   :  { %6376 = vpow2.f32 %v1210_v30  ;;  %v1224_v32 = vmul.f32 1.442695, %v1193_v18 }
 0x20b   :  { %6378 = vpow2.f32 %v1212_v54 }
 0x20c   :  { %v6361_v10 = vpop.eup %6360  ;;  %6380 = vpow2.f32 %v1214_v55 }
 0x20d   :  { %v6363_v39 = vpop.eup %6362  ;;  %6382 = vpow2.f32 %v1216_v60  ;;  %v1226_v36 = vadd.f32 1.0, %v6361_v10 }
 0x20e   :  { %v6365_v16 = vpop.eup %6364  ;;  %6384 = vpow2.f32 %v1218_v51  ;;  %v1227_v57 = vadd.f32 1.0, %v6363_v39 }
 0x20f   :  { %v6367_v33 = vpop.eup %6366  ;;  %6386 = vpow2.f32 %v1220_v34  ;;  %v1228_v1 = vadd.f32 1.0, %v6365_v16 }
 0x210   :  { %v6369_v0 = vpop.eup %6368  ;;  %6388 = vpow2.f32 %v1222_v15  ;;  %v1229_v2 = vadd.f32 1.0, %v6367_v33 }
 0x211   :  { %v6371_v49 = vpop.eup %6370  ;;  %6390 = vpow2.f32 %v1224_v32  ;;  %v1230_v50 = vadd.f32 1.0, %v6369_v0 }
 0x212   :  { %v6373_v43 = vpop.eup %6372  ;;  %6392 = vrcp.f32 %v1226_v36  ;;  %v1231_v29 = vadd.f32 1.0, %v6371_v49 }
 0x213   :  { %v6375_v35 = vpop.eup %6374  ;;  %6394 = vrcp.f32 %v1227_v57  ;;  %v1232_v5 = vadd.f32 1.0, %v6373_v43 }
 0x214   :  { %v6377_v56 = vpop.eup %6376  ;;  %6396 = vrcp.f32 %v1228_v1  ;;  %v1233_v48 = vadd.f32 1.0, %v6375_v35 }
 0x215   :  { %v6379_v61 = vpop.eup %6378  ;;  %6398 = vrcp.f32 %v1229_v2  ;;  %v1234_v24 = vadd.f32 1.0, %v6377_v56 }
 0x216   :  { %v6381_v46 = vpop.eup %6380  ;;  %6400 = vrcp.f32 %v1230_v50  ;;  %v1235_v41 = vadd.f32 1.0, %v6379_v61 }
 0x217   :  { %v6383_v62 = vpop.eup %6382  ;;  %6402 = vrcp.f32 %v1231_v29  ;;  %v1236_v12 = vadd.f32 1.0, %v6381_v46 }
 0x218   :  { %v6385_v9 = vpop.eup %6384  ;;  %6404 = vrcp.f32 %v1232_v5  ;;  %v1237_v11 = vadd.f32 1.0, %v6383_v62 }
 0x219   :  { %v6387_v52 = vpop.eup %6386  ;;  %6406 = vrcp.f32 %v1233_v48  ;;  %v1238_v7 = vadd.f32 1.0, %v6385_v9 }
 0x21a   :  { %v6389_v27 = vpop.eup %6388  ;;  %6408 = vrcp.f32 %v1234_v24  ;;  %v1239_v8 = vadd.f32 1.0, %v6387_v52 }
 0x21b   :  { %v6391_v47 = vpop.eup %6390  ;;  %6410 = vrcp.f32 %v1235_v41  ;;  %v1240_v20 = vadd.f32 1.0, %v6389_v27 }
 0x21c   :  { %v6393_v17 = vpop.eup %6392  ;;  %6412 = vrcp.f32 %v1236_v12  ;;  %v1241_v55 = vadd.f32 1.0, %v6391_v47 }
 0x21d   :  { %v6395_v58 = vpop.eup %6394  ;;  %6414 = vrcp.f32 %v1237_v11  ;;  %v7765_v42 = vmul.f32 %v6393_v17, %v7702_v22  ;;  %v6152_v17 = vld [vmem:[%s6830_s14] sm:$0xff]  }
 0x21e   :  { %v6397_v59 = vpop.eup %6396  ;;  %6416 = vrcp.f32 %v1238_v7  ;;  %v7768_v6 = vmul.f32 %v6395_v58, %v7704_v26  ;;  %5893 = vmatpush3.bf16.msra.mxu0 %v6152_v17  ;;  %v7830_v58 = vld [vmem:[#allocation2] sm:$0xff] }
 0x21f   :  { %v6399_v38 = vpop.eup %6398  ;;  %6418 = vrcp.f32 %v1239_v8  ;;  %v7771_v30 = vmul.f32 %v6397_v59, %v7706_v3  ;;  %5894 = vmatprep.subr.bf16.mxu0 %v7830_v58  ;;  %v6154_v59 = vld [vmem:[%s6830_s14 + $0x10] sm:$0xff]  }
 0x220   :  { %v6401_v53 = vpop.eup %6400  ;;  %v1274_v54 = vadd.f32 %v7768_v6, %v7765_v42  ;;  %6420 = vrcp.f32 %v1240_v20  ;;  %v7776_v60 = vmul.f32 %v6399_v38, %v7711_v37  ;;  %v6153_v20 = vld [vmem:[%s6830_s14 + $0x8] sm:$0xff]   ;;  %v6155_v38 = vld [vmem:[%s6830_s14 + $0x18] sm:$0xff]  }
 0x221   :  { %v6403_v28 = vpop.eup %6402  ;;  %v7780_v34 = vmul.f32 %v6401_v53, %v7716_v25  ;;  %6422 = vrcp.f32 %v1241_v55  ;;  %v6156_v53 = vld [vmem:[%s6830_s14 + $0x20] sm:$0xff]   ;;  %v6159_v55 = vld [vmem:[%s6830_s14 + $0x38] sm:$0xff]  }
 0x222   :  { %v6405_v18 = vpop.eup %6404  ;;  %v1275_v22 = vadd.f32 %v1274_v54, %v7771_v30  ;;  %v7783_v3 = vmul.f32 %v6403_v28, %v7719_v44  ;;  %5895 = vmatpush3.bf16.msra.mxu0 %v6153_v20  ;;  %v6157_v54 = vld [vmem:[%s6830_s14 + $0x28] sm:$0xff]   ;;  %v6158_v28 = vld [vmem:[%s6830_s14 + $0x30] sm:$0xff]   ;;  %s9026_s14 = sld [smem:[#allocation28_spill]] }
 0x223   :  { %v6407_v26 = vpop.eup %6406  ;;  %v7787_v32 = vmul.f32 %v6405_v18, %v7721_v19  ;;  %5896 = vmatprep.subr.bf16.mxu0 %v7830_v58  ;;  %v5506_v18 = vld [vmem:[%s6825_s8] ss:$0 sm:$0xff]  ;;  %s9025_s8 = sld [smem:[#allocation25_spill]] }
 0x224   :  { %v6409_v51 = vpop.eup %6408  ;;  %v1276_v10 = vadd.f32 %v1275_v22, %v7776_v60  ;;  %v7803_v1 = vmul.f32 %v6407_v26, %v7729_v23 }
 0x225   :  { %v6411_v15 = vpop.eup %6410  ;;  %v7790_v37 = vmul.f32 %v6409_v51, %v7734_v21 }
 0x226   :  { %v6413_v39 = vpop.eup %6412  ;;  %v7793_v16 = vmul.f32 %v6411_v15, %v7737_v45  ;;  %v1277_v25 = vadd.f32 %v1276_v10, %v7780_v34  ;;  %5897 = vmatpush3.bf16.msra.mxu0 %v6154_v59 }
 0x227   :  { %v6415_v36 = vpop.eup %6414  ;;  %v7797_v44 = vmul.f32 %v6413_v39, %v7739_v13  ;;  %5898 = vmatprep.subr.bf16.mxu0 %v7830_v58 }
 0x228   :  { %v6417_v33 = vpop.eup %6416  ;;  %v1278_v57 = vadd.f32 %v1277_v25, %v7783_v3  ;;  %v1289_v0 = vadd.f32 %v7793_v16, %v7790_v37  ;;  %v7806_v21 = vmul.f32 %v6415_v36, %v7745_v14 }
 0x229   :  { %v6419_v19 = vpop.eup %6418  ;;  %v7811_v13 = vmul.f32 %v6417_v33, %v7748_v4 }
 0x22a   :  { %v1279_v45 = vadd.f32 %v1278_v57, %v7787_v32  ;;  %v1290_v49 = vadd.f32 %v1289_v0, %v7797_v44  ;;  %v6421_v2 = vpop.eup %6420  ;;  %v7814_v43 = vmul.f32 %v6419_v19, %v7751_v31  ;;  %5899 = vmatpush3.bf16.msra.mxu0 %v6155_v38 }
 0x22b   :  { %v7819_v23 = vmul.f32 %v6421_v2, %v7754_v40  ;;  %v6423_v56 = vpop.eup %6422  ;;  %5900 = vmatprep.subr.bf16.mxu0 %v7830_v58  ;;  %v6162_v2 = vld [vmem:[%s6840_s24 + $0x10] sm:$0xff]  }
 0x22c   :  { %v1280_v50 = vadd.f32 %v1279_v45, %v7803_v1  ;;  %v1291_v35 = vadd.f32 %v1290_v49, %v7806_v21  ;;  %v7824_v4 = vmul.f32 %v6423_v56, %v7757_v63  ;;  %v6160_v45 = vld [vmem:[%s6840_s24] sm:$0xff]   ;;  %v6161_v49 = vld [vmem:[%s6840_s24 + $0x8] sm:$0xff]   ;;  %v6167_v56 = vld [vmem:[%s6840_s24 + $0x38] sm:$0xff]  }
 0x22d   :  { %5912 = vmatprep.subr.bf16.mxu1 %v6160_v45 }
 0x22e   :  { %v1281_v14 = vrot.slane %v1280_v50, 4  ;;  %v1292_v29 = vadd.f32 %v1291_v35, %v7811_v13  ;;  %5901 = vmatpush3.bf16.msra.mxu0 %v6156_v53  ;;  %v6164_v35 = vld [vmem:[%s6840_s24 + $0x20] sm:$0xff]  }
 0x22f   :  { %5902 = vmatprep.subr.bf16.mxu0 %v7830_v58 }
 0x230   :  { %v1282_v5 = vadd.f32 %v1281_v14, %v1280_v50  ;;  %v1293_v61 = vadd.f32 %v1292_v29, %v7814_v43  ;;  %v6163_v50 = vld [vmem:[%s6840_s24 + $0x18] sm:$0xff]   ;;  %v6165_v14 = vld [vmem:[%s6840_s24 + $0x28] sm:$0xff]   ;;  %v6166_v29 = vld [vmem:[%s6840_s24 + $0x30] sm:$0xff]   ;;  %s9027_s24 = sld [smem:[#allocation27_spill]] }
 0x232   :  { %v1283_v48 = vrot.slane %v1282_v5, 2  ;;  %v1294_v31 = vadd.f32 %v1293_v61, %v7819_v23  ;;  %5903 = vmatpush3.bf16.msra.mxu0 %v6157_v54  ;;  %v6169_v61 = vld [vmem:[%s6855_s12 + $0x8] sm:$0xff]  }
 0x233   :  { %5904 = vmatprep.subr.bf16.mxu0 %v7830_v58 }
 0x234   :  { %v1295_v46 = vadd.f32 %v1294_v31, %v7824_v4  ;;  %v1284_v24 = vadd.f32 %v1283_v48, %v1282_v5  ;;  %v6168_v5 = vld [vmem:[%s6855_s12] sm:$0xff]   ;;  %v6170_v48 = vld [vmem:[%s6855_s12 + $0x10] sm:$0xff]   ;;  %v6171_v31 = vld [vmem:[%s6855_s12 + $0x18] sm:$0xff]  }
 0x236   :  { %v1296_v62 = vrot.slane %v1295_v46, 4  ;;  %v1285_v41 = vrot.slane %v1284_v24, 1  ;;  %5905 = vmatpush3.bf16.msra.mxu0 %v6158_v28 }
 0x237   :  { %5906 = vmatprep.subr.bf16.mxu0 %v7830_v58 }
 0x238   :  { %v1297_v40 = vadd.f32 %v1296_v62, %v1295_v46  ;;  %v1286_v52 = vadd.f32 %v1285_v41, %v1284_v24  ;;  %v6172_v46 = vld [vmem:[%s6855_s12 + $0x20] sm:$0xff]  }
 0x239   :  { %v5515_v24 = vld [vmem:[%s9015_s5] ss:$0 sm:$0xff] }
 0x23a   :  { %v1298_v9 = vrot.slane %v1297_v40, 2  ;;  %v1288_v63 = vmul.f32 0.015625, %v1286_v52  ;;  %5907 = vmatpush3.bf16.msra.mxu0 %v6159_v55 }
 0x23b   :  { %5944 = vmatprep.subr.bf16.mxu0 %v6168_v5 }
 0x23c   :  { %v1299_v12 = vadd.f32 %v1298_v9, %v1297_v40 }
 0x23e   :  { %v1300_v11 = vrot.slane %v1299_v12, 1 }
 0x240   :  { %v1301_v27 = vadd.f32 %v1300_v11, %v1299_v12 }
 0x242   :  { %v1302_v7 = vmul.f32 0.015625, %v1301_v27 }
 0x244   :  { %v1304_v47 = vsel %vm1303_vm1, %v1288_v63, %v1302_v7  ;;  %v1540_v7 = vlaneseq }
 0x245   :  { %v1305_v8 = vpack.c.bf16 %v1304_v47, %v1304_v47 }
 0x246   :  { %v1541_v47 = vshrl.u32 %v1540_v7, 7 }
 0x247   :  { %5889 = vmatmul.mubr.bf16.vlgmr.msra.gmra.mrb[0].mxu1 %v1305_v8 }
 0x248   :  { %5913 = vmatpush3.bf16.msra.mxu1 %v6160_v45  ;;  %v7862_v8 = vsub.s32 0, %v1541_v47  ;;  %v7865_v59 = vsub.s32 1, %v1541_v47 }
 0x249   :  { %5914 = vmatprep.subr.bf16.mxu1 %v6161_v49 }
 0x24a   :  { %9016 = vst [vmem:[#allocation55_spill] sm:$0xff] %v7862_v8  ;;  %9017 = vst [vmem:[#allocation62_spill] sm:$0xff] %v7865_v59 }
 0x24c   :  { %5915 = vmatpush3.bf16.msra.mxu1 %v6161_v49 }
 0x24d   :  { %5916 = vmatprep.subr.bf16.mxu1 %v6162_v2 }
 0x250   :  { %5917 = vmatpush3.bf16.msra.mxu1 %v6162_v2 }
 0x251   :  { %5918 = vmatprep.subr.bf16.mxu1 %v6163_v50 }
 0x254   :  { %5919 = vmatpush3.bf16.msra.mxu1 %v6163_v50 }
 0x255   :  { %5920 = vmatprep.subr.bf16.mxu1 %v6164_v35 }
 0x258   :  { %5921 = vmatpush3.bf16.msra.mxu1 %v6164_v35 }
 0x259   :  { %5922 = vmatprep.subr.bf16.mxu1 %v6165_v14 }
 0x25c   :  { %5923 = vmatpush3.bf16.msra.mxu1 %v6165_v14 }
 0x25d   :  { %5924 = vmatprep.subr.bf16.mxu1 %v6166_v29 }
 0x260   :  { %5925 = vmatpush3.bf16.msra.mxu1 %v6166_v29 }
 0x261   :  { %5926 = vmatprep.subr.bf16.mxu1 %v6167_v56 }
 0x264   :  { %5927 = vmatpush3.bf16.msra.mxu1 %v6167_v56 }
 0x265   :  { %5976 = vmatprep.subr.bf16.mxu1 %v7830_v58 }
 0x31a   :  { %v1411_v22 = vpop.f32.mrb[0].mxu1 }
 0x31b   :  { %v1412_v26 = vadd.f32 %v5506_v18, %v1411_v22  ;;  %v5890_v51 = vpop.f32.mrb[1].mxu1 }
 0x31c   :  { %v1414_v10 = vpop.f32.mrb[2].mxu1 }
 0x31d   :  { %v1417_v15 = vsub.f32 0.0, %v1412_v26  ;;  %v5891_v39 = vpop.f32.mrb[3].mxu1 }
 0x31f   :  { %v1418_v25 = vmul.f32 1.442695, %v1417_v15 }
 0x321   :  { %6424 = vpow2.f32 %v1418_v25 }
 0x32b   :  { %v6425_v36 = vpop.eup %6424 }
 0x32c   :  { %v1420_v33 = vadd.f32 1.0, %v6425_v36 }
 0x32e   :  { %6426 = vrcp.f32 %v1420_v33 }
 0x338   :  { %v6427_v57 = vpop.eup %6426 }
 0x339   :  { %v1422_v0 = vmul.f32 %v6427_v57, %v1412_v26 }
 0x33b   :  { %v1423_v19 = vpack.c.bf16 %v1422_v0, %v1422_v0 }
 0x33d   :  { %5909 = vmatmul.mubr.bf16.vlgmr.msra.gmra.mrb[16].mxu0 %v1423_v19 }
 0x33e   :  { %5945 = vmatpush3.bf16.msra.mxu0 %v6168_v5  ;;  %v6613_v5 = vld [vmem:[#allocation2 + $0x1f] sm:$0xff] }
 0x33f   :  { %5946 = vmatprep.subr.bf16.mxu0 %v6169_v61 }
 0x342   :  { %5947 = vmatpush3.bf16.msra.mxu0 %v6169_v61 }
 0x343   :  { %5948 = vmatprep.subr.bf16.mxu0 %v6170_v48 }
 0x346   :  { %5949 = vmatpush3.bf16.msra.mxu0 %v6170_v48  ;;  %v6614_v48 = vld [vmem:[#allocation2 + $0x29] sm:$0xff] }
 0x347   :  { %5950 = vmatprep.subr.bf16.mxu0 %v6171_v31 }
 0x34a   :  { %5951 = vmatpush3.bf16.msra.mxu0 %v6171_v31 }
 0x34b   :  { %5952 = vmatprep.subr.bf16.mxu0 %v6172_v46 }
 0x34e   :  { %5953 = vmatpush3.bf16.msra.mxu0 %v6172_v46  ;;  %v6615_v46 = vld [vmem:[#allocation2 + $0xb] sm:$0xff] }
 0x410   :  { %v1529_v62 = vpop.f32.mrb[16].mxu0 }
 0x411   :  { %v1530_v40 = vadd.f32 %v5515_v24, %v1529_v62  ;;  %v5910_v41 = vpop.f32.mrb[17].mxu0  ;;  %v6616_v62 = vld [vmem:[#allocation2 + $0x15] sm:$0xff] }
 0x412   :  { %v1532_v9 = vpop.f32.mrb[18].mxu0 }
 0x413   :  { %v1535_v12 = vsub.f32 0.0, %v1530_v40  ;;  %v5911_v52 = vpop.f32.mrb[19].mxu0 }
 0x415   :  { %v1536_v11 = vmul.f32 1.442695, %v1535_v12 }
 0x417   :  { %6428 = vpow2.f32 %v1536_v11 }
 0x421   :  { %v6429_v27 = vpop.eup %6428 }
 0x422   :  { %v1538_v63 = vadd.f32 1.0, %v6429_v27 }
 0x424   :  { %6430 = vrcp.f32 %v1538_v63 }
 0x42e   :  { %v6431_v17 = vpop.eup %6430 }
 0x42f   :  { %v1543_v20 = vrot.slane %v6431_v17, %v7862_v8  ;;  %v1547_v51 = vrot.slane %v6431_v17, %v7865_v59 }
 0x431   :  { %v1548_v38 = vmul.f32 %v1543_v20, %v7765_v42  ;;  %v1549_v53 = vmul.f32 %v1543_v20, %v7768_v6  ;;  %v1550_v54 = vmul.f32 %v1543_v20, %v7771_v30  ;;  %v1551_v28 = vmul.f32 %v1543_v20, %v7776_v60 }
 0x432   :  { %v1552_v55 = vmul.f32 %v1543_v20, %v7780_v34  ;;  %v1553_v18 = vmul.f32 %v1543_v20, %v7783_v3  ;;  %v1554_v42 = vmul.f32 %v1543_v20, %v7787_v32  ;;  %v1555_v6 = vmul.f32 %v1543_v20, %v7803_v1 }
 0x433   :  { %v1564_v22 = vpack.c.bf16 %v1549_v53, %v1548_v38  ;;  %v1565_v26 = vpack.c.bf16 %v1551_v28, %v1550_v54  ;;  %v1556_v30 = vmul.f32 %v1547_v51, %v7790_v37  ;;  %v1557_v60 = vmul.f32 %v1547_v51, %v7793_v16  ;;  %v6617_v28 = vld [vmem:[#allocation2 + $0x47] sm:$0xff] }
 0x434   :  { %v1566_v10 = vpack.c.bf16 %v1553_v18, %v1552_v55  ;;  %v1567_v15 = vpack.c.bf16 %v1555_v6, %v1554_v42  ;;  %v1558_v3 = vmul.f32 %v1547_v51, %v7797_v44  ;;  %v1559_v39 = vmul.f32 %v1547_v51, %v7806_v21  ;;  %v6173_v44 = vld [vmem:[%s6855_s12 + $0x28] sm:$0xff]   ;;  %v6174_v21 = vld [vmem:[%s6855_s12 + $0x30] sm:$0xff]  }
 0x435   :  { %5928 = vmatprep.mubr.bf16.mxu1 %v1564_v22  ;;  %v1568_v34 = vpack.c.bf16 %v1557_v60, %v1556_v30  ;;  %v1560_v25 = vmul.f32 %v1547_v51, %v7811_v13  ;;  %v1561_v32 = vmul.f32 %v1547_v51, %v7814_v43  ;;  %v1562_v37 = vmul.f32 %v1547_v51, %v7819_v23  ;;  %v6175_v13 = vld [vmem:[%s6855_s12 + $0x38] sm:$0xff]   ;;  %v7891_v43 = vld [vmem:[%s9018_s9] ss:$0 sm:$0xff]  ;;  %s9029_s12 = sld [smem:[#allocation33_spill]] }
 0x436   :  { %5929 = vmatmul.mubr.bf16.vlgmr.msra.gmra.mrb[4].mxu1 %v1565_v26  ;;  %v1569_v1 = vpack.c.bf16 %v1559_v39, %v1558_v3  ;;  %v1563_v16 = vmul.f32 %v1547_v51, %v7824_v4  ;;  %5954 = vmatprep.subr.bf16.mxu0 %v6173_v44  ;;  %v7894_v4 = vld [vmem:[%s9019_s13] ss:$0 sm:$0xff]  ;;  %v6618_v18 = vld [vmem:[#allocation2 + $0x51] sm:$0xff] }
 0x437   :  { %5932 = vmatprep.mubr.bf16.mxu1 %v1566_v10  ;;  %v1570_v36 = vpack.c.bf16 %v1561_v32, %v1560_v25  ;;  %5955 = vmatpush3.bf16.msra.mxu0 %v6173_v44  ;;  %v6619_v26 = vld [vmem:[#allocation2 + $0x33] sm:$0xff]  ;;  %v6620_v10 = vld [vmem:[#allocation2 + $0x3d] sm:$0xff] }
 0x438   :  { %v1571_v33 = vpack.c.bf16 %v1563_v16, %v1562_v37  ;;  %5956 = vmatprep.subr.bf16.mxu0 %v6174_v21  ;;  %v6621_v44 = vld [vmem:[#allocation2 + $0x83] sm:$0xff] }
 0x43b   :  { %5957 = vmatpush3.bf16.msra.mxu0 %v6174_v21 }
 0x43c   :  { %5958 = vmatprep.subr.bf16.mxu0 %v6175_v13 }
 0x43e   :  { %5933 = vmatmul.mubr.bf16.gmra.mrb[8].mxu1 %v1567_v15 }
 0x43f   :  { %5936 = vmatprep.mubr.bf16.mxu1 %v1568_v34  ;;  %5959 = vmatpush3.bf16.msra.mxu0 %v6175_v13  ;;  %v6622_v13 = vld [vmem:[#allocation2 + $0x8d] sm:$0xff] }
 0x440   :  { %5996 = vmatprep.subr.bf16.mxu0 %v7830_v58 }
 0x446   :  { %5937 = vmatmul.mubr.bf16.gmra.mrb[12].mxu1 %v1569_v1 }
 0x447   :  { %5940 = vmatprep.mubr.bf16.mxu1 %v1570_v36 }
 0x44e   :  { %5941 = vmatmul.mubr.bf16.gmra.mrb[16].mxu1 %v1571_v33 }
 0x44f   :  { %5992 = vmatprep.mubr.msk.bf16.mxu1 %vm6775_vm0, %v7830_v58 }
 0x509   :  { %v5930_v23 = vpop.f32.mrb[4].mxu1 }
 0x50a   :  { %v1742_v57 = vmul.f32 %v5930_v23, %v7891_v43  ;;  %v1670_v0 = vpop.f32.mrb[5].mxu1 }
 0x50b   :  { %v1740_v19 = vmul.f32 %v7891_v43, %v1670_v0  ;;  %v5931_v45 = vpop.f32.mrb[6].mxu1 }
 0x50c   :  { %v1765_v49 = vadd.f32 %v7894_v4, %v1742_v57  ;;  %v1743_v2 = vmul.f32 %v5931_v45, %v7891_v43  ;;  %v1673_v50 = vpop.f32.mrb[7].mxu1  ;;  %v6623_v57 = vld [vmem:[#allocation2 + $0x6f] sm:$0xff] }
 0x50d   :  { %v1763_v35 = vadd.f32 %v7894_v4, %v1740_v19  ;;  %v1741_v14 = vmul.f32 %v7891_v43, %v1673_v50  ;;  %v6624_v19 = vld [vmem:[#allocation2 + $0x79] sm:$0xff] }
 0x50e   :  { %v1766_v29 = vadd.f32 %v7894_v4, %v1743_v2  ;;  %v1781_v61 = vadd.f32 %v6613_v5, %v1765_v49 }
 0x50f   :  { %v1764_v56 = vadd.f32 %v7894_v4, %v1741_v14  ;;  %v1779_v24 = vadd.f32 %v6615_v46, %v1763_v35 }
 0x510   :  { %v1782_v31 = vadd.f32 %v6614_v48, %v1766_v29 }
 0x511   :  { %v1780_v40 = vadd.f32 %v6616_v62, %v1764_v56  ;;  %v5934_v41 = vpop.f32.mrb[8].mxu1 }
 0x512   :  { %v1796_v9 = vpack.c.bf16 %v1782_v31, %v1781_v61  ;;  %v1746_v12 = vmul.f32 %v5934_v41, %v7891_v43  ;;  %v1686_v52 = vpop.f32.mrb[9].mxu1 }
 0x513   :  { %v1744_v11 = vmul.f32 %v7891_v43, %v1686_v52  ;;  %v5935_v27 = vpop.f32.mrb[10].mxu1  ;;  %v1795_v63 = vpack.c.bf16 %v1780_v40, %v1779_v24  ;;  %v6625_v40 = vld [vmem:[#allocation2 + $0xab] sm:$0xff]  ;;  %v6627_v52 = vld [vmem:[#allocation2 + $0x97] sm:$0xff] }
 0x514   :  { %v1769_v7 = vadd.f32 %v7894_v4, %v1746_v12  ;;  %v1747_v47 = vmul.f32 %v5935_v27, %v7891_v43  ;;  %v1689_v17 = vpop.f32.mrb[11].mxu1  ;;  %v6628_v27 = vld [vmem:[#allocation2 + $0xa1] sm:$0xff] }
 0x515   :  { %v1767_v20 = vadd.f32 %v7894_v4, %v1744_v11  ;;  %v1745_v38 = vmul.f32 %v7891_v43, %v1689_v17  ;;  %5960 = vmatprep.mubr.bf16.mxu0 %v1795_v63  ;;  %v6178_v17 = vld [vmem:[%s9020_s17 + $0x10] sm:$0xff]  }
 0x516   :  { %v1770_v53 = vadd.f32 %v7894_v4, %v1747_v47  ;;  %5961 = vmatmul.mubr.bf16.vlgmr.msra.gmra.mrb[20].mxu0 %v1796_v9  ;;  %v1785_v55 = vadd.f32 %v6617_v28, %v1769_v7  ;;  %v6626_v9 = vld [vmem:[#allocation2 + $0xb5] sm:$0xff]  ;;  %v6177_v47 = vld [vmem:[%s9020_s17 + $0x8] sm:$0xff]   ;;  %v7943_v28 = vld [vmem:[%s9022_s25] ss:$0 sm:$0xff] }
 0x517   :  { %v1768_v54 = vadd.f32 %v7894_v4, %v1745_v38  ;;  %v1783_v51 = vadd.f32 %v6619_v26, %v1767_v20  ;;  %v6179_v20 = vld [vmem:[%s9020_s17 + $0x18] sm:$0xff]   ;;  %v6180_v38 = vld [vmem:[%s9020_s17 + $0x20] sm:$0xff]  }
 0x518   :  { %v1786_v22 = vadd.f32 %v6618_v18, %v1770_v53  ;;  %v7939_v53 = vld [vmem:[%s9021_s21] ss:$0 sm:$0xff] }
 0x519   :  { %v1784_v42 = vadd.f32 %v6620_v10, %v1768_v54  ;;  %v5938_v6 = vpop.f32.mrb[12].mxu1 }
 0x51a   :  { %v1750_v30 = vmul.f32 %v5938_v6, %v7891_v43  ;;  %v1702_v60 = vpop.f32.mrb[13].mxu1  ;;  %v1798_v15 = vpack.c.bf16 %v1786_v22, %v1785_v55  ;;  %v6181_v22 = vld [vmem:[%s9020_s17 + $0x28] sm:$0xff]  }
 0x51b   :  { %v1748_v34 = vmul.f32 %v7891_v43, %v1702_v60  ;;  %v5939_v3 = vpop.f32.mrb[14].mxu1  ;;  %v1797_v39 = vpack.c.bf16 %v1784_v42, %v1783_v51 }
 0x51c   :  { %v1773_v25 = vadd.f32 %v7894_v4, %v1750_v30  ;;  %v1751_v32 = vmul.f32 %v5939_v3, %v7891_v43  ;;  %v1705_v1 = vpop.f32.mrb[15].mxu1  ;;  %v6182_v3 = vld [vmem:[%s9020_s17 + $0x30] sm:$0xff]  }
 0x51d   :  { %v1771_v36 = vadd.f32 %v7894_v4, %v1748_v34  ;;  %v1749_v37 = vmul.f32 %v7891_v43, %v1705_v1  ;;  %5964 = vmatprep.mubr.bf16.mxu0 %v1797_v39 }
 0x51e   :  { %v1774_v16 = vadd.f32 %v7894_v4, %v1751_v32  ;;  %5965 = vmatmul.mubr.bf16.gmra.mrb[24].mxu0 %v1798_v15  ;;  %v1789_v21 = vadd.f32 %v6621_v44, %v1773_v25 }
 0x51f   :  { %v1772_v33 = vadd.f32 %v7894_v4, %v1749_v37  ;;  %v1787_v0 = vadd.f32 %v6623_v57, %v1771_v36 }
 0x520   :  { %v1790_v23 = vadd.f32 %v6622_v13, %v1774_v16  ;;  %v6183_v13 = vld [vmem:[%s9020_s17 + $0x38] sm:$0xff]  }
 0x521   :  { %v1788_v45 = vadd.f32 %v6624_v19, %v1772_v33  ;;  %v5942_v49 = vpop.f32.mrb[16].mxu1 }
 0x522   :  { %v1754_v2 = vmul.f32 %v5942_v49, %v7891_v43  ;;  %v1718_v50 = vpop.f32.mrb[17].mxu1  ;;  %v1800_v35 = vpack.c.bf16 %v1790_v23, %v1789_v21 }
 0x523   :  { %v1752_v14 = vmul.f32 %v7891_v43, %v1718_v50  ;;  %v5943_v29 = vpop.f32.mrb[18].mxu1  ;;  %v1799_v56 = vpack.c.bf16 %v1788_v45, %v1787_v0 }
 0x524   :  { %v1777_v5 = vadd.f32 %v7894_v4, %v1754_v2  ;;  %v1755_v61 = vmul.f32 %v5943_v29, %v7891_v43  ;;  %v1721_v48 = vpop.f32.mrb[19].mxu1 }
 0x525   :  { %v1775_v31 = vadd.f32 %v7894_v4, %v1752_v14  ;;  %v1753_v46 = vmul.f32 %v7891_v43, %v1721_v48  ;;  %5968 = vmatprep.mubr.bf16.mxu0 %v1799_v56 }
 0x526   :  { %v1778_v24 = vadd.f32 %v7894_v4, %v1755_v61  ;;  %5969 = vmatmul.mubr.bf16.gmra.mrb[28].mxu0 %v1800_v35  ;;  %v1793_v41 = vadd.f32 %v6625_v40, %v1777_v5 }
 0x527   :  { %v1776_v62 = vadd.f32 %v7894_v4, %v1753_v46  ;;  %v1791_v11 = vadd.f32 %v6627_v52, %v1775_v31  ;;  %v6176_v4 = vld [vmem:[%s9020_s17] sm:$0xff]  }
 0x528   :  { %v1794_v12 = vadd.f32 %v6626_v9, %v1778_v24  ;;  %5977 = vmatpush3.bf16.msra.mxu1 %v6176_v4 }
 0x529   :  { %v1792_v63 = vadd.f32 %v6628_v27, %v1776_v62  ;;  %5978 = vmatprep.subr.bf16.mxu1 %v7830_v58 }
 0x52a   :  { %v1802_v7 = vpack.c.bf16 %v1794_v12, %v1793_v41 }
 0x52b   :  { %v1801_v43 = vpack.c.bf16 %v1792_v63, %v1791_v11 }
 0x52c   :  { %5979 = vmatpush3.bf16.msra.mxu1 %v6177_v47 }
 0x52d   :  { %5972 = vmatprep.mubr.bf16.mxu0 %v1801_v43  ;;  %5980 = vmatprep.subr.bf16.mxu1 %v7830_v58 }
 0x52e   :  { %5973 = vmatmul.mubr.bf16.gmra.mrb[32].mxu0 %v1802_v7 }
 0x52f   :  { %6012 = vmatprep.mubr.msk.bf16.mxu0 %vm6775_vm0, %v7830_v58 }
 0x530   :  { %5981 = vmatpush3.bf16.msra.mxu1 %v6178_v17 }
 0x531   :  { %5982 = vmatprep.subr.bf16.mxu1 %v7830_v58 }
 0x534   :  { %5983 = vmatpush3.bf16.msra.mxu1 %v6179_v20 }
 0x535   :  { %5984 = vmatprep.subr.bf16.mxu1 %v7830_v58 }
 0x538   :  { %5985 = vmatpush3.bf16.msra.mxu1 %v6180_v38 }
 0x539   :  { %5986 = vmatprep.subr.bf16.mxu1 %v7830_v58 }
 0x53c   :  { %5987 = vmatpush3.bf16.msra.mxu1 %v6181_v22 }
 0x53d   :  { %5988 = vmatprep.subr.bf16.mxu1 %v7830_v58 }
 0x540   :  { %5989 = vmatpush3.bf16.msra.mxu1 %v6182_v3 }
 0x541   :  { %5990 = vmatprep.subr.bf16.mxu1 %v7830_v58 }
 0x544   :  { %5991 = vmatpush3.bf16.msra.mxu1 %v6183_v13 }
 0x5e9   :  { %v5962_v54 = vpop.f32.mrb[20].mxu0 }
 0x5ea   :  { %v1973_v55 = vmul.f32 %v5962_v54, %v7939_v53  ;;  %v1901_v18 = vpop.f32.mrb[21].mxu0 }
 0x5eb   :  { %v1971_v26 = vmul.f32 %v7939_v53, %v1901_v18  ;;  %v5963_v51 = vpop.f32.mrb[22].mxu0 }
 0x5ec   :  { %v7950_v10 = vadd.f32 %v7943_v28, %v1973_v55  ;;  %v1974_v42 = vmul.f32 %v5963_v51, %v7939_v53  ;;  %v1904_v6 = vpop.f32.mrb[23].mxu0 }
 0x5ed   :  { %v7954_v30 = vadd.f32 %v7943_v28, %v1971_v26  ;;  %v1972_v60 = vmul.f32 %v7939_v53, %v1904_v6 }
 0x5ee   :  { %v2012_v15 = vsub.f32 0.0, %v7950_v10  ;;  %v7959_v34 = vadd.f32 %v7943_v28, %v1974_v42 }
 0x5ef   :  { %v2010_v39 = vsub.f32 0.0, %v7954_v30  ;;  %v7964_v25 = vadd.f32 %v7943_v28, %v1972_v60 }
 0x5f0   :  { %v2030_v32 = vmul.f32 1.442695, %v2012_v15  ;;  %v2013_v1 = vsub.f32 0.0, %v7959_v34 }
 0x5f1   :  { %v2026_v36 = vmul.f32 1.442695, %v2010_v39  ;;  %v2011_v37 = vsub.f32 0.0, %v7964_v25  ;;  %v5966_v16 = vpop.f32.mrb[24].mxu0 }
 0x5f2   :  { %6432 = vpow2.f32 %v2030_v32  ;;  %v2032_v33 = vmul.f32 1.442695, %v2013_v1  ;;  %v1977_v44 = vmul.f32 %v5966_v16, %v7939_v53  ;;  %v1917_v21 = vpop.f32.mrb[25].mxu0 }
 0x5f3   :  { %6434 = vpow2.f32 %v2026_v36  ;;  %v2028_v23 = vmul.f32 1.442695, %v2011_v37  ;;  %v1975_v57 = vmul.f32 %v7939_v53, %v1917_v21  ;;  %v5967_v0 = vpop.f32.mrb[26].mxu0 }
 0x5f4   :  { %6436 = vpow2.f32 %v2032_v33  ;;  %v7974_v19 = vadd.f32 %v7943_v28, %v1977_v44  ;;  %v1978_v45 = vmul.f32 %v5967_v0, %v7939_v53  ;;  %v1920_v49 = vpop.f32.mrb[27].mxu0 }
 0x5f5   :  { %6438 = vpow2.f32 %v2028_v23  ;;  %v7978_v2 = vadd.f32 %v7943_v28, %v1975_v57  ;;  %v1976_v50 = vmul.f32 %v7939_v53, %v1920_v49 }
 0x5f6   :  { %v2016_v35 = vsub.f32 0.0, %v7974_v19  ;;  %v7983_v14 = vadd.f32 %v7943_v28, %v1978_v45 }
 0x5f7   :  { %v2014_v58 = vsub.f32 0.0, %v7978_v2  ;;  %v7987_v29 = vadd.f32 %v7943_v28, %v1976_v50 }
 0x5f8   :  { %v2038_v56 = vmul.f32 1.442695, %v2016_v35  ;;  %v2017_v5 = vsub.f32 0.0, %v7983_v14 }
 0x5f9   :  { %v2034_v61 = vmul.f32 1.442695, %v2014_v58  ;;  %v2015_v48 = vsub.f32 0.0, %v7987_v29  ;;  %v5970_v31 = vpop.f32.mrb[28].mxu0 }
 0x5fa   :  { %6440 = vpow2.f32 %v2038_v56  ;;  %v2040_v46 = vmul.f32 1.442695, %v2017_v5  ;;  %v1981_v24 = vmul.f32 %v5970_v31, %v7939_v53  ;;  %v1933_v62 = vpop.f32.mrb[29].mxu0 }
 0x5fb   :  { %6442 = vpow2.f32 %v2034_v61  ;;  %v2036_v40 = vmul.f32 1.442695, %v2015_v48  ;;  %v1979_v41 = vmul.f32 %v7939_v53, %v1933_v62  ;;  %v5971_v9 = vpop.f32.mrb[30].mxu0 }
 0x5fc   :  { %v6433_v12 = vpop.eup %6432  ;;  %6444 = vpow2.f32 %v2040_v46  ;;  %v7994_v52 = vadd.f32 %v7943_v28, %v1981_v24  ;;  %v1982_v11 = vmul.f32 %v5971_v9, %v7939_v53  ;;  %v1936_v27 = vpop.f32.mrb[31].mxu0 }
 0x5fd   :  { %v6435_v63 = vpop.eup %6434  ;;  %v2060_v7 = vadd.f32 1.0, %v6433_v12  ;;  %6446 = vpow2.f32 %v2036_v40  ;;  %v7998_v43 = vadd.f32 %v7943_v28, %v1979_v41  ;;  %v1980_v4 = vmul.f32 %v7939_v53, %v1936_v27 }
 0x5fe   :  { %v6437_v47 = vpop.eup %6436  ;;  %v2058_v17 = vadd.f32 1.0, %v6435_v63  ;;  %v2020_v20 = vsub.f32 0.0, %v7994_v52  ;;  %v8003_v38 = vadd.f32 %v7943_v28, %v1982_v11 }
 0x5ff   :  { %v6439_v54 = vpop.eup %6438  ;;  %6448 = vrcp.f32 %v2060_v7  ;;  %v2061_v55 = vadd.f32 1.0, %v6437_v47  ;;  %v2018_v18 = vsub.f32 0.0, %v7998_v43  ;;  %v8007_v22 = vadd.f32 %v7943_v28, %v1980_v4 }
 0x600   :  { %6450 = vrcp.f32 %v2058_v17  ;;  %v2059_v26 = vadd.f32 1.0, %v6439_v54  ;;  %v2046_v51 = vmul.f32 1.442695, %v2020_v20  ;;  %v2021_v42 = vsub.f32 0.0, %v8003_v38  ;;  %v8034_v17 = vld [vmem:[%s9023_s29] ss:$0 sm:$0xff] }
 0x601   :  { %6452 = vrcp.f32 %v2061_v55  ;;  %v2042_v6 = vmul.f32 1.442695, %v2018_v18  ;;  %v2019_v60 = vsub.f32 0.0, %v8007_v22  ;;  %v5974_v15 = vpop.f32.mrb[32].mxu0  ;;  %v8038_v55 = vld [vmem:[%s9023_s29 + $0x1] ss:$0 sm:$0xff] }
 0x602   :  { %6454 = vrcp.f32 %v2059_v26  ;;  %v2048_v3 = vmul.f32 1.442695, %v2021_v42  ;;  %v1985_v39 = vmul.f32 %v5974_v15, %v7939_v53  ;;  %v1949_v32 = vpop.f32.mrb[33].mxu0  ;;  %v8041_v18 = vld [vmem:[%s9023_s29 + $0x2] ss:$0 sm:$0xff] }
 0x603   :  { %6456 = vpow2.f32 %v2046_v51  ;;  %v2044_v1 = vmul.f32 1.442695, %v2019_v60  ;;  %v5975_v36 = vpop.f32.mrb[34].mxu0  ;;  %v1983_v50 = vmul.f32 %v7939_v53, %v1949_v32  ;;  %v8049_v32 = vld [vmem:[%s9023_s29 + $0x3] ss:$0 sm:$0xff] }
 0x604   :  { %v6441_v37 = vpop.eup %6440  ;;  %6458 = vpow2.f32 %v2042_v6  ;;  %v8013_v16 = vadd.f32 %v7943_v28, %v1985_v39  ;;  %v1952_v33 = vpop.f32.mrb[35].mxu0  ;;  %v1986_v31 = vmul.f32 %v5975_v36, %v7939_v53 }
 0x605   :  { %v6443_v44 = vpop.eup %6442  ;;  %v2064_v21 = vadd.f32 1.0, %v6441_v37  ;;  %6460 = vpow2.f32 %v2048_v3  ;;  %v8022_v62 = vadd.f32 %v7943_v28, %v1983_v50  ;;  %v1984_v40 = vmul.f32 %v7939_v53, %v1952_v33 }
 0x606   :  { %v6445_v13 = vpop.eup %6444  ;;  %v2062_v23 = vadd.f32 1.0, %v6443_v44  ;;  %6462 = vpow2.f32 %v2044_v1  ;;  %v2024_v57 = vsub.f32 0.0, %v8013_v16 }
 0x607   :  { %v6447_v0 = vpop.eup %6446  ;;  %6464 = vrcp.f32 %v2064_v21  ;;  %v2065_v45 = vadd.f32 1.0, %v6445_v13  ;;  %v2022_v63 = vsub.f32 0.0, %v8022_v62 }
 0x608   :  { %6466 = vrcp.f32 %v2062_v23  ;;  %v2063_v49 = vadd.f32 1.0, %v6447_v0  ;;  %v2054_v5 = vmul.f32 1.442695, %v2024_v57  ;;  %v8057_v0 = vld [vmem:[%s9023_s29 + $0x4] ss:$0 sm:$0xff] }
 0x609   :  { %v6449_v35 = vpop.eup %6448  ;;  %6468 = vrcp.f32 %v2065_v45  ;;  %v2050_v60 = vmul.f32 1.442695, %v2022_v63 }
 0x60a   :  { %v6451_v58 = vpop.eup %6450  ;;  %v2092_v56 = vmul.f32 %v6449_v35, %v7950_v10  ;;  %6470 = vrcp.f32 %v2063_v49 }
 0x60b   :  { %v6453_v61 = vpop.eup %6452  ;;  %v2090_v48 = vmul.f32 %v6451_v58, %v7954_v30  ;;  %6472 = vpow2.f32 %v2054_v5 }
 0x60c   :  { %v6455_v46 = vpop.eup %6454  ;;  %2110 = vst [vmem:[#allocation4 + $0x12] sm:$0xff] %v2092_v56  ;;  %v2093_v24 = vmul.f32 %v6453_v61, %v7959_v34  ;;  %v8027_v34 = vadd.f32 %v7943_v28, %v1986_v31 }
 0x60d   :  { %v6457_v41 = vpop.eup %6456  ;;  %2106 = vst [vmem:[#allocation4] sm:$0xff] %v2090_v48  ;;  %v2091_v10 = vmul.f32 %v6455_v46, %v7964_v25  ;;  %v8031_v25 = vadd.f32 %v7943_v28, %v1984_v40 }
 0x60e   :  { %v6459_v9 = vpop.eup %6458  ;;  %2112 = vst [vmem:[#allocation4 + $0x1b] sm:$0xff] %v2093_v24  ;;  %v2068_v12 = vadd.f32 1.0, %v6457_v41  ;;  %v2025_v28 = vsub.f32 0.0, %v8027_v34  ;;  %v8062_v24 = vld [vmem:[%s9023_s29 + $0x5] ss:$0 sm:$0xff] }
 0x60f   :  { %v6461_v30 = vpop.eup %6460  ;;  %2108 = vst [vmem:[#allocation4 + $0x9] sm:$0xff] %v2091_v10  ;;  %v2066_v11 = vadd.f32 1.0, %v6459_v9 }
 0x610   :  { %v6463_v27 = vpop.eup %6462  ;;  %6474 = vrcp.f32 %v2068_v12  ;;  %v2069_v53 = vadd.f32 1.0, %v6461_v30  ;;  %v8067_v30 = vld [vmem:[%s9023_s29 + $0x6] ss:$0 sm:$0xff] }
 0x611   :  { %v6465_v7 = vpop.eup %6464  ;;  %6476 = vrcp.f32 %v2066_v11  ;;  %v2067_v4 = vadd.f32 1.0, %v6463_v27 }
 0x612   :  { %v6467_v47 = vpop.eup %6466  ;;  %v2096_v20 = vmul.f32 %v6465_v7, %v7974_v19  ;;  %6478 = vrcp.f32 %v2069_v53  ;;  %v2023_v19 = vsub.f32 0.0, %v8031_v25 }
 0x613   :  { %v6469_v54 = vpop.eup %6468  ;;  %v2094_v26 = vmul.f32 %v6467_v47, %v7978_v2  ;;  %6480 = vrcp.f32 %v2067_v4  ;;  %v2220_v42 = vld [vmem:[#allocation4 + $0x12] ss:$2 sm:$0xf]  ;;  %v2222_v3 = vld [vmem:[#allocation4 + $0x13] ss:$2 sm:$0xf] }
 0x614   :  { %v6471_v51 = vpop.eup %6470  ;;  %2118 = vst [vmem:[#allocation4 + $0x36] sm:$0xff] %v2096_v20  ;;  %v2097_v6 = vmul.f32 %v6469_v54, %v7983_v14  ;;  %v2221_v15 = vmul.f32 %v8034_v17, %v2220_v42  ;;  %v2225_v39 = vld [vmem:[#allocation4 + $0x14] ss:$2 sm:$0xf]  ;;  %v2223_v1 = vmul.f32 %v8038_v55, %v2222_v3  ;;  %6482 = vpow2.f32 %v2050_v60  ;;  %v8075_v42 = vld [vmem:[%s9023_s29 + $0x7] ss:$0 sm:$0xff] }
 0x615   :  { %2114 = vst [vmem:[#allocation4 + $0x24] sm:$0xff] %v2094_v26  ;;  %v2095_v2 = vmul.f32 %v6471_v51, %v7987_v29  ;;  %v2185_v36 = vld [vmem:[#allocation4] ss:$2 sm:$0xf]  ;;  %v6473_v13 = vpop.eup %6472  ;;  %v2226_v57 = vmul.f32 %v8041_v18, %v2225_v39  ;;  %v2056_v29 = vmul.f32 1.442695, %v2025_v28 }
 0x616   :  { %v2188_v37 = vld [vmem:[#allocation4 + $0x1] ss:$2 sm:$0xf]  ;;  %2120 = vst [vmem:[#allocation4 + $0x3f] sm:$0xff] %v2097_v6  ;;  %v2186_v14 = vmul.f32 %v8034_v17, %v2185_v36  ;;  %v2224_v23 = vadd.f32 %v2223_v1, %v2221_v15  ;;  %v2052_v48 = vmul.f32 1.442695, %v2023_v19 }
 0x617   :  { %v2189_v33 = vmul.f32 %v8038_v55, %v2188_v37  ;;  %v2192_v44 = vld [vmem:[#allocation4 + $0x2] ss:$2 sm:$0xf]  ;;  %v2229_v21 = vld [vmem:[#allocation4 + $0x1b] ss:$2 sm:$0xf]  ;;  %6484 = vpow2.f32 %v2056_v29 }
 0x618   :  { %2116 = vst [vmem:[#allocation4 + $0x2d] sm:$0xff] %v2095_v2  ;;  %v2193_v49 = vmul.f32 %v8041_v18, %v2192_v44  ;;  %v2233_v50 = vld [vmem:[#allocation4 + $0x1c] ss:$2 sm:$0xf]  ;;  %v2227_v56 = vadd.f32 %v2226_v57, %v2224_v23  ;;  %v2230_v5 = vmul.f32 %v8049_v32, %v2229_v21  ;;  %v2072_v9 = vadd.f32 1.0, %v6473_v13 }
 0x619   :  { %v2190_v45 = vadd.f32 %v2189_v33, %v2186_v14  ;;  %v2196_v35 = vld [vmem:[#allocation4 + $0x9] ss:$2 sm:$0xf]  ;;  %v2200_v61 = vld [vmem:[#allocation4 + $0xa] ss:$2 sm:$0xf]  ;;  %v2234_v53 = vmul.f32 %v8057_v0, %v2233_v50 }
 0x61a   :  { %v6475_v58 = vpop.eup %6474  ;;  %v2237_v40 = vld [vmem:[#allocation4 + $0x1d] ss:$2 sm:$0xf]  ;;  %v2197_v41 = vmul.f32 %v8049_v32, %v2196_v35  ;;  %v2208_v11 = vld [vmem:[#allocation4 + $0x12] ss:$2 sm:$0xf]  ;;  %v2231_v27 = vadd.f32 %v2230_v5, %v2227_v56  ;;  %v2201_v54 = vmul.f32 %v8057_v0, %v2200_v61  ;;  %6486 = vrcp.f32 %v2072_v9 }
 0x61b   :  { %v6477_v31 = vpop.eup %6476  ;;  %v2194_v46 = vadd.f32 %v2193_v49, %v2190_v45  ;;  %v2100_v10 = vmul.f32 %v6475_v58, %v7994_v52  ;;  %v2204_v63 = vld [vmem:[#allocation4 + $0xb] ss:$2 sm:$0xf]  ;;  %v2286_v7 = vld [vmem:[#allocation4 + $0x36] ss:$2 sm:$0xf]  ;;  %v2238_v19 = vmul.f32 %v8062_v24, %v2237_v40  ;;  %6488 = vpow2.f32 %v2052_v48 }
 0x61c   :  { %v6479_v12 = vpop.eup %6478  ;;  %v2098_v4 = vmul.f32 %v6477_v31, %v7998_v43  ;;  %v2287_v52 = vmul.f32 %v8034_v17, %v2286_v7  ;;  %v2288_v26 = vld [vmem:[#allocation4 + $0x37] ss:$2 sm:$0xf]  ;;  %v2291_v28 = vld [vmem:[#allocation4 + $0x38] ss:$2 sm:$0xf]  ;;  %v2235_v60 = vadd.f32 %v2234_v53, %v2231_v27  ;;  %v2205_v1 = vmul.f32 %v8062_v24, %v2204_v63 }
 0x61d   :  { %v6481_v47 = vpop.eup %6480  ;;  %v2198_v20 = vadd.f32 %v2197_v41, %v2194_v46  ;;  %2127 = vst [vmem:[#allocation4 + $0x63] sm:$0xff] %v2100_v10  ;;  %v2101_v51 = vmul.f32 %v6479_v12, %v8003_v38  ;;  %v2212_v6 = vld [vmem:[#allocation4 + $0x13] ss:$2 sm:$0xf]  ;;  %v2289_v43 = vmul.f32 %v8038_v55, %v2288_v26  ;;  %v8083_v14 = vld [vmem:[%s9023_s29 + $0x8] ss:$0 sm:$0xff]  ;;  %v2292_v21 = vmul.f32 %v8041_v18, %v2291_v28 }
 0x61e   :  { %v2241_v15 = vld [vmem:[#allocation4 + $0x24] ss:$2 sm:$0xf]  ;;  %v2245_v3 = vld [vmem:[#allocation4 + $0x25] ss:$2 sm:$0xf]  ;;  %v2099_v39 = vmul.f32 %v6481_v47, %v8007_v22  ;;  %v2239_v33 = vadd.f32 %v2238_v19, %v2235_v60  ;;  %v2209_v22 = vmul.f32 %v8067_v30, %v2208_v11  ;;  %v2213_v46 = vmul.f32 %v8075_v42, %v2212_v6  ;;  %v6483_v11 = vpop.eup %6482 }
 0x61f   :  { %2123 = vst [vmem:[#allocation4 + $0x51] sm:$0xff] %v2098_v4  ;;  %v2202_v2 = vadd.f32 %v2201_v54, %v2198_v20  ;;  %v2242_v36 = vmul.f32 %v8067_v30, %v2241_v15  ;;  %v2249_v38 = vld [vmem:[#allocation4 + $0x26] ss:$2 sm:$0xf]  ;;  %2129 = vst [vmem:[#allocation4 + $0x6c] sm:$0xff] %v2101_v51  ;;  %v2290_v44 = vadd.f32 %v2289_v43, %v2287_v52 }
 0x620   :  { %v2253_v37 = vld [vmem:[#allocation4 + $0x24] ss:$2 sm:$0xf]  ;;  %v2255_v23 = vld [vmem:[#allocation4 + $0x25] ss:$2 sm:$0xf]  ;;  %v2246_v5 = vmul.f32 %v8075_v42, %v2245_v3  ;;  %v2250_v48 = vmul.f32 %v8083_v14, %v2249_v38 }
 0x621   :  { %v2254_v13 = vmul.f32 %v8034_v17, %v2253_v37  ;;  %v2258_v57 = vld [vmem:[#allocation4 + $0x26] ss:$2 sm:$0xf]  ;;  %2125 = vst [vmem:[#allocation4 + $0x5a] sm:$0xff] %v2099_v39  ;;  %v2206_v29 = vadd.f32 %v2205_v1, %v2202_v2  ;;  %v2256_v45 = vmul.f32 %v8038_v55, %v2255_v23  ;;  %v2293_v58 = vadd.f32 %v2292_v21, %v2290_v44  ;;  %v6485_v28 = vpop.eup %6484 }
 0x622   :  { %v2295_v49 = vld [vmem:[#allocation4 + $0x3f] ss:$2 sm:$0xf]  ;;  %v2299_v50 = vld [vmem:[#allocation4 + $0x40] ss:$2 sm:$0xf]  ;;  %v2243_v56 = vadd.f32 %v2242_v36, %v2239_v33  ;;  %v2259_v10 = vmul.f32 %v8041_v18, %v2258_v57 }
 0x623   :  { %v2216_v35 = vld [vmem:[#allocation4 + $0x14] ss:$2 sm:$0xf]  ;;  %v2296_v61 = vmul.f32 %v8049_v32, %v2295_v49  ;;  %v2262_v31 = vld [vmem:[#allocation4 + $0x2d] ss:$2 sm:$0xf]  ;;  %v2210_v40 = vadd.f32 %v2209_v22, %v2206_v29  ;;  %v2257_v41 = vadd.f32 %v2256_v45, %v2254_v13  ;;  %v2300_v63 = vmul.f32 %v8057_v0, %v2299_v50 }
 0x624   :  { %v2303_v9 = vld [vmem:[#allocation4 + $0x41] ss:$2 sm:$0xf]  ;;  %v2307_v12 = vld [vmem:[#allocation4 + $0x48] ss:$2 sm:$0xf]  ;;  %v2247_v27 = vadd.f32 %v2246_v5, %v2243_v56  ;;  %v2217_v4 = vmul.f32 %v8083_v14, %v2216_v35  ;;  %v2263_v26 = vmul.f32 %v8049_v32, %v2262_v31  ;;  %v6487_v57 = vpop.eup %6486 }
 0x625   :  { %v2297_v53 = vadd.f32 %v2296_v61, %v2293_v58  ;;  %v2266_v7 = vld [vmem:[#allocation4 + $0x2e] ss:$2 sm:$0xf]  ;;  %v2214_v47 = vadd.f32 %v2213_v46, %v2210_v40  ;;  %v2260_v20 = vadd.f32 %v2259_v10, %v2257_v41  ;;  %v2311_v54 = vld [vmem:[#allocation4 + $0x49] ss:$2 sm:$0xf]  ;;  %v2304_v43 = vmul.f32 %v8062_v24, %v2303_v9  ;;  %v6489_v5 = vpop.eup %6488 }
 0x626   :  { %v2315_v52 = vld [vmem:[#allocation4 + $0x4a] ss:$2 sm:$0xf]  ;;  %v2274_v51 = vld [vmem:[#allocation4 + $0x36] ss:$2 sm:$0xf]  ;;  %v2251_v60 = vadd.f32 %v2250_v48, %v2247_v27  ;;  %v2308_v15 = vmul.f32 %v8067_v30, %v2307_v12  ;;  %v2267_v1 = vmul.f32 %v8057_v0, %v2266_v7  ;;  %v2312_v33 = vmul.f32 %v8075_v42, %v2311_v54 }
 0x627   :  { %v2278_v6 = vld [vmem:[#allocation4 + $0x37] ss:$2 sm:$0xf]  ;;  %v2301_v19 = vadd.f32 %v2300_v63, %v2297_v53  ;;  %v2270_v3 = vld [vmem:[#allocation4 + $0x2f] ss:$2 sm:$0xf]  ;;  %v2218_v39 = vadd.f32 %v2217_v4, %v2214_v47  ;;  %v2264_v2 = vadd.f32 %v2263_v26, %v2260_v20  ;;  %v2316_v49 = vmul.f32 %v8083_v14, %v2315_v52 }
 0x628   :  { %v2320_v36 = vld [vmem:[#allocation4 + $0x51] ss:$2 sm:$0xf]  ;;  %v2323_v38 = vld [vmem:[#allocation4 + $0x52] ss:$2 sm:$0xf]  ;;  %v2271_v29 = vmul.f32 %v8062_v24, %v2270_v3  ;;  %v2275_v61 = vmul.f32 %v8067_v30, %v2274_v51  ;;  %v2279_v31 = vmul.f32 %v8075_v42, %v2278_v6  ;;  %v2104_v48 = vmul.f32 %v6487_v57, %v8013_v16 }
 0x629   :  { %2252 = vst [vmem:[#allocation5 + $0x4] sm:$0xf] %v2251_v60  ;;  %v2305_v37 = vadd.f32 %v2304_v43, %v2301_v19  ;;  %v2355_v44 = vld [vmem:[#allocation4 + $0x63] ss:$2 sm:$0xf]  ;;  %v2321_v21 = vmul.f32 %v8034_v17, %v2320_v36  ;;  %v2324_v13 = vmul.f32 %v8038_v55, %v2323_v38  ;;  %v2268_v22 = vadd.f32 %v2267_v1, %v2264_v2 }
 0x62a   :  { %v2327_v23 = vld [vmem:[#allocation4 + $0x53] ss:$2 sm:$0xf]  ;;  %2219 = vst [vmem:[#allocation5] sm:$0xf] %v2218_v39  ;;  %v2356_v40 = vmul.f32 %v8034_v17, %v2355_v44  ;;  %v2070_v4 = vadd.f32 1.0, %v6483_v11 }
 0x62b   :  { %v2309_v45 = vadd.f32 %v2308_v15, %v2305_v37  ;;  %v2357_v50 = vld [vmem:[#allocation4 + $0x64] ss:$2 sm:$0xf]  ;;  %v2325_v35 = vadd.f32 %v2324_v13, %v2321_v21  ;;  %v2328_v58 = vmul.f32 %v8041_v18, %v2327_v23  ;;  %v2331_v56 = vld [vmem:[#allocation4 + $0x5a] ss:$2 sm:$0xf]  ;;  %v2272_v46 = vadd.f32 %v2271_v29, %v2268_v22 }
 0x62c   :  { %v2335_v41 = vld [vmem:[#allocation4 + $0x5b] ss:$2 sm:$0xf]  ;;  %v2282_v10 = vld [vmem:[#allocation4 + $0x38] ss:$2 sm:$0xf]  ;;  %v2332_v27 = vmul.f32 %v8049_v32, %v2331_v56  ;;  %v2358_v63 = vmul.f32 %v8038_v55, %v2357_v50  ;;  %6490 = vrcp.f32 %v2070_v4 }
 0x62d   :  { %v2313_v9 = vadd.f32 %v2312_v33, %v2309_v45  ;;  %v2329_v12 = vadd.f32 %v2328_v58, %v2325_v35  ;;  %v2276_v53 = vadd.f32 %v2275_v61, %v2272_v46  ;;  %v2339_v7 = vld [vmem:[#allocation4 + $0x5c] ss:$2 sm:$0xf]  ;;  %v2073_v47 = vadd.f32 1.0, %v6485_v28  ;;  %2135 = vst [vmem:[#allocation4 + $0x87] sm:$0xff] %v2104_v48 }
 0x62e   :  { %v2336_v52 = vmul.f32 %v8057_v0, %v2335_v41  ;;  %v2071_v26 = vadd.f32 1.0, %v6489_v5  ;;  %v2283_v51 = vmul.f32 %v8083_v14, %v2282_v10  ;;  %v2343_v60 = vld [vmem:[#allocation4 + $0x63] ss:$2 sm:$0xf]  ;;  %v2340_v16 = vmul.f32 %v8062_v24, %v2339_v7 }
 0x62f   :  { %v2317_v20 = vadd.f32 %v2316_v49, %v2313_v9  ;;  %v2333_v54 = vadd.f32 %v2332_v27, %v2329_v12  ;;  %v2280_v6 = vadd.f32 %v2279_v31, %v2276_v53  ;;  %6492 = vrcp.f32 %v2073_v47  ;;  %v2347_v15 = vld [vmem:[#allocation4 + $0x64] ss:$2 sm:$0xf]  ;;  %v2360_v11 = vld [vmem:[#allocation4 + $0x65] ss:$2 sm:$0xf] }
 0x630   :  { %6494 = vrcp.f32 %v2071_v26  ;;  %v2344_v28 = vmul.f32 %v8067_v30, %v2343_v60  ;;  %v2359_v3 = vadd.f32 %v2358_v63, %v2356_v40  ;;  %v2351_v2 = vld [vmem:[#allocation4 + $0x65] ss:$2 sm:$0xf]  ;;  %v2348_v1 = vmul.f32 %v8075_v42, %v2347_v15  ;;  %v2364_v37 = vld [vmem:[#allocation4 + $0x6c] ss:$2 sm:$0xf] }
 0x631   :  { %2318 = vst [vmem:[#allocation5 + $0xc] sm:$0xf] %v2317_v20  ;;  %v2337_v19 = vadd.f32 %v2336_v52, %v2333_v54  ;;  %v2284_v43 = vadd.f32 %v2283_v51, %v2280_v6  ;;  %v2361_v36 = vmul.f32 %v8041_v18, %v2360_v11  ;;  %v2352_v33 = vmul.f32 %v8083_v14, %v2351_v2  ;;  %v2368_v22 = vld [vmem:[#allocation4 + $0x6d] ss:$2 sm:$0xf] }
 0x632   :  { %v2365_v13 = vmul.f32 %v8049_v32, %v2364_v37  ;;  %v2369_v5 = vmul.f32 %v8057_v0, %v2368_v22  ;;  %v2372_v31 = vld [vmem:[#allocation4 + $0x6e] ss:$2 sm:$0xf] }
 0x633   :  { %v2341_v39 = vadd.f32 %v2340_v16, %v2337_v19  ;;  %2285 = vst [vmem:[#allocation5 + $0x8] sm:$0xf] %v2284_v43  ;;  %v2362_v44 = vadd.f32 %v2361_v36, %v2359_v3  ;;  %v2454_v12 = vld [vmem:[#allocation5] sm:$0xff] }
 0x634   :  { %v2421_v49 = vld [vmem:[#allocation4 + $0x87] ss:$2 sm:$0xf]  ;;  %v2423_v50 = vld [vmem:[#allocation4 + $0x88] ss:$2 sm:$0xf] }
 0x635   :  { %v2345_v38 = vadd.f32 %v2344_v28, %v2341_v39  ;;  %v2366_v45 = vadd.f32 %v2365_v13, %v2362_v44  ;;  %v2422_v46 = vmul.f32 %v8034_v17, %v2421_v49  ;;  %v2424_v40 = vmul.f32 %v8038_v55, %v2423_v50  ;;  %v2426_v9 = vld [vmem:[#allocation4 + $0x89] ss:$2 sm:$0xf] }
 0x636   :  { %v6491_v57 = vpop.eup %6490  ;;  %v2427_v63 = vmul.f32 %v8041_v18, %v2426_v9 }
 0x637   :  { %v2349_v21 = vadd.f32 %v2348_v1, %v2345_v38  ;;  %v2102_v35 = vmul.f32 %v6491_v57, %v8022_v62  ;;  %v2370_v41 = vadd.f32 %v2369_v5, %v2366_v45  ;;  %v2373_v62 = vmul.f32 %v8062_v24, %v2372_v31  ;;  %v2446_v57 = vld [vmem:[#allocation4 + $0x9a] ss:$2 sm:$0xf] }
 0x638   :  { %v2425_v27 = vadd.f32 %v2424_v40, %v2422_v46  ;;  %v2447_v46 = vmul.f32 %v8075_v42, %v2446_v57 }
 0x639   :  { %v2353_v23 = vadd.f32 %v2352_v33, %v2349_v21  ;;  %v6493_v29 = vpop.eup %6492  ;;  %2131 = vst [vmem:[#allocation4 + $0x75] sm:$0xff] %v2102_v35  ;;  %v2374_v48 = vadd.f32 %v2373_v62, %v2370_v41  ;;  %v2442_v33 = vld [vmem:[#allocation4 + $0x99] ss:$2 sm:$0xf] }
 0x63a   :  { %v6495_v58 = vpop.eup %6494  ;;  %v2105_v56 = vmul.f32 %v6493_v29, %v8027_v34  ;;  %v2455_v10 = vld [vmem:[#allocation5 + $0x8] sm:$0xff]  ;;  %v8128_v34 = vld [vmem:[%s9024_s3] ss:$0 sm:$0xff]  ;;  %v2428_v26 = vadd.f32 %v2427_v63, %v2425_v27  ;;  %v2443_v50 = vmul.f32 %v8067_v30, %v2442_v33 }
 0x63b   :  { %2354 = vst [vmem:[#allocation5 + $0x10] sm:$0xf] %v2353_v23  ;;  %v2103_v61 = vmul.f32 %v6495_v58, %v8031_v25  ;;  %v2466_v53 = vmul.f32 %v8128_v34, %v2455_v10  ;;  %v8132_v25 = vld [vmem:[%s9025_s8] ss:$0 sm:$0xff]  ;;  %v2465_v47 = vmul.f32 %v8128_v34, %v2454_v12 }
 0x63c   :  { %2137 = vst [vmem:[#allocation4 + $0x90] sm:$0xff] %v2105_v56  ;;  %v2413_v10 = vld [vmem:[#allocation4 + $0x88] ss:$2 sm:$0xf] }
 0x63d   :  { %2133 = vst [vmem:[#allocation4 + $0x7e] sm:$0xff] %v2103_v61  ;;  %v8141_v28 = vadd.f32 %v8132_v25, %v2466_v53  ;;  %v8145_v2 = vadd.f32 %v8132_v25, %v2465_v47  ;;  %v2409_v61 = vld [vmem:[#allocation4 + $0x87] ss:$2 sm:$0xf]  ;;  %v2414_v63 = vmul.f32 %v8075_v42, %v2413_v10  ;;  %v6187_v10 = vld [vmem:[%s9026_s14 + $0x18] sm:$0xff]  }
 0x63e   :  { %v2410_v12 = vmul.f32 %v8067_v30, %v2409_v61  ;;  %v2417_v53 = vld [vmem:[#allocation4 + $0x89] ss:$2 sm:$0xf] }
 0x63f   :  { %v2481_v29 = vsub.f32 0.0, %v8141_v28  ;;  %v2480_v5 = vsub.f32 0.0, %v8145_v2 }
 0x640   :  { %v2376_v7 = vld [vmem:[#allocation4 + $0x75] ss:$2 sm:$0xf]  ;;  %v2380_v4 = vld [vmem:[#allocation4 + $0x76] ss:$2 sm:$0xf] }
 0x641   :  { %v2377_v20 = vmul.f32 %v8067_v30, %v2376_v7  ;;  %v2384_v54 = vld [vmem:[#allocation4 + $0x77] ss:$2 sm:$0xf]  ;;  %v2390_v6 = vld [vmem:[#allocation4 + $0x76] ss:$2 sm:$0xf]  ;;  %v2381_v16 = vmul.f32 %v8075_v42, %v2380_v4 }
 0x642   :  { %v2388_v52 = vld [vmem:[#allocation4 + $0x75] ss:$2 sm:$0xf]  ;;  %v2391_v43 = vmul.f32 %v8038_v55, %v2390_v6  ;;  %v2486_v41 = vmul.f32 1.442695, %v2481_v29 }
 0x643   :  { %v2389_v51 = vmul.f32 %v8034_v17, %v2388_v52  ;;  %v2393_v60 = vld [vmem:[#allocation4 + $0x77] ss:$2 sm:$0xf]  ;;  %v2378_v19 = vadd.f32 %v2377_v20, %v2374_v48  ;;  %v2430_v15 = vld [vmem:[#allocation4 + $0x90] ss:$2 sm:$0xf]  ;;  %v2385_v17 = vmul.f32 %v8083_v14, %v2384_v54  ;;  %v2418_v20 = vmul.f32 %v8083_v14, %v2417_v53 }
 0x644   :  { %v2434_v11 = vld [vmem:[#allocation4 + $0x91] ss:$2 sm:$0xf]  ;;  %v2431_v3 = vmul.f32 %v8049_v32, %v2430_v15  ;;  %v2397_v39 = vld [vmem:[#allocation4 + $0x7e] ss:$2 sm:$0xf]  ;;  %v2394_v38 = vmul.f32 %v8041_v18, %v2393_v60  ;;  %6496 = vpow2.f32 %v2486_v41 }
 0x645   :  { %v2382_v1 = vadd.f32 %v2381_v16, %v2378_v19  ;;  %v2392_v36 = vadd.f32 %v2391_v43, %v2389_v51  ;;  %v2438_v37 = vld [vmem:[#allocation4 + $0x92] ss:$2 sm:$0xf]  ;;  %v2435_v44 = vmul.f32 %v8057_v0, %v2434_v11  ;;  %v2401_v21 = vld [vmem:[#allocation4 + $0x7f] ss:$2 sm:$0xf]  ;;  %v2398_v22 = vmul.f32 %v8049_v32, %v2397_v39 }
 0x646   :  { %v2432_v55 = vadd.f32 %v2431_v3, %v2428_v26  ;;  %v2439_v49 = vmul.f32 %v8062_v24, %v2438_v37  ;;  %v2405_v35 = vld [vmem:[#allocation4 + $0x80] ss:$2 sm:$0xf]  ;;  %v2450_v18 = vld [vmem:[#allocation4 + $0x9b] ss:$2 sm:$0xf]  ;;  %v2402_v56 = vmul.f32 %v8057_v0, %v2401_v21 }
 0x647   :  { %v2386_v13 = vadd.f32 %v2385_v17, %v2382_v1  ;;  %v2395_v23 = vadd.f32 %v2394_v38, %v2392_v36  ;;  %v2406_v40 = vmul.f32 %v8062_v24, %v2405_v35  ;;  %v2451_v9 = vmul.f32 %v8083_v14, %v2450_v18  ;;  %v6186_v41 = vld [vmem:[%s9026_s14 + $0x10] sm:$0xff]  }
 0x648   :  { %v2436_v45 = vadd.f32 %v2435_v44, %v2432_v55  ;;  %v2484_v48 = vmul.f32 1.442695, %v2480_v5 }
 0x649   :  { %2387 = vst [vmem:[#allocation5 + $0x14] sm:$0xf] %v2386_v13  ;;  %v2399_v58 = vadd.f32 %v2398_v22, %v2395_v23 }
 0x64a   :  { %v2440_v31 = vadd.f32 %v2439_v49, %v2436_v45  ;;  %6498 = vpow2.f32 %v2484_v48  ;;  %v5555_v48 = vld [vmem:[%s9027_s24] ss:$0 sm:$0xff] }
 0x64b   :  { %v2403_v32 = vadd.f32 %v2402_v56, %v2399_v58 }
 0x64c   :  { %v2444_v62 = vadd.f32 %v2443_v50, %v2440_v31 }
 0x64d   :  { %v2407_v27 = vadd.f32 %v2406_v40, %v2403_v32  ;;  %v6629_v32 = vld [vmem:[#allocation2] sm:$0xff]  ;;  %v6185_v40 = vld [vmem:[%s9026_s14 + $0x8] sm:$0xff]  }
 0x64e   :  { %v2448_v0 = vadd.f32 %v2447_v46, %v2444_v62  ;;  %v6497_v51 = vpop.eup %6496  ;;  %v6184_v46 = vld [vmem:[%s9026_s14] sm:$0xff]  }
 0x64f   :  { %v2411_v7 = vadd.f32 %v2410_v12, %v2407_v27  ;;  %v2493_v19 = vadd.f32 1.0, %v6497_v51  ;;  %5997 = vmatpush3.bf16.msra.mxu0 %v6184_v46  ;;  %v6188_v62 = vld [vmem:[%s9026_s14 + $0x20] sm:$0xff]   ;;  %v6190_v12 = vld [vmem:[%s9026_s14 + $0x30] sm:$0xff]   ;;  %v6191_v27 = vld [vmem:[%s9026_s14 + $0x38] sm:$0xff]  }
 0x650   :  { %v2452_v4 = vadd.f32 %v2451_v9, %v2448_v0  ;;  %v2456_v47 = vld [vmem:[#allocation5 + $0x10] sm:$0xff]  ;;  %5998 = vmatprep.subr.bf16.mxu0 %v6629_v32  ;;  %v6189_v9 = vld [vmem:[%s9026_s14 + $0x28] sm:$0xff]  }
 0x651   :  { %v2415_v24 = vadd.f32 %v2414_v63, %v2411_v7  ;;  %v2467_v54 = vmul.f32 %v8128_v34, %v2456_v47  ;;  %v6192_v51 = vld [vmem:[%s9028_s6] sm:$0xff]  }
 0x652   :  { %2453 = vst [vmem:[#allocation5 + $0x1c] sm:$0xf] %v2452_v4  ;;  %6016 = vmatprep.subr.bf16.mxu1 %v6192_v51 }
 0x653   :  { %v2419_v52 = vadd.f32 %v2418_v20, %v2415_v24  ;;  %v2478_v30 = vadd.f32 %v8132_v25, %v2467_v54  ;;  %5999 = vmatpush3.bf16.msra.mxu0 %v6185_v40 }
 0x654   :  { %v6499_v6 = vpop.eup %6498  ;;  %6000 = vmatprep.subr.bf16.mxu0 %v6629_v32 }
 0x655   :  { %2420 = vst [vmem:[#allocation5 + $0x18] sm:$0xf] %v2419_v52  ;;  %v2482_v26 = vsub.f32 0.0, %v2478_v30  ;;  %v2492_v43 = vadd.f32 1.0, %v6499_v6  ;;  %v6193_v6 = vld [vmem:[%s9028_s6 + $0x8] sm:$0xff]  }
 0x657   :  { %v2488_v60 = vmul.f32 1.442695, %v2482_v26  ;;  %6001 = vmatpush3.bf16.msra.mxu0 %v6186_v41  ;;  %v6220_v41 = vld [vmem:[%s9029_s12 + $0x64] ss:$8 sps:$4 sm:$0xff]  }
 0x658   :  { %6002 = vmatprep.subr.bf16.mxu0 %v6629_v32 }
 0x659   :  { %6500 = vpow2.f32 %v2488_v60  ;;  %v6194_v60 = vld [vmem:[%s9028_s6 + $0x10] sm:$0xff]  }
 0x65a   :  { %6502 = vrcp.f32 %v2493_v19  ;;  %v6196_v19 = vld [vmem:[%s9028_s6 + $0x20] sm:$0xff]  }
 0x65b   :  { %6504 = vrcp.f32 %v2492_v43  ;;  %6003 = vmatpush3.bf16.msra.mxu0 %v6187_v10  ;;  %v6198_v43 = vld [vmem:[%s9028_s6 + $0x30] sm:$0xff]   ;;  %v6218_v10 = vld [vmem:[%s9029_s12 + $0x60] ss:$8 sps:$4 sm:$0xff]  }
 0x65c   :  { %v2457_v42 = vld [vmem:[#allocation5 + $0x18] sm:$0xff]  ;;  %6004 = vmatprep.subr.bf16.mxu0 %v6629_v32 }
 0x65d   :  { %v2468_v16 = vmul.f32 %v8128_v34, %v2457_v42  ;;  %v6195_v42 = vld [vmem:[%s9028_s6 + $0x18] sm:$0xff]  }
 0x65f   :  { %v2479_v14 = vadd.f32 %v8132_v25, %v2468_v16  ;;  %6005 = vmatpush3.bf16.msra.mxu0 %v6188_v62  ;;  %v6197_v16 = vld [vmem:[%s9028_s6 + $0x28] sm:$0xff]   ;;  %v6223_v62 = vld [vmem:[%s9029_s12 + $0x74] ss:$8 sps:$4 sm:$0xff]  }
 0x660   :  { %6006 = vmatprep.subr.bf16.mxu0 %v6629_v32 }
 0x661   :  { %v2483_v15 = vsub.f32 0.0, %v2479_v14 }
 0x663   :  { %v2490_v11 = vmul.f32 1.442695, %v2483_v15  ;;  %v6501_v3 = vpop.eup %6500  ;;  %6007 = vmatpush3.bf16.msra.mxu0 %v6189_v9  ;;  %v6200_v15 = vld [vmem:[%s9029_s12] ss:$8 sps:$4 sm:$0xff]   ;;  %v6221_v9 = vld [vmem:[%s9029_s12 + $0x70] ss:$8 sps:$4 sm:$0xff]  }
 0x664   :  { %v6503_v39 = vpop.eup %6502  ;;  %v2494_v17 = vadd.f32 1.0, %v6501_v3  ;;  %6008 = vmatprep.subr.bf16.mxu0 %v6629_v32  ;;  %v6205_v3 = vld [vmem:[%s9029_s12 + $0x14] ss:$8 sps:$4 sm:$0xff]  }
 0x665   :  { %6506 = vpow2.f32 %v2490_v11  ;;  %v6505_v1 = vpop.eup %6504  ;;  %v8167_v36 = vmul.f32 %v6503_v39, %v8141_v28  ;;  %v6202_v11 = vld [vmem:[%s9029_s12 + $0x4] ss:$8 sps:$4 sm:$0xff]   ;;  %v6203_v39 = vld [vmem:[%s9029_s12 + $0x10] ss:$8 sps:$4 sm:$0xff]  }
 0x666   :  { %v8170_v37 = vmul.f32 %v6505_v1, %v8145_v2  ;;  %6508 = vrcp.f32 %v2494_v17  ;;  %v6208_v1 = vld [vmem:[%s9029_s12 + $0x24] ss:$8 sps:$4 sm:$0xff]   ;;  %v6206_v17 = vld [vmem:[%s9029_s12 + $0x20] ss:$8 sps:$4 sm:$0xff]  }
 0x667   :  { %6009 = vmatpush3.bf16.msra.mxu0 %v6190_v12 }
 0x668   :  { %v2504_v25 = vadd.f32 %v8167_v36, %v8170_v37  ;;  %6010 = vmatprep.subr.bf16.mxu0 %v6629_v32 }
 0x66a   :  { %v2505_v33 = vrot.slane %v2504_v25, 4 }
 0x66b   :  { %6011 = vmatpush3.bf16.msra.mxu0 %v6191_v27 }
 0x66c   :  { %v2506_v55 = vadd.f32 %v2505_v33, %v2504_v25  ;;  %3004 = vmatprep.subr.bf16.mxu0 %v6202_v11  ;;  %v6214_v25 = vld [vmem:[%s9029_s12 + $0x44] ss:$8 sps:$4 sm:$0xff]   ;;  %v6212_v33 = vld [vmem:[%s9029_s12 + $0x40] ss:$8 sps:$4 sm:$0xff]  }
 0x66e   :  { %v2507_v28 = vrot.slane %v2506_v55, 2 }
 0x66f   :  { %v6507_v38 = vpop.eup %6506 }
 0x670   :  { %v2495_v34 = vadd.f32 1.0, %v6507_v38  ;;  %v6509_v44 = vpop.eup %6508  ;;  %v2508_v57 = vadd.f32 %v2507_v28, %v2506_v55  ;;  %v6211_v38 = vld [vmem:[%s9029_s12 + $0x34] ss:$8 sps:$4 sm:$0xff]  }
 0x671   :  { %v8174_v13 = vmul.f32 %v6509_v44, %v2478_v30  ;;  %v6217_v55 = vld [vmem:[%s9029_s12 + $0x54] ss:$8 sps:$4 sm:$0xff]   ;;  %v6215_v44 = vld [vmem:[%s9029_s12 + $0x50] ss:$8 sps:$4 sm:$0xff]  }
 0x672   :  { %6510 = vrcp.f32 %v2495_v34  ;;  %v2509_v45 = vrot.slane %v2508_v57, 1  ;;  %v6209_v34 = vld [vmem:[%s9029_s12 + $0x30] ss:$8 sps:$4 sm:$0xff]  }
 0x674   :  { %v2510_v35 = vadd.f32 %v2509_v45, %v2508_v57 }
 0x676   :  { %v2512_v56 = vmul.f32 0.0625, %v2510_v35 }
 0x67c   :  { %v6511_v21 = vpop.eup %6510 }
 0x67d   :  { %v8176_v23 = vmul.f32 %v6511_v21, %v2479_v14  ;;  %v6199_v14 = vld [vmem:[%s9028_s6 + $0x38] sm:$0xff]   ;;  %v5564_v21 = vld [vmem:[%s9030_s27] ss:$0 sm:$0xff] }
 0x67f   :  { %v2513_v2 = vadd.f32 %v8176_v23, %v8174_v13 }
 0x681   :  { %v2514_v22 = vrot.slane %v2513_v2, 4 }
 0x683   :  { %v2515_v29 = vadd.f32 %v2514_v22, %v2513_v2 }
 0x685   :  { %v2516_v49 = vrot.slane %v2515_v29, 2 }
 0x687   :  { %v2517_v50 = vadd.f32 %v2516_v49, %v2515_v29 }
 0x689   :  { %v2518_v18 = vrot.slane %v2517_v50, 1 }
 0x68b   :  { %v2519_v58 = vadd.f32 %v2518_v18, %v2517_v50 }
 0x68d   :  { %v2520_v5 = vmul.f32 0.0625, %v2519_v58 }
 0x68f   :  { %v2521_v61 = vsel %vm1303_vm1, %v2512_v56, %v2520_v5 }
 0x690   :  { %v2522_v31 = vpack.c.bf16 %v2521_v61, %v2521_v61 }
 0x692   :  { %5993 = vmatmul.mubr.bf16.vlgmr.msra.gmra.mrb[20].mxu1 %v2522_v31 }
 0x693   :  { %6017 = vmatpush3.bf16.msra.mxu1 %v6192_v51 }
 0x694   :  { %6018 = vmatprep.subr.bf16.mxu1 %v6193_v6 }
 0x697   :  { %6019 = vmatpush3.bf16.msra.mxu1 %v6193_v6 }
 0x698   :  { %6020 = vmatprep.subr.bf16.mxu1 %v6194_v60 }
 0x69b   :  { %6021 = vmatpush3.bf16.msra.mxu1 %v6194_v60 }
 0x69c   :  { %6022 = vmatprep.subr.bf16.mxu1 %v6195_v42 }
 0x69f   :  { %6023 = vmatpush3.bf16.msra.mxu1 %v6195_v42 }
 0x6a0   :  { %6024 = vmatprep.subr.bf16.mxu1 %v6196_v19 }
 0x6a3   :  { %6025 = vmatpush3.bf16.msra.mxu1 %v6196_v19  ;;  %v5599_v19 = vld [vmem:[%s9037_s26 + $0x1] ss:$8 sm:$0x3] }
 0x6a4   :  { %6026 = vmatprep.subr.bf16.mxu1 %v6197_v16 }
 0x6a7   :  { %6027 = vmatpush3.bf16.msra.mxu1 %v6197_v16 }
 0x6a8   :  { %6028 = vmatprep.subr.bf16.mxu1 %v6198_v43 }
 0x6ab   :  { %6029 = vmatpush3.bf16.msra.mxu1 %v6198_v43 }
 0x6ac   :  { %6030 = vmatprep.subr.bf16.mxu1 %v6199_v14 }
 0x6af   :  { %6031 = vmatpush3.bf16.msra.mxu1 %v6199_v14 }
 0x765   :  { %v2628_v53 = vpop.f32.mrb[20].mxu1 }
 0x766   :  { %v2629_v0 = vadd.f32 %v5555_v48, %v2628_v53  ;;  %v5994_v63 = vpop.f32.mrb[21].mxu1  ;;  %v5582_v48 = vld [vmem:[%s9032_s0] ss:$0 sm:$0xff] }
 0x767   :  { %v2631_v7 = vpop.f32.mrb[22].mxu1 }
 0x768   :  { %v2634_v4 = vsub.f32 0.0, %v2629_v0  ;;  %v5995_v47 = vpop.f32.mrb[23].mxu1 }
 0x76a   :  { %v2635_v20 = vmul.f32 1.442695, %v2634_v4 }
 0x76c   :  { %6512 = vpow2.f32 %v2635_v20 }
 0x776   :  { %v6513_v24 = vpop.eup %6512 }
 0x777   :  { %v2637_v54 = vadd.f32 1.0, %v6513_v24 }
 0x779   :  { %6514 = vrcp.f32 %v2637_v54 }
 0x783   :  { %v6515_v52 = vpop.eup %6514 }
 0x784   :  { %v2639_v30 = vmul.f32 %v6515_v52, %v2629_v0 }
 0x786   :  { %v2640_v26 = vpack.c.bf16 %v2639_v30, %v2639_v30  ;;  %v3057_v30 = vld [vmem:[%s9033_s22] sm:$0x3] }
 0x787   :  { %v3062_v51 = vrot.slane %v3057_v30, %v7862_v8  ;;  %v3066_v6 = vrot.slane %v3057_v30, %v7865_v59 }
 0x788   :  { %6013 = vmatmul.mubr.bf16.vlgmr.msra.gmra.mrb[36].mxu0 %v2640_v26  ;;  %v3077_v26 = vld [vmem:[%s9034_s23] sm:$0x3] }
 0x789   :  { %3005 = vmatpush1.bf16.msra.mxu0 %v6200_v15  ;;  %v3082_v60 = vrot.slane %v3077_v26, %v7862_v8  ;;  %v3086_v16 = vrot.slane %v3077_v26, %v7865_v59  ;;  %v3237_v15 = vld [vmem:[%s9037_s26] ss:$8 sm:$0x3] }
 0x78a   :  { %3006 = vmatprep.subr.bf16.mxu0 %v6205_v3 }
 0x78d   :  { %3007 = vmatpush1.bf16.msra.mxu0 %v6203_v39 }
 0x78e   :  { %3008 = vmatprep.subr.bf16.mxu0 %v6208_v1  ;;  %v8246_v1 = vrot.slane %v5599_v19, %v7862_v8 }
 0x791   :  { %3009 = vmatpush1.bf16.msra.mxu0 %v6206_v17  ;;  %v5600_v17 = vld [vmem:[%s9037_s26 + $0x2] ss:$8 sm:$0x3] }
 0x792   :  { %3010 = vmatprep.subr.bf16.mxu0 %v6211_v38 }
 0x795   :  { %3011 = vmatpush1.bf16.msra.mxu0 %v6209_v34 }
 0x796   :  { %3012 = vmatprep.subr.bf16.mxu0 %v6214_v25  ;;  %v3357_v25 = vld [vmem:[#allocation6] sm:$0x1e] }
 0x799   :  { %3013 = vmatpush1.bf16.msra.mxu0 %v6212_v33 }
 0x79a   :  { %3014 = vmatprep.subr.bf16.mxu0 %v6217_v55 }
 0x79d   :  { %3015 = vmatpush1.bf16.msra.mxu0 %v6215_v44 }
 0x79e   :  { %3016 = vmatprep.subr.bf16.mxu0 %v6220_v41 }
 0x7a1   :  { %3017 = vmatpush1.bf16.msra.mxu0 %v6218_v10 }
 0x7a2   :  { %3018 = vmatprep.subr.bf16.mxu0 %v6223_v62 }
 0x7a5   :  { %3019 = vmatpush1.bf16.msra.mxu0 %v6221_v9 }
 0x85b   :  { %v2746_v28 = vpop.f32.mrb[36].mxu0 }
 0x85c   :  { %v2747_v2 = vadd.f32 %v5564_v21, %v2746_v28  ;;  %v6014_v57 = vpop.f32.mrb[37].mxu0  ;;  %v8253_v21 = vrot.slane %v3237_v15, %v7862_v8 }
 0x85d   :  { %v2749_v22 = vpop.f32.mrb[38].mxu0  ;;  %v3353_v57 = vld [vmem:[#allocation6] sm:$0xf] }
 0x85e   :  { %v2752_v29 = vsub.f32 0.0, %v2747_v2  ;;  %v6015_v45 = vpop.f32.mrb[39].mxu0  ;;  %v8258_v2 = vrot.slane %v5600_v17, %v7862_v8 }
 0x860   :  { %v2753_v49 = vmul.f32 1.442695, %v2752_v29 }
 0x862   :  { %6516 = vpow2.f32 %v2753_v49  ;;  %v3359_v49 = vmul.f32 %v3357_v25, %v8246_v1 }
 0x864   :  { %v3363_v62 = vrot.slane %v3359_v49, 1 }
 0x86c   :  { %v6517_v50 = vpop.eup %6516 }
 0x86d   :  { %v2755_v35 = vadd.f32 1.0, %v6517_v50  ;;  %v3369_v50 = vld [vmem:[#allocation6] sm:$0x3c] }
 0x86f   :  { %6518 = vrcp.f32 %v2755_v35 }
 0x879   :  { %v6519_v18 = vpop.eup %6518 }
 0x87a   :  { %v2760_v58 = vrot.slane %v6519_v18, %v7862_v8  ;;  %v2764_v56 = vrot.slane %v6519_v18, %v7865_v59 }
 0x87c   :  { %v2765_v5 = vmul.f32 %v2760_v58, %v8170_v37  ;;  %v2766_v61 = vmul.f32 %v2760_v58, %v8167_v36  ;;  %v2767_v31 = vmul.f32 %v2764_v56, %v8174_v13  ;;  %v2768_v46 = vmul.f32 %v2764_v56, %v8176_v23  ;;  %v5581_v36 = vld [vmem:[%s9031_s18] ss:$0 sm:$0xff] }
 0x87d   :  { %v6776_v37 = vmov 0  }
 0x87e   :  { %v2769_v32 = vpack.c.bf16 %v2766_v61, %v2765_v5  ;;  %v2770_v40 = vpack.c.bf16 %v2768_v46, %v2767_v31  ;;  %3036 = vmatprep.mubr.bf16.mxu0 %v6776_v37  ;;  %v3355_v5 = vmul.f32 %v3353_v57, %v8253_v21 }
 0x880   :  { %6032 = vmatprep.mubr.bf16.mxu1 %v2769_v32  ;;  %v3371_v32 = vmul.f32 %v3369_v50, %v8258_v2  ;;  %v3367_v30 = vadd.f32 %v3363_v62, %v3355_v5 }
 0x881   :  { %6033 = vmatmul.mubr.bf16.vlgmr.msra.gmra.mrb[24].mxu1 %v2770_v40 }
 0x882   :  { %v3375_v26 = vrot.slane %v3371_v32, 2 }
 0x884   :  { %v8329_v57 = vadd.f32 %v3375_v26, %v3367_v30 }
 0x954   :  { %v6034_v13 = vpop.f32.mrb[24].mxu1 }
 0x955   :  { %v2869_v12 = vpop.f32.mrb[25].mxu1  ;;  %v2893_v20 = vmul.f32 %v6034_v13, %v5581_v36  ;;  %v8271_v13 = vrot.slane %v5599_v19, %v7865_v59  ;;  %v8299_v19 = vrot.slane %v3237_v15, %v7865_v59 }
 0x956   :  { %v2891_v27 = vmul.f32 %v5581_v36, %v2869_v12  ;;  %v6035_v23 = vpop.f32.mrb[26].mxu1 }
 0x957   :  { %v2872_v53 = vpop.f32.mrb[27].mxu1  ;;  %v2894_v4 = vmul.f32 %v6035_v23, %v5581_v36  ;;  %v8231_v54 = vadd.f32 %v5582_v48, %v2893_v20  ;;  %v8276_v23 = vld [vmem:[%s9037_s26 + $0x3] ss:$8 sm:$0x3] }
 0x958   :  { %v2892_v0 = vmul.f32 %v5581_v36, %v2872_v53  ;;  %v8223_v63 = vadd.f32 %v5582_v48, %v2891_v27 }
 0x959   :  { %v8229_v24 = vadd.f32 %v5582_v48, %v2894_v4  ;;  %9039 = vst [vmem:[#allocation58_spill] sm:$0xff] %v8231_v54  ;;  %v8282_v4 = vld [vmem:[%s9037_s26 + $0x4] ss:$8 sm:$0x3] }
 0x95a   :  { %9035 = vst [vmem:[#allocation46_spill] sm:$0xff] %v8223_v63  ;;  %v8225_v7 = vadd.f32 %v5582_v48, %v2892_v0  ;;  %v3358_v48 = vld [vmem:[#allocation6 + $0x8] sm:$0x1e] }
 0x95b   :  { %9038 = vst [vmem:[#allocation59_spill] sm:$0xff] %v8229_v24  ;;  %v2907_v52 = vpack.c.bf16 %v8229_v24, %v8231_v54 }
 0x95c   :  { %9036 = vst [vmem:[#allocation54_spill] sm:$0xff] %v8225_v7  ;;  %v2906_v47 = vpack.c.bf16 %v8225_v7, %v8223_v63 }
 0x95e   :  { %3037 = vmatmul.mubr.bf16.vlgmr.msra.gmra.mrb[40].mxu0 %v2906_v47  ;;  %v8285_v47 = vld [vmem:[%s9037_s26 + $0x5] ss:$8 sm:$0x3] }
 0x95f   :  { %3046 = vmatprep.mubr.bf16.mxu0 %v6776_v37 }
 0x966   :  { %3047 = vmatmul.mubr.bf16.gmra.mrb[44].mxu0 %v2907_v52  ;;  %v8290_v52 = vld [vmem:[%s9037_s26 + $0x6] ss:$8 sm:$0x3] }
 0x967   :  { %4884 = vmatprep.mubr.bf16.mxu0 %v6776_v37  ;;  %v8316_v15 = vrot.slane %v8290_v52, %v7862_v8 }
 0xa31   :  { %v3038_v42 = vpop.f32.mrb[40].mxu0 }
 0xa32   :  { %v3069_v43 = vmul.f32 %v3062_v51, %v3038_v42  ;;  %v3040_v14 = vpop.f32.mrb[41].mxu0  ;;  %v8293_v42 = vld [vmem:[%s9037_s26 + $0x7] ss:$8 sm:$0x3] }
 0xa33   :  { %v3070_v11 = vmul.f32 %v3066_v6, %v3040_v14  ;;  %v3042_v3 = vpop.f32.mrb[42].mxu0  ;;  %v8308_v14 = vrot.slane %v8282_v4, %v7862_v8 }
 0xa34   :  { %v8243_v39 = vadd.f32 %v3082_v60, %v3069_v43  ;;  %v3071_v38 = vmul.f32 %v3062_v51, %v3042_v3  ;;  %v3044_v34 = vpop.f32.mrb[43].mxu0  ;;  %v8304_v43 = vrot.slane %v8276_v23, %v7862_v8  ;;  %v8319_v3 = vrot.slane %v5600_v17, %v7865_v59 }
 0xa35   :  { %v8249_v33 = vadd.f32 %v3086_v16, %v3070_v11  ;;  %v3072_v55 = vmul.f32 %v3066_v6, %v3044_v34  ;;  %v8312_v11 = vrot.slane %v8285_v47, %v7862_v8  ;;  %v3900_v34 = vld [vmem:[#allocation6 + $0x50] sm:$0x1] }
 0xa36   :  { %v3097_v44 = vsub.f32 0.0, %v8243_v39  ;;  %v8255_v28 = vadd.f32 %v3082_v60, %v3071_v38  ;;  %v3898_v38 = vld [vmem:[#allocation6 + $0x40] sm:$0xe0] }
 0xa37   :  { %v3098_v22 = vsub.f32 0.0, %v8249_v33  ;;  %v8261_v29 = vadd.f32 %v3086_v16, %v3072_v55  ;;  %v8323_v55 = vrot.slane %v8293_v42, %v7862_v8  ;;  %v3902_v32 = vmul.f32 %v3898_v38, %v8246_v1  ;;  %v3894_v38 = vld [vmem:[#allocation6 + $0x40] sm:$0xf0] }
 0xa38   :  { %v3105_v45 = vmul.f32 1.442695, %v3097_v44  ;;  %v3099_v35 = vsub.f32 0.0, %v8255_v28 }
 0xa39   :  { %v3107_v18 = vmul.f32 1.442695, %v3098_v22  ;;  %v3100_v58 = vsub.f32 0.0, %v8261_v29  ;;  %v3048_v56 = vpop.f32.mrb[44].mxu0  ;;  %v3370_v22 = vld [vmem:[#allocation6 + $0x8] sm:$0x3c] }
 0xa3a   :  { %6520 = vpow2.f32 %v3105_v45  ;;  %v3109_v61 = vmul.f32 1.442695, %v3099_v35  ;;  %v3073_v31 = vmul.f32 %v3062_v51, %v3048_v56  ;;  %v3050_v46 = vpop.f32.mrb[45].mxu0  ;;  %v3829_v45 = vld [vmem:[#allocation6 + $0x30] sm:$0xc0]  ;;  %v3372_v62 = vmul.f32 %v3370_v22, %v8319_v3 }
 0xa3b   :  { %6522 = vpow2.f32 %v3107_v18  ;;  %v3111_v40 = vmul.f32 1.442695, %v3100_v58  ;;  %v3074_v41 = vmul.f32 %v3066_v6, %v3050_v46  ;;  %v3052_v10 = vpop.f32.mrb[46].mxu0  ;;  %v3831_v58 = vld [vmem:[#allocation6 + $0x40] sm:$0x3] }
 0xa3c   :  { %6524 = vpow2.f32 %v3109_v61  ;;  %v8268_v9 = vadd.f32 %v3082_v60, %v3073_v31  ;;  %v3075_v37 = vmul.f32 %v3062_v51, %v3052_v10  ;;  %v3054_v36 = vpop.f32.mrb[47].mxu0  ;;  %v3852_v31 = vld [vmem:[#allocation6 + $0x30] sm:$0x80]  ;;  %v3854_v46 = vld [vmem:[#allocation6 + $0x40] sm:$0x7] }
 0xa3d   :  { %6526 = vpow2.f32 %v3111_v40  ;;  %v8273_v12 = vadd.f32 %v3086_v16, %v3074_v41  ;;  %v3076_v27 = vmul.f32 %v3066_v6, %v3054_v36  ;;  %v8296_v6 = vld [vmem:[%s9037_s26 + $0x10] ss:$8 sm:$0x3]  ;;  %v3904_v40 = vmul.f32 %v3900_v34, %v8246_v1 }
 0xa3e   :  { %v3101_v53 = vsub.f32 0.0, %v8268_v9  ;;  %v8279_v0 = vadd.f32 %v3082_v60, %v3075_v37  ;;  %v3360_v60 = vmul.f32 %v3358_v48, %v8271_v13  ;;  %v8327_v44 = vrot.slane %v8296_v6, %v7862_v8 }
 0xa3f   :  { %v8287_v20 = vadd.f32 %v3086_v16, %v3076_v27  ;;  %v3354_v16 = vld [vmem:[#allocation6 + $0x8] sm:$0xf]  ;;  %v3102_v49 = vsub.f32 0.0, %v8273_v12  ;;  %v3833_v36 = vmul.f32 %v3829_v45, %v8316_v15  ;;  %v3835_v27 = vmul.f32 %v3831_v58, %v8316_v15 }
 0xa40   :  { %v3113_v51 = vmul.f32 1.442695, %v3101_v53  ;;  %v3356_v35 = vmul.f32 %v3354_v16, %v8299_v19  ;;  %v3364_v18 = vrot.slane %v3360_v60, 1  ;;  %v3103_v56 = vsub.f32 0.0, %v8279_v0  ;;  %v3922_v60 = vld [vmem:[#allocation6 + $0x50] sm:$0x3] }
 0xa41   :  { %v3104_v41 = vsub.f32 0.0, %v8287_v20  ;;  %v3115_v53 = vmul.f32 1.442695, %v3102_v49  ;;  %v8341_v30 = vmul.f32 %v3852_v31, %v8323_v55  ;;  %v8344_v26 = vmul.f32 %v3854_v46, %v8323_v55 }
 0xa42   :  { %6528 = vpow2.f32 %v3113_v51  ;;  %v3920_v51 = vld [vmem:[#allocation6 + $0x40] sm:$0xc0]  ;;  %v3117_v16 = vmul.f32 1.442695, %v3103_v56  ;;  %v3910_v34 = vrot.slane %v3902_v32, 1  ;;  %v8348_v45 = vrot.slane %v8276_v23, %v7865_v59 }
 0xa43   :  { %v3119_v22 = vmul.f32 1.442695, %v3104_v41  ;;  %v3368_v49 = vadd.f32 %v3364_v18, %v3356_v35  ;;  %v3842_v58 = vrot.slane %v3833_v36, 4  ;;  %v3896_v31 = vmul.f32 %v3894_v38, %v8253_v21  ;;  %v3874_v18 = vld [vmem:[#allocation6 + $0x40] sm:$0xf] }
 0xa44   :  { %v6521_v25 = vpop.eup %6520  ;;  %v8355_v46 = vmul.f32 %v3922_v60, %v8258_v2  ;;  %v8366_v41 = vrot.slane %v8285_v47, %v7865_v59  ;;  %v3901_v36 = vld [vmem:[#allocation6 + $0x58] sm:$0x1]  ;;  %v3875_v35 = vld [vmem:[#allocation6 + $0x48] sm:$0xf] }
 0xa45   :  { %v6523_v50 = vpop.eup %6522  ;;  %v3121_v17 = vadd.f32 1.0, %v6521_v25  ;;  %v3911_v25 = vrot.slane %v3904_v40, 1  ;;  %v8362_v40 = vrot.slane %v8282_v4, %v7865_v59  ;;  %v8378_v4 = vrot.slane %v8296_v6, %v7865_v59 }
 0xa46   :  { %v6525_v5 = vpop.eup %6524  ;;  %v3122_v61 = vadd.f32 1.0, %v6523_v50  ;;  %v3376_v50 = vrot.slane %v3372_v62, 2  ;;  %v3830_v62 = vld [vmem:[#allocation6 + $0x38] sm:$0xc0]  ;;  %v3933_v6 = vrot.slane %v8355_v46, 2 }
 0xa47   :  { %v6527_v10 = vpop.eup %6526  ;;  %6530 = vrcp.f32 %v3121_v17  ;;  %v3123_v37 = vadd.f32 1.0, %v6525_v5  ;;  %v3843_v5 = vrot.slane %v3835_v27, 4  ;;  %v3912_v32 = vsel %vm3511_vm2, %v3910_v34, %v3911_v25  ;;  %v3921_v34 = vld [vmem:[#allocation6 + $0x48] sm:$0xc0] }
 0xa48   :  { %6532 = vrcp.f32 %v3122_v61  ;;  %v3124_v48 = vadd.f32 1.0, %v6527_v10  ;;  %v8351_v61 = vmul.f32 %v3920_v51, %v8258_v2  ;;  %v8370_v10 = vrot.slane %v8290_v52, %v7865_v59  ;;  %v3853_v52 = vld [vmem:[#allocation6 + $0x38] sm:$0x80]  ;;  %v3855_v51 = vld [vmem:[#allocation6 + $0x48] sm:$0x7] }
 0xa49   :  { %6534 = vrcp.f32 %v3123_v37  ;;  %v3899_v37 = vld [vmem:[#allocation6 + $0x48] sm:$0xe0]  ;;  %v8374_v27 = vrot.slane %v8293_v42, %v7865_v59  ;;  %v8383_v47 = vsel %vm3841_vm3, %v3842_v58, %v3843_v5  ;;  %v8388_v38 = vadd.f32 %v3912_v32, %v3896_v31  ;;  %v3923_v58 = vld [vmem:[#allocation6 + $0x58] sm:$0x3] }
 0xa4a   :  { %6536 = vrcp.f32 %v3124_v48  ;;  %v8380_v48 = vadd.f32 %v3376_v50, %v3368_v49  ;;  %v3932_v42 = vrot.slane %v8351_v61, 2  ;;  %v3834_v49 = vmul.f32 %v3830_v62, %v8370_v10 }
 0xa4b   :  { %6538 = vpow2.f32 %v3115_v53  ;;  %v3832_v53 = vld [vmem:[#allocation6 + $0x48] sm:$0x3]  ;;  %v3903_v50 = vmul.f32 %v3899_v37, %v8271_v13  ;;  %v3857_v61 = vmul.f32 %v3853_v52, %v8374_v27  ;;  %v3859_v46 = vmul.f32 %v3855_v51, %v8374_v27  ;;  %v3895_v51 = vld [vmem:[#allocation6 + $0x48] sm:$0xf0] }
 0xa4c   :  { %v6529_v17 = vpop.eup %6528  ;;  %6540 = vpow2.f32 %v3117_v16  ;;  %v8386_v16 = vmul.f32 %v3874_v18, %v8327_v44  ;;  %v3836_v31 = vmul.f32 %v3832_v53, %v8370_v10  ;;  %v3925_v62 = vmul.f32 %v3921_v34, %v8319_v3 }
 0xa4d   :  { %v3125_v56 = vadd.f32 1.0, %v6529_v17  ;;  %6542 = vpow2.f32 %v3119_v22  ;;  %v3905_v17 = vmul.f32 %v3901_v36, %v8271_v13  ;;  %v3913_v24 = vrot.slane %v3903_v50, 1 }
 0xa4f   :  { %6544 = vrcp.f32 %v3125_v56  ;;  %v3914_v54 = vrot.slane %v3905_v17, 1 }
 0xa51   :  { %v6531_v60 = vpop.eup %6530 }
 0xa52   :  { %v6533_v25 = vpop.eup %6532  ;;  %v3137_v22 = vmul.f32 %v6531_v60, %v8243_v39 }
 0xa53   :  { %v6535_v5 = vpop.eup %6534  ;;  %v3138_v56 = vmul.f32 %v6533_v25, %v8249_v33  ;;  %v3927_v33 = vmul.f32 %v3923_v58, %v8319_v3  ;;  %v3867_v58 = vrot.slane %v3857_v61, 5 }
 0xa54   :  { %v6537_v18 = vpop.eup %6536  ;;  %v3149_v32 = vrot.slane %v3137_v22, 1  ;;  %v3159_v23 = vrot.slane %v3137_v22, 7  ;;  %v3139_v39 = vmul.f32 %v6535_v5, %v8255_v28  ;;  %v3845_v5 = vrot.slane %v3834_v49, 4 }
 0xa55   :  { %v3150_v37 = vrot.slane %v3138_v56, 1  ;;  %v3160_v60 = vrot.slane %v3138_v56, 7  ;;  %v3140_v36 = vmul.f32 %v6537_v18, %v8261_v29  ;;  %v6539_v25 = vpop.eup %6538  ;;  %v3846_v56 = vrot.slane %v3836_v31, 4 }
 0xa56   :  { %3153 = vst [vmem:[#allocation6 + $0x10] ss:$-12 sps:$4 sm:$0x87] %v3149_v32   ;;  %3163 = vst [vmem:[#allocation6 + $0x20] ss:$-12 sps:$4 sm:$0xe1] %v3159_v23   ;;  %v6541_v22 = vpop.eup %6540  ;;  %v8405_v23 = vmul.f32 %v3875_v35, %v8378_v4  ;;  %v3934_v32 = vsel %vm3638_vm4, %v3932_v42, %v3933_v6 }
 0xa57   :  { %v3171_v53 = vrot.slane %v3139_v39, 5  ;;  %v3181_v52 = vrot.slane %v3139_v39, 3  ;;  %3154 = vst [vmem:[#allocation6 + $0x18] ss:$-12 sps:$4 sm:$0x87] %v3150_v37   ;;  %v3172_v28 = vrot.slane %v3140_v36, 5  ;;  %v6543_v29 = vpop.eup %6542  ;;  %v3897_v39 = vmul.f32 %v3895_v51, %v8299_v19 }
 0xa58   :  { %3164 = vst [vmem:[#allocation6 + $0x28] ss:$-12 sps:$4 sm:$0xe1] %v3160_v60   ;;  %v3182_v34 = vrot.slane %v3140_v36, 3  ;;  %v3868_v18 = vrot.slane %v3859_v46, 5  ;;  %9040 = vst [vmem:[#allocation56_spill] sm:$0xff] %v8405_v23  ;;  %v3915_v46 = vsel %vm3511_vm2, %v3913_v24, %v3914_v54 }
 0xa59   :  { %3175 = vst [vmem:[#allocation6 + $0x20] sm:$0x78] %v3171_v53  ;;  %3185 = vst [vmem:[#allocation6 + $0x30] sm:$0x1e] %v3181_v52  ;;  %v6545_v50 = vpop.eup %6544  ;;  %v3126_v17 = vadd.f32 1.0, %v6539_v25  ;;  %v3935_v37 = vrot.slane %v3925_v62, 2  ;;  %v8420_v25 = vsel %vm3841_vm3, %v3845_v5, %v3846_v56  ;;  %v8423_v62 = vadd.f32 %v3934_v32, %v8388_v38 }
 0xa5a   :  { %3176 = vst [vmem:[#allocation6 + $0x28] sm:$0x78] %v3172_v28  ;;  %3186 = vst [vmem:[#allocation6 + $0x38] sm:$0x1e] %v3182_v34  ;;  %v3936_v60 = vrot.slane %v3927_v33, 2  ;;  %v9041_v49 = vrot.slane %v8344_v26, 5  ;;  %v3141_v35 = vmul.f32 %v6545_v50, %v8268_v9 }
 0xa5b   :  { %v9042_v31 = vrot.slane %v8341_v30, 5  ;;  %v3127_v42 = vadd.f32 1.0, %v6541_v22  ;;  %v4374_v6 = vld [vmem:[#allocation6 + $0x80] sm:$0x3c]  ;;  %v3128_v26 = vadd.f32 1.0, %v6543_v29  ;;  %v8426_v30 = vsel %vm3456_vm5, %v3867_v58, %v3868_v18 }
 0xa5c   :  { %v3197_v53 = vrot.slane %v3141_v35, 5  ;;  %v3207_v9 = vrot.slane %v3141_v35, 3  ;;  %v4388_v52 = vld [vmem:[#allocation6 + $0x80] sm:$0x78]  ;;  %6546 = vrcp.f32 %v3126_v17  ;;  %v8429_v22 = vadd.f32 %v3915_v46, %v3897_v39 }
 0xa5d   :  { %v8414_v61 = vsel %vm3456_vm5, %v9042_v31, %v9041_v49  ;;  %v3381_v24 = vld [vmem:[#allocation6] sm:$0xc0]  ;;  %v3383_v54 = vld [vmem:[#allocation6 + $0x10] sm:$0x3]  ;;  %v8432_v28 = vsel %vm3638_vm4, %v3935_v37, %v3936_v60  ;;  %v8435_v38 = vmul.f32 %v4374_v6, %v8316_v15  ;;  %v3432_v18 = vld [vmem:[#allocation6 + $0x10] sm:$0xf0]  ;;  %6548 = vrcp.f32 %v3127_v42 }
 0xa5e   :  { %v3404_v51 = vld [vmem:[#allocation6] sm:$0x80]  ;;  %9043 = vst [vmem:[#allocation60_spill] sm:$0xff] %v8429_v22  ;;  %9044 = vst [vmem:[#allocation57_spill] sm:$0xff] %v8432_v28  ;;  %v3385_v34 = vmul.f32 %v3381_v24, %v8304_v43  ;;  %v3387_v5 = vmul.f32 %v3383_v54, %v8304_v43  ;;  %v3406_v56 = vld [vmem:[#allocation6 + $0x10] sm:$0x7]  ;;  %v3434_v50 = vmul.f32 %v3432_v18, %v8316_v15  ;;  %6550 = vrcp.f32 %v3128_v26 }
 0xa5f   :  { %9045 = vst [vmem:[#allocation48_spill] sm:$0xff] %v8435_v38  ;;  %v3408_v29 = vmul.f32 %v3404_v51, %v8308_v14  ;;  %v3426_v58 = vld [vmem:[#allocation6 + $0x10] sm:$0xf]  ;;  %3201 = vst [vmem:[#allocation6 + $0x50] sm:$0x78] %v3197_v53  ;;  %v3410_v32 = vmul.f32 %v3406_v56, %v8308_v14  ;;  %v8443_v60 = vmul.f32 %v4388_v52, %v8323_v55 }
 0xa60   :  { %3211 = vst [vmem:[#allocation6 + $0x60] sm:$0x1e] %v3207_v9  ;;  %v3444_v17 = vld [vmem:[#allocation6 + $0x10] sm:$0xe0]  ;;  %v3446_v39 = vld [vmem:[#allocation6 + $0x20] sm:$0x1]  ;;  %v3428_v42 = vmul.f32 %v3426_v58, %v8312_v11 }
 0xa61   :  { %v3467_v37 = vld [vmem:[#allocation6 + $0x10] sm:$0xc0]  ;;  %9046 = vst [vmem:[#allocation49_spill] sm:$0xff] %v8443_v60  ;;  %v3394_v49 = vrot.slane %v3385_v34, 6  ;;  %v3395_v31 = vrot.slane %v3387_v5, 6  ;;  %v3416_v35 = vrot.slane %v3408_v29, 7  ;;  %v3448_v46 = vmul.f32 %v3444_v17, %v8323_v55 }
 0xa62   :  { %v3469_v6 = vld [vmem:[#allocation6 + $0x20] sm:$0x3]  ;;  %v3417_v53 = vrot.slane %v3410_v32, 7  ;;  %v3450_v9 = vmul.f32 %v3446_v39, %v8323_v55  ;;  %v3471_v24 = vmul.f32 %v3467_v37, %v8327_v44  ;;  %v3491_v54 = vld [vmem:[#allocation6] sm:$0xc0]  ;;  %v3438_v52 = vrot.slane %v3434_v50, 4 }
 0xa63   :  { %v3493_v51 = vld [vmem:[#allocation6 + $0x10] sm:$0x3]  ;;  %v3396_v56 = vsel %vm3393_vm6, %v3394_v49, %v3395_v31  ;;  %v3457_v18 = vrot.slane %v3448_v46, 5  ;;  %v3473_v26 = vmul.f32 %v3469_v6, %v8327_v44  ;;  %v3499_v34 = vld [vmem:[#allocation6] sm:$0x80]  ;;  %v3495_v58 = vmul.f32 %v3491_v54, %v8253_v21 }
 0xa64   :  { %v3501_v5 = vld [vmem:[#allocation6 + $0x10] sm:$0x7]  ;;  %v3402_v29 = vadd.f32 %v3396_v56, %v8329_v57  ;;  %v3458_v17 = vrot.slane %v3450_v9, 5  ;;  %v3479_v32 = vrot.slane %v3471_v24, 6  ;;  %v3540_v39 = vld [vmem:[#allocation6 + $0x10] sm:$0xf0]  ;;  %v3418_v37 = vsel %vm1303_vm1, %v3416_v35, %v3417_v53 }
 0xa65   :  { %v3526_v33 = vld [vmem:[#allocation6 + $0x10] sm:$0xf]  ;;  %v3480_v36 = vrot.slane %v3473_v26, 6  ;;  %v3503_v7 = vmul.f32 %v3499_v34, %v8246_v1  ;;  %v3505_v50 = vmul.f32 %v3501_v5, %v8246_v1  ;;  %v3554_v49 = vld [vmem:[#allocation6 + $0x10] sm:$0xe0]  ;;  %v3497_v6 = vmul.f32 %v3493_v51, %v8253_v21 }
 0xa66   :  { %v3556_v31 = vld [vmem:[#allocation6 + $0x20] sm:$0x1]  ;;  %v3424_v46 = vadd.f32 %v3418_v37, %v3402_v29  ;;  %v3528_v57 = vmul.f32 %v3526_v33, %v8258_v2  ;;  %v3542_v9 = vmul.f32 %v3540_v39, %v8304_v43  ;;  %v3459_v24 = vsel %vm3456_vm5, %v3457_v18, %v3458_v17  ;;  %v3580_v53 = vld [vmem:[#allocation6 + $0x10] sm:$0xc0]  ;;  %v6547_v34 = vpop.eup %6546  ;;  %v3433_v22 = vld [vmem:[#allocation6 + $0x18] sm:$0xf0] }
 0xa67   :  { %v3512_v54 = vrot.slane %v3503_v7, 1  ;;  %v3513_v56 = vrot.slane %v3505_v50, 1  ;;  %v3558_v35 = vmul.f32 %v3554_v49, %v8308_v14  ;;  %v3649_v26 = vld [vmem:[#allocation6 + $0x10] sm:$0xf0]  ;;  %v3481_v5 = vsel %vm3393_vm6, %v3479_v32, %v3480_v36  ;;  %v3655_v37 = vld [vmem:[#allocation6 + $0x20] sm:$0x1]  ;;  %v8463_v33 = vpop.eup %6548 }
 0xa68   :  { %v3430_v63 = vadd.f32 %v3428_v42, %v3424_v46  ;;  %v3532_v59 = vrot.slane %v3528_v57, 2  ;;  %v3560_v29 = vmul.f32 %v3556_v31, %v8308_v14  ;;  %v3653_v51 = vld [vmem:[#allocation6 + $0x10] sm:$0xe0]  ;;  %v3546_v7 = vrot.slane %v3542_v9, 6  ;;  %v8466_v49 = vpop.eup %6550  ;;  %v3677_v32 = vld [vmem:[#allocation6 + $0x20] sm:$0x3] }
 0xa69   :  { %v3514_v39 = vsel %vm3511_vm2, %v3512_v54, %v3513_v56  ;;  %v3524_v18 = vadd.f32 %v3513_v56, %v3497_v6  ;;  %v3566_v17 = vrot.slane %v3558_v35, 7  ;;  %v3675_v50 = vld [vmem:[#allocation6 + $0x10] sm:$0xc0]  ;;  %v3584_v36 = vmul.f32 %v3580_v53, %v8312_v11  ;;  %v3382_v54 = vld [vmem:[#allocation6 + $0x8] sm:$0xc0] }
 0xa6a   :  { %v3442_v8 = vadd.f32 %v3438_v52, %v3430_v63  ;;  %v3522_v60 = vadd.f32 %v3514_v39, %v3495_v58  ;;  %v3568_v42 = vrot.slane %v3560_v29, 7  ;;  %v3651_v31 = vmul.f32 %v3649_v26, %v8253_v21  ;;  %v3384_v52 = vld [vmem:[#allocation6 + $0x18] sm:$0x3]  ;;  %v3582_v35 = vld [vmem:[#allocation6 + $0x20] sm:$0x3] }
 0xa6b   :  { %v3538_v46 = vadd.f32 %v3532_v59, %v3524_v18  ;;  %v3657_v57 = vmul.f32 %v3653_v51, %v8246_v1  ;;  %v3659_v28 = vmul.f32 %v3655_v37, %v8246_v1  ;;  %v3679_v63 = vmul.f32 %v3675_v50, %v8258_v2  ;;  %v3405_v39 = vld [vmem:[#allocation6 + $0x8] sm:$0x80] }
 0xa6c   :  { %v3465_v6 = vadd.f32 %v3459_v24, %v3442_v8  ;;  %v3536_v9 = vadd.f32 %v3532_v59, %v3522_v60  ;;  %v3569_v56 = vsel %vm1303_vm1, %v3566_v17, %v3568_v42  ;;  %v3681_v26 = vmul.f32 %v3677_v32, %v8258_v2  ;;  %v3407_v24 = vld [vmem:[#allocation6 + $0x18] sm:$0x7]  ;;  %v6224_v59 = vld [vmem:[%s9047_s28 + $0x40] sm:$0xff]  }
 0xa6d   :  { %v3552_v58 = vadd.f32 %v3546_v7, %v3538_v46  ;;  %v3665_v53 = vrot.slane %v3657_v57, 1  ;;  %v3666_v29 = vrot.slane %v3659_v28, 1  ;;  %v3687_v37 = vrot.slane %v3679_v63, 2  ;;  %v6225_v57 = vld [vmem:[%s9047_s28] sm:$0xff]   ;;  %5771 = vmatprep.subr.bf16.mxu1 %v6224_v59 }
 0xa6e   :  { %v3487_v51 = vadd.f32 %v3481_v5, %v3465_v6  ;;  %v3550_v18 = vadd.f32 %v3546_v7, %v3536_v9  ;;  %v3386_v8 = vmul.f32 %v3382_v54, %v8348_v45  ;;  %v3688_v42 = vrot.slane %v3681_v26, 2  ;;  %v3445_v54 = vld [vmem:[#allocation6 + $0x18] sm:$0xe0]  ;;  %v3447_v6 = vld [vmem:[#allocation6 + $0x28] sm:$0x1]  ;;  %5772 = vmatpush3.bf16.msra.mxu1 %v6225_v57 }
 0xa6f   :  { %v3578_v60 = vadd.f32 %v3569_v56, %v3552_v58  ;;  %v3667_v50 = vsel %vm3511_vm2, %v3665_v53, %v3666_v29  ;;  %v3388_v46 = vmul.f32 %v3384_v52, %v8348_v45  ;;  %v3586_v5 = vmul.f32 %v3582_v35, %v8312_v11  ;;  %v6226_v9 = vld [vmem:[%s9047_s28 + $0x48] sm:$0xff]   ;;  %v3470_v53 = vld [vmem:[#allocation6 + $0x28] sm:$0x3] }
 0xa70   :  { %3489 = vst [vmem:[#allocation7] sm:$0xf] %v3487_v51  ;;  %v3576_v28 = vadd.f32 %v3566_v17, %v3550_v18  ;;  %v3397_v7 = vrot.slane %v3386_v8, 6  ;;  %v3409_v32 = vmul.f32 %v3405_v39, %v8362_v40  ;;  %v3673_v56 = vadd.f32 %v3667_v50, %v3651_v31  ;;  %v3468_v52 = vld [vmem:[#allocation6 + $0x18] sm:$0xc0]  ;;  %5773 = vmatprep.subr.bf16.mxu1 %v6226_v9  ;;  %v6228_v31 = vld [vmem:[%s9047_s28 + $0x50] sm:$0xff]  }
 0xa71   :  { %v3398_v63 = vrot.slane %v3388_v46, 6  ;;  %v3411_v58 = vmul.f32 %v3407_v24, %v8362_v40  ;;  %v8485_v29 = vmul.f32 %v6547_v34, %v8273_v12  ;;  %v6227_v17 = vld [vmem:[%s9047_s28 + $0x8] sm:$0xff]   ;;  %v8490_v26 = vadd.f32 %v3586_v5, %v3578_v60  ;;  %v3492_v34 = vld [vmem:[#allocation6 + $0x8] sm:$0xc0] }
 0xa72   :  { %v8488_v35 = vadd.f32 %v3584_v36, %v3576_v28  ;;  %v3689_v39 = vsel %vm3638_vm4, %v3687_v37, %v3688_v42  ;;  %v3419_v51 = vrot.slane %v3409_v32, 7  ;;  %v3427_v18 = vld [vmem:[#allocation6 + $0x18] sm:$0xf]  ;;  %v3435_v59 = vmul.f32 %v3433_v22, %v8370_v10  ;;  %v3500_v42 = vld [vmem:[#allocation6 + $0x8] sm:$0x80]  ;;  %5774 = vmatpush3.bf16.msra.mxu1 %v6227_v17 }
 0xa73   :  { %v3399_v8 = vsel %vm3393_vm6, %v3397_v7, %v3398_v63  ;;  %v3420_v24 = vrot.slane %v3411_v58, 7  ;;  %v3449_v12 = vmul.f32 %v3445_v54, %v8374_v27  ;;  %v3451_v60 = vmul.f32 %v3447_v6, %v8374_v27  ;;  %v3502_v46 = vld [vmem:[#allocation6 + $0x18] sm:$0x7]  ;;  %v3541_v54 = vld [vmem:[#allocation6 + $0x18] sm:$0xf0]  ;;  %5775 = vmatprep.subr.bf16.mxu1 %v6228_v31 }
 0xa74   :  { %v3403_v36 = vadd.f32 %v3399_v8, %v8380_v48  ;;  %v3472_v50 = vmul.f32 %v3468_v52, %v8378_v4  ;;  %v3474_v37 = vmul.f32 %v3470_v53, %v8378_v4  ;;  %v3527_v57 = vld [vmem:[#allocation6 + $0x18] sm:$0xf]  ;;  %v8501_v28 = vadd.f32 %v3689_v39, %v3673_v56  ;;  %v6229_v48 = vld [vmem:[%s9047_s28 + $0x10] sm:$0xff]   ;;  %v3555_v52 = vld [vmem:[#allocation6 + $0x18] sm:$0xe0] }
 0xa75   :  { %v3421_v22 = vsel %vm1303_vm1, %v3419_v51, %v3420_v24  ;;  %v3429_v5 = vmul.f32 %v3427_v18, %v8366_v41  ;;  %v3460_v7 = vrot.slane %v3449_v12, 5  ;;  %v3494_v32 = vld [vmem:[#allocation6 + $0x18] sm:$0x3]  ;;  %v3461_v9 = vrot.slane %v3451_v60, 5  ;;  %v6230_v53 = vld [vmem:[%s9047_s28 + $0x58] sm:$0xff]  }
 0xa76   :  { %v3425_v6 = vadd.f32 %v3421_v22, %v3403_v36  ;;  %v3482_v63 = vrot.slane %v3472_v50, 6  ;;  %v3483_v58 = vrot.slane %v3474_v37, 6  ;;  %v3439_v8 = vrot.slane %v3435_v59, 4  ;;  %v3557_v18 = vld [vmem:[#allocation6 + $0x28] sm:$0x1]  ;;  %5776 = vmatpush3.bf16.msra.mxu1 %v6229_v48 }
 0xa77   :  { %v3504_v56 = vmul.f32 %v3500_v42, %v8271_v13  ;;  %v3506_v39 = vmul.f32 %v3502_v46, %v8271_v13  ;;  %v3529_v51 = vmul.f32 %v3527_v57, %v8319_v3  ;;  %v3496_v17 = vmul.f32 %v3492_v34, %v8299_v19  ;;  %v3650_v60 = vld [vmem:[#allocation6 + $0x18] sm:$0xf0]  ;;  %v6231_v46 = vld [vmem:[%s9047_s28 + $0x18] sm:$0xff]   ;;  %5777 = vmatprep.subr.bf16.mxu1 %v6230_v53 }
 0xa78   :  { %v3431_v24 = vadd.f32 %v3429_v5, %v3425_v6  ;;  %v3498_v12 = vmul.f32 %v3494_v32, %v8299_v19  ;;  %v3543_v36 = vmul.f32 %v3541_v54, %v8348_v45  ;;  %v3462_v31 = vsel %vm3456_vm5, %v3460_v7, %v3461_v9  ;;  %v3654_v42 = vld [vmem:[#allocation6 + $0x18] sm:$0xe0]  ;;  %v3656_v32 = vld [vmem:[#allocation6 + $0x28] sm:$0x1]  ;;  %v6232_v54 = vld [vmem:[%s9047_s28 + $0x60] sm:$0xff]  }
 0xa79   :  { %v3515_v59 = vrot.slane %v3504_v56, 1  ;;  %v3516_v50 = vrot.slane %v3506_v39, 1  ;;  %v3559_v37 = vmul.f32 %v3555_v52, %v8362_v40  ;;  %v3484_v22 = vsel %vm3393_vm6, %v3482_v63, %v3483_v58  ;;  %v3676_v6 = vld [vmem:[#allocation6 + $0x18] sm:$0xc0]  ;;  %v3678_v52 = vld [vmem:[#allocation6 + $0x28] sm:$0x3] }
 0xa7a   :  { %v3443_v57 = vadd.f32 %v3439_v8, %v3431_v24  ;;  %v3533_v5 = vrot.slane %v3529_v51, 2  ;;  %v3561_v34 = vmul.f32 %v3557_v18, %v8362_v40  ;;  %v3547_v9 = vrot.slane %v3543_v36, 6  ;;  %v3592_v18 = vld [vmem:[#allocation6 + $0x20] sm:$0x3c]  ;;  %5778 = vmatpush3.bf16.msra.mxu1 %v6231_v46  ;;  %v3581_v46 = vld [vmem:[#allocation6 + $0x18] sm:$0xc0] }
 0xa7b   :  { %v3517_v23 = vsel %vm3511_vm2, %v3515_v59, %v3516_v50  ;;  %v3525_v7 = vadd.f32 %v3516_v50, %v3498_v12  ;;  %v3567_v56 = vrot.slane %v3559_v37, 7  ;;  %v3652_v8 = vmul.f32 %v3650_v60, %v8299_v19  ;;  %v3606_v24 = vld [vmem:[#allocation6 + $0x20] sm:$0x78]  ;;  %v6233_v12 = vld [vmem:[%s9047_s28 + $0x20] sm:$0xff]   ;;  %5779 = vmatprep.subr.bf16.mxu1 %v6232_v54  ;;  %v6234_v50 = vld [vmem:[%s9047_s28 + $0x68] sm:$0xff]  }
 0xa7c   :  { %v3466_v39 = vadd.f32 %v3462_v31, %v3443_v57  ;;  %v3523_v48 = vadd.f32 %v3517_v23, %v3496_v17  ;;  %v3570_v38 = vrot.slane %v3561_v34, 7  ;;  %v3658_v58 = vmul.f32 %v3654_v42, %v8271_v13  ;;  %v3620_v17 = vld [vmem:[#allocation6 + $0x20] sm:$0xf0]  ;;  %v3583_v42 = vld [vmem:[#allocation6 + $0x28] sm:$0x3] }
 0xa7d   :  { %v3539_v63 = vadd.f32 %v3533_v5, %v3525_v7  ;;  %v3660_v51 = vmul.f32 %v3656_v32, %v8271_v13  ;;  %v3680_v53 = vmul.f32 %v3676_v6, %v8319_v3  ;;  %v3682_v23 = vmul.f32 %v3678_v52, %v8319_v3  ;;  %v3697_v60 = vld [vmem:[#allocation6 + $0x20] sm:$0x3c] }
 0xa7e   :  { %v3488_v36 = vadd.f32 %v3484_v22, %v3466_v39  ;;  %v3537_v59 = vadd.f32 %v3533_v5, %v3523_v48  ;;  %v3571_v31 = vsel %vm1303_vm1, %v3567_v56, %v3570_v38  ;;  %v3668_v57 = vrot.slane %v3658_v58, 1  ;;  %5780 = vmatpush3.bf16.msra.mxu1 %v6233_v12  ;;  %v6235_v48 = vld [vmem:[%s9047_s28 + $0x28] sm:$0xff]   ;;  %v3727_v12 = vld [vmem:[#allocation6 + $0x30] sm:$0xf] }
 0xa7f   :  { %v3553_v37 = vadd.f32 %v3547_v9, %v3539_v63  ;;  %v3669_v34 = vrot.slane %v3660_v51, 1  ;;  %v3690_v32 = vrot.slane %v3680_v53, 2  ;;  %v3691_v22 = vrot.slane %v3682_v23, 2  ;;  %v3709_v51 = vld [vmem:[#allocation6 + $0x20] sm:$0x78]  ;;  %5781 = vmatprep.subr.bf16.mxu1 %v6234_v50 }
 0xa80   :  { %3490 = vst [vmem:[#allocation7 + $0x8] sm:$0xf] %v3488_v36  ;;  %v3551_v6 = vadd.f32 %v3547_v9, %v3537_v59  ;;  %v3594_v5 = vmul.f32 %v3592_v18, %v8316_v15  ;;  %v3608_v38 = vmul.f32 %v3606_v24, %v8323_v55  ;;  %v3622_v54 = vmul.f32 %v3620_v17, %v8327_v44  ;;  %v6236_v18 = vld [vmem:[%s9047_s28 + $0x70] sm:$0xff]   ;;  %v3739_v23 = vld [vmem:[#allocation6 + $0x30] sm:$0x1e] }
 0xa81   :  { %v3579_v7 = vadd.f32 %v3571_v31, %v3553_v37  ;;  %v3670_v52 = vsel %vm3511_vm2, %v3668_v57, %v3669_v34  ;;  %v3699_v39 = vmul.f32 %v3697_v60, %v8304_v43  ;;  %v3587_v58 = vmul.f32 %v3583_v42, %v8366_v41  ;;  %v3751_v34 = vld [vmem:[#allocation6 + $0x30] sm:$0x3c] }
 0xa82   :  { %v3577_v63 = vadd.f32 %v3567_v56, %v3551_v6  ;;  %v3598_v9 = vrot.slane %v3594_v5, 4  ;;  %v8537_v53 = vmul.f32 %v8463_v33, %v8279_v0  ;;  %v3585_v24 = vmul.f32 %v3581_v46, %v8366_v41  ;;  %v3721_v0 = vld [vmem:[#allocation6 + $0x20] sm:$0xf0]  ;;  %5782 = vmatpush3.bf16.msra.mxu1 %v6235_v48 }
 0xa83   :  { %v3674_v36 = vadd.f32 %v3670_v52, %v3652_v8  ;;  %v3692_v59 = vsel %vm3638_vm4, %v3690_v32, %v3691_v22  ;;  %v3703_v31 = vrot.slane %v3699_v39, 6  ;;  %v8542_v56 = vadd.f32 %v3587_v58, %v3579_v7  ;;  %v3775_v33 = vld [vmem:[#allocation6 + $0x20] sm:$0x78]  ;;  %5783 = vmatprep.subr.bf16.mxu1 %v6236_v18  ;;  %v6238_v7 = vld [vmem:[%s9047_s28 + $0x78] sm:$0xff]  }
 0xa84   :  { %v3602_v17 = vadd.f32 %v3598_v9, %v8488_v35  ;;  %v3604_v60 = vadd.f32 %v3598_v9, %v8490_v26  ;;  %v3612_v37 = vrot.slane %v3608_v38, 5  ;;  %v8546_v50 = vadd.f32 %v3585_v24, %v3577_v63  ;;  %v3771_v32 = vld [vmem:[#allocation6 + $0x20] sm:$0x3c]  ;;  %v3799_v38 = vld [vmem:[#allocation6 + $0x30] sm:$0xf] }
 0xa85   :  { %v3626_v42 = vrot.slane %v3622_v54, 6  ;;  %v3707_v8 = vadd.f32 %v3703_v31, %v8501_v28  ;;  %v3711_v57 = vmul.f32 %v3709_v51, %v8308_v14  ;;  %v6237_v6 = vld [vmem:[%s9047_s28 + $0x30] sm:$0xff]   ;;  %v3729_v35 = vmul.f32 %v3727_v12, %v8316_v15  ;;  %v3811_v51 = vld [vmem:[#allocation6 + $0x30] sm:$0x1e] }
 0xa86   :  { %v3616_v46 = vadd.f32 %v3612_v37, %v3602_v17  ;;  %v3618_v22 = vadd.f32 %v3612_v37, %v3604_v60  ;;  %v3741_v26 = vmul.f32 %v3739_v23, %v8323_v55  ;;  %v3787_v5 = vld [vmem:[#allocation6 + $0x20] sm:$0xf0]  ;;  %v3696_v52 = vadd.f32 %v3692_v59, %v3674_v36  ;;  %v3823_v36 = vld [vmem:[#allocation6 + $0x30] sm:$0x3c]  ;;  %v3593_v59 = vld [vmem:[#allocation6 + $0x28] sm:$0x3c]  ;;  %5784 = vmatpush3.bf16.msra.mxu1 %v6237_v6 }
 0xa87   :  { %v3715_v54 = vrot.slane %v3711_v57, 7  ;;  %v3723_v28 = vmul.f32 %v3721_v0, %v8312_v11  ;;  %v3777_v39 = vmul.f32 %v3775_v33, %v8246_v1  ;;  %v3753_v58 = vmul.f32 %v3751_v34, %v8327_v44  ;;  %v3607_v23 = vld [vmem:[#allocation6 + $0x28] sm:$0x78]  ;;  %5785 = vmatprep.subr.bf16.mxu1 %v6238_v7 }
 0xa88   :  { %v3630_v63 = vadd.f32 %v3626_v42, %v3616_v46  ;;  %v3632_v48 = vadd.f32 %v3626_v42, %v3618_v22  ;;  %v3773_v9 = vmul.f32 %v3771_v32, %v8253_v21  ;;  %v3789_v12 = vmul.f32 %v3787_v5, %v8258_v2  ;;  %v6239_v17 = vld [vmem:[%s9047_s28 + $0x38] sm:$0xff]  }
 0xa89   :  { %v3719_v24 = vadd.f32 %v3715_v54, %v3707_v8  ;;  %v3781_v31 = vrot.slane %v3777_v39, 1  ;;  %v3801_v18 = vmul.f32 %v3799_v38, %v8304_v43  ;;  %v3733_v0 = vrot.slane %v3729_v35, 4  ;;  %v3698_v42 = vld [vmem:[#allocation6 + $0x28] sm:$0x3c] }
 0xa8a   :  { %v3639_v60 = vrot.slane %v3630_v63, 2  ;;  %v3640_v37 = vrot.slane %v3632_v48, 2  ;;  %v3745_v33 = vrot.slane %v3741_v26, 5  ;;  %v3793_v32 = vrot.slane %v3789_v12, 2  ;;  %v3621_v46 = vld [vmem:[#allocation6 + $0x28] sm:$0xf0]  ;;  %5786 = vmatpush3.bf16.msra.mxu1 %v6239_v17 }
 0xa8b   :  { %v3725_v57 = vadd.f32 %v3723_v28, %v3719_v24  ;;  %v3785_v34 = vadd.f32 %v3781_v31, %v3773_v9  ;;  %v3813_v8 = vmul.f32 %v3811_v51, %v8308_v14  ;;  %v3710_v22 = vld [vmem:[#allocation6 + $0x28] sm:$0x78]  ;;  %v3757_v38 = vrot.slane %v3753_v58, 6  ;;  %v3728_v28 = vld [vmem:[#allocation6 + $0x38] sm:$0xf] }
 0xa8c   :  { %v3641_v5 = vsel %vm3638_vm4, %v3639_v60, %v3640_v37  ;;  %v3595_v54 = vmul.f32 %v3593_v59, %v8370_v10  ;;  %v3609_v6 = vmul.f32 %v3607_v23, %v8374_v27  ;;  %v3805_v26 = vrot.slane %v3801_v18, 6  ;;  %v3740_v59 = vld [vmem:[#allocation6 + $0x38] sm:$0x1e]  ;;  %v3722_v37 = vld [vmem:[#allocation6 + $0x28] sm:$0xf0] }
 0xa8d   :  { %3647 = vst [vmem:[#allocation7] sm:$0xf0] %v3641_v5  ;;  %v3737_v39 = vadd.f32 %v3733_v0, %v3725_v57  ;;  %v3797_v35 = vadd.f32 %v3793_v32, %v3785_v34  ;;  %v3700_v7 = vmul.f32 %v3698_v42, %v8348_v45  ;;  %v3825_v63 = vmul.f32 %v3823_v36, %v8312_v11  ;;  %v3752_v34 = vld [vmem:[#allocation6 + $0x38] sm:$0x3c]  ;;  %v3788_v5 = vld [vmem:[#allocation6 + $0x28] sm:$0xf0] }
 0xa8e   :  { %v3599_v48 = vrot.slane %v3595_v54, 4  ;;  %v3623_v9 = vmul.f32 %v3621_v46, %v8378_v4  ;;  %v3712_v51 = vmul.f32 %v3710_v22, %v8362_v40  ;;  %v3817_v31 = vrot.slane %v3813_v8, 7  ;;  %v3776_v22 = vld [vmem:[#allocation6 + $0x28] sm:$0x78] }
 0xa8f   :  { %v3749_v58 = vadd.f32 %v3745_v33, %v3737_v39  ;;  %v3809_v24 = vadd.f32 %v3805_v26, %v3797_v35  ;;  %v3704_v12 = vrot.slane %v3700_v7, 6  ;;  %v3613_v60 = vrot.slane %v3609_v6, 5  ;;  %v3800_v6 = vld [vmem:[#allocation6 + $0x38] sm:$0xf]  ;;  %v3772_v7 = vld [vmem:[#allocation6 + $0x28] sm:$0x3c] }
 0xa90   :  { %v3603_v23 = vadd.f32 %v3599_v48, %v8546_v50  ;;  %v3605_v18 = vadd.f32 %v3599_v48, %v8542_v56  ;;  %v3730_v17 = vmul.f32 %v3728_v28, %v8370_v10  ;;  %v3716_v57 = vrot.slane %v3712_v51, 7 }
 0xa91   :  { %v3761_v0 = vadd.f32 %v3757_v38, %v3749_v58  ;;  %v3821_v36 = vadd.f32 %v3817_v31, %v3809_v24  ;;  %v3708_v42 = vadd.f32 %v3704_v12, %v3696_v52  ;;  %v3627_v33 = vrot.slane %v3623_v9, 6  ;;  %v3812_v58 = vld [vmem:[#allocation6 + $0x38] sm:$0x1e] }
 0xa92   :  { %v3617_v32 = vadd.f32 %v3613_v60, %v3603_v23  ;;  %v3619_v46 = vadd.f32 %v3613_v60, %v3605_v18  ;;  %v3742_v8 = vmul.f32 %v3740_v59, %v8374_v27  ;;  %v3724_v56 = vmul.f32 %v3722_v37, %v8366_v41  ;;  %v3954_v23 = vld [vmem:[#allocation6 + $0x50] sm:$0x78] }
 0xa93   :  { %v3765_v54 = vrot.slane %v3761_v0, 4  ;;  %v3827_v50 = vadd.f32 %v3825_v63, %v3821_v36  ;;  %v3720_v39 = vadd.f32 %v3716_v57, %v3708_v42  ;;  %v3734_v38 = vrot.slane %v3730_v17, 4  ;;  %v3942_v63 = vld [vmem:[#allocation6 + $0x50] sm:$0x3c]  ;;  %v3984_v0 = vld [vmem:[#allocation6 + $0x60] sm:$0x1e] }
 0xa94   :  { %v3631_v35 = vadd.f32 %v3627_v33, %v3617_v32  ;;  %v3633_v26 = vadd.f32 %v3627_v33, %v3619_v46  ;;  %v3754_v52 = vmul.f32 %v3752_v34, %v8378_v4  ;;  %v3778_v9 = vmul.f32 %v3776_v22, %v8271_v13  ;;  %v3824_v22 = vld [vmem:[#allocation6 + $0x38] sm:$0x3c] }
 0xa95   :  { %3769 = vst [vmem:[#allocation7 + $0x10] sm:$0xf] %v3765_v54  ;;  %v3850_v28 = vadd.f32 %v8383_v47, %v3827_v50  ;;  %v3726_v48 = vadd.f32 %v3724_v56, %v3720_v39  ;;  %v3790_v51 = vmul.f32 %v3788_v5, %v8319_v3  ;;  %v3746_v12 = vrot.slane %v3742_v8, 5  ;;  %v3972_v47 = vld [vmem:[#allocation6 + $0x60] sm:$0xf] }
 0xa96   :  { %v3642_v24 = vrot.slane %v3631_v35, 2  ;;  %v3643_v31 = vrot.slane %v3633_v26, 2  ;;  %v3802_v59 = vmul.f32 %v3800_v6, %v8348_v45  ;;  %v3774_v37 = vmul.f32 %v3772_v7, %v8299_v19  ;;  %v3996_v5 = vld [vmem:[#allocation6 + $0x60] sm:$0x3c]  ;;  %v3966_v39 = vld [vmem:[#allocation6 + $0x50] sm:$0xf0] }
 0xa97   :  { %v3872_v18 = vadd.f32 %v8414_v61, %v3850_v28  ;;  %v3738_v60 = vadd.f32 %v3734_v38, %v3726_v48  ;;  %v3782_v17 = vrot.slane %v3778_v9, 1  ;;  %v3758_v42 = vrot.slane %v3754_v52, 6  ;;  %v4020_v35 = vld [vmem:[#allocation6 + $0x50] sm:$0x78]  ;;  %v4044_v28 = vld [vmem:[#allocation6 + $0x60] sm:$0xf] }
 0xa98   :  { %v3644_v36 = vsel %vm3638_vm4, %v3642_v24, %v3643_v31  ;;  %v3794_v57 = vrot.slane %v3790_v51, 2  ;;  %v3814_v34 = vmul.f32 %v3812_v58, %v8362_v40  ;;  %v9048_v32 = vrot.slane %v8386_v16, 6  ;;  %v4032_v7 = vld [vmem:[#allocation6 + $0x50] sm:$0xf0] }
 0xa99   :  { %3648 = vst [vmem:[#allocation7 + $0x8] sm:$0xf0] %v3644_v36  ;;  %v3750_v33 = vadd.f32 %v3746_v12, %v3738_v60  ;;  %v3786_v8 = vadd.f32 %v3782_v17, %v3774_v37  ;;  %v3944_v61 = vmul.f32 %v3942_v63, %v8304_v43  ;;  %v3806_v54 = vrot.slane %v3802_v59, 6  ;;  %v4016_v59 = vld [vmem:[#allocation6 + $0x50] sm:$0x3c] }
 0xa9a   :  { %v3884_v46 = vadd.f32 %v9048_v32, %v3872_v18  ;;  %v3956_v50 = vmul.f32 %v3954_v23, %v8308_v14  ;;  %v3974_v56 = vmul.f32 %v3972_v47, %v8316_v15  ;;  %v3986_v6 = vmul.f32 %v3984_v0, %v8323_v55  ;;  %v4056_v23 = vld [vmem:[#allocation6 + $0x60] sm:$0x1e] }
 0xa9b   :  { %v3762_v38 = vadd.f32 %v3758_v42, %v3750_v33  ;;  %v3798_v16 = vadd.f32 %v3794_v57, %v3786_v8  ;;  %v3948_v52 = vrot.slane %v3944_v61, 6  ;;  %v3818_v48 = vrot.slane %v3814_v34, 7  ;;  %v4142_v47 = vld [vmem:[#allocation6 + $0x60] sm:$0x1e] }
 0xa9c   :  { %v3888_v26 = vrot.slane %v3884_v46, 6  ;;  %v3826_v9 = vmul.f32 %v3824_v22, %v8366_v41  ;;  %v3998_v51 = vmul.f32 %v3996_v5, %v8327_v44  ;;  %v3144_v58 = vmul.f32 %v8466_v49, %v8287_v20  ;;  %v4138_v8 = vld [vmem:[#allocation6 + $0x60] sm:$0xf] }
 0xa9d   :  { %v3766_v63 = vrot.slane %v3762_v38, 4  ;;  %v3810_v24 = vadd.f32 %v3806_v54, %v3798_v16  ;;  %v3952_v31 = vadd.f32 %v3948_v52, %v8423_v62  ;;  %v3960_v12 = vrot.slane %v3956_v50, 7  ;;  %v4154_v54 = vld [vmem:[#allocation6 + $0x60] sm:$0x3c] }
 0xa9e   :  { %3892 = vst [vmem:[#allocation7 + $0x10] sm:$0xf0] %v3888_v26  ;;  %v3968_v18 = vmul.f32 %v3966_v39, %v8312_v11  ;;  %v4022_v60 = vmul.f32 %v4020_v35, %v8246_v1  ;;  %v4034_v37 = vmul.f32 %v4032_v7, %v8258_v2  ;;  %v4046_v17 = vmul.f32 %v4044_v28, %v8304_v43  ;;  %v4402_v38 = vld [vmem:[#allocation6 + $0x80] sm:$0xf0] }
 0xa9f   :  { %3770 = vst [vmem:[#allocation7 + $0x18] sm:$0xf] %v3766_v63  ;;  %v3822_v0 = vadd.f32 %v3818_v48, %v3810_v24  ;;  %v3964_v20 = vadd.f32 %v3960_v12, %v3952_v31  ;;  %v3978_v49 = vrot.slane %v3974_v56, 4  ;;  %v3990_v36 = vrot.slane %v3986_v6, 5  ;;  %v4438_v63 = vld [vmem:[%s9049_s4] sm:$0x3] }
 0xaa0   :  { %v4002_v42 = vrot.slane %v3998_v51, 6  ;;  %v4018_v62 = vmul.f32 %v4016_v59, %v8253_v21  ;;  %v4026_v57 = vrot.slane %v4022_v60, 1  ;;  %v4058_v34 = vmul.f32 %v4056_v23, %v8308_v14  ;;  %v9050_v12 = vld [vmem:[#allocation48_spill] sm:$0xff] }
 0xaa1   :  { %v3828_v32 = vadd.f32 %v3826_v9, %v3822_v0  ;;  %v3970_v46 = vadd.f32 %v3968_v18, %v3964_v20  ;;  %v4038_v33 = vrot.slane %v4034_v37, 2  ;;  %v4144_v22 = vmul.f32 %v4142_v47, %v8246_v1  ;;  %v9055_v47 = vld [vmem:[#allocation57_spill] sm:$0xff]  ;;  %v4389_v20 = vld [vmem:[#allocation6 + $0x88] sm:$0x78] }
 0xaa2   :  { %v4030_v61 = vadd.f32 %v4026_v57, %v4018_v62  ;;  %v4050_v5 = vrot.slane %v4046_v17, 6  ;;  %v3198_v50 = vrot.slane %v8485_v29, 5  ;;  %v3208_v39 = vrot.slane %v8485_v29, 3  ;;  %v4068_v29 = vld [vmem:[#allocation6 + $0x60] sm:$0x3c]  ;;  %v9054_v17 = vld [vmem:[#allocation60_spill] sm:$0xff] }
 0xaa3   :  { %v3851_v56 = vadd.f32 %v8420_v25, %v3828_v32  ;;  %v3982_v6 = vadd.f32 %v3978_v49, %v3970_v46  ;;  %v4148_v35 = vrot.slane %v4144_v22, 1  ;;  %v3217_v26 = vrot.slane %v8537_v53, 1  ;;  %v4403_v49 = vld [vmem:[#allocation6 + $0x88] sm:$0xf0]  ;;  %v9056_v57 = vld [vmem:[#allocation49_spill] sm:$0xff]  ;;  %v9057_v32 = vld [vmem:[#allocation55_spill] sm:$0xff] }
 0xaa4   :  { %v4042_v16 = vadd.f32 %v4038_v33, %v4030_v61  ;;  %v4140_v52 = vmul.f32 %v4138_v8, %v8253_v21  ;;  %3202 = vst [vmem:[#allocation6 + $0x58] sm:$0x78] %v3198_v50  ;;  %3212 = vst [vmem:[#allocation6 + $0x68] sm:$0x1e] %v3208_v39  ;;  %v3227_v7 = vrot.slane %v8537_v53, 7  ;;  %v3218_v28 = vrot.slane %v3144_v58, 1 }
 0xaa5   :  { %v3873_v48 = vadd.f32 %v8426_v30, %v3851_v56  ;;  %v3994_v9 = vadd.f32 %v3990_v36, %v3982_v6  ;;  %v4156_v25 = vmul.f32 %v4154_v54, %v8258_v2  ;;  %3221 = vst [vmem:[#allocation6 + $0x70] ss:$-12 sps:$4 sm:$0x87] %v3217_v26   ;;  %v3228_v51 = vrot.slane %v3144_v58, 7  ;;  %v9052_v53 = vld [vmem:[#allocation56_spill] sm:$0xff]  ;;  %v9058_v61 = vld [vmem:[#allocation62_spill] sm:$0xff] }
 0xaa6   :  { %v4054_v24 = vadd.f32 %v4050_v5, %v4042_v16  ;;  %v4062_v31 = vrot.slane %v4058_v34, 7  ;;  %3231 = vst [vmem:[#allocation6 + $0x80] ss:$-12 sps:$4 sm:$0xe1] %v3227_v7   ;;  %v8612_v23 = vmul.f32 %v4402_v38, %v8327_v44  ;;  %v9053_v18 = vrot.slane %v9052_v53, 6  ;;  %v4430_v54 = vld [vmem:[#allocation7] sm:$0xff] }
 0xaa7   :  { %3222 = vst [vmem:[#allocation6 + $0x78] ss:$-12 sps:$4 sm:$0x87] %v3218_v28   ;;  %v4006_v60 = vadd.f32 %v4002_v42, %v3994_v9  ;;  %v4152_v37 = vadd.f32 %v4148_v35, %v4140_v52  ;;  %v3941_v0 = vadd.f32 %v9055_v47, %v9054_v17  ;;  %3232 = vst [vmem:[#allocation6 + $0x88] ss:$-12 sps:$4 sm:$0xe1] %v3228_v51  }
 0xaa8   :  { %v3885_v30 = vadd.f32 %v9053_v18, %v3873_v48  ;;  %v4375_v58 = vld [vmem:[#allocation6 + $0x88] sm:$0x3c]  ;;  %v4066_v36 = vadd.f32 %v4062_v31, %v4054_v24  ;;  %v4070_v62 = vmul.f32 %v4068_v29, %v8312_v11  ;;  %v8621_v46 = vrot.slane %v4438_v63, %v9057_v32  ;;  %v4458_v33 = vld [vmem:[%s9051_s1] sm:$0x3]  ;;  %v4432_v50 = vld [vmem:[#allocation7 + $0x10] sm:$0xff] }
 0xaa9   :  { %v4010_v22 = vrot.slane %v4006_v60, 4  ;;  %v4160_v42 = vrot.slane %v4156_v25, 2  ;;  %v8625_v5 = vrot.slane %v4438_v63, %v9058_v61  ;;  %v8629_v56 = vmul.f32 %v4375_v58, %v8370_v10  ;;  %v4431_v26 = vld [vmem:[#allocation7 + $0x8] sm:$0xff] }
 0xaaa   :  { %v3889_v8 = vrot.slane %v3885_v30, 6  ;;  %v8632_v6 = vmul.f32 %v4389_v20, %v8374_v27  ;;  %v8635_v35 = vmul.f32 %v4403_v49, %v8378_v4  ;;  %v8637_v38 = vadd.f32 %v4070_v62, %v4066_v36 }
 0xaab   :  { %4014 = vst [vmem:[#allocation7 + $0x20] sm:$0xf] %v4010_v22  ;;  %v8639_v16 = vadd.f32 %v4160_v42, %v4152_v37  ;;  %v3943_v52 = vld [vmem:[#allocation6 + $0x58] sm:$0x3c]  ;;  %v8642_v48 = vrot.slane %v4458_v33, %v9057_v32  ;;  %v8645_v9 = vrot.slane %v4458_v33, %v9058_v61  ;;  %v3973_v51 = vld [vmem:[#allocation6 + $0x68] sm:$0xf]  ;;  %v8650_v31 = vmul.f32 %v8621_v46, %v4430_v54 }
 0xaac   :  { %9059 = vst [vmem:[#allocation61_spill] sm:$0xff] %v8632_v6  ;;  %9060 = vst [vmem:[#allocation50_spill] sm:$0xff] %v8635_v35  ;;  %v3955_v7 = vld [vmem:[#allocation6 + $0x58] sm:$0x78]  ;;  %v3945_v29 = vmul.f32 %v3943_v52, %v8348_v45  ;;  %v3985_v63 = vld [vmem:[#allocation6 + $0x68] sm:$0x1e]  ;;  %v8653_v53 = vmul.f32 %v8621_v46, %v4432_v50  ;;  %v3975_v18 = vmul.f32 %v3973_v51, %v8370_v10 }
 0xaad   :  { %3893 = vst [vmem:[#allocation7 + $0x18] sm:$0xf0] %v3889_v8  ;;  %v3967_v28 = vld [vmem:[#allocation6 + $0x58] sm:$0xf0]  ;;  %v3957_v25 = vmul.f32 %v3955_v7, %v8362_v40  ;;  %v3997_v24 = vld [vmem:[#allocation6 + $0x68] sm:$0x3c]  ;;  %v3987_v30 = vmul.f32 %v3985_v63, %v8374_v27  ;;  %v8661_v58 = vmul.f32 %v8625_v5, %v4431_v26 }
 0xaae   :  { %v8658_v60 = vmul.f32 %v3997_v24, %v8378_v4  ;;  %v4017_v37 = vld [vmem:[#allocation6 + $0x58] sm:$0x3c]  ;;  %v3949_v20 = vrot.slane %v3945_v29, 6  ;;  %v3969_v36 = vmul.f32 %v3967_v28, %v8366_v41  ;;  %v4045_v33 = vld [vmem:[#allocation6 + $0x68] sm:$0xf]  ;;  %v3979_v22 = vrot.slane %v3975_v18, 4 }
 0xaaf   :  { %v4021_v17 = vld [vmem:[#allocation6 + $0x58] sm:$0x78]  ;;  %v3961_v49 = vrot.slane %v3957_v25, 7  ;;  %v4057_v8 = vld [vmem:[#allocation6 + $0x68] sm:$0x1e]  ;;  %v3991_v42 = vrot.slane %v3987_v30, 5  ;;  %v4019_v54 = vmul.f32 %v4017_v37, %v8299_v19  ;;  %v4047_v51 = vmul.f32 %v4045_v33, %v8348_v45 }
 0xab0   :  { %v4033_v47 = vld [vmem:[#allocation6 + $0x58] sm:$0xf0]  ;;  %v4023_v62 = vmul.f32 %v4021_v17, %v8271_v13  ;;  %v3953_v52 = vadd.f32 %v3949_v20, %v3941_v0  ;;  %v4059_v26 = vmul.f32 %v4057_v8, %v8362_v40  ;;  %v4139_v29 = vld [vmem:[#allocation6 + $0x68] sm:$0xf]  ;;  %v4003_v28 = vrot.slane %v8658_v60, 6 }
 0xab1   :  { %v4035_v50 = vmul.f32 %v4033_v47, %v8319_v3  ;;  %v4143_v25 = vld [vmem:[#allocation6 + $0x68] sm:$0x1e]  ;;  %v4141_v24 = vmul.f32 %v4139_v29, %v8299_v19  ;;  %v4074_v17 = vld [vmem:[#allocation6 + $0x60] sm:$0xc0]  ;;  %v4051_v47 = vrot.slane %v4047_v51, 6 }
 0xab2   :  { %v4027_v7 = vrot.slane %v4023_v62, 1  ;;  %v4145_v18 = vmul.f32 %v4143_v25, %v8271_v13  ;;  %v4155_v30 = vld [vmem:[#allocation6 + $0x68] sm:$0x3c]  ;;  %v3965_v37 = vadd.f32 %v3961_v49, %v3953_v52  ;;  %v4063_v0 = vrot.slane %v4059_v26, 7  ;;  %v4076_v20 = vld [vmem:[#allocation6 + $0x70] sm:$0x3] }
 0xab3   :  { %v4039_v63 = vrot.slane %v4035_v50, 2  ;;  %v4096_v62 = vld [vmem:[#allocation6 + $0x60] sm:$0x80]  ;;  %v4157_v8 = vmul.f32 %v4155_v30, %v8319_v3  ;;  %v4078_v34 = vmul.f32 %v4074_v17, %v8316_v15  ;;  %v4080_v60 = vmul.f32 %v4076_v20, %v8316_v15  ;;  %v4098_v50 = vld [vmem:[#allocation6 + $0x70] sm:$0x7] }
 0xab4   :  { %v4031_v39 = vadd.f32 %v4027_v7, %v4019_v54  ;;  %v4149_v33 = vrot.slane %v4145_v18, 1  ;;  %v3971_v59 = vadd.f32 %v3969_v36, %v3965_v37  ;;  %v4069_v61 = vld [vmem:[#allocation6 + $0x68] sm:$0x3c]  ;;  %v4100_v25 = vmul.f32 %v4096_v62, %v8323_v55  ;;  %v4118_v54 = vld [vmem:[#allocation6 + $0x70] sm:$0xf] }
 0xab5   :  { %v4102_v49 = vmul.f32 %v4098_v50, %v8323_v55  ;;  %v4166_v52 = vld [vmem:[#allocation6 + $0x60] sm:$0xc0]  ;;  %v4161_v51 = vrot.slane %v4157_v8, 2  ;;  %v4086_v26 = vrot.slane %v4078_v34, 4  ;;  %v4087_v18 = vrot.slane %v4080_v60, 4 }
 0xab6   :  { %v4043_v29 = vadd.f32 %v4039_v63, %v4031_v39  ;;  %v4153_v7 = vadd.f32 %v4149_v33, %v4141_v24  ;;  %v3983_v32 = vadd.f32 %v3979_v22, %v3971_v59  ;;  %v4108_v35 = vrot.slane %v4100_v25, 5  ;;  %v4168_v6 = vld [vmem:[#allocation6 + $0x70] sm:$0x3]  ;;  %v4188_v20 = vld [vmem:[#allocation6 + $0x60] sm:$0x80] }
 0xab7   :  { %v4109_v17 = vrot.slane %v4102_v49, 5  ;;  %v4071_v36 = vmul.f32 %v4069_v61, %v8366_v41  ;;  %v4088_v39 = vsel %vm3841_vm3, %v4086_v26, %v4087_v18  ;;  %v4120_v63 = vmul.f32 %v4118_v54, %v8327_v44  ;;  %v4190_v62 = vld [vmem:[#allocation6 + $0x70] sm:$0x7]  ;;  %v4216_v34 = vld [vmem:[#allocation6 + $0x70] sm:$0xf0] }
 0xab8   :  { %v4055_v30 = vadd.f32 %v4051_v47, %v4043_v29  ;;  %v4170_v37 = vmul.f32 %v4166_v52, %v8304_v43  ;;  %v3995_v50 = vadd.f32 %v3991_v42, %v3983_v32  ;;  %v8681_v33 = vadd.f32 %v4161_v51, %v4153_v7  ;;  %v4210_v60 = vld [vmem:[#allocation6 + $0x70] sm:$0xf]  ;;  %v4228_v29 = vld [vmem:[#allocation6 + $0x70] sm:$0xe0]  ;;  %v4230_v42 = vld [vmem:[#allocation6 + $0x80] sm:$0x1] }
 0xab9   :  { %v4094_v59 = vadd.f32 %v4088_v39, %v8637_v38  ;;  %v4110_v22 = vsel %vm3456_vm5, %v4108_v35, %v4109_v17  ;;  %v4172_v47 = vmul.f32 %v4168_v6, %v8304_v43  ;;  %v4192_v61 = vmul.f32 %v4188_v20, %v8308_v14  ;;  %v4274_v17 = vld [vmem:[#allocation6 + $0x60] sm:$0xc0] }
 0xaba   :  { %v4067_v24 = vadd.f32 %v4063_v0, %v4055_v30  ;;  %v4178_v8 = vrot.slane %v4170_v37, 6  ;;  %v4007_v25 = vadd.f32 %v4003_v28, %v3995_v50  ;;  %v4124_v54 = vrot.slane %v4120_v63, 6  ;;  %v4250_v0 = vld [vmem:[#allocation6 + $0x70] sm:$0xc0]  ;;  %v4252_v30 = vld [vmem:[#allocation6 + $0x80] sm:$0x3] }
 0xabb   :  { %v4116_v49 = vadd.f32 %v4110_v22, %v4094_v59  ;;  %v4194_v32 = vmul.f32 %v4190_v62, %v8308_v14  ;;  %v4179_v38 = vrot.slane %v4172_v47, 6  ;;  %v4200_v7 = vrot.slane %v4192_v61, 7  ;;  %v4276_v63 = vld [vmem:[#allocation6 + $0x70] sm:$0x3]  ;;  %v4282_v37 = vld [vmem:[#allocation6 + $0x60] sm:$0x80] }
 0xabc   :  { %v8688_v52 = vadd.f32 %v4071_v36, %v4067_v24  ;;  %v4218_v35 = vmul.f32 %v4216_v34, %v8316_v15  ;;  %v4011_v51 = vrot.slane %v4007_v25, 4  ;;  %v4232_v18 = vmul.f32 %v4228_v29, %v8323_v55  ;;  %v4284_v62 = vld [vmem:[#allocation6 + $0x70] sm:$0x7]  ;;  %v4322_v22 = vld [vmem:[#allocation6 + $0x70] sm:$0xf0] }
 0xabd   :  { %v4128_v6 = vadd.f32 %v4124_v54, %v4116_v49  ;;  %v4201_v26 = vrot.slane %v4194_v32, 7  ;;  %v4180_v28 = vsel %vm3393_vm6, %v4178_v8, %v4179_v38  ;;  %v4212_v20 = vmul.f32 %v4210_v60, %v8312_v11  ;;  %v4308_v34 = vld [vmem:[#allocation6 + $0x70] sm:$0xf] }
 0xabe   :  { %v4234_v39 = vmul.f32 %v4230_v42, %v8323_v55  ;;  %v4254_v36 = vmul.f32 %v4250_v0, %v8327_v44  ;;  %4015 = vst [vmem:[#allocation7 + $0x28] sm:$0xf] %v4011_v51  ;;  %v4186_v50 = vadd.f32 %v4180_v28, %v8639_v16  ;;  %v4222_v59 = vrot.slane %v4218_v35, 4  ;;  %v4336_v55 = vld [vmem:[#allocation6 + $0x70] sm:$0xe0] }
 0xabf   :  { %v4132_v15 = vrot.slane %v4128_v6, 6  ;;  %v4202_v24 = vsel %vm1303_vm1, %v4200_v7, %v4201_v26  ;;  %v4240_v47 = vrot.slane %v4232_v18, 5  ;;  %v4256_v61 = vmul.f32 %v4252_v30, %v8327_v44  ;;  %v4338_v16 = vld [vmem:[#allocation6 + $0x80] sm:$0x1]  ;;  %v4077_v28 = vld [vmem:[#allocation6 + $0x78] sm:$0x3] }
 0xac0   :  { %v4241_v8 = vrot.slane %v4234_v39, 5  ;;  %v4262_v60 = vrot.slane %v4254_v36, 6  ;;  %v4208_v29 = vadd.f32 %v4202_v24, %v4186_v50  ;;  %v4278_v25 = vmul.f32 %v4274_v17, %v8253_v21  ;;  %v4364_v6 = vld [vmem:[#allocation6 + $0x80] sm:$0x3]  ;;  %v4075_v17 = vld [vmem:[#allocation6 + $0x68] sm:$0xc0] }
 0xac1   :  { %4136 = vst [vmem:[#allocation7 + $0x20] sm:$0xf0] %v4132_v15  ;;  %v4286_v49 = vmul.f32 %v4282_v37, %v8246_v1  ;;  %v4288_v54 = vmul.f32 %v4284_v62, %v8246_v1  ;;  %v4263_v32 = vrot.slane %v4256_v61, 6  ;;  %v4280_v42 = vmul.f32 %v4276_v63, %v8253_v21  ;;  %v4099_v36 = vld [vmem:[#allocation6 + $0x78] sm:$0x7] }
 0xac2   :  { %v4310_v0 = vmul.f32 %v4308_v34, %v8258_v2  ;;  %v4324_v38 = vmul.f32 %v4322_v22, %v8304_v43  ;;  %v4214_v7 = vadd.f32 %v4212_v20, %v4208_v29  ;;  %v4340_v51 = vmul.f32 %v4336_v55, %v8308_v14  ;;  %v4097_v20 = vld [vmem:[#allocation6 + $0x68] sm:$0x80]  ;;  %v4119_v22 = vld [vmem:[#allocation6 + $0x78] sm:$0xf] }
 0xac3   :  { %v4294_v44 = vrot.slane %v4286_v49, 1  ;;  %v4295_v35 = vrot.slane %v4288_v54, 1  ;;  %v4242_v26 = vsel %vm3456_vm5, %v4240_v47, %v4241_v8  ;;  %v4264_v18 = vsel %vm3393_vm6, %v4262_v60, %v4263_v32  ;;  %v4167_v60 = vld [vmem:[#allocation6 + $0x68] sm:$0xc0]  ;;  %v4169_v55 = vld [vmem:[#allocation6 + $0x78] sm:$0x3] }
 0xac4   :  { %v4314_v30 = vrot.slane %v4310_v0, 2  ;;  %v4342_v1 = vmul.f32 %v4338_v16, %v8308_v14  ;;  %v4226_v21 = vadd.f32 %v4222_v59, %v4214_v7  ;;  %v4348_v43 = vrot.slane %v4340_v51, 7  ;;  %v4362_v49 = vld [vmem:[#allocation6 + $0x70] sm:$0xc0]  ;;  %v4189_v7 = vld [vmem:[#allocation6 + $0x68] sm:$0x80] }
 0xac5   :  { %v4296_v2 = vsel %vm3511_vm2, %v4294_v44, %v4295_v35  ;;  %v4306_v39 = vadd.f32 %v4295_v35, %v4280_v42  ;;  %v4328_v37 = vrot.slane %v4324_v38, 6  ;;  %v4368_v15 = vmul.f32 %v4364_v6, %v8312_v11 }
 0xac6   :  { %v4304_v63 = vadd.f32 %v4296_v2, %v4278_v25  ;;  %v4350_v62 = vrot.slane %v4342_v1, 7  ;;  %v4248_v50 = vadd.f32 %v4242_v26, %v4226_v21  ;;  %v4079_v34 = vmul.f32 %v4075_v17, %v8370_v10  ;;  %v4191_v26 = vld [vmem:[#allocation6 + $0x78] sm:$0x7] }
 0xac7   :  { %v4320_v24 = vadd.f32 %v4314_v30, %v4306_v39  ;;  %v4081_v14 = vmul.f32 %v4077_v28, %v8370_v10  ;;  %v4101_v8 = vmul.f32 %v4097_v20, %v8374_v27  ;;  %v4103_v61 = vmul.f32 %v4099_v36, %v8374_v27  ;;  %v4217_v28 = vld [vmem:[#allocation6 + $0x78] sm:$0xf0]  ;;  %v4211_v36 = vld [vmem:[#allocation6 + $0x78] sm:$0xf] }
 0xac8   :  { %v4318_v47 = vadd.f32 %v4314_v30, %v4304_v63  ;;  %v4351_v59 = vsel %vm1303_vm1, %v4348_v43, %v4350_v62  ;;  %v4270_v29 = vadd.f32 %v4264_v18, %v4248_v50  ;;  %v4089_v54 = vrot.slane %v4079_v34, 4 }
 0xac9   :  { %v4334_v25 = vadd.f32 %v4328_v37, %v4320_v24  ;;  %v4090_v16 = vrot.slane %v4081_v14, 4  ;;  %v4111_v42 = vrot.slane %v4101_v8, 5  ;;  %v4112_v0 = vrot.slane %v4103_v61, 5  ;;  %v4229_v24 = vld [vmem:[#allocation6 + $0x78] sm:$0xe0] }
 0xaca   :  { %v4332_v32 = vadd.f32 %v4328_v37, %v4318_v47  ;;  %v4121_v38 = vmul.f32 %v4119_v22, %v8378_v4  ;;  %4272 = vst [vmem:[#allocation7 + $0x30] sm:$0xf] %v4270_v29  ;;  %v4171_v51 = vmul.f32 %v4167_v60, %v8348_v45  ;;  %v4173_v6 = vmul.f32 %v4169_v55, %v8348_v45  ;;  %v4251_v22 = vld [vmem:[#allocation6 + $0x78] sm:$0xc0] }
 0xacb   :  { %v4360_v44 = vadd.f32 %v4351_v59, %v4334_v25  ;;  %v4091_v35 = vsel %vm3841_vm3, %v4089_v54, %v4090_v16  ;;  %v4366_v30 = vmul.f32 %v4362_v49, %v8312_v11  ;;  %v4113_v17 = vsel %vm3456_vm5, %v4111_v42, %v4112_v0  ;;  %v4253_v16 = vld [vmem:[#allocation6 + $0x88] sm:$0x3] }
 0xacc   :  { %v4358_v18 = vadd.f32 %v4348_v43, %v4332_v32  ;;  %v4095_v1 = vadd.f32 %v4091_v35, %v8688_v52  ;;  %v4181_v2 = vrot.slane %v4171_v51, 6  ;;  %v4182_v39 = vrot.slane %v4173_v6, 6  ;;  %v4231_v43 = vld [vmem:[#allocation6 + $0x88] sm:$0x1]  ;;  %v4283_v6 = vld [vmem:[#allocation6 + $0x68] sm:$0x80] }
 0xacd   :  { %v4372_v21 = vadd.f32 %v4368_v15, %v4360_v44  ;;  %v4193_v20 = vmul.f32 %v4189_v7, %v8362_v40  ;;  %v4125_v62 = vrot.slane %v4121_v38, 6  ;;  %v4195_v50 = vmul.f32 %v4191_v26, %v8362_v40  ;;  %v4285_v26 = vld [vmem:[#allocation6 + $0x78] sm:$0x7] }
 0xace   :  { %v4370_v63 = vadd.f32 %v4366_v30, %v4358_v18  ;;  %v4117_v37 = vadd.f32 %v4113_v17, %v4095_v1  ;;  %v9061_v11 = vrot.slane %v9050_v12, 4  ;;  %v4183_v52 = vsel %vm3393_vm6, %v4181_v2, %v4182_v39  ;;  %v4309_v1 = vld [vmem:[#allocation6 + $0x78] sm:$0xf]  ;;  %v4337_v17 = vld [vmem:[#allocation6 + $0x78] sm:$0xe0] }
 0xacf   :  { %v4203_v14 = vrot.slane %v4193_v20, 7  ;;  %v4219_v15 = vmul.f32 %v4217_v28, %v8370_v10  ;;  %v4187_v61 = vadd.f32 %v4183_v52, %v8681_v33  ;;  %v4204_v60 = vrot.slane %v4195_v50, 7  ;;  %v4277_v33 = vld [vmem:[#allocation6 + $0x78] sm:$0x3] }
 0xad0   :  { %v4386_v34 = vadd.f32 %v9061_v11, %v4372_v21  ;;  %v9062_v47 = vmov %v9061_v11  ;;  %v4129_v8 = vadd.f32 %v4125_v62, %v4117_v37  ;;  %v9063_v55 = vrot.slane %v9056_v57, 5 }
 0xad1   :  { %v4384_v59 = vadd.f32 %v9062_v47, %v4370_v63  ;;  %v4213_v25 = vmul.f32 %v4211_v36, %v8366_v41  ;;  %v4233_v49 = vmul.f32 %v4229_v24, %v8374_v27  ;;  %v4235_v54 = vmul.f32 %v4231_v43, %v8374_v27  ;;  %v4323_v36 = vld [vmem:[#allocation6 + $0x78] sm:$0xf0] }
 0xad2   :  { %v4400_v29 = vadd.f32 %v9063_v55, %v4386_v34  ;;  %v9064_v10 = vmov %v9063_v55  ;;  %v4133_v42 = vrot.slane %v4129_v8, 6  ;;  %v4205_v12 = vsel %vm1303_vm1, %v4203_v14, %v4204_v60  ;;  %v4433_v8 = vld [vmem:[#allocation7 + $0x18] sm:$0xff] }
 0xad3   :  { %v4398_v32 = vadd.f32 %v9064_v10, %v4384_v59  ;;  %v4255_v0 = vmul.f32 %v4251_v22, %v8378_v4  ;;  %v9065_v38 = vrot.slane %v8612_v23, 6  ;;  %v4209_v44 = vadd.f32 %v4205_v12, %v4187_v61  ;;  %v4275_v23 = vld [vmem:[#allocation6 + $0x68] sm:$0xc0]  ;;  %v4365_v12 = vld [vmem:[#allocation6 + $0x88] sm:$0x3] }
 0xad4   :  { %v4243_v35 = vrot.slane %v4233_v49, 5  ;;  %v4244_v51 = vrot.slane %v4235_v54, 5  ;;  %4137 = vst [vmem:[#allocation7 + $0x28] sm:$0xf0] %v4133_v42  ;;  %v4223_v57 = vrot.slane %v4219_v15, 4  ;;  %v4257_v30 = vmul.f32 %v4253_v16, %v8378_v4 }
 0xad5   :  { %v4414_v7 = vadd.f32 %v9065_v38, %v4400_v29  ;;  %v9066_v27 = vmov %v9065_v38  ;;  %v8748_v28 = vadd.f32 %v8645_v9, %v8661_v58  ;;  %v4215_v2 = vadd.f32 %v4213_v25, %v4209_v44  ;;  %v4339_v4 = vld [vmem:[#allocation6 + $0x88] sm:$0x1]  ;;  %v4434_v29 = vld [vmem:[#allocation7 + $0x20] sm:$0xff]  ;;  %v4363_v42 = vld [vmem:[#allocation6 + $0x78] sm:$0xc0] }
 0xad6   :  { %v4412_v18 = vadd.f32 %v9066_v27, %v4398_v32  ;;  %v4245_v39 = vsel %vm3456_vm5, %v4243_v35, %v4244_v51  ;;  %v4265_v20 = vrot.slane %v4255_v0, 6  ;;  %v4266_v37 = vrot.slane %v4257_v30, 6 }
 0xad7   :  { %v4421_v21 = vrot.slane %v4414_v7, 2  ;;  %v4287_v62 = vmul.f32 %v4283_v6, %v8271_v13  ;;  %v4289_v50 = vmul.f32 %v4285_v26, %v8271_v13  ;;  %v4227_v24 = vadd.f32 %v4223_v57, %v4215_v2 }
 0xad8   :  { %v4420_v63 = vrot.slane %v4412_v18, 2  ;;  %v4281_v43 = vmul.f32 %v4277_v33, %v8299_v19  ;;  %v4311_v58 = vmul.f32 %v4309_v1, %v8319_v3  ;;  %v4341_v11 = vmul.f32 %v4337_v17, %v8362_v40 }
 0xad9   :  { %v4297_v52 = vrot.slane %v4287_v62, 1  ;;  %v4298_v14 = vrot.slane %v4289_v50, 1  ;;  %v4325_v15 = vmul.f32 %v4323_v36, %v8348_v45  ;;  %v4249_v22 = vadd.f32 %v4245_v39, %v4227_v24  ;;  %v9067_v36 = vld [vmem:[#allocation61_spill] sm:$0xff]  ;;  %v9068_v24 = vld [vmem:[#allocation50_spill] sm:$0xff] }
 0xada   :  { %v4422_v34 = vsel %vm3638_vm4, %v4420_v63, %v4421_v21  ;;  %v4267_v47 = vsel %vm3393_vm6, %v4265_v20, %v4266_v37  ;;  %v4279_v13 = vmul.f32 %v4275_v23, %v8299_v19  ;;  %v4343_v59 = vmul.f32 %v4339_v4, %v8362_v40 }
 0xadb   :  { %4428 = vst [vmem:[#allocation7 + $0x30] sm:$0xf0] %v4422_v34  ;;  %v4299_v61 = vsel %vm3511_vm2, %v4297_v52, %v4298_v14  ;;  %v4307_v3 = vadd.f32 %v4298_v14, %v4281_v43  ;;  %v4315_v60 = vrot.slane %v4311_v58, 2  ;;  %v4349_v55 = vrot.slane %v4341_v11, 7  ;;  %v4435_v6 = vld [vmem:[#allocation7 + $0x28] sm:$0xff] }
 0xadc   :  { %v4271_v25 = vadd.f32 %v4267_v47, %v4249_v22  ;;  %v4305_v49 = vadd.f32 %v4299_v61, %v4279_v13  ;;  %v4352_v54 = vrot.slane %v4343_v59, 7  ;;  %v8764_v45 = vadd.f32 %v8642_v48, %v8650_v31 }
 0xadd   :  { %v4321_v16 = vadd.f32 %v4315_v60, %v4307_v3  ;;  %v4329_v10 = vrot.slane %v4325_v15, 6  ;;  %v4453_v19 = vmul.f32 %v8625_v5, %v4433_v8  ;;  %v4479_v40 = vsub.f32 0.0, %v8748_v28 }
 0xade   :  { %4273 = vst [vmem:[#allocation7 + $0x38] sm:$0xf] %v4271_v25  ;;  %v4319_v32 = vadd.f32 %v4315_v60, %v4305_v49  ;;  %v4381_v0 = vrot.slane %v8629_v56, 4  ;;  %v4454_v33 = vmul.f32 %v8621_v46, %v4434_v29  ;;  %v8772_v38 = vadd.f32 %v8642_v48, %v8653_v53 }
 0xadf   :  { %v4335_v31 = vadd.f32 %v4329_v10, %v4321_v16  ;;  %v4353_v7 = vsel %vm1303_vm1, %v4349_v55, %v4352_v54  ;;  %v8776_v44 = vadd.f32 %v8645_v9, %v4453_v19  ;;  %v4488_v35 = vmul.f32 1.442695, %v4479_v40 }
 0xae0   :  { %v4333_v51 = vadd.f32 %v4329_v10, %v4319_v32  ;;  %v8779_v26 = vadd.f32 %v8642_v48, %v4454_v33  ;;  %v4478_v56 = vsub.f32 0.0, %v8764_v45  ;;  %v4480_v27 = vsub.f32 0.0, %v8772_v38 }
 0xae1   :  { %v4361_v18 = vadd.f32 %v4353_v7, %v4335_v31  ;;  %v4367_v53 = vmul.f32 %v4363_v42, %v8366_v41  ;;  %v4369_v57 = vmul.f32 %v4365_v12, %v8366_v41  ;;  %v4481_v30 = vsub.f32 0.0, %v8776_v44 }
 0xae2   :  { %v4436_v1 = vld [vmem:[#allocation7 + $0x30] sm:$0xff]  ;;  %v4359_v17 = vadd.f32 %v4349_v55, %v4333_v51  ;;  %v4482_v2 = vsub.f32 0.0, %v8779_v26  ;;  %v4486_v39 = vmul.f32 1.442695, %v4478_v56  ;;  %v4395_v63 = vrot.slane %v9067_v36, 5 }
 0xae3   :  { %v4456_v21 = vmul.f32 %v8621_v46, %v4436_v1  ;;  %v4373_v20 = vadd.f32 %v4369_v57, %v4361_v18  ;;  %v4455_v37 = vmul.f32 %v8625_v5, %v4435_v6  ;;  %v4490_v23 = vmul.f32 1.442695, %v4480_v27 }
 0xae4   :  { %v4371_v62 = vadd.f32 %v4367_v53, %v4359_v17  ;;  %6552 = vpow2.f32 %v4488_v35  ;;  %v4494_v41 = vmul.f32 1.442695, %v4482_v2  ;;  %v4409_v43 = vrot.slane %v9068_v24, 6 }
 0xae5   :  { %v4476_v50 = vadd.f32 %v8642_v48, %v4456_v21  ;;  %v4387_v4 = vadd.f32 %v4381_v0, %v4373_v20  ;;  %v4492_v58 = vmul.f32 1.442695, %v4481_v30  ;;  %6554 = vpow2.f32 %v4486_v39 }
 0xae6   :  { %v4385_v46 = vadd.f32 %v4381_v0, %v4371_v62  ;;  %6556 = vpow2.f32 %v4490_v23  ;;  %v8793_v14 = vadd.f32 %v8645_v9, %v4455_v37 }
 0xae7   :  { %v4484_v11 = vsub.f32 0.0, %v4476_v50  ;;  %v4401_v34 = vadd.f32 %v4395_v63, %v4387_v4  ;;  %6558 = vpow2.f32 %v4494_v41 }
 0xae8   :  { %v4399_v52 = vadd.f32 %v4395_v63, %v4385_v46  ;;  %6560 = vpow2.f32 %v4492_v58  ;;  %v4483_v59 = vsub.f32 0.0, %v8793_v14 }
 0xae9   :  { %v4498_v15 = vmul.f32 1.442695, %v4484_v11  ;;  %v4415_v22 = vadd.f32 %v4409_v43, %v4401_v34 }
 0xaea   :  { %v4413_v47 = vadd.f32 %v4409_v43, %v4399_v52  ;;  %v4496_v60 = vmul.f32 1.442695, %v4483_v59 }
 0xaeb   :  { %6562 = vpow2.f32 %v4498_v15  ;;  %v4424_v48 = vrot.slane %v4415_v22, 2 }
 0xaec   :  { %v4423_v13 = vrot.slane %v4413_v47, 2  ;;  %6564 = vpow2.f32 %v4496_v60 }
 0xaee   :  { %v6553_v8 = vpop.eup %6552  ;;  %v4425_v61 = vsel %vm3638_vm4, %v4423_v13, %v4424_v48 }
 0xaef   :  { %v6555_v3 = vpop.eup %6554  ;;  %4429 = vst [vmem:[#allocation7 + $0x38] sm:$0xf0] %v4425_v61  ;;  %v4503_v29 = vadd.f32 1.0, %v6553_v8 }
 0xaf0   :  { %v6557_v55 = vpop.eup %6556  ;;  %v4502_v49 = vadd.f32 1.0, %v6555_v3 }
 0xaf1   :  { %v6559_v25 = vpop.eup %6558  ;;  %v4504_v10 = vadd.f32 1.0, %v6557_v55  ;;  %6566 = vrcp.f32 %v4503_v29 }
 0xaf2   :  { %v6561_v54 = vpop.eup %6560  ;;  %v4506_v19 = vadd.f32 1.0, %v6559_v25  ;;  %6568 = vrcp.f32 %v4502_v49 }
 0xaf3   :  { %v4505_v42 = vadd.f32 1.0, %v6561_v54 }
 0xaf5   :  { %v6563_v16 = vpop.eup %6562 }
 0xaf6   :  { %v4508_v40 = vadd.f32 1.0, %v6563_v16  ;;  %v4437_v32 = vld [vmem:[#allocation7 + $0x38] sm:$0xff]  ;;  %v6565_v7 = vpop.eup %6564 }
 0xaf7   :  { %v4457_v12 = vmul.f32 %v8625_v5, %v4437_v32  ;;  %v4507_v57 = vadd.f32 1.0, %v6565_v7  ;;  %v6245_v32 = vld [vmem:[%s9069_s2 + $0x14] ss:$8 sps:$4 sm:$0xff]   ;;  %v6254_v7 = vld [vmem:[%s9069_s2 + $0x44] ss:$8 sps:$4 sm:$0xff]  }
 0xaf8   :  { %6570 = vrcp.f32 %v4508_v40  ;;  %v6240_v40 = vld [vmem:[%s9069_s2] ss:$8 sps:$4 sm:$0xff]  }
 0xaf9   :  { %6572 = vrcp.f32 %v4504_v10  ;;  %v4477_v0 = vadd.f32 %v8645_v9, %v4457_v12  ;;  %v6248_v12 = vld [vmem:[%s9069_s2 + $0x24] ss:$8 sps:$4 sm:$0xff]  }
 0xafa   :  { %6574 = vrcp.f32 %v4506_v19  ;;  %v6242_v19 = vld [vmem:[%s9069_s2 + $0x4] ss:$8 sps:$4 sm:$0xff]  }
 0xafb   :  { %6576 = vrcp.f32 %v4505_v42  ;;  %v4485_v33 = vsub.f32 0.0, %v4477_v0  ;;  %v6567_v35 = vpop.eup %6566  ;;  %4852 = vmatprep.subr.bf16.mxu0 %v6242_v19  ;;  %v6243_v42 = vld [vmem:[%s9069_s2 + $0x10] ss:$8 sps:$4 sm:$0xff]  }
 0xafc   :  { %v6569_v51 = vpop.eup %6568  ;;  %v8811_v1 = vmul.f32 %v6567_v35, %v8748_v28  ;;  %4853 = vmatpush1.bf16.msra.mxu0 %v6240_v40  ;;  %v6252_v35 = vld [vmem:[%s9069_s2 + $0x40] ss:$8 sps:$4 sm:$0xff]  }
 0xafd   :  { %v4500_v31 = vmul.f32 1.442695, %v4485_v33  ;;  %v8802_v5 = vmul.f32 %v6569_v51, %v8764_v45  ;;  %4854 = vmatprep.subr.bf16.mxu0 %v6245_v32  ;;  %v6251_v33 = vld [vmem:[%s9069_s2 + $0x34] ss:$8 sps:$4 sm:$0xff]  }
 0xafe   :  { %v6257_v51 = vld [vmem:[%s9069_s2 + $0x54] ss:$8 sps:$4 sm:$0xff]  }
 0xaff   :  { %6578 = vpow2.f32 %v4500_v31  ;;  %v6249_v31 = vld [vmem:[%s9069_s2 + $0x30] ss:$8 sps:$4 sm:$0xff]  }
 0xb00   :  { %6580 = vrcp.f32 %v4507_v57  ;;  %4855 = vmatpush1.bf16.msra.mxu0 %v6243_v42  ;;  %v6263_v57 = vld [vmem:[%s9069_s2 + $0x74] ss:$8 sps:$4 sm:$0xff]  }
 0xb01   :  { %4856 = vmatprep.subr.bf16.mxu0 %v6248_v12 }
 0xb02   :  { %v6571_v6 = vpop.eup %6570 }
 0xb03   :  { %v6573_v56 = vpop.eup %6572  ;;  %v8799_v53 = vmul.f32 %v6571_v6, %v4476_v50  ;;  %v6255_v6 = vld [vmem:[%s9069_s2 + $0x50] ss:$8 sps:$4 sm:$0xff]  }
 0xb04   :  { %v6575_v27 = vpop.eup %6574  ;;  %v8805_v9 = vmul.f32 %v6573_v56, %v8772_v38  ;;  %v6260_v56 = vld [vmem:[%s9069_s2 + $0x64] ss:$8 sps:$4 sm:$0xff]  }
 0xb05   :  { %v6577_v18 = vpop.eup %6576  ;;  %v8808_v30 = vmul.f32 %v6575_v27, %v8779_v26  ;;  %v6258_v27 = vld [vmem:[%s9069_s2 + $0x60] ss:$8 sps:$4 sm:$0xff]  }
 0xb06   :  { %v8814_v17 = vmul.f32 %v6577_v18, %v8776_v44  ;;  %v4526_v45 = vadd.f32 %v8805_v9, %v8802_v5  ;;  %v6261_v18 = vld [vmem:[%s9069_s2 + $0x70] ss:$8 sps:$4 sm:$0xff]  }
 0xb07   :  { %v4542_v21 = vadd.f32 %v8799_v53, %v8808_v30 }
 0xb08   :  { %v4533_v38 = vadd.f32 %v8814_v17, %v8811_v1  ;;  %v4527_v20 = vrot.slane %v4526_v45, 4 }
 0xb09   :  { %v6579_v2 = vpop.eup %6578  ;;  %v4543_v26 = vrot.slane %v4542_v21, 4 }
 0xb0a   :  { %v4509_v39 = vadd.f32 1.0, %v6579_v2  ;;  %v4534_v28 = vrot.slane %v4533_v38, 4  ;;  %v4528_v63 = vadd.f32 %v4527_v20, %v4526_v45  ;;  %v6581_v37 = vpop.eup %6580  ;;  %v5607_v2 = vld [vmem:[%s9070_s7] ss:$0 sm:$0xff] }
 0xb0b   :  { %v4544_v36 = vadd.f32 %v4543_v26, %v4542_v21  ;;  %v8823_v41 = vmul.f32 %v6581_v37, %v8793_v14 }
 0xb0c   :  { %6582 = vrcp.f32 %v4509_v39  ;;  %v4535_v44 = vadd.f32 %v4534_v28, %v4533_v38  ;;  %v4529_v50 = vrot.slane %v4528_v63, 2 }
 0xb0d   :  { %v4545_v23 = vrot.slane %v4544_v36, 2 }
 0xb0e   :  { %v4536_v24 = vrot.slane %v4535_v44, 2  ;;  %v4530_v46 = vadd.f32 %v4529_v50, %v4528_v63  ;;  %v6264_v50 = vld [vmem:[%s9071_s10 + $0x40] sm:$0xff]  }
 0xb0f   :  { %v4546_v43 = vadd.f32 %v4545_v23, %v4544_v36  ;;  %5793 = vmatprep.subr.bf16.mxu1 %v6264_v50  ;;  %v5656_v50 = vld [vmem:[%s9076_s15] ss:$0 sm:$0xff] }
 0xb10   :  { %v4537_v11 = vadd.f32 %v4536_v24, %v4535_v44  ;;  %v4531_v22 = vrot.slane %v4530_v46, 1  ;;  %v6265_v24 = vld [vmem:[%s9071_s10] sm:$0xff]  }
 0xb11   :  { %v4547_v52 = vrot.slane %v4546_v43, 1 }
 0xb12   :  { %v4538_v47 = vrot.slane %v4537_v11, 1  ;;  %v4532_v14 = vadd.f32 %v4531_v22, %v4530_v46  ;;  %v6268_v46 = vld [vmem:[%s9071_s10 + $0x50] sm:$0xff]   ;;  %v6273_v22 = vld [vmem:[%s9071_s10 + $0x20] sm:$0xff]  }
 0xb13   :  { %v4548_v13 = vadd.f32 %v4547_v52, %v4546_v43  ;;  %v6266_v43 = vld [vmem:[%s9071_s10 + $0x48] sm:$0xff]   ;;  %v6271_v52 = vld [vmem:[%s9071_s10 + $0x18] sm:$0xff]  }
 0xb14   :  { %v4539_v8 = vadd.f32 %v4538_v47, %v4537_v11  ;;  %v4540_v55 = vmul.f32 0.0625, %v4532_v14  ;;  %v6269_v11 = vld [vmem:[%s9071_s10 + $0x10] sm:$0xff]   ;;  %v6274_v47 = vld [vmem:[%s9071_s10 + $0x68] sm:$0xff]   ;;  %v6278_v14 = vld [vmem:[%s9071_s10 + $0x78] sm:$0xff]  }
 0xb15   :  { %v4556_v3 = vmul.f32 0.0625, %v4548_v13  ;;  %v6276_v13 = vld [vmem:[%s9071_s10 + $0x70] sm:$0xff]  }
 0xb16   :  { %v6583_v62 = vpop.eup %6582  ;;  %v4541_v29 = vmul.f32 0.0625, %v4539_v8  ;;  %v6279_v8 = vld [vmem:[%s9071_s10 + $0x38] sm:$0xff]  }
 0xb17   :  { %v8825_v4 = vmul.f32 %v6583_v62, %v4477_v0  ;;  %v4558_v49 = vsel %vm1303_vm1, %v4540_v55, %v4556_v3  ;;  %v6246_v0 = vld [vmem:[%s9069_s2 + $0x20] ss:$8 sps:$4 sm:$0xff]   ;;  %v6282_v55 = vld [vmem:[%s9072_s11 + $0x10] sm:$0xff]  }
 0xb18   :  { %v4560_v10 = vpack.c.bf16 %v4558_v49, %v4558_v49  ;;  %4857 = vmatpush1.bf16.msra.mxu0 %v6246_v0  ;;  %v6280_v3 = vld [vmem:[%s9072_s11] sm:$0xff]  }
 0xb19   :  { %v4549_v58 = vadd.f32 %v8825_v4, %v8823_v41  ;;  %4858 = vmatprep.subr.bf16.mxu0 %v6251_v33 }
 0xb1b   :  { %v4550_v34 = vrot.slane %v4549_v58, 4 }
 0xb1c   :  { %4859 = vmatpush1.bf16.msra.mxu0 %v6249_v31 }
 0xb1d   :  { %v4551_v15 = vadd.f32 %v4550_v34, %v4549_v58  ;;  %4860 = vmatprep.subr.bf16.mxu0 %v6254_v7  ;;  %v6267_v58 = vld [vmem:[%s9071_s10 + $0x8] sm:$0xff]   ;;  %v6270_v34 = vld [vmem:[%s9071_s10 + $0x58] sm:$0xff]  }
 0xb1f   :  { %v4552_v48 = vrot.slane %v4551_v15, 2 }
 0xb20   :  { %4861 = vmatpush1.bf16.msra.mxu0 %v6252_v35 }
 0xb21   :  { %v4553_v59 = vadd.f32 %v4552_v48, %v4551_v15  ;;  %4862 = vmatprep.subr.bf16.mxu0 %v6257_v51  ;;  %v6272_v15 = vld [vmem:[%s9071_s10 + $0x60] sm:$0xff]   ;;  %v6275_v48 = vld [vmem:[%s9071_s10 + $0x28] sm:$0xff]  }
 0xb23   :  { %v4554_v61 = vrot.slane %v4553_v59, 1 }
 0xb24   :  { %4863 = vmatpush1.bf16.msra.mxu0 %v6255_v6 }
 0xb25   :  { %v4555_v60 = vadd.f32 %v4554_v61, %v4553_v59  ;;  %4864 = vmatprep.subr.bf16.mxu0 %v6260_v56  ;;  %v6277_v59 = vld [vmem:[%s9071_s10 + $0x30] sm:$0xff]   ;;  %v8864_v61 = vld [vmem:[#allocation2] sm:$0xff] }
 0xb27   :  { %v4557_v25 = vmul.f32 0.0625, %v4555_v60  ;;  %v6281_v60 = vld [vmem:[%s9072_s11 + $0x8] sm:$0xff]  }
 0xb28   :  { %4865 = vmatpush1.bf16.msra.mxu0 %v6258_v27 }
 0xb29   :  { %v4559_v54 = vsel %vm1303_vm1, %v4541_v29, %v4557_v25  ;;  %4866 = vmatprep.subr.bf16.mxu0 %v6263_v57  ;;  %v4760_v29 = vld [vmem:[%s9073_s20] sm:$0x3]  ;;  %v9074_v25 = vld [vmem:[#allocation55_spill] sm:$0xff] }
 0xb2a   :  { %v4561_v16 = vpack.c.bf16 %v4559_v54, %v4559_v54  ;;  %v4765_v49 = vrot.slane %v4760_v29, %v9074_v25  ;;  %v9075_v54 = vld [vmem:[#allocation62_spill] sm:$0xff] }
 0xb2c   :  { %4729 = vmatprep.mubr.bf16.mxu1 %v4561_v16  ;;  %4867 = vmatpush1.bf16.msra.mxu0 %v6261_v18  ;;  %v4769_v16 = vrot.slane %v4760_v29, %v9075_v54 }
 0xb2d   :  { %4730 = vmatmul.mubr.bf16.vlgmr.msra.gmra.mrb[28].mxu1 %v4560_v10  ;;  %6036 = vmatprep.subr.bf16.mxu0 %v6280_v3 }
 0xb2e   :  { %5794 = vmatpush3.bf16.msra.mxu1 %v6265_v24 }
 0xb2f   :  { %5795 = vmatprep.subr.bf16.mxu1 %v6266_v43 }
 0xb32   :  { %5796 = vmatpush3.bf16.msra.mxu1 %v6267_v58  ;;  %v5657_v58 = vld [vmem:[#allocation8] ss:$0 sm:$0xff] }
 0xb33   :  { %5797 = vmatprep.subr.bf16.mxu1 %v6268_v46 }
 0xb36   :  { %5798 = vmatpush3.bf16.msra.mxu1 %v6269_v11 }
 0xb37   :  { %5799 = vmatprep.subr.bf16.mxu1 %v6270_v34 }
 0xb3a   :  { %5800 = vmatpush3.bf16.msra.mxu1 %v6271_v52 }
 0xb3b   :  { %5801 = vmatprep.subr.bf16.mxu1 %v6272_v15 }
 0xb3e   :  { %5802 = vmatpush3.bf16.msra.mxu1 %v6273_v22 }
 0xb3f   :  { %5803 = vmatprep.subr.bf16.mxu1 %v6274_v47 }
 0xb42   :  { %5804 = vmatpush3.bf16.msra.mxu1 %v6275_v48 }
 0xb43   :  { %5805 = vmatprep.subr.bf16.mxu1 %v6276_v13 }
 0xb46   :  { %5806 = vmatpush3.bf16.msra.mxu1 %v6277_v59 }
 0xb47   :  { %5807 = vmatprep.subr.bf16.mxu1 %v6278_v14  ;;  %v9077_v14 = vld [vmem:[#allocation46_spill] sm:$0xff] }
 0xb4a   :  { %5808 = vmatpush3.bf16.msra.mxu1 %v6279_v8 }
 0xb4b   :  { %6056 = vmatprep.subr.bf16.mxu1 %v8864_v61 }
 0xc00   :  { %v5787_v21 = vpop.f32.mrb[28].mxu1 }
 0xc01   :  { %v5788_v39 = vpop.f32.mrb[29].mxu1 }
 0xc02   :  { %v5789_v45 = vadd.f32 %v5788_v39, %v5787_v21  ;;  %v5790_v38 = vpop.f32.mrb[30].mxu1 }
 0xc03   :  { %v5791_v26 = vpop.f32.mrb[31].mxu1 }
 0xc04   :  { %v4732_v20 = vadd.f32 %v5789_v45, %v5607_v2 }
 0xc06   :  { %v4737_v28 = vsub.f32 0.0, %v4732_v20 }
 0xc08   :  { %v4738_v36 = vmul.f32 1.442695, %v4737_v28 }
 0xc0a   :  { %6584 = vpow2.f32 %v4738_v36 }
 0xc14   :  { %v6585_v63 = vpop.eup %6584 }
 0xc15   :  { %v4740_v44 = vadd.f32 1.0, %v6585_v63 }
 0xc17   :  { %6586 = vrcp.f32 %v4740_v44 }
 0xc21   :  { %v6587_v37 = vpop.eup %6586 }
 0xc22   :  { %v4742_v23 = vmul.f32 %v6587_v37, %v4732_v20 }
 0xc24   :  { %v4743_v62 = vpack.c.bf16 %v4742_v23, %v4742_v23  ;;  %v6286_v23 = vld [vmem:[%s9072_s11 + $0x30] sm:$0xff]  }
 0xc26   :  { %4885 = vmatmul.mubr.bf16.vlgmr.msra.gmra.mrb[48].mxu0 %v4743_v62  ;;  %v6287_v62 = vld [vmem:[%s9072_s11 + $0x38] sm:$0xff]  }
 0xc27   :  { %6037 = vmatpush3.bf16.msra.mxu0 %v6280_v3  ;;  %v9078_v3 = vld [vmem:[#allocation54_spill] sm:$0xff] }
 0xc28   :  { %6038 = vmatprep.subr.bf16.mxu0 %v6281_v60 }
 0xc2b   :  { %6039 = vmatpush3.bf16.msra.mxu0 %v6281_v60 }
 0xc2c   :  { %6040 = vmatprep.subr.bf16.mxu0 %v6282_v55 }
 0xc2f   :  { %6041 = vmatpush3.bf16.msra.mxu0 %v6282_v55 }
 0xcf9   :  { %v4886_v10 = vpop.f32.mrb[48].mxu0 }
 0xcfa   :  { %v4887_v19 = vadd.f32 %v4886_v10, %v4765_v49  ;;  %v4888_v40 = vpop.f32.mrb[49].mxu0 }
 0xcfb   :  { %v4889_v32 = vadd.f32 %v4888_v40, %v4769_v16  ;;  %v4890_v42 = vpop.f32.mrb[50].mxu0 }
 0xcfc   :  { %v4893_v12 = vsub.f32 0.0, %v4887_v19  ;;  %v4891_v0 = vpop.f32.mrb[51].mxu0  ;;  %v9079_v19 = vld [vmem:[#allocation58_spill] sm:$0xff] }
 0xcfd   :  { %v4894_v33 = vsub.f32 0.0, %v4889_v32  ;;  %v9080_v32 = vld [vmem:[#allocation59_spill] sm:$0xff]  ;;  %v6288_v0 = vld [vmem:[%s7000_s30] sm:$0xff]  }
 0xcfe   :  { %v4895_v31 = vmul.f32 1.442695, %v4893_v12 }
 0xcff   :  { %v4897_v7 = vmul.f32 1.442695, %v4894_v33  ;;  %v6289_v33 = vld [vmem:[%s7000_s30 + $0x8] sm:$0xff]  }
 0xd00   :  { %6588 = vpow2.f32 %v4895_v31  ;;  %v6290_v31 = vld [vmem:[%s7000_s30 + $0x10] sm:$0xff]  }
 0xd01   :  { %6590 = vpow2.f32 %v4897_v7  ;;  %v6291_v7 = vld [vmem:[%s7000_s30 + $0x18] sm:$0xff]  }
 0xd0a   :  { %v6589_v35 = vpop.eup %6588 }
 0xd0b   :  { %v6591_v51 = vpop.eup %6590  ;;  %v4899_v6 = vadd.f32 1.0, %v6589_v35  ;;  %v6292_v35 = vld [vmem:[%s7000_s30 + $0x20] sm:$0xff]  }
 0xd0c   :  { %v4900_v56 = vadd.f32 1.0, %v6591_v51  ;;  %v6293_v51 = vld [vmem:[%s7000_s30 + $0x28] sm:$0xff]  }
 0xd0d   :  { %6592 = vrcp.f32 %v4899_v6  ;;  %v6294_v6 = vld [vmem:[%s7000_s30 + $0x30] sm:$0xff]  }
 0xd0e   :  { %6594 = vrcp.f32 %v4900_v56  ;;  %v6295_v56 = vld [vmem:[%s7000_s30 + $0x38] sm:$0xff]  }
 0xd17   :  { %v6593_v27 = vpop.eup %6592 }
 0xd18   :  { %v6595_v18 = vpop.eup %6594  ;;  %v4906_v57 = vrot.slane %v6593_v27, %v9074_v25  ;;  %v4914_v44 = vrot.slane %v6593_v27, %v9075_v54  ;;  %v5666_v27 = vld [vmem:[#allocation10] ss:$0 sm:$0xff] }
 0xd19   :  { %v4910_v21 = vrot.slane %v6595_v18, %v9074_v25  ;;  %v4918_v2 = vrot.slane %v6595_v18, %v9075_v54 }
 0xd1a   :  { %v4919_v39 = vmul.f32 %v4906_v57, %v8802_v5  ;;  %v4921_v45 = vmul.f32 %v4906_v57, %v8805_v9  ;;  %v4923_v5 = vmul.f32 %v4914_v44, %v8808_v30  ;;  %v4925_v9 = vmul.f32 %v4914_v44, %v8799_v53  ;;  %v5667_v57 = vld [vmem:[#allocation12] ss:$0 sm:$0xff] }
 0xd1b   :  { %v4920_v38 = vmul.f32 %v4910_v21, %v8811_v1  ;;  %v4922_v26 = vmul.f32 %v4910_v21, %v8814_v17  ;;  %v4924_v20 = vmul.f32 %v4918_v2, %v8823_v41  ;;  %v4926_v28 = vmul.f32 %v4918_v2, %v8825_v4  ;;  %v6283_v17 = vld [vmem:[%s9072_s11 + $0x18] sm:$0xff]   ;;  %v6284_v41 = vld [vmem:[%s9072_s11 + $0x20] sm:$0xff]   ;;  %v6285_v4 = vld [vmem:[%s9072_s11 + $0x28] sm:$0xff]  }
 0xd1c   :  { %v4927_v63 = vpack.c.bf16 %v4921_v45, %v4919_v39  ;;  %v4929_v1 = vpack.c.bf16 %v4925_v9, %v4923_v5  ;;  %6042 = vmatprep.subr.bf16.mxu0 %v6283_v17 }
 0xd1d   :  { %v4928_v36 = vpack.c.bf16 %v4922_v26, %v4920_v38  ;;  %v4930_v37 = vpack.c.bf16 %v4926_v28, %v4924_v20  ;;  %6043 = vmatpush3.bf16.msra.mxu0 %v6283_v17 }
 0xd1e   :  { %6044 = vmatprep.subr.bf16.mxu0 %v6284_v41 }
 0xd1f   :  { %5091 = vmatprep.mubr.bf16.mxu1 %v4928_v36 }
 0xd20   :  { %5092 = vmatmul.mubr.bf16.vlgmr.msra.gmra.mrb[32].mxu1 %v4927_v63 }
 0xd21   :  { %5099 = vmatprep.mubr.bf16.mxu1 %v4930_v37  ;;  %6045 = vmatpush3.bf16.msra.mxu0 %v6284_v41 }
 0xd22   :  { %6046 = vmatprep.subr.bf16.mxu0 %v6285_v4  ;;  %6057 = vmatpush3.bf16.msra.mxu1 %v6288_v0  ;;  %v5668_v0 = vld [vmem:[#allocation13] ss:$0 sm:$0xff] }
 0xd23   :  { %6058 = vmatprep.subr.bf16.mxu1 %v8864_v61 }
 0xd25   :  { %6047 = vmatpush3.bf16.msra.mxu0 %v6285_v4 }
 0xd26   :  { %6048 = vmatprep.subr.bf16.mxu0 %v6286_v23  ;;  %6059 = vmatpush3.bf16.msra.mxu1 %v6289_v33 }
 0xd27   :  { %6060 = vmatprep.subr.bf16.mxu1 %v8864_v61 }
 0xd28   :  { %5100 = vmatmul.mubr.bf16.gmra.mrb[36].mxu1 %v4929_v1 }
 0xd29   :  { %6072 = vmatprep.mubr.msk.bf16.mxu1 %vm6775_vm0, %v8864_v61  ;;  %6049 = vmatpush3.bf16.msra.mxu0 %v6286_v23 }
 0xd2a   :  { %6050 = vmatprep.subr.bf16.mxu0 %v6287_v62  ;;  %6061 = vmatpush3.bf16.msra.mxu1 %v6290_v31 }
 0xd2b   :  { %6062 = vmatprep.subr.bf16.mxu1 %v8864_v61 }
 0xd2d   :  { %6051 = vmatpush3.bf16.msra.mxu0 %v6287_v62 }
 0xd2e   :  { %6063 = vmatpush3.bf16.msra.mxu1 %v6291_v7 }
 0xd2f   :  { %6064 = vmatprep.subr.bf16.mxu1 %v8864_v61 }
 0xd32   :  { %6065 = vmatpush3.bf16.msra.mxu1 %v6292_v35 }
 0xd33   :  { %6066 = vmatprep.subr.bf16.mxu1 %v8864_v61 }
 0xd36   :  { %6067 = vmatpush3.bf16.msra.mxu1 %v6293_v51 }
 0xd37   :  { %6068 = vmatprep.subr.bf16.mxu1 %v8864_v61 }
 0xd3a   :  { %6069 = vmatpush3.bf16.msra.mxu1 %v6294_v6 }
 0xd3b   :  { %6070 = vmatprep.subr.bf16.mxu1 %v8864_v61 }
 0xd3e   :  { %6071 = vmatpush3.bf16.msra.mxu1 %v6295_v56 }
 0xdf3   :  { %v5809_v53 = vpop.f32.mrb[32].mxu1 }
 0xdf4   :  { %v5810_v30 = vpop.f32.mrb[33].mxu1 }
 0xdf5   :  { %v5811_v24 = vadd.f32 %v5810_v30, %v5809_v53  ;;  %v5812_v43 = vpop.f32.mrb[34].mxu1 }
 0xdf6   :  { %v5813_v46 = vpop.f32.mrb[35].mxu1 }
 0xdf7   :  { %v5115_v11 = vmul.f32 %v5811_v24, %v5656_v50  ;;  %v5814_v34 = vadd.f32 %v5813_v46, %v5812_v43 }
 0xdf9   :  { %v5126_v52 = vadd.f32 %v5657_v58, %v5115_v11  ;;  %v5116_v15 = vmul.f32 %v5814_v34, %v5656_v50 }
 0xdfb   :  { %v5127_v22 = vadd.f32 %v5657_v58, %v5116_v15  ;;  %v5815_v47 = vpop.f32.mrb[36].mxu1  ;;  %v5130_v8 = vadd.f32 %v5126_v52, %v9077_v14 }
 0xdfc   :  { %v5816_v48 = vpop.f32.mrb[37].mxu1 }
 0xdfd   :  { %v5817_v13 = vadd.f32 %v5816_v48, %v5815_v47  ;;  %v5818_v59 = vpop.f32.mrb[38].mxu1  ;;  %v5131_v60 = vadd.f32 %v5127_v22, %v9078_v3 }
 0xdfe   :  { %v5819_v55 = vpop.f32.mrb[39].mxu1 }
 0xdff   :  { %v5117_v29 = vmul.f32 %v5817_v13, %v5656_v50  ;;  %v5820_v25 = vadd.f32 %v5819_v55, %v5818_v59  ;;  %v5134_v49 = vpack.c.bf16 %v5131_v60, %v5130_v8 }
 0xe01   :  { %v5128_v54 = vadd.f32 %v5657_v58, %v5117_v29  ;;  %v5118_v16 = vmul.f32 %v5820_v25, %v5656_v50  ;;  %6052 = vmatprep.mubr.bf16.mxu0 %v5134_v49 }
 0xe03   :  { %v5129_v10 = vadd.f32 %v5657_v58, %v5118_v16  ;;  %v5132_v40 = vadd.f32 %v5128_v54, %v9079_v19 }
 0xe05   :  { %v5133_v42 = vadd.f32 %v5129_v10, %v9080_v32 }
 0xe07   :  { %v5135_v12 = vpack.c.bf16 %v5133_v42, %v5132_v40 }
 0xe09   :  { %6053 = vmatmul.mubr.bf16.vlgmr.msra.gmra.mrb[52].mxu0 %v5135_v12 }
 0xedc   :  { %v6054_v18 = vpop.f32.mrb[52].mxu0 }
 0xedd   :  { %v5258_v21 = vmul.f32 %v6054_v18, %v5666_v27  ;;  %v5234_v2 = vpop.f32.mrb[53].mxu0 }
 0xede   :  { %v5256_v39 = vmul.f32 %v5666_v27, %v5234_v2  ;;  %v6055_v45 = vpop.f32.mrb[54].mxu0 }
 0xedf   :  { %v5269_v38 = vadd.f32 %v5667_v57, %v5258_v21  ;;  %v5259_v26 = vmul.f32 %v6055_v45, %v5666_v27  ;;  %v5237_v20 = vpop.f32.mrb[55].mxu0 }
 0xee0   :  { %v5267_v28 = vadd.f32 %v5667_v57, %v5256_v39  ;;  %v5257_v36 = vmul.f32 %v5666_v27, %v5237_v20 }
 0xee1   :  { %v5273_v63 = vsub.f32 0.0, %v5269_v38  ;;  %v5270_v44 = vadd.f32 %v5667_v57, %v5259_v26 }
 0xee2   :  { %v5271_v37 = vsub.f32 0.0, %v5267_v28  ;;  %v5268_v5 = vadd.f32 %v5667_v57, %v5257_v36 }
 0xee3   :  { %v5279_v9 = vmul.f32 1.442695, %v5273_v63  ;;  %v5274_v1 = vsub.f32 0.0, %v5270_v44 }
 0xee4   :  { %v5275_v61 = vmul.f32 1.442695, %v5271_v37  ;;  %v5272_v17 = vsub.f32 0.0, %v5268_v5 }
 0xee5   :  { %6596 = vpow2.f32 %v5279_v9  ;;  %v5281_v41 = vmul.f32 1.442695, %v5274_v1 }
 0xee6   :  { %6598 = vpow2.f32 %v5275_v61  ;;  %v5277_v4 = vmul.f32 1.442695, %v5272_v17 }
 0xee7   :  { %6600 = vpow2.f32 %v5281_v41 }
 0xee8   :  { %6602 = vpow2.f32 %v5277_v4 }
 0xeef   :  { %v6597_v23 = vpop.eup %6596 }
 0xef0   :  { %v6599_v62 = vpop.eup %6598  ;;  %v5285_v53 = vadd.f32 1.0, %v6597_v23 }
 0xef1   :  { %v6601_v30 = vpop.eup %6600  ;;  %v5283_v50 = vadd.f32 1.0, %v6599_v62 }
 0xef2   :  { %v6603_v24 = vpop.eup %6602  ;;  %6604 = vrcp.f32 %v5285_v53  ;;  %v5286_v43 = vadd.f32 1.0, %v6601_v30 }
 0xef3   :  { %6606 = vrcp.f32 %v5283_v50  ;;  %v5284_v58 = vadd.f32 1.0, %v6603_v24 }
 0xef4   :  { %6608 = vrcp.f32 %v5286_v43 }
 0xef5   :  { %6610 = vrcp.f32 %v5284_v58 }
 0xefc   :  { %v6605_v46 = vpop.eup %6604 }
 0xefd   :  { %v6607_v11 = vpop.eup %6606  ;;  %v5293_v15 = vmul.f32 %v6605_v46, %v5269_v38 }
 0xefe   :  { %v6609_v34 = vpop.eup %6608  ;;  %v5291_v47 = vmul.f32 %v6607_v11, %v5267_v28 }
 0xeff   :  { %v6611_v52 = vpop.eup %6610  ;;  %v5294_v22 = vmul.f32 %v6609_v34, %v5270_v44 }
 0xf00   :  { %v5292_v48 = vmul.f32 %v6611_v52, %v5268_v5 }
 0xf01   :  { %v5303_v13 = vadd.f32 %v5294_v22, %v5293_v15 }
 0xf02   :  { %v5295_v59 = vadd.f32 %v5292_v48, %v5291_v47 }
 0xf03   :  { %v5304_v14 = vrot.slane %v5303_v13, 4 }
 0xf04   :  { %v5296_v8 = vrot.slane %v5295_v59, 4 }
 0xf05   :  { %v5305_v3 = vadd.f32 %v5304_v14, %v5303_v13 }
 0xf06   :  { %v5297_v60 = vadd.f32 %v5296_v8, %v5295_v59 }
 0xf07   :  { %v5306_v55 = vrot.slane %v5305_v3, 2 }
 0xf08   :  { %v5298_v29 = vrot.slane %v5297_v60, 2 }
 0xf09   :  { %v5307_v25 = vadd.f32 %v5306_v55, %v5305_v3 }
 0xf0a   :  { %v5299_v49 = vadd.f32 %v5298_v29, %v5297_v60 }
 0xf0b   :  { %v5308_v54 = vrot.slane %v5307_v25, 1 }
 0xf0c   :  { %v5300_v16 = vrot.slane %v5299_v49, 1 }
 0xf0d   :  { %v5309_v10 = vadd.f32 %v5308_v54, %v5307_v25 }
 0xf0e   :  { %v5301_v19 = vadd.f32 %v5300_v16, %v5299_v49 }
 0xf0f   :  { %v5310_v40 = vmul.f32 0.0625, %v5309_v10 }
 0xf10   :  { %v5302_v32 = vmul.f32 0.0625, %v5301_v19 }
 0xf12   :  { %v5311_v42 = vsel %vm1303_vm1, %v5302_v32, %v5310_v40 }
 0xf13   :  { %v5312_v12 = vpack.c.bf16 %v5311_v42, %v5311_v42 }
 0xf15   :  { %6073 = vmatmul.mubr.bf16.vlgmr.msra.gmra.mrb[40].mxu1 %v5312_v12 }
 0xfe8   :  { %v5418_v33 = vpop.f32.mrb[40].mxu1 }
 0xfe9   :  { %v5419_v31 = vadd.f32 %v5668_v0, %v5418_v33  ;;  %v6074_v7 = vpop.f32.mrb[41].mxu1 }
 0xfea   :  { %v5421_v35 = vpop.f32.mrb[42].mxu1 }
 0xfeb   :  { %5424 = vst [vmem:[%s7010_s19] sm:$0x3] %v5419_v31  ;;  %v6075_v51 = vpop.f32.mrb[43].mxu1 }
 0xfec   :  { %5429 = vsyncpa [#allocation9], 1 }
 0xfed   :  { %5430 = vsyncpa [#allocation11], 1 }
 0xfee   :  { %5431 = vsyncpa [#allocation14], 1 }

</bundles_post_ra>
